<compile_context>
chip_gen: v5e
topology: v5e:2x2
jax: 0.10.0
libtpu: 0.0.40
codegen_flags: <defaults>
</compile_context>

<pallas_src>
import functools

import jax
import jax.numpy as jnp
from jax.experimental import pallas as pl
from jax.experimental.pallas import tpu as pltpu


# ------------------------------- shared math --------------------------------

def _ln(y, g, b, eps):
    mu = jnp.mean(y, axis=-1, keepdims=True)
    var = jnp.mean((y - mu) ** 2, axis=-1, keepdims=True)
    return (y - mu) * jax.lax.rsqrt(var + eps) * g + b


def _group_ln(x, groups, g, b, eps):
    # Per-group LayerNorm over `groups` contiguous channel groups of a (rows, groups*C)
    # tile.  Slice + concat (lane slices / minor-dim concat are guaranteed lowerings).
    c = x.shape[1] // groups
    parts = []
    for gi in range(groups):
        seg = x[:, gi * c:(gi + 1) * c]
        mu = jnp.mean(seg, axis=-1, keepdims=True)
        var = jnp.mean((seg - mu) ** 2, axis=-1, keepdims=True)
        parts.append((seg - mu) * jax.lax.rsqrt(var + eps))
    return jnp.concatenate(parts, axis=-1) * g + b


# ----------------------------- Pallas kernels ------------------------------

def _mm_bias_ln_kernel(x_ref, w_ref, b_ref, g_ref, beta_ref, o_ref, *, eps):
    # PatchEmbed (occupancy-only path): patchified conv (kernel==stride) as bf16 matmul
    # + bias followed by LayerNorm over the embedding dim.
    y = jnp.dot(x_ref[...].astype(jnp.bfloat16), w_ref[...],
                preferred_element_type=jnp.float32) + b_ref[...]
    o_ref[...] = _ln(y, g_ref[...], beta_ref[...], eps)


def _fused_embed_kernel(occ_ref, flow_ref,
                        wo_ref, bo_ref, go_ref, beto_ref,
                        wfbd_ref, bf_ref, gf_ref, betf_ref,
                        wtc_ref, btc_ref, o_ref, *, eps, T):
    # Fused: occ patch-embed(+LN)  +  all-T flow patch-embed (block-diagonal weight,
    # one K=T*p*p*Cf matmul) + per-t LN + Conv3d(T,1,1) as one K=T*D0 matmul + ReLU
    # + add occupancy embedding.  No HBM temps, MXU K dims are 128.
    yo = jnp.dot(occ_ref[...].astype(jnp.bfloat16), wo_ref[...],
                 preferred_element_type=jnp.float32) + bo_ref[...]
    yo = _ln(yo, go_ref[...], beto_ref[...], eps)

    yf = jnp.dot(flow_ref[...].astype(jnp.bfloat16), wfbd_ref[...],
                 preferred_element_type=jnp.float32) + bf_ref[...]      # (tn, T*D0)
    yfn = _group_ln(yf, T, gf_ref[...], betf_ref[...], eps)
    acc = jnp.dot(yfn.astype(jnp.bfloat16), wtc_ref[...],
                  preferred_element_type=jnp.float32) + btc_ref[...]    # (tn, D0)
    o_ref[...] = yo + jnp.maximum(acc, 0.0)


def _ds_ln_mm_kernel(x_ref, g_ref, b_ref, w_ref, bias_ref, o_ref, *, eps, groups):
    # Fused ConvNeXt downsample: per-pixel LayerNorm (each C-wide group of the gathered
    # 2x2 patch is one pixel) + 2x2 stride-2 conv as a single bf16 matmul + bias.
    xn = _group_ln(x_ref[...], groups, g_ref[...], b_ref[...], eps)
    o_ref[...] = (jnp.dot(xn.astype(jnp.bfloat16), w_ref[...],
                          preferred_element_type=jnp.float32) + bias_ref[...])


def _convnext_block_kernel(x_ref, mask_ref, dww_ref, dwb_ref, lng_ref, lnb_ref,
                           w1_ref, b1_ref, w2_ref, b2_ref, gamma_ref, o_ref,
                           *, H, W, eps):
    # Fused ConvNeXt block on the padded-rows layout ((H+6)*W + 6, C):
    #   7x7 depthwise conv (49 static row-offset slices + column mask) -> LN ->
    #   Linear(4x) -> GELU -> Linear -> layer-scale -> +x, emitted back in the same
    #   padded-rows layout so blocks chain without re-padding in XLA.
    HW = H * W
    xf = x_ref[0]                                   # ((H+6)*W + 6, C), halo rows = 0
    wdw = dww_ref[...]                              # (49, C)
    mask = mask_ref[...]                            # (H*W, 7) column-validity per j

    acc = jnp.zeros((HW, xf.shape[1]), jnp.float32)
    for j in range(7):
        xj = xf[j:j + (H + 6) * W, :]               # one offset slice per j
        accj = jnp.zeros((HW, xf.shape[1]), jnp.float32)
        for i in range(7):
            accj = accj + xj[i * W:i * W + HW, :] * wdw[i * 7 + j:i * 7 + j + 1, :]
        acc = acc + accj * mask[:, j:j + 1]

    dw = acc + dwb_ref[...]
    resid = xf[3 * W + 3:3 * W + 3 + HW, :]         # original x, no extra HBM read

    xn = _ln(dw, lng_ref[...], lnb_ref[...], eps)
    h = jnp.dot(xn.astype(jnp.bfloat16), w1_ref[...],
                preferred_element_type=jnp.float32) + b1_ref[...]
    # TODO(synk): PyTorch nn.GELU() is erf-exact; tanh-approx GELU used here for
    # guaranteed Mosaic lowering (EUP tanh).
    h = jax.nn.gelu(h)
    y = jnp.dot(h.astype(jnp.bfloat16), w2_ref[...],
                preferred_element_type=jnp.float32) + b2_ref[...]
    interior = resid + gamma_ref[...] * y

    zpad = jnp.zeros((3 * W + 3, xf.shape[1]), jnp.float32)
    o_ref[0] = jnp.concatenate([zpad, interior, zpad], axis=0)


# ------------------------------ call helpers -------------------------------

def _row_grid(n, cap=512, min_steps=4):
    # Tile size: multiple of 8, <= cap, chosen so the grid has >= min_steps steps
    # (megacore + pipelining).  Grid is cdiv-based; caller pads the row tail.
    t = pl.cdiv(n, min_steps)
    t = pl.cdiv(t, 8) * 8
    t = max(8, min(t, cap))
    g = pl.cdiv(n, t)
    return t, g


def _call_rows(kernel, args_specs, n_rows, d_out):
    """Row-tiled pallas_call. args_specs = [(2-D array, tiled?), ...] in kernel argument
    order; tiled args share the row tiling (zero-padded tail), others stay resident."""
    t, g = _row_grid(n_rows)
    n_pad = g * t
    in_specs, args = [], []
    for a, tiled in args_specs:
        if tiled:
            if n_pad != n_rows:
                a = jnp.pad(a, ((0, n_pad - n_rows), (0, 0)))
            in_specs.append(pl.BlockSpec((t, a.shape[1]), lambda i: (i, 0)))
        else:
            in_specs.append(pl.BlockSpec(a.shape, lambda i: (0, 0)))
        args.append(a)
    out = pl.pallas_call(
        kernel,
        out_shape=jax.ShapeDtypeStruct((n_pad, d_out), jnp.float32),
        grid=(g,),
        in_specs=in_specs,
        out_specs=pl.BlockSpec((t, d_out), lambda i: (i, 0)),
        compiler_params=pltpu.CompilerParams(dimension_semantics=("parallel",)),
    )(*args)
    return out[:n_rows] if n_pad != n_rows else out


def _patchify2d(x, p):
    # (N, H, W, C) -> (N*Hp*Wp, p*p*C) with (pi, pj, c) ordering inside each row.
    N, H, W, C = x.shape
    Hp, Wp = H // p, W // p
    xp = x.reshape(N, Hp, p, Wp, p, C).transpose(0, 1, 3, 2, 4, 5)
    return xp.reshape(N * Hp * Wp, p * p * C)


def _to_rows_padded(x_nhwc):
    # (B, H, W, C) -> padded-rows layout (B, (H+6)*W + 6, C), halo rows zero.
    B, H, W, C = x_nhwc.shape
    xp = jnp.pad(x_nhwc, ((0, 0), (3, 3), (0, 0), (0, 0))).reshape(B, (H + 6) * W, C)
    return jnp.pad(xp, ((0, 0), (3, 3), (0, 0)))


def _from_rows_padded(xr, H, W):
    B, _, C = xr.shape
    return xr[:, 3 * W + 3:3 * W + 3 + H * W, :].reshape(B, H, W, C)


# --------------------------- model building blocks -------------------------

def fused_patch_embed_temporal(occ_rows, flow_rows, prm_occ, prm_flow, tc_w, tc_b, T):
    D0 = tc_w.shape[1]
    wfbd = jnp.kron(jnp.eye(T, dtype=jnp.float32), prm_flow['w']).astype(jnp.bfloat16)
    kern = functools.partial(_fused_embed_kernel, eps=1e-5, T=T)
    return _call_rows(
        kern,
        [(occ_rows, True), (flow_rows, True),
         (prm_occ['w'].astype(jnp.bfloat16), False), (prm_occ['b'], False),
         (prm_occ['ln_g'], False), (prm_occ['ln_b'], False),
         (wfbd, False), (jnp.tile(prm_flow['b'], (1, T)), False),
         (jnp.tile(prm_flow['ln_g'], (1, T)), False),
         (jnp.tile(prm_flow['ln_b'], (1, T)), False),
         (tc_w.astype(jnp.bfloat16), False), (tc_b, False)],
        occ_rows.shape[0], D0)


def _convnext_block_call(xr, maskf, prm, H, W):
    B, R, C = xr.shape                      # R = (H+6)*W + 6
    kern = functools.partial(_convnext_block_kernel, H=H, W=W, eps=1e-6)
    w1 = prm['w1'].astype(jnp.bfloat16)
    w2 = prm['w2'].astype(jnp.bfloat16)
    full2 = lambda b: (0, 0)
    cost = pl.CostEstimate(
        flops=int(B * H * W * C * (2 * 49 + 16 * C)),
        transcendentals=int(B * H * W * 4 * C),
        bytes_accessed=int(8 * B * R * C + 2 * 8 * C * C + 4 * H * W * 7))
    return pl.pallas_call(
        kern,
        out_shape=jax.ShapeDtypeStruct((B, R, C), jnp.float32),
        grid=(B,),
        in_specs=[
            pl.BlockSpec((1, R, C), lambda b: (b, 0, 0)),
            pl.BlockSpec((H * W, 7), full2),
            pl.BlockSpec((49, C), full2),
            pl.BlockSpec((1, C), full2),
            pl.BlockSpec((1, C), full2),
            pl.BlockSpec((1, C), full2),
            pl.BlockSpec((C, 4 * C), full2),
            pl.BlockSpec((1, 4 * C), full2),
            pl.BlockSpec((4 * C, C), full2),
            pl.BlockSpec((1, C), full2),
            pl.BlockSpec((1, C), full2),
        ],
        out_specs=pl.BlockSpec((1, R, C), lambda b: (b, 0, 0)),
        compiler_params=pltpu.CompilerParams(
            dimension_semantics=("parallel",),
            vmem_limit_bytes=48 * 1024 * 1024),
        cost_estimate=cost,
    )(xr, maskf, prm['dw_w'], prm['dw_b'], prm['ln_g'], prm['ln_b'],
      w1, prm['b1'], w2, prm['b2'], prm['gamma'])


def convnext_stage(x_nhwc, blocks_prm):
    B, H, W, C = x_nhwc.shape
    xr = _to_rows_padded(x_nhwc)            # pad once per stage, blocks chain padded
    w_ar = jnp.tile(jnp.arange(W, dtype=jnp.int32), H)
    maskf = jnp.stack(
        [((w_ar + j - 3) >= 0) & ((w_ar + j - 3) < W) for j in range(7)],
        axis=1).astype(jnp.float32)         # (H*W, 7)
    for prm in blocks_prm:
        xr = _convnext_block_call(xr, maskf, prm, H, W)
    return _from_rows_padded(xr, H, W)


def convnext_downsample(x_nhwc, prm):
    B, H, W, C = x_nhwc.shape
    Ho, Wo = H // 2, W // 2
    # TODO(synk): 2x2 stride-2 gather still done by XLA (reshape/transpose round trip).
    xg = x_nhwc.reshape(B, Ho, 2, Wo, 2, C).transpose(0, 1, 3, 2, 4, 5)
    xg = xg.reshape(B * Ho * Wo, 4 * C)
    g4 = jnp.tile(prm['ln_g'], (1, 4))
    b4 = jnp.tile(prm['ln_b'], (1, 4))
    y = _call_rows(functools.partial(_ds_ln_mm_kernel, eps=1e-6, groups=4),
                   [(xg, True), (g4, False), (b4, False),
                    (prm['w'].astype(jnp.bfloat16), False), (prm['b'], False)],
                   xg.shape[0], prm['w'].shape[1])
    return y.reshape(B, Ho, Wo, -1)


def convnext_feature_extractor_forward(occupancy_map, flow_map, params, cfg):
    B, H, W, T, _ = occupancy_map.shape
    p = cfg['patch_size']
    dims = cfg['embed_dims']
    indices = cfg['indices']
    Hp, Wp = H // p, W // p
    D0 = dims[0]

    # occupancy: (B,H,W,T,1) -> (B,H,W,T) -> patchify rows
    occ = occupancy_map.reshape(B, H, W, T)
    occ_rows = _patchify2d(occ, p)                         # (B*Hp*Wp, p*p*T)

    if flow_map is None:
        x_rows = _call_rows(functools.partial(_mm_bias_ln_kernel, eps=1e-5),
                            [(occ_rows, True),
                             (params['pe_occ']['w'].astype(jnp.bfloat16), False),
                             (params['pe_occ']['b'], False),
                             (params['pe_occ']['ln_g'], False),
                             (params['pe_occ']['ln_b'], False)],
                            occ_rows.shape[0], D0)
    else:
        _, _, _, Tf, Cf = flow_map.shape
        # per (b,hp,wp) row: [t0 patch(pi,pj,c), t1 patch, ...]  (t-major, matches wtc)
        fm = flow_map.reshape(B, Hp, p, Wp, p, Tf, Cf).transpose(0, 1, 3, 5, 2, 4, 6)
        flow_rows = fm.reshape(B * Hp * Wp, Tf * p * p * Cf)
        x_rows = fused_patch_embed_temporal(occ_rows, flow_rows,
                                            params['pe_occ'], params['pe_flow'],
                                            params['tc_w'], params['tc_b'], Tf)
    x = x_rows.reshape(B, Hp, Wp, D0)

    # TODO(synk): ConvNeXt backbone source was not provided with the module; standard
    # ConvNeXt stages (7x7 dwconv + LN + 4x MLP + layer scale, stride-2 downsamples,
    # drop_path==identity) implemented.
    feats = []
    cur = x
    for s in range(len(dims)):
        if s > 0:
            cur = convnext_downsample(cur, params['down'][s])
        cur = convnext_stage(cur, params['blocks'][s])
        if (s + 1) in indices:
            feats.append(jnp.transpose(cur, (0, 3, 1, 2)))   # NCHW like PyTorch
    return tuple(feats)


# ------------------------------ params init --------------------------------

def init_params(key, cfg):
    p = cfg['patch_size']
    T = cfg['T']
    c_occ = T                      # occupancy (B,H,W,T,1) reshaped -> T channels
    c_flow = cfg['flow_chans']
    dims = cfg['embed_dims']
    depths = cfg['depths']
    D0 = dims[0]

    keys = list(jax.random.split(key, 256))
    kidx = [0]

    def nxt():
        k = keys[kidx[0]]
        kidx[0] += 1
        return k

    def nrm(shape):
        return 0.02 * jax.random.normal(nxt(), shape, jnp.float32)

    def pe(cin):
        return dict(w=nrm((p * p * cin, D0)),
                    b=jnp.zeros((1, D0), jnp.float32),
                    ln_g=jnp.ones((1, D0), jnp.float32),
                    ln_b=jnp.zeros((1, D0), jnp.float32))

    params = dict(pe_occ=pe(c_occ), pe_flow=pe(c_flow),
                  tc_w=nrm((T * D0, D0)),
                  tc_b=jnp.zeros((1, D0), jnp.float32))

    downs = [None]
    blocks = []
    for s, d in enumerate(dims):
        if s > 0:
            downs.append(dict(ln_g=jnp.ones((1, dims[s - 1]), jnp.float32),
                              ln_b=jnp.zeros((1, dims[s - 1]), jnp.float32),
                              w=nrm((4 * dims[s - 1], d)),
                              b=jnp.zeros((1, d), jnp.float32)))
        sb = []
        for _ in range(depths[s]):
            sb.append(dict(dw_w=nrm((49, d)),
                           dw_b=jnp.zeros((1, d), jnp.float32),
                           ln_g=jnp.ones((1, d), jnp.float32),
                           ln_b=jnp.zeros((1, d), jnp.float32),
                           w1=nrm((d, 4 * d)),
                           b1=jnp.zeros((1, 4 * d), jnp.float32),
                           w2=nrm((4 * d, d)),
                           b2=jnp.zeros((1, d), jnp.float32),
                           gamma=jnp.full((1, d), 1e-6, jnp.float32)))
        blocks.append(sb)
    params['down'] = downs
    params['blocks'] = blocks
    return params


# --------------------------------- main -------------------------------------

if __name__ == "__main__":
    cfg = dict(patch_size=4, T=4, flow_chans=2,
               embed_dims=(32, 64, 128), depths=(2, 2, 2),
               shallow_decode=1)
    n_stages = len(cfg['embed_dims'])
    # mirrors: indicies = range(len(embed_dims)+1)[1:-shallow_decode]
    cfg['indices'] = tuple(range(n_stages + 1))[1:-cfg['shallow_decode']]

    key = jax.random.PRNGKey(0)
    k_occ, k_flow, k_par = jax.random.split(key, 3)
    B, H, W, T = 2, 32, 32, cfg['T']
    occupancy_map = jax.random.normal(k_occ, (B, H, W, T, 1), jnp.float32)
    flow_map = jax.random.normal(k_flow, (B, H, W, T, cfg['flow_chans']), jnp.float32)
    params = init_params(k_par, cfg)

    fwd = jax.jit(functools.partial(convnext_feature_extractor_forward, cfg=cfg))
    feats = fwd(occupancy_map, flow_map, params)
    feats = jax.block_until_ready(feats)

    # expected: stage1 (B,32,H/4,W/4), stage2 (B,64,H/8,W/8)
    expected = [(B, cfg['embed_dims'][0], H // 4, W // 4),
                (B, cfg['embed_dims'][1], H // 8, W // 8)]
    assert [tuple(f.shape) for f in feats] == expected, [f.shape for f in feats]
    assert all(bool(jnp.all(jnp.isfinite(f))) for f in feats)
    print("KERNEL_OK")
</pallas_src>

<mosaic_0001>
module attributes {stable_mosaic.version = 11 : i64} {
  func.func @_fused_embed_kernel(%arg0: i32, %arg1: memref<32x64xf32, #tpu.memory_space<vmem>>, %arg2: memref<32x128xf32, #tpu.memory_space<vmem>>, %arg3: memref<64x32xbf16, #tpu.memory_space<vmem>>, %arg4: memref<1x32xf32, #tpu.memory_space<vmem>>, %arg5: memref<1x32xf32, #tpu.memory_space<vmem>>, %arg6: memref<1x32xf32, #tpu.memory_space<vmem>>, %arg7: memref<128x128xbf16, #tpu.memory_space<vmem>>, %arg8: memref<1x128xf32, #tpu.memory_space<vmem>>, %arg9: memref<1x128xf32, #tpu.memory_space<vmem>>, %arg10: memref<1x128xf32, #tpu.memory_space<vmem>>, %arg11: memref<128x32xbf16, #tpu.memory_space<vmem>>, %arg12: memref<1x32xf32, #tpu.memory_space<vmem>>, %arg13: memref<32x32xf32, #tpu.memory_space<vmem>>) attributes {dimension_semantics = [#tpu.dimension_semantics<parallel>], iteration_bounds = array<i64: 4>, scalar_prefetch = 0 : i64, scratch_operands = 0 : i64, tpu.core_type = #tpu.core_type<tc>, window_params = [{transform_indices = @transform_0, window_bounds = array<i64: 32, 64>}, {transform_indices = @transform_1, window_bounds = array<i64: 32, 128>}, {pipeline_mode = #tpu.pipeline_mode<synchronous>, transform_indices = @transform_2, window_bounds = array<i64: 64, 32>}, {pipeline_mode = #tpu.pipeline_mode<synchronous>, transform_indices = @transform_3, window_bounds = array<i64: 1, 32>}, {pipeline_mode = #tpu.pipeline_mode<synchronous>, transform_indices = @transform_4, window_bounds = array<i64: 1, 32>}, {pipeline_mode = #tpu.pipeline_mode<synchronous>, transform_indices = @transform_5, window_bounds = array<i64: 1, 32>}, {pipeline_mode = #tpu.pipeline_mode<synchronous>, transform_indices = @transform_6, window_bounds = array<i64: 128, 128>}, {pipeline_mode = #tpu.pipeline_mode<synchronous>, transform_indices = @transform_7, window_bounds = array<i64: 1, 128>}, {pipeline_mode = #tpu.pipeline_mode<synchronous>, transform_indices = @transform_8, window_bounds = array<i64: 1, 128>}, {pipeline_mode = #tpu.pipeline_mode<synchronous>, transform_indices = @transform_9, window_bounds = array<i64: 1, 128>}, {pipeline_mode = #tpu.pipeline_mode<synchronous>, transform_indices = @transform_10, window_bounds = array<i64: 128, 32>}, {pipeline_mode = #tpu.pipeline_mode<synchronous>, transform_indices = @transform_11, window_bounds = array<i64: 1, 32>}, {transform_indices = @transform_12, window_bounds = array<i64: 32, 32>}]} {
    %c0 = arith.constant 0 : index
    %c0_0 = arith.constant 0 : index
    %0 = vector.load %arg1[%c0, %c0_0] : memref<32x64xf32, #tpu.memory_space<vmem>>, vector<32x64xf32>
    %1 = arith.truncf %0 : vector<32x64xf32> to vector<32x64xbf16>
    %c0_1 = arith.constant 0 : index
    %c0_2 = arith.constant 0 : index
    %2 = vector.load %arg3[%c0_1, %c0_2] : memref<64x32xbf16, #tpu.memory_space<vmem>>, vector<64x32xbf16>
    %cst = arith.constant dense<0.000000e+00> : vector<32x32xf32>
    %3 = tpu.matmul %1, %2, %cst {dimension_numbers = #tpu.dot_dimension_numbers<[1], [0], [0], [1], [0, 0, 1, 1], [], []>} : vector<32x64xbf16>, vector<64x32xbf16>, vector<32x32xf32> -> vector<32x32xf32>
    %c0_3 = arith.constant 0 : index
    %c0_4 = arith.constant 0 : index
    %4 = vector.load %arg4[%c0_3, %c0_4] : memref<1x32xf32, #tpu.memory_space<vmem>>, vector<1x32xf32>
    %5 = vector.broadcast %4 : vector<1x32xf32> to vector<32x32xf32>
    %6 = arith.addf %3, %5 : vector<32x32xf32>
    %c0_5 = arith.constant 0 : index
    %c0_6 = arith.constant 0 : index
    %7 = vector.load %arg5[%c0_5, %c0_6] : memref<1x32xf32, #tpu.memory_space<vmem>>, vector<1x32xf32>
    %c0_7 = arith.constant 0 : index
    %c0_8 = arith.constant 0 : index
    %8 = vector.load %arg6[%c0_7, %c0_8] : memref<1x32xf32, #tpu.memory_space<vmem>>, vector<1x32xf32>
    %cst_9 = arith.constant dense<0.000000e+00> : vector<32xf32>
    %9 = vector.multi_reduction <add>, %6, %cst_9 [1] : vector<32x32xf32> to vector<32xf32>
    %10 = vector.shape_cast %9 : vector<32xf32> to vector<32x1xf32>
    %cst_10 = arith.constant 3.200000e+01 : f32
    %11 = vector.broadcast %cst_10 : f32 to vector<32x1xf32>
    %12 = arith.divf %10, %11 : vector<32x1xf32>
    %13 = vector.broadcast %12 : vector<32x1xf32> to vector<32x32xf32>
    %14 = arith.subf %6, %13 : vector<32x32xf32>
    %15 = arith.mulf %14, %14 : vector<32x32xf32>
    %cst_11 = arith.constant dense<0.000000e+00> : vector<32xf32>
    %16 = vector.multi_reduction <add>, %15, %cst_11 [1] : vector<32x32xf32> to vector<32xf32>
    %17 = vector.shape_cast %16 : vector<32xf32> to vector<32x1xf32>
    %cst_12 = arith.constant 3.200000e+01 : f32
    %18 = vector.broadcast %cst_12 : f32 to vector<32x1xf32>
    %19 = arith.divf %17, %18 : vector<32x1xf32>
    %20 = vector.broadcast %12 : vector<32x1xf32> to vector<32x32xf32>
    %21 = arith.subf %6, %20 : vector<32x32xf32>
    %cst_13 = arith.constant 9.99999974E-6 : f32
    %22 = vector.broadcast %cst_13 : f32 to vector<32x1xf32>
    %23 = arith.addf %19, %22 : vector<32x1xf32>
    %24 = math.rsqrt %23 : vector<32x1xf32>
    %25 = vector.broadcast %24 : vector<32x1xf32> to vector<32x32xf32>
    %26 = arith.mulf %21, %25 : vector<32x32xf32>
    %27 = vector.broadcast %7 : vector<1x32xf32> to vector<32x32xf32>
    %28 = arith.mulf %26, %27 : vector<32x32xf32>
    %29 = vector.broadcast %8 : vector<1x32xf32> to vector<32x32xf32>
    %30 = arith.addf %28, %29 : vector<32x32xf32>
    %c0_14 = arith.constant 0 : index
    %c0_15 = arith.constant 0 : index
    %31 = vector.load %arg2[%c0_14, %c0_15] : memref<32x128xf32, #tpu.memory_space<vmem>>, vector<32x128xf32>
    %32 = arith.truncf %31 : vector<32x128xf32> to vector<32x128xbf16>
    %c0_16 = arith.constant 0 : index
    %c0_17 = arith.constant 0 : index
    %33 = vector.load %arg7[%c0_16, %c0_17] : memref<128x128xbf16, #tpu.memory_space<vmem>>, vector<128x128xbf16>
    %cst_18 = arith.constant dense<0.000000e+00> : vector<32x128xf32>
    %34 = tpu.matmul %32, %33, %cst_18 {dimension_numbers = #tpu.dot_dimension_numbers<[1], [0], [0], [1], [0, 0, 1, 1], [], []>} : vector<32x128xbf16>, vector<128x128xbf16>, vector<32x128xf32> -> vector<32x128xf32>
    %c0_19 = arith.constant 0 : index
    %c0_20 = arith.constant 0 : index
    %35 = vector.load %arg8[%c0_19, %c0_20] : memref<1x128xf32, #tpu.memory_space<vmem>>, vector<1x128xf32>
    %36 = vector.broadcast %35 : vector<1x128xf32> to vector<32x128xf32>
    %37 = arith.addf %34, %36 : vector<32x128xf32>
    %c0_21 = arith.constant 0 : index
    %c0_22 = arith.constant 0 : index
    %38 = vector.load %arg9[%c0_21, %c0_22] : memref<1x128xf32, #tpu.memory_space<vmem>>, vector<1x128xf32>
    %c0_23 = arith.constant 0 : index
    %c0_24 = arith.constant 0 : index
    %39 = vector.load %arg10[%c0_23, %c0_24] : memref<1x128xf32, #tpu.memory_space<vmem>>, vector<1x128xf32>
    %40 = vector.extract_strided_slice %37 {offsets = [0, 0], sizes = [32, 32], strides = [1, 1]} : vector<32x128xf32> to vector<32x32xf32>
    %cst_25 = arith.constant dense<0.000000e+00> : vector<32xf32>
    %41 = vector.multi_reduction <add>, %40, %cst_25 [1] : vector<32x32xf32> to vector<32xf32>
    %42 = vector.shape_cast %41 : vector<32xf32> to vector<32x1xf32>
    %cst_26 = arith.constant 3.200000e+01 : f32
    %43 = vector.broadcast %cst_26 : f32 to vector<32x1xf32>
    %44 = arith.divf %42, %43 : vector<32x1xf32>
    %45 = vector.broadcast %44 : vector<32x1xf32> to vector<32x32xf32>
    %46 = arith.subf %40, %45 : vector<32x32xf32>
    %47 = arith.mulf %46, %46 : vector<32x32xf32>
    %cst_27 = arith.constant dense<0.000000e+00> : vector<32xf32>
    %48 = vector.multi_reduction <add>, %47, %cst_27 [1] : vector<32x32xf32> to vector<32xf32>
    %49 = vector.shape_cast %48 : vector<32xf32> to vector<32x1xf32>
    %cst_28 = arith.constant 3.200000e+01 : f32
    %50 = vector.broadcast %cst_28 : f32 to vector<32x1xf32>
    %51 = arith.divf %49, %50 : vector<32x1xf32>
    %52 = vector.broadcast %44 : vector<32x1xf32> to vector<32x32xf32>
    %53 = arith.subf %40, %52 : vector<32x32xf32>
    %cst_29 = arith.constant 9.99999974E-6 : f32
    %54 = vector.broadcast %cst_29 : f32 to vector<32x1xf32>
    %55 = arith.addf %51, %54 : vector<32x1xf32>
    %56 = math.rsqrt %55 : vector<32x1xf32>
    %57 = vector.broadcast %56 : vector<32x1xf32> to vector<32x32xf32>
    %58 = arith.mulf %53, %57 : vector<32x32xf32>
    %59 = vector.extract_strided_slice %37 {offsets = [0, 32], sizes = [32, 32], strides = [1, 1]} : vector<32x128xf32> to vector<32x32xf32>
    %cst_30 = arith.constant dense<0.000000e+00> : vector<32xf32>
    %60 = vector.multi_reduction <add>, %59, %cst_30 [1] : vector<32x32xf32> to vector<32xf32>
    %61 = vector.shape_cast %60 : vector<32xf32> to vector<32x1xf32>
    %cst_31 = arith.constant 3.200000e+01 : f32
    %62 = vector.broadcast %cst_31 : f32 to vector<32x1xf32>
    %63 = arith.divf %61, %62 : vector<32x1xf32>
    %64 = vector.broadcast %63 : vector<32x1xf32> to vector<32x32xf32>
    %65 = arith.subf %59, %64 : vector<32x32xf32>
    %66 = arith.mulf %65, %65 : vector<32x32xf32>
    %cst_32 = arith.constant dense<0.000000e+00> : vector<32xf32>
    %67 = vector.multi_reduction <add>, %66, %cst_32 [1] : vector<32x32xf32> to vector<32xf32>
    %68 = vector.shape_cast %67 : vector<32xf32> to vector<32x1xf32>
    %cst_33 = arith.constant 3.200000e+01 : f32
    %69 = vector.broadcast %cst_33 : f32 to vector<32x1xf32>
    %70 = arith.divf %68, %69 : vector<32x1xf32>
    %71 = vector.broadcast %63 : vector<32x1xf32> to vector<32x32xf32>
    %72 = arith.subf %59, %71 : vector<32x32xf32>
    %cst_34 = arith.constant 9.99999974E-6 : f32
    %73 = vector.broadcast %cst_34 : f32 to vector<32x1xf32>
    %74 = arith.addf %70, %73 : vector<32x1xf32>
    %75 = math.rsqrt %74 : vector<32x1xf32>
    %76 = vector.broadcast %75 : vector<32x1xf32> to vector<32x32xf32>
    %77 = arith.mulf %72, %76 : vector<32x32xf32>
    %78 = vector.extract_strided_slice %37 {offsets = [0, 64], sizes = [32, 32], strides = [1, 1]} : vector<32x128xf32> to vector<32x32xf32>
    %cst_35 = arith.constant dense<0.000000e+00> : vector<32xf32>
    %79 = vector.multi_reduction <add>, %78, %cst_35 [1] : vector<32x32xf32> to vector<32xf32>
    %80 = vector.shape_cast %79 : vector<32xf32> to vector<32x1xf32>
    %cst_36 = arith.constant 3.200000e+01 : f32
    %81 = vector.broadcast %cst_36 : f32 to vector<32x1xf32>
    %82 = arith.divf %80, %81 : vector<32x1xf32>
    %83 = vector.broadcast %82 : vector<32x1xf32> to vector<32x32xf32>
    %84 = arith.subf %78, %83 : vector<32x32xf32>
    %85 = arith.mulf %84, %84 : vector<32x32xf32>
    %cst_37 = arith.constant dense<0.000000e+00> : vector<32xf32>
    %86 = vector.multi_reduction <add>, %85, %cst_37 [1] : vector<32x32xf32> to vector<32xf32>
    %87 = vector.shape_cast %86 : vector<32xf32> to vector<32x1xf32>
    %cst_38 = arith.constant 3.200000e+01 : f32
    %88 = vector.broadcast %cst_38 : f32 to vector<32x1xf32>
    %89 = arith.divf %87, %88 : vector<32x1xf32>
    %90 = vector.broadcast %82 : vector<32x1xf32> to vector<32x32xf32>
    %91 = arith.subf %78, %90 : vector<32x32xf32>
    %cst_39 = arith.constant 9.99999974E-6 : f32
    %92 = vector.broadcast %cst_39 : f32 to vector<32x1xf32>
    %93 = arith.addf %89, %92 : vector<32x1xf32>
    %94 = math.rsqrt %93 : vector<32x1xf32>
    %95 = vector.broadcast %94 : vector<32x1xf32> to vector<32x32xf32>
    %96 = arith.mulf %91, %95 : vector<32x32xf32>
    %97 = vector.extract_strided_slice %37 {offsets = [0, 96], sizes = [32, 32], strides = [1, 1]} : vector<32x128xf32> to vector<32x32xf32>
    %cst_40 = arith.constant dense<0.000000e+00> : vector<32xf32>
    %98 = vector.multi_reduction <add>, %97, %cst_40 [1] : vector<32x32xf32> to vector<32xf32>
    %99 = vector.shape_cast %98 : vector<32xf32> to vector<32x1xf32>
    %cst_41 = arith.constant 3.200000e+01 : f32
    %100 = vector.broadcast %cst_41 : f32 to vector<32x1xf32>
    %101 = arith.divf %99, %100 : vector<32x1xf32>
    %102 = vector.broadcast %101 : vector<32x1xf32> to vector<32x32xf32>
    %103 = arith.subf %97, %102 : vector<32x32xf32>
    %104 = arith.mulf %103, %103 : vector<32x32xf32>
    %cst_42 = arith.constant dense<0.000000e+00> : vector<32xf32>
    %105 = vector.multi_reduction <add>, %104, %cst_42 [1] : vector<32x32xf32> to vector<32xf32>
    %106 = vector.shape_cast %105 : vector<32xf32> to vector<32x1xf32>
    %cst_43 = arith.constant 3.200000e+01 : f32
    %107 = vector.broadcast %cst_43 : f32 to vector<32x1xf32>
    %108 = arith.divf %106, %107 : vector<32x1xf32>
    %109 = vector.broadcast %101 : vector<32x1xf32> to vector<32x32xf32>
    %110 = arith.subf %97, %109 : vector<32x32xf32>
    %cst_44 = arith.constant 9.99999974E-6 : f32
    %111 = vector.broadcast %cst_44 : f32 to vector<32x1xf32>
    %112 = arith.addf %108, %111 : vector<32x1xf32>
    %113 = math.rsqrt %112 : vector<32x1xf32>
    %114 = vector.broadcast %113 : vector<32x1xf32> to vector<32x32xf32>
    %115 = arith.mulf %110, %114 : vector<32x32xf32>
    %116 = tpu.concatenate %58, %77, %96, %115 in 1 : vector<32x32xf32>, vector<32x32xf32>, vector<32x32xf32>, vector<32x32xf32> -> vector<32x128xf32>
    %117 = vector.broadcast %38 : vector<1x128xf32> to vector<32x128xf32>
    %118 = arith.mulf %116, %117 : vector<32x128xf32>
    %119 = vector.broadcast %39 : vector<1x128xf32> to vector<32x128xf32>
    %120 = arith.addf %118, %119 : vector<32x128xf32>
    %121 = arith.truncf %120 : vector<32x128xf32> to vector<32x128xbf16>
    %c0_45 = arith.constant 0 : index
    %c0_46 = arith.constant 0 : index
    %122 = vector.load %arg11[%c0_45, %c0_46] : memref<128x32xbf16, #tpu.memory_space<vmem>>, vector<128x32xbf16>
    %cst_47 = arith.constant dense<0.000000e+00> : vector<32x32xf32>
    %123 = tpu.matmul %121, %122, %cst_47 {dimension_numbers = #tpu.dot_dimension_numbers<[1], [0], [0], [1], [0, 0, 1, 1], [], []>} : vector<32x128xbf16>, vector<128x32xbf16>, vector<32x32xf32> -> vector<32x32xf32>
    %c0_48 = arith.constant 0 : index
    %c0_49 = arith.constant 0 : index
    %124 = vector.load %arg12[%c0_48, %c0_49] : memref<1x32xf32, #tpu.memory_space<vmem>>, vector<1x32xf32>
    %125 = vector.broadcast %124 : vector<1x32xf32> to vector<32x32xf32>
    %126 = arith.addf %123, %125 : vector<32x32xf32>
    %cst_50 = arith.constant 0.000000e+00 : f32
    %127 = vector.broadcast %cst_50 : f32 to vector<32x32xf32>
    %128 = arith.maximumf %126, %127 : vector<32x32xf32>
    %129 = arith.addf %30, %128 : vector<32x32xf32>
    %c0_51 = arith.constant 0 : index
    %c0_52 = arith.constant 0 : index
    %130 = vector.load %arg13[%c0_51, %c0_52] : memref<32x32xf32, #tpu.memory_space<vmem>>, vector<32x32xf32>
    tpu.vector_store %arg13[%c0_51, %c0_52], %129 {strides = array<i32>} : memref<32x32xf32, #tpu.memory_space<vmem>>, vector<32x32xf32>,
    return
  }
  func.func @transform_0(%arg0: i32) -> (i32, i32) {
    %c0_i32 = arith.constant 0 : i32
    %c0_i32_0 = arith.constant 0 : i32
    return %arg0, %c0_i32 : i32, i32
  }
  func.func @transform_1(%arg0: i32) -> (i32, i32) {
    %c0_i32 = arith.constant 0 : i32
    %c0_i32_0 = arith.constant 0 : i32
    return %arg0, %c0_i32 : i32, i32
  }
  func.func @transform_2(%arg0: i32) -> (i32, i32) {
    %c0_i32 = arith.constant 0 : i32
    %c0_i32_0 = arith.constant 0 : i32
    %c0_i32_1 = arith.constant 0 : i32
    return %c0_i32, %c0_i32_0 : i32, i32
  }
  func.func @transform_3(%arg0: i32) -> (i32, i32) {
    %c0_i32 = arith.constant 0 : i32
    %c0_i32_0 = arith.constant 0 : i32
    %c0_i32_1 = arith.constant 0 : i32
    return %c0_i32, %c0_i32_0 : i32, i32
  }
  func.func @transform_4(%arg0: i32) -> (i32, i32) {
    %c0_i32 = arith.constant 0 : i32
    %c0_i32_0 = arith.constant 0 : i32
    %c0_i32_1 = arith.constant 0 : i32
    return %c0_i32, %c0_i32_0 : i32, i32
  }
  func.func @transform_5(%arg0: i32) -> (i32, i32) {
    %c0_i32 = arith.constant 0 : i32
    %c0_i32_0 = arith.constant 0 : i32
    %c0_i32_1 = arith.constant 0 : i32
    return %c0_i32, %c0_i32_0 : i32, i32
  }
  func.func @transform_6(%arg0: i32) -> (i32, i32) {
    %c0_i32 = arith.constant 0 : i32
    %c0_i32_0 = arith.constant 0 : i32
    %c0_i32_1 = arith.constant 0 : i32
    return %c0_i32, %c0_i32_0 : i32, i32
  }
  func.func @transform_7(%arg0: i32) -> (i32, i32) {
    %c0_i32 = arith.constant 0 : i32
    %c0_i32_0 = arith.constant 0 : i32
    %c0_i32_1 = arith.constant 0 : i32
    return %c0_i32, %c0_i32_0 : i32, i32
  }
  func.func @transform_8(%arg0: i32) -> (i32, i32) {
    %c0_i32 = arith.constant 0 : i32
    %c0_i32_0 = arith.constant 0 : i32
    %c0_i32_1 = arith.constant 0 : i32
    return %c0_i32, %c0_i32_0 : i32, i32
  }
  func.func @transform_9(%arg0: i32) -> (i32, i32) {
    %c0_i32 = arith.constant 0 : i32
    %c0_i32_0 = arith.constant 0 : i32
    %c0_i32_1 = arith.constant 0 : i32
    return %c0_i32, %c0_i32_0 : i32, i32
  }
  func.func @transform_10(%arg0: i32) -> (i32, i32) {
    %c0_i32 = arith.constant 0 : i32
    %c0_i32_0 = arith.constant 0 : i32
    %c0_i32_1 = arith.constant 0 : i32
    return %c0_i32, %c0_i32_0 : i32, i32
  }
  func.func @transform_11(%arg0: i32) -> (i32, i32) {
    %c0_i32 = arith.constant 0 : i32
    %c0_i32_0 = arith.constant 0 : i32
    %c0_i32_1 = arith.constant 0 : i32
    return %c0_i32, %c0_i32_0 : i32, i32
  }
  func.func @transform_12(%arg0: i32) -> (i32, i32) {
    %c0_i32 = arith.constant 0 : i32
    %c0_i32_0 = arith.constant 0 : i32
    return %arg0, %c0_i32 : i32, i32
  }
}

module attributes {stable_mosaic.version = 11 : i64} {
  func.func @_convnext_block_kernel(%arg0: i32, %arg1: memref<1x118x32xf32, #tpu.memory_space<vmem>>, %arg2: memref<64x7xf32, #tpu.memory_space<vmem>>, %arg3: memref<49x32xf32, #tpu.memory_space<vmem>>, %arg4: memref<1x32xf32, #tpu.memory_space<vmem>>, %arg5: memref<1x32xf32, #tpu.memory_space<vmem>>, %arg6: memref<1x32xf32, #tpu.memory_space<vmem>>, %arg7: memref<32x128xbf16, #tpu.memory_space<vmem>>, %arg8: memref<1x128xf32, #tpu.memory_space<vmem>>, %arg9: memref<128x32xbf16, #tpu.memory_space<vmem>>, %arg10: memref<1x32xf32, #tpu.memory_space<vmem>>, %arg11: memref<1x32xf32, #tpu.memory_space<vmem>>, %arg12: memref<1x118x32xf32, #tpu.memory_space<vmem>>) attributes {dimension_semantics = [#tpu.dimension_semantics<parallel>], iteration_bounds = array<i64: 2>, scalar_prefetch = 0 : i64, scratch_operands = 0 : i64, tpu.core_type = #tpu.core_type<tc>, window_params = [{transform_indices = @transform_0, window_bounds = array<i64: 1, 118, 32>}, {pipeline_mode = #tpu.pipeline_mode<synchronous>, transform_indices = @transform_1, window_bounds = array<i64: 64, 7>}, {pipeline_mode = #tpu.pipeline_mode<synchronous>, transform_indices = @transform_2, window_bounds = array<i64: 49, 32>}, {pipeline_mode = #tpu.pipeline_mode<synchronous>, transform_indices = @transform_3, window_bounds = array<i64: 1, 32>}, {pipeline_mode = #tpu.pipeline_mode<synchronous>, transform_indices = @transform_4, window_bounds = array<i64: 1, 32>}, {pipeline_mode = #tpu.pipeline_mode<synchronous>, transform_indices = @transform_5, window_bounds = array<i64: 1, 32>}, {pipeline_mode = #tpu.pipeline_mode<synchronous>, transform_indices = @transform_6, window_bounds = array<i64: 32, 128>}, {pipeline_mode = #tpu.pipeline_mode<synchronous>, transform_indices = @transform_7, window_bounds = array<i64: 1, 128>}, {pipeline_mode = #tpu.pipeline_mode<synchronous>, transform_indices = @transform_8, window_bounds = array<i64: 128, 32>}, {pipeline_mode = #tpu.pipeline_mode<synchronous>, transform_indices = @transform_9, window_bounds = array<i64: 1, 32>}, {pipeline_mode = #tpu.pipeline_mode<synchronous>, transform_indices = @transform_10, window_bounds = array<i64: 1, 32>}, {transform_indices = @transform_11, window_bounds = array<i64: 1, 118, 32>}]} {
    %c0 = arith.constant 0 : index
    %c0_0 = arith.constant 0 : index
    %c0_1 = arith.constant 0 : index
    %0 = vector.load %arg1[%c0, %c0_0, %c0_1] : memref<1x118x32xf32, #tpu.memory_space<vmem>>, vector<1x118x32xf32>
    %1 = vector.shape_cast %0 : vector<1x118x32xf32> to vector<118x32xf32>
    %c0_2 = arith.constant 0 : index
    %c0_3 = arith.constant 0 : index
    %2 = vector.load %arg3[%c0_2, %c0_3] : memref<49x32xf32, #tpu.memory_space<vmem>>, vector<49x32xf32>
    %c0_4 = arith.constant 0 : index
    %c0_5 = arith.constant 0 : index
    %3 = vector.load %arg2[%c0_4, %c0_5] : memref<64x7xf32, #tpu.memory_space<vmem>>, vector<64x7xf32>
    %cst = arith.constant 0.000000e+00 : f32
    %4 = vector.broadcast %cst : f32 to vector<64x32xf32>
    %5 = vector.extract_strided_slice %1 {offsets = [0, 0], sizes = [112, 32], strides = [1, 1]} : vector<118x32xf32> to vector<112x32xf32>
    %cst_6 = arith.constant 0.000000e+00 : f32
    %6 = vector.broadcast %cst_6 : f32 to vector<64x32xf32>
    %7 = vector.extract_strided_slice %5 {offsets = [0, 0], sizes = [64, 32], strides = [1, 1]} : vector<112x32xf32> to vector<64x32xf32>
    %8 = vector.extract_strided_slice %2 {offsets = [0, 0], sizes = [1, 32], strides = [1, 1]} : vector<49x32xf32> to vector<1x32xf32>
    %9 = vector.broadcast %8 : vector<1x32xf32> to vector<64x32xf32>
    %10 = arith.mulf %7, %9 : vector<64x32xf32>
    %11 = arith.addf %6, %10 : vector<64x32xf32>
    %12 = vector.extract_strided_slice %5 {offsets = [8, 0], sizes = [64, 32], strides = [1, 1]} : vector<112x32xf32> to vector<64x32xf32>
    %13 = vector.extract_strided_slice %2 {offsets = [7, 0], sizes = [1, 32], strides = [1, 1]} : vector<49x32xf32> to vector<1x32xf32>
    %14 = vector.broadcast %13 : vector<1x32xf32> to vector<64x32xf32>
    %15 = arith.mulf %12, %14 : vector<64x32xf32>
    %16 = arith.addf %11, %15 : vector<64x32xf32>
    %17 = vector.extract_strided_slice %5 {offsets = [16, 0], sizes = [64, 32], strides = [1, 1]} : vector<112x32xf32> to vector<64x32xf32>
    %18 = vector.extract_strided_slice %2 {offsets = [14, 0], sizes = [1, 32], strides = [1, 1]} : vector<49x32xf32> to vector<1x32xf32>
    %19 = vector.broadcast %18 : vector<1x32xf32> to vector<64x32xf32>
    %20 = arith.mulf %17, %19 : vector<64x32xf32>
    %21 = arith.addf %16, %20 : vector<64x32xf32>
    %22 = vector.extract_strided_slice %5 {offsets = [24, 0], sizes = [64, 32], strides = [1, 1]} : vector<112x32xf32> to vector<64x32xf32>
    %23 = vector.extract_strided_slice %2 {offsets = [21, 0], sizes = [1, 32], strides = [1, 1]} : vector<49x32xf32> to vector<1x32xf32>
    %24 = vector.broadcast %23 : vector<1x32xf32> to vector<64x32xf32>
    %25 = arith.mulf %22, %24 : vector<64x32xf32>
    %26 = arith.addf %21, %25 : vector<64x32xf32>
    %27 = vector.extract_strided_slice %5 {offsets = [32, 0], sizes = [64, 32], strides = [1, 1]} : vector<112x32xf32> to vector<64x32xf32>
    %28 = vector.extract_strided_slice %2 {offsets = [28, 0], sizes = [1, 32], strides = [1, 1]} : vector<49x32xf32> to vector<1x32xf32>
    %29 = vector.broadcast %28 : vector<1x32xf32> to vector<64x32xf32>
    %30 = arith.mulf %27, %29 : vector<64x32xf32>
    %31 = arith.addf %26, %30 : vector<64x32xf32>
    %32 = vector.extract_strided_slice %5 {offsets = [40, 0], sizes = [64, 32], strides = [1, 1]} : vector<112x32xf32> to vector<64x32xf32>
    %33 = vector.extract_strided_slice %2 {offsets = [35, 0], sizes = [1, 32], strides = [1, 1]} : vector<49x32xf32> to vector<1x32xf32>
    %34 = vector.broadcast %33 : vector<1x32xf32> to vector<64x32xf32>
    %35 = arith.mulf %32, %34 : vector<64x32xf32>
    %36 = arith.addf %31, %35 : vector<64x32xf32>
    %37 = vector.extract_strided_slice %5 {offsets = [48, 0], sizes = [64, 32], strides = [1, 1]} : vector<112x32xf32> to vector<64x32xf32>
    %38 = vector.extract_strided_slice %2 {offsets = [42, 0], sizes = [1, 32], strides = [1, 1]} : vector<49x32xf32> to vector<1x32xf32>
    %39 = vector.broadcast %38 : vector<1x32xf32> to vector<64x32xf32>
    %40 = arith.mulf %37, %39 : vector<64x32xf32>
    %41 = arith.addf %36, %40 : vector<64x32xf32>
    %42 = vector.extract_strided_slice %3 {offsets = [0, 0], sizes = [64, 1], strides = [1, 1]} : vector<64x7xf32> to vector<64x1xf32>
    %43 = vector.broadcast %42 : vector<64x1xf32> to vector<64x32xf32>
    %44 = arith.mulf %41, %43 : vector<64x32xf32>
    %45 = arith.addf %4, %44 : vector<64x32xf32>
    %46 = vector.extract_strided_slice %1 {offsets = [1, 0], sizes = [112, 32], strides = [1, 1]} : vector<118x32xf32> to vector<112x32xf32>
    %cst_7 = arith.constant 0.000000e+00 : f32
    %47 = vector.broadcast %cst_7 : f32 to vector<64x32xf32>
    %48 = vector.extract_strided_slice %46 {offsets = [0, 0], sizes = [64, 32], strides = [1, 1]} : vector<112x32xf32> to vector<64x32xf32>
    %49 = vector.extract_strided_slice %2 {offsets = [1, 0], sizes = [1, 32], strides = [1, 1]} : vector<49x32xf32> to vector<1x32xf32>
    %50 = vector.broadcast %49 : vector<1x32xf32> to vector<64x32xf32>
    %51 = arith.mulf %48, %50 : vector<64x32xf32>
    %52 = arith.addf %47, %51 : vector<64x32xf32>
    %53 = vector.extract_strided_slice %46 {offsets = [8, 0], sizes = [64, 32], strides = [1, 1]} : vector<112x32xf32> to vector<64x32xf32>
    %54 = vector.extract_strided_slice %2 {offsets = [8, 0], sizes = [1, 32], strides = [1, 1]} : vector<49x32xf32> to vector<1x32xf32>
    %55 = vector.broadcast %54 : vector<1x32xf32> to vector<64x32xf32>
    %56 = arith.mulf %53, %55 : vector<64x32xf32>
    %57 = arith.addf %52, %56 : vector<64x32xf32>
    %58 = vector.extract_strided_slice %46 {offsets = [16, 0], sizes = [64, 32], strides = [1, 1]} : vector<112x32xf32> to vector<64x32xf32>
    %59 = vector.extract_strided_slice %2 {offsets = [15, 0], sizes = [1, 32], strides = [1, 1]} : vector<49x32xf32> to vector<1x32xf32>
    %60 = vector.broadcast %59 : vector<1x32xf32> to vector<64x32xf32>
    %61 = arith.mulf %58, %60 : vector<64x32xf32>
    %62 = arith.addf %57, %61 : vector<64x32xf32>
    %63 = vector.extract_strided_slice %46 {offsets = [24, 0], sizes = [64, 32], strides = [1, 1]} : vector<112x32xf32> to vector<64x32xf32>
    %64 = vector.extract_strided_slice %2 {offsets = [22, 0], sizes = [1, 32], strides = [1, 1]} : vector<49x32xf32> to vector<1x32xf32>
    %65 = vector.broadcast %64 : vector<1x32xf32> to vector<64x32xf32>
    %66 = arith.mulf %63, %65 : vector<64x32xf32>
    %67 = arith.addf %62, %66 : vector<64x32xf32>
    %68 = vector.extract_strided_slice %46 {offsets = [32, 0], sizes = [64, 32], strides = [1, 1]} : vector<112x32xf32> to vector<64x32xf32>
    %69 = vector.extract_strided_slice %2 {offsets = [29, 0], sizes = [1, 32], strides = [1, 1]} : vector<49x32xf32> to vector<1x32xf32>
    %70 = vector.broadcast %69 : vector<1x32xf32> to vector<64x32xf32>
    %71 = arith.mulf %68, %70 : vector<64x32xf32>
    %72 = arith.addf %67, %71 : vector<64x32xf32>
    %73 = vector.extract_strided_slice %46 {offsets = [40, 0], sizes = [64, 32], strides = [1, 1]} : vector<112x32xf32> to vector<64x32xf32>
    %74 = vector.extract_strided_slice %2 {offsets = [36, 0], sizes = [1, 32], strides = [1, 1]} : vector<49x32xf32> to vector<1x32xf32>
    %75 = vector.broadcast %74 : vector<1x32xf32> to vector<64x32xf32>
    %76 = arith.mulf %73, %75 : vector<64x32xf32>
    %77 = arith.addf %72, %76 : vector<64x32xf32>
    %78 = vector.extract_strided_slice %46 {offsets = [48, 0], sizes = [64, 32], strides = [1, 1]} : vector<112x32xf32> to vector<64x32xf32>
    %79 = vector.extract_strided_slice %2 {offsets = [43, 0], sizes = [1, 32], strides = [1, 1]} : vector<49x32xf32> to vector<1x32xf32>
    %80 = vector.broadcast %79 : vector<1x32xf32> to vector<64x32xf32>
    %81 = arith.mulf %78, %80 : vector<64x32xf32>
    %82 = arith.addf %77, %81 : vector<64x32xf32>
    %83 = vector.extract_strided_slice %3 {offsets = [0, 1], sizes = [64, 1], strides = [1, 1]} : vector<64x7xf32> to vector<64x1xf32>
    %84 = vector.broadcast %83 : vector<64x1xf32> to vector<64x32xf32>
    %85 = arith.mulf %82, %84 : vector<64x32xf32>
    %86 = arith.addf %45, %85 : vector<64x32xf32>
    %87 = vector.extract_strided_slice %1 {offsets = [2, 0], sizes = [112, 32], strides = [1, 1]} : vector<118x32xf32> to vector<112x32xf32>
    %cst_8 = arith.constant 0.000000e+00 : f32
    %88 = vector.broadcast %cst_8 : f32 to vector<64x32xf32>
    %89 = vector.extract_strided_slice %87 {offsets = [0, 0], sizes = [64, 32], strides = [1, 1]} : vector<112x32xf32> to vector<64x32xf32>
    %90 = vector.extract_strided_slice %2 {offsets = [2, 0], sizes = [1, 32], strides = [1, 1]} : vector<49x32xf32> to vector<1x32xf32>
    %91 = vector.broadcast %90 : vector<1x32xf32> to vector<64x32xf32>
    %92 = arith.mulf %89, %91 : vector<64x32xf32>
    %93 = arith.addf %88, %92 : vector<64x32xf32>
    %94 = vector.extract_strided_slice %87 {offsets = [8, 0], sizes = [64, 32], strides = [1, 1]} : vector<112x32xf32> to vector<64x32xf32>
    %95 = vector.extract_strided_slice %2 {offsets = [9, 0], sizes = [1, 32], strides = [1, 1]} : vector<49x32xf32> to vector<1x32xf32>
    %96 = vector.broadcast %95 : vector<1x32xf32> to vector<64x32xf32>
    %97 = arith.mulf %94, %96 : vector<64x32xf32>
    %98 = arith.addf %93, %97 : vector<64x32xf32>
    %99 = vector.extract_strided_slice %87 {offsets = [16, 0], sizes = [64, 32], strides = [1, 1]} : vector<112x32xf32> to vector<64x32xf32>
    %100 = vector.extract_strided_slice %2 {offsets = [16, 0], sizes = [1, 32], strides = [1, 1]} : vector<49x32xf32> to vector<1x32xf32>
    %101 = vector.broadcast %100 : vector<1x32xf32> to vector<64x32xf32>
    %102 = arith.mulf %99, %101 : vector<64x32xf32>
    %103 = arith.addf %98, %102 : vector<64x32xf32>
    %104 = vector.extract_strided_slice %87 {offsets = [24, 0], sizes = [64, 32], strides = [1, 1]} : vector<112x32xf32> to vector<64x32xf32>
    %105 = vector.extract_strided_slice %2 {offsets = [23, 0], sizes = [1, 32], strides = [1, 1]} : vector<49x32xf32> to vector<1x32xf32>
    %106 = vector.broadcast %105 : vector<1x32xf32> to vector<64x32xf32>
    %107 = arith.mulf %104, %106 : vector<64x32xf32>
    %108 = arith.addf %103, %107 : vector<64x32xf32>
    %109 = vector.extract_strided_slice %87 {offsets = [32, 0], sizes = [64, 32], strides = [1, 1]} : vector<112x32xf32> to vector<64x32xf32>
    %110 = vector.extract_strided_slice %2 {offsets = [30, 0], sizes = [1, 32], strides = [1, 1]} : vector<49x32xf32> to vector<1x32xf32>
    %111 = vector.broadcast %110 : vector<1x32xf32> to vector<64x32xf32>
    %112 = arith.mulf %109, %111 : vector<64x32xf32>
    %113 = arith.addf %108, %112 : vector<64x32xf32>
    %114 = vector.extract_strided_slice %87 {offsets = [40, 0], sizes = [64, 32], strides = [1, 1]} : vector<112x32xf32> to vector<64x32xf32>
    %115 = vector.extract_strided_slice %2 {offsets = [37, 0], sizes = [1, 32], strides = [1, 1]} : vector<49x32xf32> to vector<1x32xf32>
    %116 = vector.broadcast %115 : vector<1x32xf32> to vector<64x32xf32>
    %117 = arith.mulf %114, %116 : vector<64x32xf32>
    %118 = arith.addf %113, %117 : vector<64x32xf32>
    %119 = vector.extract_strided_slice %87 {offsets = [48, 0], sizes = [64, 32], strides = [1, 1]} : vector<112x32xf32> to vector<64x32xf32>
    %120 = vector.extract_strided_slice %2 {offsets = [44, 0], sizes = [1, 32], strides = [1, 1]} : vector<49x32xf32> to vector<1x32xf32>
    %121 = vector.broadcast %120 : vector<1x32xf32> to vector<64x32xf32>
    %122 = arith.mulf %119, %121 : vector<64x32xf32>
    %123 = arith.addf %118, %122 : vector<64x32xf32>
    %124 = vector.extract_strided_slice %3 {offsets = [0, 2], sizes = [64, 1], strides = [1, 1]} : vector<64x7xf32> to vector<64x1xf32>
    %125 = vector.broadcast %124 : vector<64x1xf32> to vector<64x32xf32>
    %126 = arith.mulf %123, %125 : vector<64x32xf32>
    %127 = arith.addf %86, %126 : vector<64x32xf32>
    %128 = vector.extract_strided_slice %1 {offsets = [3, 0], sizes = [112, 32], strides = [1, 1]} : vector<118x32xf32> to vector<112x32xf32>
    %cst_9 = arith.constant 0.000000e+00 : f32
    %129 = vector.broadcast %cst_9 : f32 to vector<64x32xf32>
    %130 = vector.extract_strided_slice %128 {offsets = [0, 0], sizes = [64, 32], strides = [1, 1]} : vector<112x32xf32> to vector<64x32xf32>
    %131 = vector.extract_strided_slice %2 {offsets = [3, 0], sizes = [1, 32], strides = [1, 1]} : vector<49x32xf32> to vector<1x32xf32>
    %132 = vector.broadcast %131 : vector<1x32xf32> to vector<64x32xf32>
    %133 = arith.mulf %130, %132 : vector<64x32xf32>
    %134 = arith.addf %129, %133 : vector<64x32xf32>
    %135 = vector.extract_strided_slice %128 {offsets = [8, 0], sizes = [64, 32], strides = [1, 1]} : vector<112x32xf32> to vector<64x32xf32>
    %136 = vector.extract_strided_slice %2 {offsets = [10, 0], sizes = [1, 32], strides = [1, 1]} : vector<49x32xf32> to vector<1x32xf32>
    %137 = vector.broadcast %136 : vector<1x32xf32> to vector<64x32xf32>
    %138 = arith.mulf %135, %137 : vector<64x32xf32>
    %139 = arith.addf %134, %138 : vector<64x32xf32>
    %140 = vector.extract_strided_slice %128 {offsets = [16, 0], sizes = [64, 32], strides = [1, 1]} : vector<112x32xf32> to vector<64x32xf32>
    %141 = vector.extract_strided_slice %2 {offsets = [17, 0], sizes = [1, 32], strides = [1, 1]} : vector<49x32xf32> to vector<1x32xf32>
    %142 = vector.broadcast %141 : vector<1x32xf32> to vector<64x32xf32>
    %143 = arith.mulf %140, %142 : vector<64x32xf32>
    %144 = arith.addf %139, %143 : vector<64x32xf32>
    %145 = vector.extract_strided_slice %128 {offsets = [24, 0], sizes = [64, 32], strides = [1, 1]} : vector<112x32xf32> to vector<64x32xf32>
    %146 = vector.extract_strided_slice %2 {offsets = [24, 0], sizes = [1, 32], strides = [1, 1]} : vector<49x32xf32> to vector<1x32xf32>
    %147 = vector.broadcast %146 : vector<1x32xf32> to vector<64x32xf32>
    %148 = arith.mulf %145, %147 : vector<64x32xf32>
    %149 = arith.addf %144, %148 : vector<64x32xf32>
    %150 = vector.extract_strided_slice %128 {offsets = [32, 0], sizes = [64, 32], strides = [1, 1]} : vector<112x32xf32> to vector<64x32xf32>
    %151 = vector.extract_strided_slice %2 {offsets = [31, 0], sizes = [1, 32], strides = [1, 1]} : vector<49x32xf32> to vector<1x32xf32>
    %152 = vector.broadcast %151 : vector<1x32xf32> to vector<64x32xf32>
    %153 = arith.mulf %150, %152 : vector<64x32xf32>
    %154 = arith.addf %149, %153 : vector<64x32xf32>
    %155 = vector.extract_strided_slice %128 {offsets = [40, 0], sizes = [64, 32], strides = [1, 1]} : vector<112x32xf32> to vector<64x32xf32>
    %156 = vector.extract_strided_slice %2 {offsets = [38, 0], sizes = [1, 32], strides = [1, 1]} : vector<49x32xf32> to vector<1x32xf32>
    %157 = vector.broadcast %156 : vector<1x32xf32> to vector<64x32xf32>
    %158 = arith.mulf %155, %157 : vector<64x32xf32>
    %159 = arith.addf %154, %158 : vector<64x32xf32>
    %160 = vector.extract_strided_slice %128 {offsets = [48, 0], sizes = [64, 32], strides = [1, 1]} : vector<112x32xf32> to vector<64x32xf32>
    %161 = vector.extract_strided_slice %2 {offsets = [45, 0], sizes = [1, 32], strides = [1, 1]} : vector<49x32xf32> to vector<1x32xf32>
    %162 = vector.broadcast %161 : vector<1x32xf32> to vector<64x32xf32>
    %163 = arith.mulf %160, %162 : vector<64x32xf32>
    %164 = arith.addf %159, %163 : vector<64x32xf32>
    %165 = vector.extract_strided_slice %3 {offsets = [0, 3], sizes = [64, 1], strides = [1, 1]} : vector<64x7xf32> to vector<64x1xf32>
    %166 = vector.broadcast %165 : vector<64x1xf32> to vector<64x32xf32>
    %167 = arith.mulf %164, %166 : vector<64x32xf32>
    %168 = arith.addf %127, %167 : vector<64x32xf32>
    %169 = vector.extract_strided_slice %1 {offsets = [4, 0], sizes = [112, 32], strides = [1, 1]} : vector<118x32xf32> to vector<112x32xf32>
    %cst_10 = arith.constant 0.000000e+00 : f32
    %170 = vector.broadcast %cst_10 : f32 to vector<64x32xf32>
    %171 = vector.extract_strided_slice %169 {offsets = [0, 0], sizes = [64, 32], strides = [1, 1]} : vector<112x32xf32> to vector<64x32xf32>
    %172 = vector.extract_strided_slice %2 {offsets = [4, 0], sizes = [1, 32], strides = [1, 1]} : vector<49x32xf32> to vector<1x32xf32>
    %173 = vector.broadcast %172 : vector<1x32xf32> to vector<64x32xf32>
    %174 = arith.mulf %171, %173 : vector<64x32xf32>
    %175 = arith.addf %170, %174 : vector<64x32xf32>
    %176 = vector.extract_strided_slice %169 {offsets = [8, 0], sizes = [64, 32], strides = [1, 1]} : vector<112x32xf32> to vector<64x32xf32>
    %177 = vector.extract_strided_slice %2 {offsets = [11, 0], sizes = [1, 32], strides = [1, 1]} : vector<49x32xf32> to vector<1x32xf32>
    %178 = vector.broadcast %177 : vector<1x32xf32> to vector<64x32xf32>
    %179 = arith.mulf %176, %178 : vector<64x32xf32>
    %180 = arith.addf %175, %179 : vector<64x32xf32>
    %181 = vector.extract_strided_slice %169 {offsets = [16, 0], sizes = [64, 32], strides = [1, 1]} : vector<112x32xf32> to vector<64x32xf32>
    %182 = vector.extract_strided_slice %2 {offsets = [18, 0], sizes = [1, 32], strides = [1, 1]} : vector<49x32xf32> to vector<1x32xf32>
    %183 = vector.broadcast %182 : vector<1x32xf32> to vector<64x32xf32>
    %184 = arith.mulf %181, %183 : vector<64x32xf32>
    %185 = arith.addf %180, %184 : vector<64x32xf32>
    %186 = vector.extract_strided_slice %169 {offsets = [24, 0], sizes = [64, 32], strides = [1, 1]} : vector<112x32xf32> to vector<64x32xf32>
    %187 = vector.extract_strided_slice %2 {offsets = [25, 0], sizes = [1, 32], strides = [1, 1]} : vector<49x32xf32> to vector<1x32xf32>
    %188 = vector.broadcast %187 : vector<1x32xf32> to vector<64x32xf32>
    %189 = arith.mulf %186, %188 : vector<64x32xf32>
    %190 = arith.addf %185, %189 : vector<64x32xf32>
    %191 = vector.extract_strided_slice %169 {offsets = [32, 0], sizes = [64, 32], strides = [1, 1]} : vector<112x32xf32> to vector<64x32xf32>
    %192 = vector.extract_strided_slice %2 {offsets = [32, 0], sizes = [1, 32], strides = [1, 1]} : vector<49x32xf32> to vector<1x32xf32>
    %193 = vector.broadcast %192 : vector<1x32xf32> to vector<64x32xf32>
    %194 = arith.mulf %191, %193 : vector<64x32xf32>
    %195 = arith.addf %190, %194 : vector<64x32xf32>
    %196 = vector.extract_strided_slice %169 {offsets = [40, 0], sizes = [64, 32], strides = [1, 1]} : vector<112x32xf32> to vector<64x32xf32>
    %197 = vector.extract_strided_slice %2 {offsets = [39, 0], sizes = [1, 32], strides = [1, 1]} : vector<49x32xf32> to vector<1x32xf32>
    %198 = vector.broadcast %197 : vector<1x32xf32> to vector<64x32xf32>
    %199 = arith.mulf %196, %198 : vector<64x32xf32>
    %200 = arith.addf %195, %199 : vector<64x32xf32>
    %201 = vector.extract_strided_slice %169 {offsets = [48, 0], sizes = [64, 32], strides = [1, 1]} : vector<112x32xf32> to vector<64x32xf32>
    %202 = vector.extract_strided_slice %2 {offsets = [46, 0], sizes = [1, 32], strides = [1, 1]} : vector<49x32xf32> to vector<1x32xf32>
    %203 = vector.broadcast %202 : vector<1x32xf32> to vector<64x32xf32>
    %204 = arith.mulf %201, %203 : vector<64x32xf32>
    %205 = arith.addf %200, %204 : vector<64x32xf32>
    %206 = vector.extract_strided_slice %3 {offsets = [0, 4], sizes = [64, 1], strides = [1, 1]} : vector<64x7xf32> to vector<64x1xf32>
    %207 = vector.broadcast %206 : vector<64x1xf32> to vector<64x32xf32>
    %208 = arith.mulf %205, %207 : vector<64x32xf32>
    %209 = arith.addf %168, %208 : vector<64x32xf32>
    %210 = vector.extract_strided_slice %1 {offsets = [5, 0], sizes = [112, 32], strides = [1, 1]} : vector<118x32xf32> to vector<112x32xf32>
    %cst_11 = arith.constant 0.000000e+00 : f32
    %211 = vector.broadcast %cst_11 : f32 to vector<64x32xf32>
    %212 = vector.extract_strided_slice %210 {offsets = [0, 0], sizes = [64, 32], strides = [1, 1]} : vector<112x32xf32> to vector<64x32xf32>
    %213 = vector.extract_strided_slice %2 {offsets = [5, 0], sizes = [1, 32], strides = [1, 1]} : vector<49x32xf32> to vector<1x32xf32>
    %214 = vector.broadcast %213 : vector<1x32xf32> to vector<64x32xf32>
    %215 = arith.mulf %212, %214 : vector<64x32xf32>
    %216 = arith.addf %211, %215 : vector<64x32xf32>
    %217 = vector.extract_strided_slice %210 {offsets = [8, 0], sizes = [64, 32], strides = [1, 1]} : vector<112x32xf32> to vector<64x32xf32>
    %218 = vector.extract_strided_slice %2 {offsets = [12, 0], sizes = [1, 32], strides = [1, 1]} : vector<49x32xf32> to vector<1x32xf32>
    %219 = vector.broadcast %218 : vector<1x32xf32> to vector<64x32xf32>
    %220 = arith.mulf %217, %219 : vector<64x32xf32>
    %221 = arith.addf %216, %220 : vector<64x32xf32>
    %222 = vector.extract_strided_slice %210 {offsets = [16, 0], sizes = [64, 32], strides = [1, 1]} : vector<112x32xf32> to vector<64x32xf32>
    %223 = vector.extract_strided_slice %2 {offsets = [19, 0], sizes = [1, 32], strides = [1, 1]} : vector<49x32xf32> to vector<1x32xf32>
    %224 = vector.broadcast %223 : vector<1x32xf32> to vector<64x32xf32>
    %225 = arith.mulf %222, %224 : vector<64x32xf32>
    %226 = arith.addf %221, %225 : vector<64x32xf32>
    %227 = vector.extract_strided_slice %210 {offsets = [24, 0], sizes = [64, 32], strides = [1, 1]} : vector<112x32xf32> to vector<64x32xf32>
    %228 = vector.extract_strided_slice %2 {offsets = [26, 0], sizes = [1, 32], strides = [1, 1]} : vector<49x32xf32> to vector<1x32xf32>
    %229 = vector.broadcast %228 : vector<1x32xf32> to vector<64x32xf32>
    %230 = arith.mulf %227, %229 : vector<64x32xf32>
    %231 = arith.addf %226, %230 : vector<64x32xf32>
    %232 = vector.extract_strided_slice %210 {offsets = [32, 0], sizes = [64, 32], strides = [1, 1]} : vector<112x32xf32> to vector<64x32xf32>
    %233 = vector.extract_strided_slice %2 {offsets = [33, 0], sizes = [1, 32], strides = [1, 1]} : vector<49x32xf32> to vector<1x32xf32>
    %234 = vector.broadcast %233 : vector<1x32xf32> to vector<64x32xf32>
    %235 = arith.mulf %232, %234 : vector<64x32xf32>
    %236 = arith.addf %231, %235 : vector<64x32xf32>
    %237 = vector.extract_strided_slice %210 {offsets = [40, 0], sizes = [64, 32], strides = [1, 1]} : vector<112x32xf32> to vector<64x32xf32>
    %238 = vector.extract_strided_slice %2 {offsets = [40, 0], sizes = [1, 32], strides = [1, 1]} : vector<49x32xf32> to vector<1x32xf32>
    %239 = vector.broadcast %238 : vector<1x32xf32> to vector<64x32xf32>
    %240 = arith.mulf %237, %239 : vector<64x32xf32>
    %241 = arith.addf %236, %240 : vector<64x32xf32>
    %242 = vector.extract_strided_slice %210 {offsets = [48, 0], sizes = [64, 32], strides = [1, 1]} : vector<112x32xf32> to vector<64x32xf32>
    %243 = vector.extract_strided_slice %2 {offsets = [47, 0], sizes = [1, 32], strides = [1, 1]} : vector<49x32xf32> to vector<1x32xf32>
    %244 = vector.broadcast %243 : vector<1x32xf32> to vector<64x32xf32>
    %245 = arith.mulf %242, %244 : vector<64x32xf32>
    %246 = arith.addf %241, %245 : vector<64x32xf32>
    %247 = vector.extract_strided_slice %3 {offsets = [0, 5], sizes = [64, 1], strides = [1, 1]} : vector<64x7xf32> to vector<64x1xf32>
    %248 = vector.broadcast %247 : vector<64x1xf32> to vector<64x32xf32>
    %249 = arith.mulf %246, %248 : vector<64x32xf32>
    %250 = arith.addf %209, %249 : vector<64x32xf32>
    %251 = vector.extract_strided_slice %1 {offsets = [6, 0], sizes = [112, 32], strides = [1, 1]} : vector<118x32xf32> to vector<112x32xf32>
    %cst_12 = arith.constant 0.000000e+00 : f32
    %252 = vector.broadcast %cst_12 : f32 to vector<64x32xf32>
    %253 = vector.extract_strided_slice %251 {offsets = [0, 0], sizes = [64, 32], strides = [1, 1]} : vector<112x32xf32> to vector<64x32xf32>
    %254 = vector.extract_strided_slice %2 {offsets = [6, 0], sizes = [1, 32], strides = [1, 1]} : vector<49x32xf32> to vector<1x32xf32>
    %255 = vector.broadcast %254 : vector<1x32xf32> to vector<64x32xf32>
    %256 = arith.mulf %253, %255 : vector<64x32xf32>
    %257 = arith.addf %252, %256 : vector<64x32xf32>
    %258 = vector.extract_strided_slice %251 {offsets = [8, 0], sizes = [64, 32], strides = [1, 1]} : vector<112x32xf32> to vector<64x32xf32>
    %259 = vector.extract_strided_slice %2 {offsets = [13, 0], sizes = [1, 32], strides = [1, 1]} : vector<49x32xf32> to vector<1x32xf32>
    %260 = vector.broadcast %259 : vector<1x32xf32> to vector<64x32xf32>
    %261 = arith.mulf %258, %260 : vector<64x32xf32>
    %262 = arith.addf %257, %261 : vector<64x32xf32>
    %263 = vector.extract_strided_slice %251 {offsets = [16, 0], sizes = [64, 32], strides = [1, 1]} : vector<112x32xf32> to vector<64x32xf32>
    %264 = vector.extract_strided_slice %2 {offsets = [20, 0], sizes = [1, 32], strides = [1, 1]} : vector<49x32xf32> to vector<1x32xf32>
    %265 = vector.broadcast %264 : vector<1x32xf32> to vector<64x32xf32>
    %266 = arith.mulf %263, %265 : vector<64x32xf32>
    %267 = arith.addf %262, %266 : vector<64x32xf32>
    %268 = vector.extract_strided_slice %251 {offsets = [24, 0], sizes = [64, 32], strides = [1, 1]} : vector<112x32xf32> to vector<64x32xf32>
    %269 = vector.extract_strided_slice %2 {offsets = [27, 0], sizes = [1, 32], strides = [1, 1]} : vector<49x32xf32> to vector<1x32xf32>
    %270 = vector.broadcast %269 : vector<1x32xf32> to vector<64x32xf32>
    %271 = arith.mulf %268, %270 : vector<64x32xf32>
    %272 = arith.addf %267, %271 : vector<64x32xf32>
    %273 = vector.extract_strided_slice %251 {offsets = [32, 0], sizes = [64, 32], strides = [1, 1]} : vector<112x32xf32> to vector<64x32xf32>
    %274 = vector.extract_strided_slice %2 {offsets = [34, 0], sizes = [1, 32], strides = [1, 1]} : vector<49x32xf32> to vector<1x32xf32>
    %275 = vector.broadcast %274 : vector<1x32xf32> to vector<64x32xf32>
    %276 = arith.mulf %273, %275 : vector<64x32xf32>
    %277 = arith.addf %272, %276 : vector<64x32xf32>
    %278 = vector.extract_strided_slice %251 {offsets = [40, 0], sizes = [64, 32], strides = [1, 1]} : vector<112x32xf32> to vector<64x32xf32>
    %279 = vector.extract_strided_slice %2 {offsets = [41, 0], sizes = [1, 32], strides = [1, 1]} : vector<49x32xf32> to vector<1x32xf32>
    %280 = vector.broadcast %279 : vector<1x32xf32> to vector<64x32xf32>
    %281 = arith.mulf %278, %280 : vector<64x32xf32>
    %282 = arith.addf %277, %281 : vector<64x32xf32>
    %283 = vector.extract_strided_slice %251 {offsets = [48, 0], sizes = [64, 32], strides = [1, 1]} : vector<112x32xf32> to vector<64x32xf32>
    %284 = vector.extract_strided_slice %2 {offsets = [48, 0], sizes = [1, 32], strides = [1, 1]} : vector<49x32xf32> to vector<1x32xf32>
    %285 = vector.broadcast %284 : vector<1x32xf32> to vector<64x32xf32>
    %286 = arith.mulf %283, %285 : vector<64x32xf32>
    %287 = arith.addf %282, %286 : vector<64x32xf32>
    %288 = vector.extract_strided_slice %3 {offsets = [0, 6], sizes = [64, 1], strides = [1, 1]} : vector<64x7xf32> to vector<64x1xf32>
    %289 = vector.broadcast %288 : vector<64x1xf32> to vector<64x32xf32>
    %290 = arith.mulf %287, %289 : vector<64x32xf32>
    %291 = arith.addf %250, %290 : vector<64x32xf32>
    %c0_13 = arith.constant 0 : index
    %c0_14 = arith.constant 0 : index
    %292 = vector.load %arg4[%c0_13, %c0_14] : memref<1x32xf32, #tpu.memory_space<vmem>>, vector<1x32xf32>
    %293 = vector.broadcast %292 : vector<1x32xf32> to vector<64x32xf32>
    %294 = arith.addf %291, %293 : vector<64x32xf32>
    %295 = vector.extract_strided_slice %1 {offsets = [27, 0], sizes = [64, 32], strides = [1, 1]} : vector<118x32xf32> to vector<64x32xf32>
    %c0_15 = arith.constant 0 : index
    %c0_16 = arith.constant 0 : index
    %296 = vector.load %arg5[%c0_15, %c0_16] : memref<1x32xf32, #tpu.memory_space<vmem>>, vector<1x32xf32>
    %c0_17 = arith.constant 0 : index
    %c0_18 = arith.constant 0 : index
    %297 = vector.load %arg6[%c0_17, %c0_18] : memref<1x32xf32, #tpu.memory_space<vmem>>, vector<1x32xf32>
    %cst_19 = arith.constant dense<0.000000e+00> : vector<64xf32>
    %298 = vector.multi_reduction <add>, %294, %cst_19 [1] : vector<64x32xf32> to vector<64xf32>
    %299 = vector.shape_cast %298 : vector<64xf32> to vector<64x1xf32>
    %cst_20 = arith.constant 3.200000e+01 : f32
    %300 = vector.broadcast %cst_20 : f32 to vector<64x1xf32>
    %301 = arith.divf %299, %300 : vector<64x1xf32>
    %302 = vector.broadcast %301 : vector<64x1xf32> to vector<64x32xf32>
    %303 = arith.subf %294, %302 : vector<64x32xf32>
    %304 = arith.mulf %303, %303 : vector<64x32xf32>
    %cst_21 = arith.constant dense<0.000000e+00> : vector<64xf32>
    %305 = vector.multi_reduction <add>, %304, %cst_21 [1] : vector<64x32xf32> to vector<64xf32>
    %306 = vector.shape_cast %305 : vector<64xf32> to vector<64x1xf32>
    %cst_22 = arith.constant 3.200000e+01 : f32
    %307 = vector.broadcast %cst_22 : f32 to vector<64x1xf32>
    %308 = arith.divf %306, %307 : vector<64x1xf32>
    %309 = vector.broadcast %301 : vector<64x1xf32> to vector<64x32xf32>
    %310 = arith.subf %294, %309 : vector<64x32xf32>
    %cst_23 = arith.constant 9.99999997E-7 : f32
    %311 = vector.broadcast %cst_23 : f32 to vector<64x1xf32>
    %312 = arith.addf %308, %311 : vector<64x1xf32>
    %313 = math.rsqrt %312 : vector<64x1xf32>
    %314 = vector.broadcast %313 : vector<64x1xf32> to vector<64x32xf32>
    %315 = arith.mulf %310, %314 : vector<64x32xf32>
    %316 = vector.broadcast %296 : vector<1x32xf32> to vector<64x32xf32>
    %317 = arith.mulf %315, %316 : vector<64x32xf32>
    %318 = vector.broadcast %297 : vector<1x32xf32> to vector<64x32xf32>
    %319 = arith.addf %317, %318 : vector<64x32xf32>
    %320 = arith.truncf %319 : vector<64x32xf32> to vector<64x32xbf16>
    %c0_24 = arith.constant 0 : index
    %c0_25 = arith.constant 0 : index
    %321 = vector.load %arg7[%c0_24, %c0_25] : memref<32x128xbf16, #tpu.memory_space<vmem>>, vector<32x128xbf16>
    %cst_26 = arith.constant dense<0.000000e+00> : vector<64x128xf32>
    %322 = tpu.matmul %320, %321, %cst_26 {dimension_numbers = #tpu.dot_dimension_numbers<[1], [0], [0], [1], [0, 0, 1, 1], [], []>} : vector<64x32xbf16>, vector<32x128xbf16>, vector<64x128xf32> -> vector<64x128xf32>
    %c0_27 = arith.constant 0 : index
    %c0_28 = arith.constant 0 : index
    %323 = vector.load %arg8[%c0_27, %c0_28] : memref<1x128xf32, #tpu.memory_space<vmem>>, vector<1x128xf32>
    %324 = vector.broadcast %323 : vector<1x128xf32> to vector<64x128xf32>
    %325 = arith.addf %322, %324 : vector<64x128xf32>
    %326 = arith.mulf %325, %325 : vector<64x128xf32>
    %327 = arith.mulf %325, %326 : vector<64x128xf32>
    %cst_29 = arith.constant 4.471500e-02 : f32
    %328 = vector.broadcast %cst_29 : f32 to vector<64x128xf32>
    %329 = arith.mulf %328, %327 : vector<64x128xf32>
    %330 = arith.addf %325, %329 : vector<64x128xf32>
    %cst_30 = arith.constant 0.797884583 : f32
    %331 = vector.broadcast %cst_30 : f32 to vector<64x128xf32>
    %332 = arith.mulf %331, %330 : vector<64x128xf32>
    %333 = math.tanh %332 : vector<64x128xf32>
    %cst_31 = arith.constant 1.000000e+00 : f32
    %334 = vector.broadcast %cst_31 : f32 to vector<64x128xf32>
    %335 = arith.addf %334, %333 : vector<64x128xf32>
    %cst_32 = arith.constant 5.000000e-01 : f32
    %336 = vector.broadcast %cst_32 : f32 to vector<64x128xf32>
    %337 = arith.mulf %336, %335 : vector<64x128xf32>
    %338 = arith.mulf %325, %337 : vector<64x128xf32>
    %339 = arith.truncf %338 : vector<64x128xf32> to vector<64x128xbf16>
    %c0_33 = arith.constant 0 : index
    %c0_34 = arith.constant 0 : index
    %340 = vector.load %arg9[%c0_33, %c0_34] : memref<128x32xbf16, #tpu.memory_space<vmem>>, vector<128x32xbf16>
    %cst_35 = arith.constant dense<0.000000e+00> : vector<64x32xf32>
    %341 = tpu.matmul %339, %340, %cst_35 {dimension_numbers = #tpu.dot_dimension_numbers<[1], [0], [0], [1], [0, 0, 1, 1], [], []>} : vector<64x128xbf16>, vector<128x32xbf16>, vector<64x32xf32> -> vector<64x32xf32>
    %c0_36 = arith.constant 0 : index
    %c0_37 = arith.constant 0 : index
    %342 = vector.load %arg10[%c0_36, %c0_37] : memref<1x32xf32, #tpu.memory_space<vmem>>, vector<1x32xf32>
    %343 = vector.broadcast %342 : vector<1x32xf32> to vector<64x32xf32>
    %344 = arith.addf %341, %343 : vector<64x32xf32>
    %c0_38 = arith.constant 0 : index
    %c0_39 = arith.constant 0 : index
    %345 = vector.load %arg11[%c0_38, %c0_39] : memref<1x32xf32, #tpu.memory_space<vmem>>, vector<1x32xf32>
    %346 = vector.broadcast %345 : vector<1x32xf32> to vector<64x32xf32>
    %347 = arith.mulf %346, %344 : vector<64x32xf32>
    %348 = arith.addf %295, %347 : vector<64x32xf32>
    %cst_40 = arith.constant 0.000000e+00 : f32
    %349 = vector.broadcast %cst_40 : f32 to vector<27x32xf32>
    %350 = tpu.concatenate %349, %348, %349 in 0 : vector<27x32xf32>, vector<64x32xf32>, vector<27x32xf32> -> vector<118x32xf32>
    %c0_41 = arith.constant 0 : index
    %c0_42 = arith.constant 0 : index
    %c0_43 = arith.constant 0 : index
    %351 = vector.load %arg12[%c0_41, %c0_42, %c0_43] : memref<1x118x32xf32, #tpu.memory_space<vmem>>, vector<1x118x32xf32>
    %352 = vector.shape_cast %351 : vector<1x118x32xf32> to vector<118x32xf32>
    %353 = vector.shape_cast %350 : vector<118x32xf32> to vector<1x118x32xf32>
    tpu.vector_store %arg12[%c0_41, %c0_42, %c0_43], %353 {strides = array<i32>} : memref<1x118x32xf32, #tpu.memory_space<vmem>>, vector<1x118x32xf32>,
    return
  }
  func.func @transform_0(%arg0: i32) -> (i32, i32, i32) {
    %c0_i32 = arith.constant 0 : i32
    %c0_i32_0 = arith.constant 0 : i32
    %c0_i32_1 = arith.constant 0 : i32
    return %arg0, %c0_i32, %c0_i32_0 : i32, i32, i32
  }
  func.func @transform_1(%arg0: i32) -> (i32, i32) {
    %c0_i32 = arith.constant 0 : i32
    %c0_i32_0 = arith.constant 0 : i32
    %c0_i32_1 = arith.constant 0 : i32
    return %c0_i32, %c0_i32_0 : i32, i32
  }
  func.func @transform_2(%arg0: i32) -> (i32, i32) {
    %c0_i32 = arith.constant 0 : i32
    %c0_i32_0 = arith.constant 0 : i32
    %c0_i32_1 = arith.constant 0 : i32
    return %c0_i32, %c0_i32_0 : i32, i32
  }
  func.func @transform_3(%arg0: i32) -> (i32, i32) {
    %c0_i32 = arith.constant 0 : i32
    %c0_i32_0 = arith.constant 0 : i32
    %c0_i32_1 = arith.constant 0 : i32
    return %c0_i32, %c0_i32_0 : i32, i32
  }
  func.func @transform_4(%arg0: i32) -> (i32, i32) {
    %c0_i32 = arith.constant 0 : i32
    %c0_i32_0 = arith.constant 0 : i32
    %c0_i32_1 = arith.constant 0 : i32
    return %c0_i32, %c0_i32_0 : i32, i32
  }
  func.func @transform_5(%arg0: i32) -> (i32, i32) {
    %c0_i32 = arith.constant 0 : i32
    %c0_i32_0 = arith.constant 0 : i32
    %c0_i32_1 = arith.constant 0 : i32
    return %c0_i32, %c0_i32_0 : i32, i32
  }
  func.func @transform_6(%arg0: i32) -> (i32, i32) {
    %c0_i32 = arith.constant 0 : i32
    %c0_i32_0 = arith.constant 0 : i32
    %c0_i32_1 = arith.constant 0 : i32
    return %c0_i32, %c0_i32_0 : i32, i32
  }
  func.func @transform_7(%arg0: i32) -> (i32, i32) {
    %c0_i32 = arith.constant 0 : i32
    %c0_i32_0 = arith.constant 0 : i32
    %c0_i32_1 = arith.constant 0 : i32
    return %c0_i32, %c0_i32_0 : i32, i32
  }
  func.func @transform_8(%arg0: i32) -> (i32, i32) {
    %c0_i32 = arith.constant 0 : i32
    %c0_i32_0 = arith.constant 0 : i32
    %c0_i32_1 = arith.constant 0 : i32
    return %c0_i32, %c0_i32_0 : i32, i32
  }
  func.func @transform_9(%arg0: i32) -> (i32, i32) {
    %c0_i32 = arith.constant 0 : i32
    %c0_i32_0 = arith.constant 0 : i32
    %c0_i32_1 = arith.constant 0 : i32
    return %c0_i32, %c0_i32_0 : i32, i32
  }
  func.func @transform_10(%arg0: i32) -> (i32, i32) {
    %c0_i32 = arith.constant 0 : i32
    %c0_i32_0 = arith.constant 0 : i32
    %c0_i32_1 = arith.constant 0 : i32
    return %c0_i32, %c0_i32_0 : i32, i32
  }
  func.func @transform_11(%arg0: i32) -> (i32, i32, i32) {
    %c0_i32 = arith.constant 0 : i32
    %c0_i32_0 = arith.constant 0 : i32
    %c0_i32_1 = arith.constant 0 : i32
    return %arg0, %c0_i32, %c0_i32_0 : i32, i32, i32
  }
}

module attributes {stable_mosaic.version = 11 : i64} {
  func.func @_ds_ln_mm_kernel(%arg0: i32, %arg1: memref<8x128xf32, #tpu.memory_space<vmem>>, %arg2: memref<1x128xf32, #tpu.memory_space<vmem>>, %arg3: memref<1x128xf32, #tpu.memory_space<vmem>>, %arg4: memref<128x64xbf16, #tpu.memory_space<vmem>>, %arg5: memref<1x64xf32, #tpu.memory_space<vmem>>, %arg6: memref<8x64xf32, #tpu.memory_space<vmem>>) attributes {dimension_semantics = [#tpu.dimension_semantics<parallel>], iteration_bounds = array<i64: 4>, scalar_prefetch = 0 : i64, scratch_operands = 0 : i64, tpu.core_type = #tpu.core_type<tc>, window_params = [{transform_indices = @transform_0, window_bounds = array<i64: 8, 128>}, {pipeline_mode = #tpu.pipeline_mode<synchronous>, transform_indices = @transform_1, window_bounds = array<i64: 1, 128>}, {pipeline_mode = #tpu.pipeline_mode<synchronous>, transform_indices = @transform_2, window_bounds = array<i64: 1, 128>}, {pipeline_mode = #tpu.pipeline_mode<synchronous>, transform_indices = @transform_3, window_bounds = array<i64: 128, 64>}, {pipeline_mode = #tpu.pipeline_mode<synchronous>, transform_indices = @transform_4, window_bounds = array<i64: 1, 64>}, {transform_indices = @transform_5, window_bounds = array<i64: 8, 64>}]} {
    %c0 = arith.constant 0 : index
    %c0_0 = arith.constant 0 : index
    %0 = vector.load %arg1[%c0, %c0_0] : memref<8x128xf32, #tpu.memory_space<vmem>>, vector<8x128xf32>
    %c0_1 = arith.constant 0 : index
    %c0_2 = arith.constant 0 : index
    %1 = vector.load %arg2[%c0_1, %c0_2] : memref<1x128xf32, #tpu.memory_space<vmem>>, vector<1x128xf32>
    %c0_3 = arith.constant 0 : index
    %c0_4 = arith.constant 0 : index
    %2 = vector.load %arg3[%c0_3, %c0_4] : memref<1x128xf32, #tpu.memory_space<vmem>>, vector<1x128xf32>
    %3 = vector.extract_strided_slice %0 {offsets = [0, 0], sizes = [8, 32], strides = [1, 1]} : vector<8x128xf32> to vector<8x32xf32>
    %cst = arith.constant dense<0.000000e+00> : vector<8xf32>
    %4 = vector.multi_reduction <add>, %3, %cst [1] : vector<8x32xf32> to vector<8xf32>
    %5 = vector.shape_cast %4 : vector<8xf32> to vector<8x1xf32>
    %cst_5 = arith.constant 3.200000e+01 : f32
    %6 = vector.broadcast %cst_5 : f32 to vector<8x1xf32>
    %7 = arith.divf %5, %6 : vector<8x1xf32>
    %8 = vector.broadcast %7 : vector<8x1xf32> to vector<8x32xf32>
    %9 = arith.subf %3, %8 : vector<8x32xf32>
    %10 = arith.mulf %9, %9 : vector<8x32xf32>
    %cst_6 = arith.constant dense<0.000000e+00> : vector<8xf32>
    %11 = vector.multi_reduction <add>, %10, %cst_6 [1] : vector<8x32xf32> to vector<8xf32>
    %12 = vector.shape_cast %11 : vector<8xf32> to vector<8x1xf32>
    %cst_7 = arith.constant 3.200000e+01 : f32
    %13 = vector.broadcast %cst_7 : f32 to vector<8x1xf32>
    %14 = arith.divf %12, %13 : vector<8x1xf32>
    %15 = vector.broadcast %7 : vector<8x1xf32> to vector<8x32xf32>
    %16 = arith.subf %3, %15 : vector<8x32xf32>
    %cst_8 = arith.constant 9.99999997E-7 : f32
    %17 = vector.broadcast %cst_8 : f32 to vector<8x1xf32>
    %18 = arith.addf %14, %17 : vector<8x1xf32>
    %19 = math.rsqrt %18 : vector<8x1xf32>
    %20 = vector.broadcast %19 : vector<8x1xf32> to vector<8x32xf32>
    %21 = arith.mulf %16, %20 : vector<8x32xf32>
    %22 = vector.extract_strided_slice %0 {offsets = [0, 32], sizes = [8, 32], strides = [1, 1]} : vector<8x128xf32> to vector<8x32xf32>
    %cst_9 = arith.constant dense<0.000000e+00> : vector<8xf32>
    %23 = vector.multi_reduction <add>, %22, %cst_9 [1] : vector<8x32xf32> to vector<8xf32>
    %24 = vector.shape_cast %23 : vector<8xf32> to vector<8x1xf32>
    %cst_10 = arith.constant 3.200000e+01 : f32
    %25 = vector.broadcast %cst_10 : f32 to vector<8x1xf32>
    %26 = arith.divf %24, %25 : vector<8x1xf32>
    %27 = vector.broadcast %26 : vector<8x1xf32> to vector<8x32xf32>
    %28 = arith.subf %22, %27 : vector<8x32xf32>
    %29 = arith.mulf %28, %28 : vector<8x32xf32>
    %cst_11 = arith.constant dense<0.000000e+00> : vector<8xf32>
    %30 = vector.multi_reduction <add>, %29, %cst_11 [1] : vector<8x32xf32> to vector<8xf32>
    %31 = vector.shape_cast %30 : vector<8xf32> to vector<8x1xf32>
    %cst_12 = arith.constant 3.200000e+01 : f32
    %32 = vector.broadcast %cst_12 : f32 to vector<8x1xf32>
    %33 = arith.divf %31, %32 : vector<8x1xf32>
    %34 = vector.broadcast %26 : vector<8x1xf32> to vector<8x32xf32>
    %35 = arith.subf %22, %34 : vector<8x32xf32>
    %cst_13 = arith.constant 9.99999997E-7 : f32
    %36 = vector.broadcast %cst_13 : f32 to vector<8x1xf32>
    %37 = arith.addf %33, %36 : vector<8x1xf32>
    %38 = math.rsqrt %37 : vector<8x1xf32>
    %39 = vector.broadcast %38 : vector<8x1xf32> to vector<8x32xf32>
    %40 = arith.mulf %35, %39 : vector<8x32xf32>
    %41 = vector.extract_strided_slice %0 {offsets = [0, 64], sizes = [8, 32], strides = [1, 1]} : vector<8x128xf32> to vector<8x32xf32>
    %cst_14 = arith.constant dense<0.000000e+00> : vector<8xf32>
    %42 = vector.multi_reduction <add>, %41, %cst_14 [1] : vector<8x32xf32> to vector<8xf32>
    %43 = vector.shape_cast %42 : vector<8xf32> to vector<8x1xf32>
    %cst_15 = arith.constant 3.200000e+01 : f32
    %44 = vector.broadcast %cst_15 : f32 to vector<8x1xf32>
    %45 = arith.divf %43, %44 : vector<8x1xf32>
    %46 = vector.broadcast %45 : vector<8x1xf32> to vector<8x32xf32>
    %47 = arith.subf %41, %46 : vector<8x32xf32>
    %48 = arith.mulf %47, %47 : vector<8x32xf32>
    %cst_16 = arith.constant dense<0.000000e+00> : vector<8xf32>
    %49 = vector.multi_reduction <add>, %48, %cst_16 [1] : vector<8x32xf32> to vector<8xf32>
    %50 = vector.shape_cast %49 : vector<8xf32> to vector<8x1xf32>
    %cst_17 = arith.constant 3.200000e+01 : f32
    %51 = vector.broadcast %cst_17 : f32 to vector<8x1xf32>
    %52 = arith.divf %50, %51 : vector<8x1xf32>
    %53 = vector.broadcast %45 : vector<8x1xf32> to vector<8x32xf32>
    %54 = arith.subf %41, %53 : vector<8x32xf32>
    %cst_18 = arith.constant 9.99999997E-7 : f32
    %55 = vector.broadcast %cst_18 : f32 to vector<8x1xf32>
    %56 = arith.addf %52, %55 : vector<8x1xf32>
    %57 = math.rsqrt %56 : vector<8x1xf32>
    %58 = vector.broadcast %57 : vector<8x1xf32> to vector<8x32xf32>
    %59 = arith.mulf %54, %58 : vector<8x32xf32>
    %60 = vector.extract_strided_slice %0 {offsets = [0, 96], sizes = [8, 32], strides = [1, 1]} : vector<8x128xf32> to vector<8x32xf32>
    %cst_19 = arith.constant dense<0.000000e+00> : vector<8xf32>
    %61 = vector.multi_reduction <add>, %60, %cst_19 [1] : vector<8x32xf32> to vector<8xf32>
    %62 = vector.shape_cast %61 : vector<8xf32> to vector<8x1xf32>
    %cst_20 = arith.constant 3.200000e+01 : f32
    %63 = vector.broadcast %cst_20 : f32 to vector<8x1xf32>
    %64 = arith.divf %62, %63 : vector<8x1xf32>
    %65 = vector.broadcast %64 : vector<8x1xf32> to vector<8x32xf32>
    %66 = arith.subf %60, %65 : vector<8x32xf32>
    %67 = arith.mulf %66, %66 : vector<8x32xf32>
    %cst_21 = arith.constant dense<0.000000e+00> : vector<8xf32>
    %68 = vector.multi_reduction <add>, %67, %cst_21 [1] : vector<8x32xf32> to vector<8xf32>
    %69 = vector.shape_cast %68 : vector<8xf32> to vector<8x1xf32>
    %cst_22 = arith.constant 3.200000e+01 : f32
    %70 = vector.broadcast %cst_22 : f32 to vector<8x1xf32>
    %71 = arith.divf %69, %70 : vector<8x1xf32>
    %72 = vector.broadcast %64 : vector<8x1xf32> to vector<8x32xf32>
    %73 = arith.subf %60, %72 : vector<8x32xf32>
    %cst_23 = arith.constant 9.99999997E-7 : f32
    %74 = vector.broadcast %cst_23 : f32 to vector<8x1xf32>
    %75 = arith.addf %71, %74 : vector<8x1xf32>
    %76 = math.rsqrt %75 : vector<8x1xf32>
    %77 = vector.broadcast %76 : vector<8x1xf32> to vector<8x32xf32>
    %78 = arith.mulf %73, %77 : vector<8x32xf32>
    %79 = tpu.concatenate %21, %40, %59, %78 in 1 : vector<8x32xf32>, vector<8x32xf32>, vector<8x32xf32>, vector<8x32xf32> -> vector<8x128xf32>
    %80 = vector.broadcast %1 : vector<1x128xf32> to vector<8x128xf32>
    %81 = arith.mulf %79, %80 : vector<8x128xf32>
    %82 = vector.broadcast %2 : vector<1x128xf32> to vector<8x128xf32>
    %83 = arith.addf %81, %82 : vector<8x128xf32>
    %84 = arith.truncf %83 : vector<8x128xf32> to vector<8x128xbf16>
    %c0_24 = arith.constant 0 : index
    %c0_25 = arith.constant 0 : index
    %85 = vector.load %arg4[%c0_24, %c0_25] : memref<128x64xbf16, #tpu.memory_space<vmem>>, vector<128x64xbf16>
    %cst_26 = arith.constant dense<0.000000e+00> : vector<8x64xf32>
    %86 = tpu.matmul %84, %85, %cst_26 {dimension_numbers = #tpu.dot_dimension_numbers<[1], [0], [0], [1], [0, 0, 1, 1], [], []>} : vector<8x128xbf16>, vector<128x64xbf16>, vector<8x64xf32> -> vector<8x64xf32>
    %c0_27 = arith.constant 0 : index
    %c0_28 = arith.constant 0 : index
    %87 = vector.load %arg5[%c0_27, %c0_28] : memref<1x64xf32, #tpu.memory_space<vmem>>, vector<1x64xf32>
    %88 = vector.broadcast %87 : vector<1x64xf32> to vector<8x64xf32>
    %89 = arith.addf %86, %88 : vector<8x64xf32>
    %c0_29 = arith.constant 0 : index
    %c0_30 = arith.constant 0 : index
    %90 = vector.load %arg6[%c0_29, %c0_30] : memref<8x64xf32, #tpu.memory_space<vmem>>, vector<8x64xf32>
    tpu.vector_store %arg6[%c0_29, %c0_30], %89 {strides = array<i32>} : memref<8x64xf32, #tpu.memory_space<vmem>>, vector<8x64xf32>,
    return
  }
  func.func @transform_0(%arg0: i32) -> (i32, i32) {
    %c0_i32 = arith.constant 0 : i32
    %c0_i32_0 = arith.constant 0 : i32
    return %arg0, %c0_i32 : i32, i32
  }
  func.func @transform_1(%arg0: i32) -> (i32, i32) {
    %c0_i32 = arith.constant 0 : i32
    %c0_i32_0 = arith.constant 0 : i32
    %c0_i32_1 = arith.constant 0 : i32
    return %c0_i32, %c0_i32_0 : i32, i32
  }
  func.func @transform_2(%arg0: i32) -> (i32, i32) {
    %c0_i32 = arith.constant 0 : i32
    %c0_i32_0 = arith.constant 0 : i32
    %c0_i32_1 = arith.constant 0 : i32
    return %c0_i32, %c0_i32_0 : i32, i32
  }
  func.func @transform_3(%arg0: i32) -> (i32, i32) {
    %c0_i32 = arith.constant 0 : i32
    %c0_i32_0 = arith.constant 0 : i32
    %c0_i32_1 = arith.constant 0 : i32
    return %c0_i32, %c0_i32_0 : i32, i32
  }
  func.func @transform_4(%arg0: i32) -> (i32, i32) {
    %c0_i32 = arith.constant 0 : i32
    %c0_i32_0 = arith.constant 0 : i32
    %c0_i32_1 = arith.constant 0 : i32
    return %c0_i32, %c0_i32_0 : i32, i32
  }
  func.func @transform_5(%arg0: i32) -> (i32, i32) {
    %c0_i32 = arith.constant 0 : i32
    %c0_i32_0 = arith.constant 0 : i32
    return %arg0, %c0_i32 : i32, i32
  }
}

module attributes {stable_mosaic.version = 11 : i64} {
  func.func @_convnext_block_kernel(%arg0: i32, %arg1: memref<1x46x64xf32, #tpu.memory_space<vmem>>, %arg2: memref<16x7xf32, #tpu.memory_space<vmem>>, %arg3: memref<49x64xf32, #tpu.memory_space<vmem>>, %arg4: memref<1x64xf32, #tpu.memory_space<vmem>>, %arg5: memref<1x64xf32, #tpu.memory_space<vmem>>, %arg6: memref<1x64xf32, #tpu.memory_space<vmem>>, %arg7: memref<64x256xbf16, #tpu.memory_space<vmem>>, %arg8: memref<1x256xf32, #tpu.memory_space<vmem>>, %arg9: memref<256x64xbf16, #tpu.memory_space<vmem>>, %arg10: memref<1x64xf32, #tpu.memory_space<vmem>>, %arg11: memref<1x64xf32, #tpu.memory_space<vmem>>, %arg12: memref<1x46x64xf32, #tpu.memory_space<vmem>>) attributes {dimension_semantics = [#tpu.dimension_semantics<parallel>], iteration_bounds = array<i64: 2>, scalar_prefetch = 0 : i64, scratch_operands = 0 : i64, tpu.core_type = #tpu.core_type<tc>, window_params = [{transform_indices = @transform_0, window_bounds = array<i64: 1, 46, 64>}, {pipeline_mode = #tpu.pipeline_mode<synchronous>, transform_indices = @transform_1, window_bounds = array<i64: 16, 7>}, {pipeline_mode = #tpu.pipeline_mode<synchronous>, transform_indices = @transform_2, window_bounds = array<i64: 49, 64>}, {pipeline_mode = #tpu.pipeline_mode<synchronous>, transform_indices = @transform_3, window_bounds = array<i64: 1, 64>}, {pipeline_mode = #tpu.pipeline_mode<synchronous>, transform_indices = @transform_4, window_bounds = array<i64: 1, 64>}, {pipeline_mode = #tpu.pipeline_mode<synchronous>, transform_indices = @transform_5, window_bounds = array<i64: 1, 64>}, {pipeline_mode = #tpu.pipeline_mode<synchronous>, transform_indices = @transform_6, window_bounds = array<i64: 64, 256>}, {pipeline_mode = #tpu.pipeline_mode<synchronous>, transform_indices = @transform_7, window_bounds = array<i64: 1, 256>}, {pipeline_mode = #tpu.pipeline_mode<synchronous>, transform_indices = @transform_8, window_bounds = array<i64: 256, 64>}, {pipeline_mode = #tpu.pipeline_mode<synchronous>, transform_indices = @transform_9, window_bounds = array<i64: 1, 64>}, {pipeline_mode = #tpu.pipeline_mode<synchronous>, transform_indices = @transform_10, window_bounds = array<i64: 1, 64>}, {transform_indices = @transform_11, window_bounds = array<i64: 1, 46, 64>}]} {
    %c0 = arith.constant 0 : index
    %c0_0 = arith.constant 0 : index
    %c0_1 = arith.constant 0 : index
    %0 = vector.load %arg1[%c0, %c0_0, %c0_1] : memref<1x46x64xf32, #tpu.memory_space<vmem>>, vector<1x46x64xf32>
    %1 = vector.shape_cast %0 : vector<1x46x64xf32> to vector<46x64xf32>
    %c0_2 = arith.constant 0 : index
    %c0_3 = arith.constant 0 : index
    %2 = vector.load %arg3[%c0_2, %c0_3] : memref<49x64xf32, #tpu.memory_space<vmem>>, vector<49x64xf32>
    %c0_4 = arith.constant 0 : index
    %c0_5 = arith.constant 0 : index
    %3 = vector.load %arg2[%c0_4, %c0_5] : memref<16x7xf32, #tpu.memory_space<vmem>>, vector<16x7xf32>
    %cst = arith.constant 0.000000e+00 : f32
    %4 = vector.broadcast %cst : f32 to vector<16x64xf32>
    %5 = vector.extract_strided_slice %1 {offsets = [0, 0], sizes = [40, 64], strides = [1, 1]} : vector<46x64xf32> to vector<40x64xf32>
    %cst_6 = arith.constant 0.000000e+00 : f32
    %6 = vector.broadcast %cst_6 : f32 to vector<16x64xf32>
    %7 = vector.extract_strided_slice %5 {offsets = [0, 0], sizes = [16, 64], strides = [1, 1]} : vector<40x64xf32> to vector<16x64xf32>
    %8 = vector.extract_strided_slice %2 {offsets = [0, 0], sizes = [1, 64], strides = [1, 1]} : vector<49x64xf32> to vector<1x64xf32>
    %9 = vector.broadcast %8 : vector<1x64xf32> to vector<16x64xf32>
    %10 = arith.mulf %7, %9 : vector<16x64xf32>
    %11 = arith.addf %6, %10 : vector<16x64xf32>
    %12 = vector.extract_strided_slice %5 {offsets = [4, 0], sizes = [16, 64], strides = [1, 1]} : vector<40x64xf32> to vector<16x64xf32>
    %13 = vector.extract_strided_slice %2 {offsets = [7, 0], sizes = [1, 64], strides = [1, 1]} : vector<49x64xf32> to vector<1x64xf32>
    %14 = vector.broadcast %13 : vector<1x64xf32> to vector<16x64xf32>
    %15 = arith.mulf %12, %14 : vector<16x64xf32>
    %16 = arith.addf %11, %15 : vector<16x64xf32>
    %17 = vector.extract_strided_slice %5 {offsets = [8, 0], sizes = [16, 64], strides = [1, 1]} : vector<40x64xf32> to vector<16x64xf32>
    %18 = vector.extract_strided_slice %2 {offsets = [14, 0], sizes = [1, 64], strides = [1, 1]} : vector<49x64xf32> to vector<1x64xf32>
    %19 = vector.broadcast %18 : vector<1x64xf32> to vector<16x64xf32>
    %20 = arith.mulf %17, %19 : vector<16x64xf32>
    %21 = arith.addf %16, %20 : vector<16x64xf32>
    %22 = vector.extract_strided_slice %5 {offsets = [12, 0], sizes = [16, 64], strides = [1, 1]} : vector<40x64xf32> to vector<16x64xf32>
    %23 = vector.extract_strided_slice %2 {offsets = [21, 0], sizes = [1, 64], strides = [1, 1]} : vector<49x64xf32> to vector<1x64xf32>
    %24 = vector.broadcast %23 : vector<1x64xf32> to vector<16x64xf32>
    %25 = arith.mulf %22, %24 : vector<16x64xf32>
    %26 = arith.addf %21, %25 : vector<16x64xf32>
    %27 = vector.extract_strided_slice %5 {offsets = [16, 0], sizes = [16, 64], strides = [1, 1]} : vector<40x64xf32> to vector<16x64xf32>
    %28 = vector.extract_strided_slice %2 {offsets = [28, 0], sizes = [1, 64], strides = [1, 1]} : vector<49x64xf32> to vector<1x64xf32>
    %29 = vector.broadcast %28 : vector<1x64xf32> to vector<16x64xf32>
    %30 = arith.mulf %27, %29 : vector<16x64xf32>
    %31 = arith.addf %26, %30 : vector<16x64xf32>
    %32 = vector.extract_strided_slice %5 {offsets = [20, 0], sizes = [16, 64], strides = [1, 1]} : vector<40x64xf32> to vector<16x64xf32>
    %33 = vector.extract_strided_slice %2 {offsets = [35, 0], sizes = [1, 64], strides = [1, 1]} : vector<49x64xf32> to vector<1x64xf32>
    %34 = vector.broadcast %33 : vector<1x64xf32> to vector<16x64xf32>
    %35 = arith.mulf %32, %34 : vector<16x64xf32>
    %36 = arith.addf %31, %35 : vector<16x64xf32>
    %37 = vector.extract_strided_slice %5 {offsets = [24, 0], sizes = [16, 64], strides = [1, 1]} : vector<40x64xf32> to vector<16x64xf32>
    %38 = vector.extract_strided_slice %2 {offsets = [42, 0], sizes = [1, 64], strides = [1, 1]} : vector<49x64xf32> to vector<1x64xf32>
    %39 = vector.broadcast %38 : vector<1x64xf32> to vector<16x64xf32>
    %40 = arith.mulf %37, %39 : vector<16x64xf32>
    %41 = arith.addf %36, %40 : vector<16x64xf32>
    %42 = vector.extract_strided_slice %3 {offsets = [0, 0], sizes = [16, 1], strides = [1, 1]} : vector<16x7xf32> to vector<16x1xf32>
    %43 = vector.broadcast %42 : vector<16x1xf32> to vector<16x64xf32>
    %44 = arith.mulf %41, %43 : vector<16x64xf32>
    %45 = arith.addf %4, %44 : vector<16x64xf32>
    %46 = vector.extract_strided_slice %1 {offsets = [1, 0], sizes = [40, 64], strides = [1, 1]} : vector<46x64xf32> to vector<40x64xf32>
    %cst_7 = arith.constant 0.000000e+00 : f32
    %47 = vector.broadcast %cst_7 : f32 to vector<16x64xf32>
    %48 = vector.extract_strided_slice %46 {offsets = [0, 0], sizes = [16, 64], strides = [1, 1]} : vector<40x64xf32> to vector<16x64xf32>
    %49 = vector.extract_strided_slice %2 {offsets = [1, 0], sizes = [1, 64], strides = [1, 1]} : vector<49x64xf32> to vector<1x64xf32>
    %50 = vector.broadcast %49 : vector<1x64xf32> to vector<16x64xf32>
    %51 = arith.mulf %48, %50 : vector<16x64xf32>
    %52 = arith.addf %47, %51 : vector<16x64xf32>
    %53 = vector.extract_strided_slice %46 {offsets = [4, 0], sizes = [16, 64], strides = [1, 1]} : vector<40x64xf32> to vector<16x64xf32>
    %54 = vector.extract_strided_slice %2 {offsets = [8, 0], sizes = [1, 64], strides = [1, 1]} : vector<49x64xf32> to vector<1x64xf32>
    %55 = vector.broadcast %54 : vector<1x64xf32> to vector<16x64xf32>
    %56 = arith.mulf %53, %55 : vector<16x64xf32>
    %57 = arith.addf %52, %56 : vector<16x64xf32>
    %58 = vector.extract_strided_slice %46 {offsets = [8, 0], sizes = [16, 64], strides = [1, 1]} : vector<40x64xf32> to vector<16x64xf32>
    %59 = vector.extract_strided_slice %2 {offsets = [15, 0], sizes = [1, 64], strides = [1, 1]} : vector<49x64xf32> to vector<1x64xf32>
    %60 = vector.broadcast %59 : vector<1x64xf32> to vector<16x64xf32>
    %61 = arith.mulf %58, %60 : vector<16x64xf32>
    %62 = arith.addf %57, %61 : vector<16x64xf32>
    %63 = vector.extract_strided_slice %46 {offsets = [12, 0], sizes = [16, 64], strides = [1, 1]} : vector<40x64xf32> to vector<16x64xf32>
    %64 = vector.extract_strided_slice %2 {offsets = [22, 0], sizes = [1, 64], strides = [1, 1]} : vector<49x64xf32> to vector<1x64xf32>
    %65 = vector.broadcast %64 : vector<1x64xf32> to vector<16x64xf32>
    %66 = arith.mulf %63, %65 : vector<16x64xf32>
    %67 = arith.addf %62, %66 : vector<16x64xf32>
    %68 = vector.extract_strided_slice %46 {offsets = [16, 0], sizes = [16, 64], strides = [1, 1]} : vector<40x64xf32> to vector<16x64xf32>
    %69 = vector.extract_strided_slice %2 {offsets = [29, 0], sizes = [1, 64], strides = [1, 1]} : vector<49x64xf32> to vector<1x64xf32>
    %70 = vector.broadcast %69 : vector<1x64xf32> to vector<16x64xf32>
    %71 = arith.mulf %68, %70 : vector<16x64xf32>
    %72 = arith.addf %67, %71 : vector<16x64xf32>
    %73 = vector.extract_strided_slice %46 {offsets = [20, 0], sizes = [16, 64], strides = [1, 1]} : vector<40x64xf32> to vector<16x64xf32>
    %74 = vector.extract_strided_slice %2 {offsets = [36, 0], sizes = [1, 64], strides = [1, 1]} : vector<49x64xf32> to vector<1x64xf32>
    %75 = vector.broadcast %74 : vector<1x64xf32> to vector<16x64xf32>
    %76 = arith.mulf %73, %75 : vector<16x64xf32>
    %77 = arith.addf %72, %76 : vector<16x64xf32>
    %78 = vector.extract_strided_slice %46 {offsets = [24, 0], sizes = [16, 64], strides = [1, 1]} : vector<40x64xf32> to vector<16x64xf32>
    %79 = vector.extract_strided_slice %2 {offsets = [43, 0], sizes = [1, 64], strides = [1, 1]} : vector<49x64xf32> to vector<1x64xf32>
    %80 = vector.broadcast %79 : vector<1x64xf32> to vector<16x64xf32>
    %81 = arith.mulf %78, %80 : vector<16x64xf32>
    %82 = arith.addf %77, %81 : vector<16x64xf32>
    %83 = vector.extract_strided_slice %3 {offsets = [0, 1], sizes = [16, 1], strides = [1, 1]} : vector<16x7xf32> to vector<16x1xf32>
    %84 = vector.broadcast %83 : vector<16x1xf32> to vector<16x64xf32>
    %85 = arith.mulf %82, %84 : vector<16x64xf32>
    %86 = arith.addf %45, %85 : vector<16x64xf32>
    %87 = vector.extract_strided_slice %1 {offsets = [2, 0], sizes = [40, 64], strides = [1, 1]} : vector<46x64xf32> to vector<40x64xf32>
    %cst_8 = arith.constant 0.000000e+00 : f32
    %88 = vector.broadcast %cst_8 : f32 to vector<16x64xf32>
    %89 = vector.extract_strided_slice %87 {offsets = [0, 0], sizes = [16, 64], strides = [1, 1]} : vector<40x64xf32> to vector<16x64xf32>
    %90 = vector.extract_strided_slice %2 {offsets = [2, 0], sizes = [1, 64], strides = [1, 1]} : vector<49x64xf32> to vector<1x64xf32>
    %91 = vector.broadcast %90 : vector<1x64xf32> to vector<16x64xf32>
    %92 = arith.mulf %89, %91 : vector<16x64xf32>
    %93 = arith.addf %88, %92 : vector<16x64xf32>
    %94 = vector.extract_strided_slice %87 {offsets = [4, 0], sizes = [16, 64], strides = [1, 1]} : vector<40x64xf32> to vector<16x64xf32>
    %95 = vector.extract_strided_slice %2 {offsets = [9, 0], sizes = [1, 64], strides = [1, 1]} : vector<49x64xf32> to vector<1x64xf32>
    %96 = vector.broadcast %95 : vector<1x64xf32> to vector<16x64xf32>
    %97 = arith.mulf %94, %96 : vector<16x64xf32>
    %98 = arith.addf %93, %97 : vector<16x64xf32>
    %99 = vector.extract_strided_slice %87 {offsets = [8, 0], sizes = [16, 64], strides = [1, 1]} : vector<40x64xf32> to vector<16x64xf32>
    %100 = vector.extract_strided_slice %2 {offsets = [16, 0], sizes = [1, 64], strides = [1, 1]} : vector<49x64xf32> to vector<1x64xf32>
    %101 = vector.broadcast %100 : vector<1x64xf32> to vector<16x64xf32>
    %102 = arith.mulf %99, %101 : vector<16x64xf32>
    %103 = arith.addf %98, %102 : vector<16x64xf32>
    %104 = vector.extract_strided_slice %87 {offsets = [12, 0], sizes = [16, 64], strides = [1, 1]} : vector<40x64xf32> to vector<16x64xf32>
    %105 = vector.extract_strided_slice %2 {offsets = [23, 0], sizes = [1, 64], strides = [1, 1]} : vector<49x64xf32> to vector<1x64xf32>
    %106 = vector.broadcast %105 : vector<1x64xf32> to vector<16x64xf32>
    %107 = arith.mulf %104, %106 : vector<16x64xf32>
    %108 = arith.addf %103, %107 : vector<16x64xf32>
    %109 = vector.extract_strided_slice %87 {offsets = [16, 0], sizes = [16, 64], strides = [1, 1]} : vector<40x64xf32> to vector<16x64xf32>
    %110 = vector.extract_strided_slice %2 {offsets = [30, 0], sizes = [1, 64], strides = [1, 1]} : vector<49x64xf32> to vector<1x64xf32>
    %111 = vector.broadcast %110 : vector<1x64xf32> to vector<16x64xf32>
    %112 = arith.mulf %109, %111 : vector<16x64xf32>
    %113 = arith.addf %108, %112 : vector<16x64xf32>
    %114 = vector.extract_strided_slice %87 {offsets = [20, 0], sizes = [16, 64], strides = [1, 1]} : vector<40x64xf32> to vector<16x64xf32>
    %115 = vector.extract_strided_slice %2 {offsets = [37, 0], sizes = [1, 64], strides = [1, 1]} : vector<49x64xf32> to vector<1x64xf32>
    %116 = vector.broadcast %115 : vector<1x64xf32> to vector<16x64xf32>
    %117 = arith.mulf %114, %116 : vector<16x64xf32>
    %118 = arith.addf %113, %117 : vector<16x64xf32>
    %119 = vector.extract_strided_slice %87 {offsets = [24, 0], sizes = [16, 64], strides = [1, 1]} : vector<40x64xf32> to vector<16x64xf32>
    %120 = vector.extract_strided_slice %2 {offsets = [44, 0], sizes = [1, 64], strides = [1, 1]} : vector<49x64xf32> to vector<1x64xf32>
    %121 = vector.broadcast %120 : vector<1x64xf32> to vector<16x64xf32>
    %122 = arith.mulf %119, %121 : vector<16x64xf32>
    %123 = arith.addf %118, %122 : vector<16x64xf32>
    %124 = vector.extract_strided_slice %3 {offsets = [0, 2], sizes = [16, 1], strides = [1, 1]} : vector<16x7xf32> to vector<16x1xf32>
    %125 = vector.broadcast %124 : vector<16x1xf32> to vector<16x64xf32>
    %126 = arith.mulf %123, %125 : vector<16x64xf32>
    %127 = arith.addf %86, %126 : vector<16x64xf32>
    %128 = vector.extract_strided_slice %1 {offsets = [3, 0], sizes = [40, 64], strides = [1, 1]} : vector<46x64xf32> to vector<40x64xf32>
    %cst_9 = arith.constant 0.000000e+00 : f32
    %129 = vector.broadcast %cst_9 : f32 to vector<16x64xf32>
    %130 = vector.extract_strided_slice %128 {offsets = [0, 0], sizes = [16, 64], strides = [1, 1]} : vector<40x64xf32> to vector<16x64xf32>
    %131 = vector.extract_strided_slice %2 {offsets = [3, 0], sizes = [1, 64], strides = [1, 1]} : vector<49x64xf32> to vector<1x64xf32>
    %132 = vector.broadcast %131 : vector<1x64xf32> to vector<16x64xf32>
    %133 = arith.mulf %130, %132 : vector<16x64xf32>
    %134 = arith.addf %129, %133 : vector<16x64xf32>
    %135 = vector.extract_strided_slice %128 {offsets = [4, 0], sizes = [16, 64], strides = [1, 1]} : vector<40x64xf32> to vector<16x64xf32>
    %136 = vector.extract_strided_slice %2 {offsets = [10, 0], sizes = [1, 64], strides = [1, 1]} : vector<49x64xf32> to vector<1x64xf32>
    %137 = vector.broadcast %136 : vector<1x64xf32> to vector<16x64xf32>
    %138 = arith.mulf %135, %137 : vector<16x64xf32>
    %139 = arith.addf %134, %138 : vector<16x64xf32>
    %140 = vector.extract_strided_slice %128 {offsets = [8, 0], sizes = [16, 64], strides = [1, 1]} : vector<40x64xf32> to vector<16x64xf32>
    %141 = vector.extract_strided_slice %2 {offsets = [17, 0], sizes = [1, 64], strides = [1, 1]} : vector<49x64xf32> to vector<1x64xf32>
    %142 = vector.broadcast %141 : vector<1x64xf32> to vector<16x64xf32>
    %143 = arith.mulf %140, %142 : vector<16x64xf32>
    %144 = arith.addf %139, %143 : vector<16x64xf32>
    %145 = vector.extract_strided_slice %128 {offsets = [12, 0], sizes = [16, 64], strides = [1, 1]} : vector<40x64xf32> to vector<16x64xf32>
    %146 = vector.extract_strided_slice %2 {offsets = [24, 0], sizes = [1, 64], strides = [1, 1]} : vector<49x64xf32> to vector<1x64xf32>
    %147 = vector.broadcast %146 : vector<1x64xf32> to vector<16x64xf32>
    %148 = arith.mulf %145, %147 : vector<16x64xf32>
    %149 = arith.addf %144, %148 : vector<16x64xf32>
    %150 = vector.extract_strided_slice %128 {offsets = [16, 0], sizes = [16, 64], strides = [1, 1]} : vector<40x64xf32> to vector<16x64xf32>
    %151 = vector.extract_strided_slice %2 {offsets = [31, 0], sizes = [1, 64], strides = [1, 1]} : vector<49x64xf32> to vector<1x64xf32>
    %152 = vector.broadcast %151 : vector<1x64xf32> to vector<16x64xf32>
    %153 = arith.mulf %150, %152 : vector<16x64xf32>
    %154 = arith.addf %149, %153 : vector<16x64xf32>
    %155 = vector.extract_strided_slice %128 {offsets = [20, 0], sizes = [16, 64], strides = [1, 1]} : vector<40x64xf32> to vector<16x64xf32>
    %156 = vector.extract_strided_slice %2 {offsets = [38, 0], sizes = [1, 64], strides = [1, 1]} : vector<49x64xf32> to vector<1x64xf32>
    %157 = vector.broadcast %156 : vector<1x64xf32> to vector<16x64xf32>
    %158 = arith.mulf %155, %157 : vector<16x64xf32>
    %159 = arith.addf %154, %158 : vector<16x64xf32>
    %160 = vector.extract_strided_slice %128 {offsets = [24, 0], sizes = [16, 64], strides = [1, 1]} : vector<40x64xf32> to vector<16x64xf32>
    %161 = vector.extract_strided_slice %2 {offsets = [45, 0], sizes = [1, 64], strides = [1, 1]} : vector<49x64xf32> to vector<1x64xf32>
    %162 = vector.broadcast %161 : vector<1x64xf32> to vector<16x64xf32>
    %163 = arith.mulf %160, %162 : vector<16x64xf32>
    %164 = arith.addf %159, %163 : vector<16x64xf32>
    %165 = vector.extract_strided_slice %3 {offsets = [0, 3], sizes = [16, 1], strides = [1, 1]} : vector<16x7xf32> to vector<16x1xf32>
    %166 = vector.broadcast %165 : vector<16x1xf32> to vector<16x64xf32>
    %167 = arith.mulf %164, %166 : vector<16x64xf32>
    %168 = arith.addf %127, %167 : vector<16x64xf32>
    %169 = vector.extract_strided_slice %1 {offsets = [4, 0], sizes = [40, 64], strides = [1, 1]} : vector<46x64xf32> to vector<40x64xf32>
    %cst_10 = arith.constant 0.000000e+00 : f32
    %170 = vector.broadcast %cst_10 : f32 to vector<16x64xf32>
    %171 = vector.extract_strided_slice %169 {offsets = [0, 0], sizes = [16, 64], strides = [1, 1]} : vector<40x64xf32> to vector<16x64xf32>
    %172 = vector.extract_strided_slice %2 {offsets = [4, 0], sizes = [1, 64], strides = [1, 1]} : vector<49x64xf32> to vector<1x64xf32>
    %173 = vector.broadcast %172 : vector<1x64xf32> to vector<16x64xf32>
    %174 = arith.mulf %171, %173 : vector<16x64xf32>
    %175 = arith.addf %170, %174 : vector<16x64xf32>
    %176 = vector.extract_strided_slice %169 {offsets = [4, 0], sizes = [16, 64], strides = [1, 1]} : vector<40x64xf32> to vector<16x64xf32>
    %177 = vector.extract_strided_slice %2 {offsets = [11, 0], sizes = [1, 64], strides = [1, 1]} : vector<49x64xf32> to vector<1x64xf32>
    %178 = vector.broadcast %177 : vector<1x64xf32> to vector<16x64xf32>
    %179 = arith.mulf %176, %178 : vector<16x64xf32>
    %180 = arith.addf %175, %179 : vector<16x64xf32>
    %181 = vector.extract_strided_slice %169 {offsets = [8, 0], sizes = [16, 64], strides = [1, 1]} : vector<40x64xf32> to vector<16x64xf32>
    %182 = vector.extract_strided_slice %2 {offsets = [18, 0], sizes = [1, 64], strides = [1, 1]} : vector<49x64xf32> to vector<1x64xf32>
    %183 = vector.broadcast %182 : vector<1x64xf32> to vector<16x64xf32>
    %184 = arith.mulf %181, %183 : vector<16x64xf32>
    %185 = arith.addf %180, %184 : vector<16x64xf32>
    %186 = vector.extract_strided_slice %169 {offsets = [12, 0], sizes = [16, 64], strides = [1, 1]} : vector<40x64xf32> to vector<16x64xf32>
    %187 = vector.extract_strided_slice %2 {offsets = [25, 0], sizes = [1, 64], strides = [1, 1]} : vector<49x64xf32> to vector<1x64xf32>
    %188 = vector.broadcast %187 : vector<1x64xf32> to vector<16x64xf32>
    %189 = arith.mulf %186, %188 : vector<16x64xf32>
    %190 = arith.addf %185, %189 : vector<16x64xf32>
    %191 = vector.extract_strided_slice %169 {offsets = [16, 0], sizes = [16, 64], strides = [1, 1]} : vector<40x64xf32> to vector<16x64xf32>
    %192 = vector.extract_strided_slice %2 {offsets = [32, 0], sizes = [1, 64], strides = [1, 1]} : vector<49x64xf32> to vector<1x64xf32>
    %193 = vector.broadcast %192 : vector<1x64xf32> to vector<16x64xf32>
    %194 = arith.mulf %191, %193 : vector<16x64xf32>
    %195 = arith.addf %190, %194 : vector<16x64xf32>
    %196 = vector.extract_strided_slice %169 {offsets = [20, 0], sizes = [16, 64], strides = [1, 1]} : vector<40x64xf32> to vector<16x64xf32>
    %197 = vector.extract_strided_slice %2 {offsets = [39, 0], sizes = [1, 64], strides = [1, 1]} : vector<49x64xf32> to vector<1x64xf32>
    %198 = vector.broadcast %197 : vector<1x64xf32> to vector<16x64xf32>
    %199 = arith.mulf %196, %198 : vector<16x64xf32>
    %200 = arith.addf %195, %199 : vector<16x64xf32>
    %201 = vector.extract_strided_slice %169 {offsets = [24, 0], sizes = [16, 64], strides = [1, 1]} : vector<40x64xf32> to vector<16x64xf32>
    %202 = vector.extract_strided_slice %2 {offsets = [46, 0], sizes = [1, 64], strides = [1, 1]} : vector<49x64xf32> to vector<1x64xf32>
    %203 = vector.broadcast %202 : vector<1x64xf32> to vector<16x64xf32>
    %204 = arith.mulf %201, %203 : vector<16x64xf32>
    %205 = arith.addf %200, %204 : vector<16x64xf32>
    %206 = vector.extract_strided_slice %3 {offsets = [0, 4], sizes = [16, 1], strides = [1, 1]} : vector<16x7xf32> to vector<16x1xf32>
    %207 = vector.broadcast %206 : vector<16x1xf32> to vector<16x64xf32>
    %208 = arith.mulf %205, %207 : vector<16x64xf32>
    %209 = arith.addf %168, %208 : vector<16x64xf32>
    %210 = vector.extract_strided_slice %1 {offsets = [5, 0], sizes = [40, 64], strides = [1, 1]} : vector<46x64xf32> to vector<40x64xf32>
    %cst_11 = arith.constant 0.000000e+00 : f32
    %211 = vector.broadcast %cst_11 : f32 to vector<16x64xf32>
    %212 = vector.extract_strided_slice %210 {offsets = [0, 0], sizes = [16, 64], strides = [1, 1]} : vector<40x64xf32> to vector<16x64xf32>
    %213 = vector.extract_strided_slice %2 {offsets = [5, 0], sizes = [1, 64], strides = [1, 1]} : vector<49x64xf32> to vector<1x64xf32>
    %214 = vector.broadcast %213 : vector<1x64xf32> to vector<16x64xf32>
    %215 = arith.mulf %212, %214 : vector<16x64xf32>
    %216 = arith.addf %211, %215 : vector<16x64xf32>
    %217 = vector.extract_strided_slice %210 {offsets = [4, 0], sizes = [16, 64], strides = [1, 1]} : vector<40x64xf32> to vector<16x64xf32>
    %218 = vector.extract_strided_slice %2 {offsets = [12, 0], sizes = [1, 64], strides = [1, 1]} : vector<49x64xf32> to vector<1x64xf32>
    %219 = vector.broadcast %218 : vector<1x64xf32> to vector<16x64xf32>
    %220 = arith.mulf %217, %219 : vector<16x64xf32>
    %221 = arith.addf %216, %220 : vector<16x64xf32>
    %222 = vector.extract_strided_slice %210 {offsets = [8, 0], sizes = [16, 64], strides = [1, 1]} : vector<40x64xf32> to vector<16x64xf32>
    %223 = vector.extract_strided_slice %2 {offsets = [19, 0], sizes = [1, 64], strides = [1, 1]} : vector<49x64xf32> to vector<1x64xf32>
    %224 = vector.broadcast %223 : vector<1x64xf32> to vector<16x64xf32>
    %225 = arith.mulf %222, %224 : vector<16x64xf32>
    %226 = arith.addf %221, %225 : vector<16x64xf32>
    %227 = vector.extract_strided_slice %210 {offsets = [12, 0], sizes = [16, 64], strides = [1, 1]} : vector<40x64xf32> to vector<16x64xf32>
    %228 = vector.extract_strided_slice %2 {offsets = [26, 0], sizes = [1, 64], strides = [1, 1]} : vector<49x64xf32> to vector<1x64xf32>
    %229 = vector.broadcast %228 : vector<1x64xf32> to vector<16x64xf32>
    %230 = arith.mulf %227, %229 : vector<16x64xf32>
    %231 = arith.addf %226, %230 : vector<16x64xf32>
    %232 = vector.extract_strided_slice %210 {offsets = [16, 0], sizes = [16, 64], strides = [1, 1]} : vector<40x64xf32> to vector<16x64xf32>
    %233 = vector.extract_strided_slice %2 {offsets = [33, 0], sizes = [1, 64], strides = [1, 1]} : vector<49x64xf32> to vector<1x64xf32>
    %234 = vector.broadcast %233 : vector<1x64xf32> to vector<16x64xf32>
    %235 = arith.mulf %232, %234 : vector<16x64xf32>
    %236 = arith.addf %231, %235 : vector<16x64xf32>
    %237 = vector.extract_strided_slice %210 {offsets = [20, 0], sizes = [16, 64], strides = [1, 1]} : vector<40x64xf32> to vector<16x64xf32>
    %238 = vector.extract_strided_slice %2 {offsets = [40, 0], sizes = [1, 64], strides = [1, 1]} : vector<49x64xf32> to vector<1x64xf32>
    %239 = vector.broadcast %238 : vector<1x64xf32> to vector<16x64xf32>
    %240 = arith.mulf %237, %239 : vector<16x64xf32>
    %241 = arith.addf %236, %240 : vector<16x64xf32>
    %242 = vector.extract_strided_slice %210 {offsets = [24, 0], sizes = [16, 64], strides = [1, 1]} : vector<40x64xf32> to vector<16x64xf32>
    %243 = vector.extract_strided_slice %2 {offsets = [47, 0], sizes = [1, 64], strides = [1, 1]} : vector<49x64xf32> to vector<1x64xf32>
    %244 = vector.broadcast %243 : vector<1x64xf32> to vector<16x64xf32>
    %245 = arith.mulf %242, %244 : vector<16x64xf32>
    %246 = arith.addf %241, %245 : vector<16x64xf32>
    %247 = vector.extract_strided_slice %3 {offsets = [0, 5], sizes = [16, 1], strides = [1, 1]} : vector<16x7xf32> to vector<16x1xf32>
    %248 = vector.broadcast %247 : vector<16x1xf32> to vector<16x64xf32>
    %249 = arith.mulf %246, %248 : vector<16x64xf32>
    %250 = arith.addf %209, %249 : vector<16x64xf32>
    %251 = vector.extract_strided_slice %1 {offsets = [6, 0], sizes = [40, 64], strides = [1, 1]} : vector<46x64xf32> to vector<40x64xf32>
    %cst_12 = arith.constant 0.000000e+00 : f32
    %252 = vector.broadcast %cst_12 : f32 to vector<16x64xf32>
    %253 = vector.extract_strided_slice %251 {offsets = [0, 0], sizes = [16, 64], strides = [1, 1]} : vector<40x64xf32> to vector<16x64xf32>
    %254 = vector.extract_strided_slice %2 {offsets = [6, 0], sizes = [1, 64], strides = [1, 1]} : vector<49x64xf32> to vector<1x64xf32>
    %255 = vector.broadcast %254 : vector<1x64xf32> to vector<16x64xf32>
    %256 = arith.mulf %253, %255 : vector<16x64xf32>
    %257 = arith.addf %252, %256 : vector<16x64xf32>
    %258 = vector.extract_strided_slice %251 {offsets = [4, 0], sizes = [16, 64], strides = [1, 1]} : vector<40x64xf32> to vector<16x64xf32>
    %259 = vector.extract_strided_slice %2 {offsets = [13, 0], sizes = [1, 64], strides = [1, 1]} : vector<49x64xf32> to vector<1x64xf32>
    %260 = vector.broadcast %259 : vector<1x64xf32> to vector<16x64xf32>
    %261 = arith.mulf %258, %260 : vector<16x64xf32>
    %262 = arith.addf %257, %261 : vector<16x64xf32>
    %263 = vector.extract_strided_slice %251 {offsets = [8, 0], sizes = [16, 64], strides = [1, 1]} : vector<40x64xf32> to vector<16x64xf32>
    %264 = vector.extract_strided_slice %2 {offsets = [20, 0], sizes = [1, 64], strides = [1, 1]} : vector<49x64xf32> to vector<1x64xf32>
    %265 = vector.broadcast %264 : vector<1x64xf32> to vector<16x64xf32>
    %266 = arith.mulf %263, %265 : vector<16x64xf32>
    %267 = arith.addf %262, %266 : vector<16x64xf32>
    %268 = vector.extract_strided_slice %251 {offsets = [12, 0], sizes = [16, 64], strides = [1, 1]} : vector<40x64xf32> to vector<16x64xf32>
    %269 = vector.extract_strided_slice %2 {offsets = [27, 0], sizes = [1, 64], strides = [1, 1]} : vector<49x64xf32> to vector<1x64xf32>
    %270 = vector.broadcast %269 : vector<1x64xf32> to vector<16x64xf32>
    %271 = arith.mulf %268, %270 : vector<16x64xf32>
    %272 = arith.addf %267, %271 : vector<16x64xf32>
    %273 = vector.extract_strided_slice %251 {offsets = [16, 0], sizes = [16, 64], strides = [1, 1]} : vector<40x64xf32> to vector<16x64xf32>
    %274 = vector.extract_strided_slice %2 {offsets = [34, 0], sizes = [1, 64], strides = [1, 1]} : vector<49x64xf32> to vector<1x64xf32>
    %275 = vector.broadcast %274 : vector<1x64xf32> to vector<16x64xf32>
    %276 = arith.mulf %273, %275 : vector<16x64xf32>
    %277 = arith.addf %272, %276 : vector<16x64xf32>
    %278 = vector.extract_strided_slice %251 {offsets = [20, 0], sizes = [16, 64], strides = [1, 1]} : vector<40x64xf32> to vector<16x64xf32>
    %279 = vector.extract_strided_slice %2 {offsets = [41, 0], sizes = [1, 64], strides = [1, 1]} : vector<49x64xf32> to vector<1x64xf32>
    %280 = vector.broadcast %279 : vector<1x64xf32> to vector<16x64xf32>
    %281 = arith.mulf %278, %280 : vector<16x64xf32>
    %282 = arith.addf %277, %281 : vector<16x64xf32>
    %283 = vector.extract_strided_slice %251 {offsets = [24, 0], sizes = [16, 64], strides = [1, 1]} : vector<40x64xf32> to vector<16x64xf32>
    %284 = vector.extract_strided_slice %2 {offsets = [48, 0], sizes = [1, 64], strides = [1, 1]} : vector<49x64xf32> to vector<1x64xf32>
    %285 = vector.broadcast %284 : vector<1x64xf32> to vector<16x64xf32>
    %286 = arith.mulf %283, %285 : vector<16x64xf32>
    %287 = arith.addf %282, %286 : vector<16x64xf32>
    %288 = vector.extract_strided_slice %3 {offsets = [0, 6], sizes = [16, 1], strides = [1, 1]} : vector<16x7xf32> to vector<16x1xf32>
    %289 = vector.broadcast %288 : vector<16x1xf32> to vector<16x64xf32>
    %290 = arith.mulf %287, %289 : vector<16x64xf32>
    %291 = arith.addf %250, %290 : vector<16x64xf32>
    %c0_13 = arith.constant 0 : index
    %c0_14 = arith.constant 0 : index
    %292 = vector.load %arg4[%c0_13, %c0_14] : memref<1x64xf32, #tpu.memory_space<vmem>>, vector<1x64xf32>
    %293 = vector.broadcast %292 : vector<1x64xf32> to vector<16x64xf32>
    %294 = arith.addf %291, %293 : vector<16x64xf32>
    %295 = vector.extract_strided_slice %1 {offsets = [15, 0], sizes = [16, 64], strides = [1, 1]} : vector<46x64xf32> to vector<16x64xf32>
    %c0_15 = arith.constant 0 : index
    %c0_16 = arith.constant 0 : index
    %296 = vector.load %arg5[%c0_15, %c0_16] : memref<1x64xf32, #tpu.memory_space<vmem>>, vector<1x64xf32>
    %c0_17 = arith.constant 0 : index
    %c0_18 = arith.constant 0 : index
    %297 = vector.load %arg6[%c0_17, %c0_18] : memref<1x64xf32, #tpu.memory_space<vmem>>, vector<1x64xf32>
    %cst_19 = arith.constant dense<0.000000e+00> : vector<16xf32>
    %298 = vector.multi_reduction <add>, %294, %cst_19 [1] : vector<16x64xf32> to vector<16xf32>
    %299 = vector.shape_cast %298 : vector<16xf32> to vector<16x1xf32>
    %cst_20 = arith.constant 6.400000e+01 : f32
    %300 = vector.broadcast %cst_20 : f32 to vector<16x1xf32>
    %301 = arith.divf %299, %300 : vector<16x1xf32>
    %302 = vector.broadcast %301 : vector<16x1xf32> to vector<16x64xf32>
    %303 = arith.subf %294, %302 : vector<16x64xf32>
    %304 = arith.mulf %303, %303 : vector<16x64xf32>
    %cst_21 = arith.constant dense<0.000000e+00> : vector<16xf32>
    %305 = vector.multi_reduction <add>, %304, %cst_21 [1] : vector<16x64xf32> to vector<16xf32>
    %306 = vector.shape_cast %305 : vector<16xf32> to vector<16x1xf32>
    %cst_22 = arith.constant 6.400000e+01 : f32
    %307 = vector.broadcast %cst_22 : f32 to vector<16x1xf32>
    %308 = arith.divf %306, %307 : vector<16x1xf32>
    %309 = vector.broadcast %301 : vector<16x1xf32> to vector<16x64xf32>
    %310 = arith.subf %294, %309 : vector<16x64xf32>
    %cst_23 = arith.constant 9.99999997E-7 : f32
    %311 = vector.broadcast %cst_23 : f32 to vector<16x1xf32>
    %312 = arith.addf %308, %311 : vector<16x1xf32>
    %313 = math.rsqrt %312 : vector<16x1xf32>
    %314 = vector.broadcast %313 : vector<16x1xf32> to vector<16x64xf32>
    %315 = arith.mulf %310, %314 : vector<16x64xf32>
    %316 = vector.broadcast %296 : vector<1x64xf32> to vector<16x64xf32>
    %317 = arith.mulf %315, %316 : vector<16x64xf32>
    %318 = vector.broadcast %297 : vector<1x64xf32> to vector<16x64xf32>
    %319 = arith.addf %317, %318 : vector<16x64xf32>
    %320 = arith.truncf %319 : vector<16x64xf32> to vector<16x64xbf16>
    %c0_24 = arith.constant 0 : index
    %c0_25 = arith.constant 0 : index
    %321 = vector.load %arg7[%c0_24, %c0_25] : memref<64x256xbf16, #tpu.memory_space<vmem>>, vector<64x256xbf16>
    %cst_26 = arith.constant dense<0.000000e+00> : vector<16x256xf32>
    %322 = tpu.matmul %320, %321, %cst_26 {dimension_numbers = #tpu.dot_dimension_numbers<[1], [0], [0], [1], [0, 0, 1, 1], [], []>} : vector<16x64xbf16>, vector<64x256xbf16>, vector<16x256xf32> -> vector<16x256xf32>
    %c0_27 = arith.constant 0 : index
    %c0_28 = arith.constant 0 : index
    %323 = vector.load %arg8[%c0_27, %c0_28] : memref<1x256xf32, #tpu.memory_space<vmem>>, vector<1x256xf32>
    %324 = vector.broadcast %323 : vector<1x256xf32> to vector<16x256xf32>
    %325 = arith.addf %322, %324 : vector<16x256xf32>
    %326 = arith.mulf %325, %325 : vector<16x256xf32>
    %327 = arith.mulf %325, %326 : vector<16x256xf32>
    %cst_29 = arith.constant 4.471500e-02 : f32
    %328 = vector.broadcast %cst_29 : f32 to vector<16x256xf32>
    %329 = arith.mulf %328, %327 : vector<16x256xf32>
    %330 = arith.addf %325, %329 : vector<16x256xf32>
    %cst_30 = arith.constant 0.797884583 : f32
    %331 = vector.broadcast %cst_30 : f32 to vector<16x256xf32>
    %332 = arith.mulf %331, %330 : vector<16x256xf32>
    %333 = math.tanh %332 : vector<16x256xf32>
    %cst_31 = arith.constant 1.000000e+00 : f32
    %334 = vector.broadcast %cst_31 : f32 to vector<16x256xf32>
    %335 = arith.addf %334, %333 : vector<16x256xf32>
    %cst_32 = arith.constant 5.000000e-01 : f32
    %336 = vector.broadcast %cst_32 : f32 to vector<16x256xf32>
    %337 = arith.mulf %336, %335 : vector<16x256xf32>
    %338 = arith.mulf %325, %337 : vector<16x256xf32>
    %339 = arith.truncf %338 : vector<16x256xf32> to vector<16x256xbf16>
    %c0_33 = arith.constant 0 : index
    %c0_34 = arith.constant 0 : index
    %340 = vector.load %arg9[%c0_33, %c0_34] : memref<256x64xbf16, #tpu.memory_space<vmem>>, vector<256x64xbf16>
    %cst_35 = arith.constant dense<0.000000e+00> : vector<16x64xf32>
    %341 = tpu.matmul %339, %340, %cst_35 {dimension_numbers = #tpu.dot_dimension_numbers<[1], [0], [0], [1], [0, 0, 1, 1], [], []>} : vector<16x256xbf16>, vector<256x64xbf16>, vector<16x64xf32> -> vector<16x64xf32>
    %c0_36 = arith.constant 0 : index
    %c0_37 = arith.constant 0 : index
    %342 = vector.load %arg10[%c0_36, %c0_37] : memref<1x64xf32, #tpu.memory_space<vmem>>, vector<1x64xf32>
    %343 = vector.broadcast %342 : vector<1x64xf32> to vector<16x64xf32>
    %344 = arith.addf %341, %343 : vector<16x64xf32>
    %c0_38 = arith.constant 0 : index
    %c0_39 = arith.constant 0 : index
    %345 = vector.load %arg11[%c0_38, %c0_39] : memref<1x64xf32, #tpu.memory_space<vmem>>, vector<1x64xf32>
    %346 = vector.broadcast %345 : vector<1x64xf32> to vector<16x64xf32>
    %347 = arith.mulf %346, %344 : vector<16x64xf32>
    %348 = arith.addf %295, %347 : vector<16x64xf32>
    %cst_40 = arith.constant 0.000000e+00 : f32
    %349 = vector.broadcast %cst_40 : f32 to vector<15x64xf32>
    %350 = tpu.concatenate %349, %348, %349 in 0 : vector<15x64xf32>, vector<16x64xf32>, vector<15x64xf32> -> vector<46x64xf32>
    %c0_41 = arith.constant 0 : index
    %c0_42 = arith.constant 0 : index
    %c0_43 = arith.constant 0 : index
    %351 = vector.load %arg12[%c0_41, %c0_42, %c0_43] : memref<1x46x64xf32, #tpu.memory_space<vmem>>, vector<1x46x64xf32>
    %352 = vector.shape_cast %351 : vector<1x46x64xf32> to vector<46x64xf32>
    %353 = vector.shape_cast %350 : vector<46x64xf32> to vector<1x46x64xf32>
    tpu.vector_store %arg12[%c0_41, %c0_42, %c0_43], %353 {strides = array<i32>} : memref<1x46x64xf32, #tpu.memory_space<vmem>>, vector<1x46x64xf32>,
    return
  }
  func.func @transform_0(%arg0: i32) -> (i32, i32, i32) {
    %c0_i32 = arith.constant 0 : i32
    %c0_i32_0 = arith.constant 0 : i32
    %c0_i32_1 = arith.constant 0 : i32
    return %arg0, %c0_i32, %c0_i32_0 : i32, i32, i32
  }
  func.func @transform_1(%arg0: i32) -> (i32, i32) {
    %c0_i32 = arith.constant 0 : i32
    %c0_i32_0 = arith.constant 0 : i32
    %c0_i32_1 = arith.constant 0 : i32
    return %c0_i32, %c0_i32_0 : i32, i32
  }
  func.func @transform_2(%arg0: i32) -> (i32, i32) {
    %c0_i32 = arith.constant 0 : i32
    %c0_i32_0 = arith.constant 0 : i32
    %c0_i32_1 = arith.constant 0 : i32
    return %c0_i32, %c0_i32_0 : i32, i32
  }
  func.func @transform_3(%arg0: i32) -> (i32, i32) {
    %c0_i32 = arith.constant 0 : i32
    %c0_i32_0 = arith.constant 0 : i32
    %c0_i32_1 = arith.constant 0 : i32
    return %c0_i32, %c0_i32_0 : i32, i32
  }
  func.func @transform_4(%arg0: i32) -> (i32, i32) {
    %c0_i32 = arith.constant 0 : i32
    %c0_i32_0 = arith.constant 0 : i32
    %c0_i32_1 = arith.constant 0 : i32
    return %c0_i32, %c0_i32_0 : i32, i32
  }
  func.func @transform_5(%arg0: i32) -> (i32, i32) {
    %c0_i32 = arith.constant 0 : i32
    %c0_i32_0 = arith.constant 0 : i32
    %c0_i32_1 = arith.constant 0 : i32
    return %c0_i32, %c0_i32_0 : i32, i32
  }
  func.func @transform_6(%arg0: i32) -> (i32, i32) {
    %c0_i32 = arith.constant 0 : i32
    %c0_i32_0 = arith.constant 0 : i32
    %c0_i32_1 = arith.constant 0 : i32
    return %c0_i32, %c0_i32_0 : i32, i32
  }
  func.func @transform_7(%arg0: i32) -> (i32, i32) {
    %c0_i32 = arith.constant 0 : i32
    %c0_i32_0 = arith.constant 0 : i32
    %c0_i32_1 = arith.constant 0 : i32
    return %c0_i32, %c0_i32_0 : i32, i32
  }
  func.func @transform_8(%arg0: i32) -> (i32, i32) {
    %c0_i32 = arith.constant 0 : i32
    %c0_i32_0 = arith.constant 0 : i32
    %c0_i32_1 = arith.constant 0 : i32
    return %c0_i32, %c0_i32_0 : i32, i32
  }
  func.func @transform_9(%arg0: i32) -> (i32, i32) {
    %c0_i32 = arith.constant 0 : i32
    %c0_i32_0 = arith.constant 0 : i32
    %c0_i32_1 = arith.constant 0 : i32
    return %c0_i32, %c0_i32_0 : i32, i32
  }
  func.func @transform_10(%arg0: i32) -> (i32, i32) {
    %c0_i32 = arith.constant 0 : i32
    %c0_i32_0 = arith.constant 0 : i32
    %c0_i32_1 = arith.constant 0 : i32
    return %c0_i32, %c0_i32_0 : i32, i32
  }
  func.func @transform_11(%arg0: i32) -> (i32, i32, i32) {
    %c0_i32 = arith.constant 0 : i32
    %c0_i32_0 = arith.constant 0 : i32
    %c0_i32_1 = arith.constant 0 : i32
    return %arg0, %c0_i32, %c0_i32_0 : i32, i32, i32
  }
}

</mosaic_0001>

<bundles_post_ra>
// kernel: convnext_feature_extractor_forward.6
= control target key start
LH: loop header
LB: loop body
LE: loop exit
PB: predicated region body
PF: predicated region fallthrough
CT: control target
= control target key end

     0   :  { %17 = vsyncpa [#allocation3], 0  ;;  %s2618_s0 = inlined_call_operand.vmem [shape: f32[128,64], index: 0, kind: input, shape index: {}]   ;;  %s2619_s1 = inlined_call_operand.vmem [shape: f32[128,128], index: 1, kind: input, shape index: {}]   ;;  %s2620_s2 = inlined_call_operand.vmem [shape: bf16[64,32], index: 2, kind: input, shape index: {}]   ;;  %s2621_s3 = inlined_call_operand.hbm [shape: f32[1,32], index: 3, kind: input, shape index: {}]   ;;  %s2622_s4 = inlined_call_operand.hbm [shape: f32[1,32], index: 4, kind: input, shape index: {}]   ;;  %s2623_s5 = inlined_call_operand.hbm [shape: f32[1,32], index: 5, kind: input, shape index: {}]   ;;  %s2624_s6 = inlined_call_operand.vmem [shape: bf16[128,128], index: 6, kind: input, shape index: {}]   ;;  %s2625_s7 = inlined_call_operand.vmem [shape: f32[1,128], index: 7, kind: input, shape index: {}]   ;;  %s2626_s8 = inlined_call_operand.vmem [shape: f32[1,128], index: 8, kind: input, shape index: {}]   ;;  %s2627_s9 = inlined_call_operand.vmem [shape: f32[1,128], index: 9, kind: input, shape index: {}]   ;;  %s2628_s10 = inlined_call_operand.vmem [shape: bf16[128,32], index: 10, kind: input, shape index: {}]   ;;  %s2629_s11 = inlined_call_operand.hbm [shape: f32[1,32], index: 11, kind: input, shape index: {}]   ;;  %s2630_s12 = inlined_call_operand.vmem [shape: f32[128,32], index: 12, kind: output, shape index: {}]  }
   0x1   :  { %18 = vsyncpa [#allocation5], 0 }
   0x2   :  { %19 = vsyncpa [#allocation8], 0  ;;  %s1897_s21 = smov 0  }
   0x3 LB: > { %s345_s24 = sshll.u32 %s2622_s4, 4  ;;  %s1451_s25 = sadd.s32 4294967295, %s1822_s21   ;;  %s1822_s21 = sphi %s1897_s21, %s25_s21   ;;  %s346_s24 = int_to_ptr.hbm [resolvable:$true] %s345_s24 }
   0x4   : > { %p1453_p0 = scmp.ge.s32.totalorder %s1822_s21, 1  ;;  %p318_p1 = scmp.lt.s32.totalorder %s1822_s21, 5 }
   0x5   : > { %p1910_p2 = scmp.eq.s32.totalorder %s1451_s25, 0  ;;  %s1824_s28 = smov [#allocation4]  }
   0x6   : > { %p1914_p3 = pnand %p1453_p0, %p318_p1  ;;  %s347_s29 = sshll.u32 %s1824_s28, 4  ;;  %s348_s29 = int_to_ptr.vmem [resolvable:$true] %s347_s29 }
   0x7   : > { %s333_s14 = sshll.u32 %s2621_s3, 4  ;;  %s357_s17 = sshll.u32 %s2623_s5, 4  ;;  %s334_s14 = int_to_ptr.hbm [resolvable:$true] %s333_s14  ;;  %s358_s17 = int_to_ptr.hbm [resolvable:$true] %s357_s17 }
   0x8   : > { %p1598_p4 = pneg %p1914_p3  ;;  %s1825_s19 = smov [#allocation2]  }
   0x9   : > { %s335_s20 = sshll.u32 %s1825_s19, 4  ;;  %s1826_s22 = smov [#allocation6]   ;;  %s336_s20 = int_to_ptr.vmem [resolvable:$true] %s335_s20 }
   0xa   : > { %p1928_p5 = pnand %p1910_p2, %p1598_p4  ;;  %s359_s23 = sshll.u32 %s1826_s22, 4  ;;  %s360_s23 = int_to_ptr.vmem [resolvable:$true] %s359_s23 }
   0xb   : > { %s384_s13 = sshll.u32 %s2629_s11, 4  ;;  %s1827_s15 = smov [#allocation7]   ;;  %s385_s13 = int_to_ptr.hbm [resolvable:$true] %s384_s13 }
   0xc   : > { %1604 = dma.hbm_to_vmem [thread:$0]  (!%p1928_p5), %s346_s24, 16, %s348_s29, [#allocation5]  }
   0xd   : > { %1601 = dma.hbm_to_vmem [thread:$0]  (!%p1928_p5), %s334_s14, 16, %s336_s20, [#allocation3]  }
   0xe   : > { %1607 = dma.hbm_to_vmem [thread:$0]  (!%p1928_p5), %s358_s17, 16, %s360_s23, [#allocation5]  }
   0xf   : > { %s386_s16 = sshll.u32 %s1827_s15, 4  ;;  %417 = sbr.rel (%p1914_p3) target bundleno = 982 (0x3d6), region = 68  ;;  %s387_s16 = int_to_ptr.vmem [resolvable:$true] %s386_s16 }
  0x10   : > { %1610 = dma.hbm_to_vmem [thread:$0]  (!%p1928_p5), %s385_s13, 16, %s387_s16, [#allocation8]  }
  0x14   : > { %1809 = dma.done.wait (%p1910_p2), [#allocation3], 16  }
  0x15   : > { %1811 = vsyncadd (%p1910_p2), [#allocation3], 4294967280 }
  0x16   : > { %1813 = dma.done.wait (%p1910_p2), [#allocation5], 32  }
  0x17   : > { %1815 = vsyncadd (%p1910_p2), [#allocation5], 4294967264 }
  0x18   : > { %1817 = dma.done.wait (%p1910_p2), [#allocation8], 16  }
  0x19   : > { %1819 = vsyncadd (%p1910_p2), [#allocation8], 4294967280  ;;  %v1565_v0 = vld [vmem:[%s2624_s6 + $0x38] sm:$0xff]  ;;  %v1564_v1 = vld [vmem:[%s2624_s6 + $0x30] sm:$0xff]  ;;  %s1464_s26 = sshll.u32 %s1451_s25, 2  ;;  %s1829_s19 = smov 64  }
  0x1a   : > { %753 = vmatpush.bf16.msra.mxu1 %v1565_v0  ;;  %1574 = vmatpush.bf16.msra.mxu3 %v1565_v0  ;;  %v1563_v2 = vld [vmem:[%s2624_s6 + $0x28] sm:$0xff]  ;;  %v1562_v3 = vld [vmem:[%s2624_s6 + $0x20] sm:$0xff]  ;;  %p481_p6 = scmp.lt.s32.totalorder %s1464_s26, 15  ;;  %v1561_v4 = vld [vmem:[%s2624_s6 + $0x18] sm:$0xff]  ;;  %s1830_s20 = smov 96   ;;  %vm569_vm0 = vcmask 261120  }
  0x1b   : > { %v1560_v5 = vld [vmem:[%s2624_s6 + $0x10] sm:$0xff]  ;;  %v1559_v6 = vld [vmem:[%s2624_s6 + $0x8] sm:$0xff]  ;;  %v1558_v7 = vld [vmem:[%s2624_s6] sm:$0xff]  ;;  %v1831_v51 = vmov 32.0   ;;  %vm541_vm2 = vcmask 523264  }
  0x1c   : > { %s2661_s26 = smov (!%p481_p6, %s1464_s26), 15  ;;  %v1635_v14 = vld [vmem:[%s2625_s7] ss:$0 sm:$0xff]  ;;  %1642 = vrcp.f32 %v1831_v51  ;;  %v1557_v56 = vld [vmem:[%s2620_s2 + $0x18] sm:$0xff]  ;;  %v1556_v58 = vld [vmem:[%s2620_s2 + $0x10] sm:$0xff] }
  0x1d   : > { %s1977_s25 = sshll.u32 %s2661_s26, 3  ;;  %s1828_s26 = smov 32   ;;  %552 = vmatpush.bf16.msra.mxu0 %v1557_v56  ;;  %v1555_v63 = vld [vmem:[%s2620_s2 + $0x8] sm:$0xff] }
  0x1e   : > { %754 = vmatpush.bf16.msra.mxu1 %v1564_v1  ;;  %1575 = vmatpush.bf16.msra.mxu3 %v1564_v1  ;;  %s490_s27 = scalar_lea.vmem %s2619_s1, %s1977_s25  ;;  %s484_s14 = scalar_lea.vmem %s2618_s0, %s1977_s25 }
  0x1f   : > { %v679_v8 = vld [vmem:[%s490_s27] sm:$0xff]  ;;  %v680_v9 = vld [vmem:[%s490_s27 + $0x8] sm:$0xff]  ;;  %v681_v10 = vld [vmem:[%s490_s27 + $0x10] sm:$0xff]  ;;  %s496_s23 = scalar_lea.vmem %s2630_s12, %s1977_s25 }
  0x20   : > { %v682_v11 = vld [vmem:[%s490_s27 + $0x18] sm:$0xff]  ;;  %v683_v12 = vpack.c.bf16 %v680_v9, %v679_v8 }
  0x21   : > { %v684_v13 = vpack.c.bf16 %v682_v11, %v681_v10  ;;  %553 = vmatpush.bf16.msra.mxu0 %v1556_v58  ;;  %v499_v10 = vld [vmem:[%s484_s14] sm:$0xff]  ;;  %v500_v11 = vld [vmem:[%s484_s14 + $0x8] sm:$0xff] }
  0x22   : > { %755 = vmatpush.bf16.msra.mxu1 %v1563_v2  ;;  %1576 = vmatpush.bf16.msra.mxu3 %v1563_v2  ;;  %v1643_v52 = vpop.eup %1642 }
  0x23   : > { %v583_v53 = vmul.f32 32.0, %v1643_v52  ;;  %vm587_vm1 = vweird.f32 %v1643_v52 }
  0x25   : > { %v584_v54 = vsub.f32 1.0, %v583_v53  ;;  %554 = vmatpush.bf16.msra.mxu0 %v1555_v63 }
  0x26   : > { %756 = vmatpush.bf16.msra.mxu1 %v1562_v3  ;;  %1577 = vmatpush.bf16.msra.mxu3 %v1562_v3 }
  0x27   : > { %v585_v55 = vmul.f32 %v1643_v52, %v584_v54 }
  0x29   : > { %v586_v57 = vadd.f32 %v1643_v52, %v585_v55 }
  0x2a   : > { %757 = vmatpush.bf16.msra.mxu1 %v1561_v4  ;;  %1578 = vmatpush.bf16.msra.mxu3 %v1561_v4  ;;  %v1554_v4 = vld [vmem:[%s2620_s2] sm:$0xff] }
  0x2b   : > { %v2048_v59 = vsel %vm587_vm1, %v1643_v52, %v586_v57  ;;  %555 = vmatpush.bf16.msra.mxu0 %v1554_v4 }
  0x2e   : > { %758 = vmatpush.bf16.msra.mxu1 %v1560_v5  ;;  %1579 = vmatpush.bf16.msra.mxu3 %v1560_v5 }
  0x32   : > { %759 = vmatpush.bf16.msra.mxu1 %v1559_v6  ;;  %1580 = vmatpush.bf16.msra.mxu3 %v1559_v6 }
  0x36   : > { %760 = vmatpush.bf16.msra.mxu1 %v1558_v7  ;;  %1581 = vmatpush.bf16.msra.mxu3 %v1558_v7 }
  0x39   : > { %761 = vmatmul.bf16.vlgmr.msra.gmra.mxu1 %v683_v12  ;;  %766 = vmatmul.bf16.vlgmr.msra.gmra.mxu3 %v684_v13  ;;  %v503_v13 = vpack.c.bf16 %v500_v11, %v499_v10 }
  0x3b   : > { %1486 = vmatmul.msk.bf16.vlgmr.msra.gmra.mxu0 %vm541_vm2, %v503_v13  ;;  %v1636_v13 = vld [vmem:[#allocation2] ss:$0 sm:$0xff] }
  0xb6   : > { %v762_v15 = vpop.f32.mrf.mxu1 }
  0xb7   : > { %v1992_v16 = vadd.f32 %v1635_v14, %v762_v15 }
  0xb8   : > { %v557_v10 = vpop.f32.mrf.mxu0 }
  0xb9   : > { %1098 = vrot.lane.b32.xlu2 %v1992_v16, %s1828_s26  ;;  %982 = vrot.lane.b32.xlu1 %v1992_v16, %s1829_s19  ;;  %v774_v23 = vsel %vm569_vm0, %v1992_v16, 0.0 }
  0xba   : > { %866 = vrot.lane.b32.xlu0 %v1992_v16, %s1830_s20 }
  0xbc   : > { %v767_v17 = vpop.f32.mrf.mxu3 }
  0xbd   : > { %v2000_v18 = vadd.f32 %v1635_v14, %v767_v17 }
  0xbe   : > { %v764_v19 = vpop.f32.mrf.mxu1 }
  0xbf   : > { %v2006_v20 = vadd.f32 %v1635_v14, %v764_v19 }
  0xc1   : > { %1102 = vrot.lane.b32.xlu1 %v2000_v18, %s1828_s26  ;;  %v777_v24 = vsel %vm569_vm0, %v2006_v20, 0.0 }
  0xc2   : > { %870 = vrot.lane.b32.xlu0 %v2000_v18, %s1830_s20 }
  0xc4   : > { %v769_v21 = vpop.f32.mrf.mxu3 }
  0xc5   : > { %v2012_v22 = vadd.f32 %v1635_v14, %v769_v21 }
  0xc9   : > { %984 = vrot.lane.b32.xlu1 %v2006_v20, %s1829_s19 }
  0xca   : > { %868 = vrot.lane.b32.xlu0 %v2006_v20, %s1830_s20 }
  0xd1   : > { %872 = vrot.lane.b32.xlu1 %v2012_v22, %s1830_s20 }
  0xe2   : > { %775 = vadd.xlane.f32.xlu2 %v774_v23 }
  0xf4   : > { %778 = vadd.xlane.f32.xlu0 %v777_v24 }
  0xfa   : > { %986 = vrot.lane.b32.xlu2 %v2000_v18, %s1829_s19 }
 0x102   : > { %1100 = vrot.lane.b32.xlu2 %v2006_v20, %s1828_s26 }
 0x108   : > { %988 = vrot.lane.b32.xlu0 %v2012_v22, %s1829_s19 }
 0x10a   : > { %1104 = vrot.lane.b32.xlu2 %v2012_v22, %s1828_s26 }
 0x113   : > { %v1099_v30 = vpop.permute.xlu2 %1098 }
 0x114   : > { %v1110_v33 = vsel %vm569_vm0, %v1099_v30, 0.0 }
 0x12b   : > { %v983_v25 = vpop.permute.xlu1 %982 }
 0x12c   : > { %v867_v26 = vpop.permute.xlu0 %866  ;;  %v994_v28 = vsel %vm569_vm0, %v983_v25, 0.0 }
 0x12d   : > { %v878_v27 = vsel %vm569_vm0, %v867_v26, 0.0 }
 0x132   : > { %879 = vadd.xlane.f32.xlu0 %v878_v27 }
 0x133   : > { %v1103_v29 = vpop.permute.xlu1 %1102  ;;  %995 = vadd.xlane.f32.xlu2 %v994_v28  ;;  %v783_v28 = vsel %vm569_vm0, %v2012_v22, 0.0 }
 0x134   : > { %v871_v31 = vpop.permute.xlu0 %870  ;;  %v1116_v35 = vsel %vm569_vm0, %v1103_v29, 0.0 }
 0x135   : > { %v884_v32 = vsel %vm569_vm0, %v871_v31, 0.0  ;;  %v501_v31 = vld [vmem:[%s484_s14 + $0x10] sm:$0xff] }
 0x13a   : > { %1111 = vadd.xlane.f32.xlu0 %v1110_v33 }
 0x13b   : > { %885 = vadd.xlane.f32.xlu2 %v884_v32  ;;  %v985_v34 = vpop.permute.xlu1 %984  ;;  %v502_v32 = vld [vmem:[%s484_s14 + $0x18] sm:$0xff] }
 0x13c   : > { %v997_v36 = vsel %vm569_vm0, %v985_v34, 0.0  ;;  %v869_v42 = vpop.permute.xlu0 %868  ;;  %v504_v33 = vpack.c.bf16 %v502_v32, %v501_v31 }
 0x13d   : > { %v881_v43 = vsel %vm569_vm0, %v869_v42, 0.0 }
 0x13e   : > { %1487 = vmatmul.msk.bf16.gmra.mxu0 %vm541_vm2, %v504_v33 }
 0x142   : > { %1117 = vadd.xlane.f32.xlu0 %v1116_v35 }
 0x143   : > { %998 = vadd.xlane.f32.xlu2 %v997_v36  ;;  %v873_v37 = vpop.permute.xlu1 %872  ;;  %v780_v36 = vsel %vm569_vm0, %v2000_v18, 0.0 }
 0x144   : > { %v887_v38 = vsel %vm569_vm0, %v873_v37, 0.0 }
 0x14a   : > { %888 = vadd.xlane.f32.xlu0 %v887_v38 }
 0x155   : > { %v776_v39 = vpop.xlane.xlu2 %775 }
 0x156   : > { %v786_v23 = vmul.f32 %v776_v39, %v2048_v59 }
 0x158   : > { %v2095_v27 = vsub.f32 %v1992_v16, %v786_v23 }
 0x15a   : > { %v794_v34 = vmul.f32 %v2095_v27, %v2095_v27 }
 0x15c   : > { %v798_v35 = vsel %vm569_vm0, %v794_v34, 0.0 }
 0x15d   : > { %v987_v40 = vpop.permute.xlu2 %986 }
 0x15e   : > { %v1000_v41 = vsel %vm569_vm0, %v987_v40, 0.0 }
 0x15f   : > { %1001 = vadd.xlane.f32.xlu1 %v1000_v41 }
 0x165   : > { %v1101_v44 = vpop.permute.xlu2 %1100 }
 0x166   : > { %v1113_v45 = vsel %vm569_vm0, %v1101_v44, 0.0 }
 0x167   : > { %882 = vadd.xlane.f32.xlu1 %v881_v43  ;;  %v2038_v46 = vpop.xlane.xlu0 %778 }
 0x168   : > { %v787_v51 = vmul.f32 %v2038_v46, %v2048_v59 }
 0x16a   : > { %v2139_v52 = vsub.f32 %v2006_v20, %v787_v51 }
 0x16c   : > { %v795_v53 = vmul.f32 %v2139_v52, %v2139_v52 }
 0x16d   : > { %v1105_v47 = vpop.permute.xlu2 %1104 }
 0x16e   : > { %v1119_v48 = vsel %vm569_vm0, %v1105_v47, 0.0  ;;  %v801_v57 = vsel %vm569_vm0, %v795_v53, 0.0 }
 0x16f   : > { %1114 = vadd.xlane.f32.xlu1 %v1113_v45 }
 0x177   : > { %1120 = vadd.xlane.f32.xlu1 %v1119_v48 }
 0x17a   : > { %v989_v49 = vpop.permute.xlu0 %988 }
 0x17b   : > { %v1003_v50 = vsel %vm569_vm0, %v989_v49, 0.0 }
 0x17c   : > { %1004 = vadd.xlane.f32.xlu2 %v1003_v50 }
 0x1a5   : > { %v880_v60 = vpop.xlane.xlu0 %879 }
 0x1a6   : > { %v890_v61 = vmul.f32 %v880_v60, %v2048_v59  ;;  %v996_v62 = vpop.xlane.xlu2 %995 }
 0x1a7   : > { %v1006_v0 = vmul.f32 %v996_v62, %v2048_v59 }
 0x1a8   : > { %v2056_v1 = vsub.f32 %v1992_v16, %v890_v61 }
 0x1a9   : > { %v2059_v2 = vsub.f32 %v1992_v16, %v1006_v0 }
 0x1aa   : > { %v898_v3 = vmul.f32 %v2056_v1, %v2056_v1 }
 0x1ab   : > { %v1014_v5 = vmul.f32 %v2059_v2, %v2059_v2 }
 0x1ac   : > { %906 = vrot.lane.b32.xlu1 %v898_v3, %s1830_s20 }
 0x1ad   : > { %v1112_v6 = vpop.xlane.xlu0 %1111  ;;  %1022 = vrot.lane.b32.xlu0 %v1014_v5, %s1829_s19 }
 0x1ae   : > { %v1122_v7 = vmul.f32 %v1112_v6, %v2048_v59  ;;  %v886_v8 = vpop.xlane.xlu2 %885 }
 0x1af   : > { %v892_v29 = vmul.f32 %v886_v8, %v2048_v59 }
 0x1b0   : > { %v2076_v9 = vsub.f32 %v1992_v16, %v1122_v7 }
 0x1b1   : > { %v2106_v16 = vsub.f32 %v2000_v18, %v892_v29 }
 0x1b2   : > { %v1130_v12 = vmul.f32 %v2076_v9, %v2076_v9 }
 0x1b3   : > { %v900_v38 = vmul.f32 %v2106_v16, %v2106_v16 }
 0x1b5   : > { %1138 = vrot.lane.b32.xlu0 %v1130_v12, %s1828_s26  ;;  %v1118_v41 = vpop.xlane.xlu0 %1117 }
 0x1b6   : > { %v999_v14 = vpop.xlane.xlu2 %998  ;;  %v1124_v42 = vmul.f32 %v1118_v41, %v2048_v59 }
 0x1b7   : > { %v1007_v15 = vmul.f32 %v999_v14, %v2048_v59 }
 0x1b8   : > { %v2124_v44 = vsub.f32 %v2000_v18, %v1124_v42 }
 0x1b9   : > { %v2084_v17 = vsub.f32 %v2006_v20, %v1007_v15 }
 0x1ba   : > { %v1132_v48 = vmul.f32 %v2124_v44, %v2124_v44 }
 0x1bb   : > { %v1015_v19 = vmul.f32 %v2084_v17, %v2084_v17 }
 0x1bd   : > { %1024 = vrot.lane.b32.xlu1 %v1015_v19, %s1829_s19  ;;  %v889_v54 = vpop.xlane.xlu0 %888 }
 0x1be   : > { %v893_v63 = vmul.f32 %v889_v54, %v2048_v59 }
 0x1c0   : > { %v2155_v4 = vsub.f32 %v2012_v22, %v893_v63 }
 0x1c2   : > { %v901_v6 = vmul.f32 %v2155_v4, %v2155_v4 }
 0x1d2   : > { %v1002_v21 = vpop.xlane.xlu1 %1001 }
 0x1d3   : > { %v1008_v37 = vmul.f32 %v1002_v21, %v2048_v59  ;;  %v559_v21 = vpop.f32.mrf.mxu0 }
 0x1d5   : > { %v2117_v40 = vsub.f32 %v2000_v18, %v1008_v37 }
 0x1d7   : > { %v1016_v43 = vmul.f32 %v2117_v40, %v2117_v40 }
 0x1da   : > { %v883_v24 = vpop.xlane.xlu1 %882 }
 0x1db   : > { %v891_v25 = vmul.f32 %v883_v24, %v2048_v59 }
 0x1dd   : > { %v2092_v26 = vsub.f32 %v2006_v20, %v891_v25  ;;  %v560_v25 = vadd.f32 %v1636_v13, %v559_v21 }
 0x1df   : > { %784 = vadd.xlane.f32.xlu0 %v783_v28  ;;  %v899_v30 = vmul.f32 %v2092_v26, %v2092_v26 }
 0x1e1   : > { %908 = vrot.lane.b32.xlu2 %v899_v30, %s1830_s20  ;;  %v573_v30 = vsel %vm569_vm0, %v560_v25, 0.0 }
 0x1e2   : > { %v1115_v39 = vpop.xlane.xlu1 %1114 }
 0x1e3   : > { %v1123_v46 = vmul.f32 %v1115_v39, %v2048_v59 }
 0x1e5   : > { %v2148_v62 = vsub.f32 %v2006_v20, %v1123_v46 }
 0x1e7   : > { %799 = vadd.xlane.f32.xlu0 %v798_v35  ;;  %781 = vadd.xlane.f32.xlu1 %v780_v36  ;;  %v1131_v0 = vmul.f32 %v2148_v62, %v2148_v62 }
 0x1e9   : > { %910 = vrot.lane.b32.xlu2 %v900_v38, %s1830_s20 }
 0x1ea   : > { %v1121_v45 = vpop.xlane.xlu1 %1120 }
 0x1eb   : > { %v1125_v47 = vmul.f32 %v1121_v45, %v2048_v59 }
 0x1ed   : > { %v2131_v49 = vsub.f32 %v2012_v22, %v1125_v47 }
 0x1ef   : > { %v1133_v50 = vmul.f32 %v2131_v49, %v2131_v49  ;;  %v1005_v61 = vpop.xlane.xlu2 %1004 }
 0x1f0   : > { %v1009_v5 = vmul.f32 %v1005_v61, %v2048_v59 }
 0x1f1   : > { %1026 = vrot.lane.b32.xlu2 %v1016_v43, %s1829_s19  ;;  %v562_v43 = vpop.f32.mrf.mxu0 }
 0x1f2   : > { %v2162_v7 = vsub.f32 %v2012_v22, %v1009_v5  ;;  %v2189_v45 = vadd.f32 %v1636_v13, %v562_v43 }
 0x1f4   : > { %v1017_v8 = vmul.f32 %v2162_v7, %v2162_v7  ;;  %v576_v47 = vsel %vm569_vm0, %v2189_v45, 0.0 }
 0x1f9   : > { %1142 = vrot.lane.b32.xlu2 %v1132_v48, %s1828_s26 }
 0x200   : > { %1144 = vrot.lane.b32.xlu1 %v1133_v50, %s1828_s26 }
 0x21e   : > { %v907_v55 = vpop.permute.xlu1 %906 }
 0x21f   : > { %v918_v56 = vsel %vm569_vm0, %v907_v55, 0.0  ;;  %v1023_v58 = vpop.permute.xlu0 %1022 }
 0x220   : > { %919 = vadd.xlane.f32.xlu0 %v918_v56  ;;  %v1034_v60 = vsel %vm569_vm0, %v1023_v58, 0.0  ;;  %v564_v58 = vpop.f32.mrf.mxu0 }
 0x221   : > { %v2200_v46 = vadd.f32 %v1636_v13, %v564_v58 }
 0x222   : > { %802 = vadd.xlane.f32.xlu2 %v801_v57  ;;  %v2196_v57 = vadd.f32 %v1636_v13, %v557_v10 }
 0x223   : > { %v579_v61 = vsel %vm569_vm0, %v2200_v46, 0.0 }
 0x227   : > { %v1139_v11 = vpop.permute.xlu0 %1138 }
 0x228   : > { %v1150_v32 = vsel %vm569_vm0, %v1139_v11, 0.0 }
 0x22a   : > { %1035 = vadd.xlane.f32.xlu1 %v1034_v60  ;;  %v570_v60 = vsel %vm569_vm0, %v2196_v57, 0.0 }
 0x22f   : > { %v1025_v31 = vpop.permute.xlu1 %1024 }
 0x230   : > { %v1037_v37 = vsel %vm569_vm0, %v1025_v31, 0.0 }
 0x23a   : > { %1140 = vrot.lane.b32.xlu2 %v1131_v0, %s1828_s26 }
 0x23b   : > { %v909_v3 = vpop.permute.xlu2 %908 }
 0x242   : > { %912 = vrot.lane.b32.xlu2 %v901_v6, %s1830_s20 }
 0x243   : > { %v911_v20 = vpop.permute.xlu2 %910 }
 0x244   : > { %v924_v39 = vsel %vm569_vm0, %v911_v20, 0.0 }
 0x24a   : > { %1028 = vrot.lane.b32.xlu2 %v1017_v8, %s1829_s19 }
 0x24b   : > { %v1027_v12 = vpop.permute.xlu2 %1026 }
 0x24c   : > { %v1040_v41 = vsel %vm569_vm0, %v1027_v12, 0.0 }
 0x252   : > { %v785_v14 = vpop.xlane.xlu0 %784 }
 0x253   : > { %v789_v15 = vmul.f32 %v785_v14, %v2048_v59  ;;  %v1143_v19 = vpop.permute.xlu2 %1142 }
 0x254   : > { %v1156_v23 = vsel %vm569_vm0, %v1143_v19, 0.0 }
 0x255   : > { %v2170_v24 = vsub.f32 %v2012_v22, %v789_v15  ;;  %1157 = vadd.xlane.f32.xlu1 %v1156_v23  ;;  %v921_v22 = vsel %vm569_vm0, %v909_v3, 0.0 }
 0x257   : > { %v797_v28 = vmul.f32 %v2170_v24, %v2170_v24 }
 0x259   : > { %v807_v29 = vsel %vm569_vm0, %v797_v28, 0.0  ;;  %v1573_v28 = vld [vmem:[%s2628_s10 + $0x38] sm:$0xff] }
 0x25a   : > { %808 = vadd.xlane.f32.xlu0 %v807_v29  ;;  %v782_v33 = vpop.xlane.xlu1 %781  ;;  %v800_v3 = vpop.xlane.xlu0 %799  ;;  %1311 = vmatpush.bf16.msra.mxu2 %v1573_v28 }
 0x25b   : > { %v788_v34 = vmul.f32 %v782_v33, %v2048_v59  ;;  %v810_v15 = vmul.f32 %v800_v3, %v2048_v59  ;;  %v1572_v33 = vld [vmem:[%s2628_s10 + $0x30] sm:$0xff] }
 0x25d   : > { %574 = vadd.xlane.f32.xlu1 %v573_v30  ;;  %v2180_v35 = vsub.f32 %v2000_v18, %v788_v34  ;;  %v2213_v23 = vadd.f32 1e-05, %v810_v15 }
 0x25e   : > { %1312 = vmatpush.bf16.msra.mxu2 %v1572_v33 }
 0x25f   : > { %v796_v36 = vmul.f32 %v2180_v35, %v2180_v35  ;;  %1644 = vrsqrt.f32 %v2213_v23  ;;  %vm824_vm4 = vweird.f32 %v2213_v23 }
 0x261   : > { %v804_v38 = vsel %vm569_vm0, %v796_v36, 0.0 }
 0x262   : > { %1151 = vadd.xlane.f32.xlu0 %v1150_v32 }
 0x26a   : > { %922 = vadd.xlane.f32.xlu0 %v921_v22 }
 0x272   : > { %1038 = vadd.xlane.f32.xlu0 %v1037_v37  ;;  %v1145_v42 = vpop.permute.xlu1 %1144 }
 0x273   : > { %805 = vadd.xlane.f32.xlu2 %v804_v38  ;;  %v1159_v18 = vsel %vm569_vm0, %v1145_v42, 0.0  ;;  %v1571_v38 = vld [vmem:[%s2628_s10 + $0x28] sm:$0xff] }
 0x274   : > { %1313 = vmatpush.bf16.msra.mxu2 %v1571_v38 }
 0x27b   : > { %925 = vadd.xlane.f32.xlu2 %v924_v39 }
 0x283   : > { %1041 = vadd.xlane.f32.xlu2 %v1040_v41  ;;  %v2239_v41 = vpop.eup %1644 }
 0x284   : > { %vm825_vm3 = vweird.f32 %v2239_v41 }
 0x285   : > { %vm2330_vm5 = vmor %vm824_vm4, %vm825_vm3 }
 0x28b   : > { %1160 = vadd.xlane.f32.xlu2 %v1159_v18 }
 0x293   : > { %577 = vadd.xlane.f32.xlu2 %v576_v47  ;;  %v920_v8 = vpop.xlane.xlu0 %919  ;;  %v1570_v47 = vld [vmem:[%s2628_s10 + $0x20] sm:$0xff] }
 0x294   : > { %1314 = vmatpush.bf16.msra.mxu2 %v1570_v47 }
 0x295   : > { %v803_v48 = vpop.xlane.xlu2 %802 }
 0x296   : > { %v811_v29 = vmul.f32 %v803_v48, %v2048_v59  ;;  %v819_v48 = vmul.f32 %v2239_v41, %v2213_v23 }
 0x298   : > { %v2227_v34 = vadd.f32 1e-05, %v811_v29  ;;  %v820_v58 = vmul.f32 %v2239_v41, %v819_v48 }
 0x29a   : > { %vm834_vm11 = vweird.f32 %v2227_v34 }
 0x29d   : > { %v1141_v50 = vpop.permute.xlu2 %1140  ;;  %v1036_v63 = vpop.xlane.xlu1 %1035 }
 0x29e   : > { %v1153_v51 = vsel %vm569_vm0, %v1141_v50, 0.0  ;;  %v1046_v30 = vmul.f32 %v1036_v63, %v2048_v59 }
 0x29f   : > { %1154 = vadd.xlane.f32.xlu0 %v1153_v51 }
 0x2a0   : > { %v2230_v36 = vadd.f32 1e-05, %v1046_v30 }
 0x2a2   : > { %vm1060_vm13 = vweird.f32 %v2230_v36 }
 0x2a5   : > { %v913_v53 = vpop.permute.xlu2 %912 }
 0x2a6   : > { %v927_v54 = vsel %vm569_vm0, %v913_v53, 0.0 }
 0x2a7   : > { %928 = vadd.xlane.f32.xlu0 %v927_v54 }
 0x2ad   : > { %v1029_v55 = vpop.permute.xlu2 %1028 }
 0x2ae   : > { %v1043_v56 = vsel %vm569_vm0, %v1029_v55, 0.0 }
 0x2af   : > { %1044 = vadd.xlane.f32.xlu0 %v1043_v56  ;;  %v1569_v56 = vld [vmem:[%s2628_s10 + $0x18] sm:$0xff] }
 0x2b0   : > { %1315 = vmatpush.bf16.msra.mxu2 %v1569_v56 }
 0x2b7   : > { %571 = vadd.xlane.f32.xlu0 %v570_v60 }
 0x2bf   : > { %580 = vadd.xlane.f32.xlu0 %v579_v61 }
 0x2c8   : > { %v1158_v0 = vpop.xlane.xlu1 %1157 }
 0x2cd   : > { %v2210_v12 = vpop.xlane.xlu0 %808 }
 0x2d0   : > { %v575_v5 = vpop.xlane.xlu1 %574 }
 0x2d1   : > { %v590_v6 = vmul.f32 %v2048_v59, %v575_v5  ;;  %v1164_v5 = vmul.f32 %v1158_v0, %v2048_v59 }
 0x2d3   : > { %v2205_v20 = vsub.f32 %v560_v25, %v590_v6  ;;  %v930_v25 = vmul.f32 %v920_v8, %v2048_v59  ;;  %v1568_v8 = vld [vmem:[%s2628_s10 + $0x10] sm:$0xff]  ;;  %v2294_v33 = vadd.f32 1e-05, %v1164_v5  ;;  %v1566_v5 = vld [vmem:[%s2628_s10] sm:$0xff] }
 0x2d4   : > { %1316 = vmatpush.bf16.msra.mxu2 %v1568_v8 }
 0x2d5   : > { %v598_v10 = vmul.f32 %v2205_v20, %v2205_v20  ;;  %v1152_v13 = vpop.xlane.xlu0 %1151  ;;  %v2222_v31 = vadd.f32 1e-05, %v930_v25 }
 0x2d6   : > { %v1162_v22 = vmul.f32 %v1152_v13, %v2048_v59 }
 0x2d7   : > { %v604_v11 = vsel %vm569_vm0, %v598_v10, 0.0  ;;  %1646 = vrsqrt.f32 %v2222_v31  ;;  %v821_v10 = vmul.f32 0.5, %v820_v58  ;;  %vm944_vm6 = vweird.f32 %v2222_v31 }
 0x2d8   : > { %605 = vadd.xlane.f32.xlu2 %v604_v11  ;;  %1648 = vrsqrt.f32 %v2227_v34  ;;  %v2237_v39 = vadd.f32 1e-05, %v1162_v22  ;;  %v813_v22 = vmul.f32 %v2210_v12, %v2048_v59 }
 0x2d9   : > { %1650 = vrsqrt.f32 %v2230_v36  ;;  %v822_v38 = vsub.f32 1.5, %v821_v10 }
 0x2da   : > { %1652 = vrsqrt.f32 %v2237_v39  ;;  %vm1176_vm1 = vweird.f32 %v2237_v39 }
 0x2dd   : > { %v923_v21 = vpop.xlane.xlu0 %922  ;;  %v2252_v50 = vpop.eup %1646 }
 0x2de   : > { %v931_v42 = vmul.f32 %v923_v21, %v2048_v59  ;;  %v2256_v53 = vpop.eup %1648  ;;  %v939_v60 = vmul.f32 %v2252_v50, %v2222_v31  ;;  %vm945_vm7 = vweird.f32 %v2252_v50 }
 0x2df   : > { %v2260_v55 = vpop.eup %1650  ;;  %v829_v61 = vmul.f32 %v2256_v53, %v2227_v34  ;;  %vm835_vm8 = vweird.f32 %v2256_v53  ;;  %vm2357_vm10 = vmor %vm944_vm6, %vm945_vm7 }
 0x2e0   : > { %v2254_v51 = vadd.f32 1e-05, %v931_v42  ;;  %v2271_v63 = vpop.eup %1652  ;;  %v1055_v3 = vmul.f32 %v2260_v55, %v2230_v36  ;;  %v940_v15 = vmul.f32 %v2252_v50, %v939_v60  ;;  %vm1061_vm9 = vweird.f32 %v2260_v55  ;;  %vm2367_vm12 = vmor %vm834_vm11, %vm835_vm8 }
 0x2e1   : > { %v830_v21 = vmul.f32 %v2256_v53, %v829_v61  ;;  %v1171_v25 = vmul.f32 %v2271_v63, %v2237_v39  ;;  %v2316_v61 = vadd.f32 1e-05, %v813_v22  ;;  %vm2385_vm14 = vmor %vm1060_vm13, %vm1061_vm9  ;;  %vm1177_vm15 = vweird.f32 %v2271_v63 }
 0x2e2   : > { %1654 = vrsqrt.f32 %v2254_v51  ;;  %v1056_v0 = vmul.f32 %v2260_v55, %v1055_v3  ;;  %vm2406_vm3 = vmor %vm1176_vm1, %vm1177_vm15  ;;  %vm954_vm6 = vweird.f32 %v2254_v51  ;;  %vm1196_vm1 = vweird.f32 %v2294_v33 }
 0x2e3   : > { %v1172_v47 = vmul.f32 %v2271_v63, %v1171_v25 }
 0x2e4   : > { %v1057_v12 = vmul.f32 0.5, %v1056_v0 }
 0x2e5   : > { %v1039_v37 = vpop.xlane.xlu0 %1038 }
 0x2e6   : > { %v806_v14 = vpop.xlane.xlu2 %805  ;;  %v1047_v43 = vmul.f32 %v1039_v37, %v2048_v59  ;;  %v1567_v37 = vld [vmem:[%s2628_s10 + $0x8] sm:$0xff] }
 0x2e7   : > { %v812_v11 = vmul.f32 %v806_v14, %v2048_v59  ;;  %1317 = vmatpush.bf16.msra.mxu2 %v1567_v37 }
 0x2e8   : > { %v2258_v54 = vadd.f32 1e-05, %v1047_v43  ;;  %v2292_v14 = vpop.eup %1654  ;;  %v831_v43 = vmul.f32 0.5, %v830_v21 }
 0x2e9   : > { %v2303_v42 = vadd.f32 1e-05, %v812_v11  ;;  %v949_v56 = vmul.f32 %v2292_v14, %v2254_v51  ;;  %v1173_v11 = vmul.f32 0.5, %v1172_v47  ;;  %vm955_vm4 = vweird.f32 %v2292_v14 }
 0x2ea   : > { %1656 = vrsqrt.f32 %v2258_v54  ;;  %v832_v10 = vsub.f32 1.5, %v831_v43  ;;  %vm2436_vm7 = vmor %vm954_vm6, %vm955_vm4  ;;  %vm1070_vm8 = vweird.f32 %v2258_v54 }
 0x2eb   : > { %1658 = vrsqrt.f32 %v2294_v33  ;;  %1318 = vmatpush.bf16.msra.mxu2 %v1566_v5 }
 0x2ec   : > { %1660 = vrsqrt.f32 %v2303_v42 }
 0x2ee   : > { %v926_v19 = vpop.xlane.xlu2 %925 }
 0x2ef   : > { %v932_v28 = vmul.f32 %v926_v19, %v2048_v59 }
 0x2f0   : > { %v2301_v19 = vpop.eup %1656 }
 0x2f1   : > { %v2308_v48 = vadd.f32 1e-05, %v932_v28  ;;  %v1065_v3 = vmul.f32 %v2301_v19, %v2258_v54  ;;  %v2344_v22 = vpop.eup %1658 }
 0x2f3   : > { %1662 = vrsqrt.f32 %v2308_v48  ;;  %v1066_v25 = vmul.f32 %v2301_v19, %v1065_v3 }
 0x2f6   : > { %v1042_v32 = vpop.xlane.xlu2 %1041 }
 0x2f7   : > { %v1048_v29 = vmul.f32 %v1042_v32, %v2048_v59  ;;  %v941_v32 = vmul.f32 0.5, %v940_v15  ;;  %v950_v15 = vmul.f32 %v2292_v14, %v949_v56 }
 0x2f9   : > { %v2312_v58 = vadd.f32 1e-05, %v1048_v29  ;;  %v942_v8 = vsub.f32 1.5, %v941_v32  ;;  %v951_v31 = vmul.f32 0.5, %v950_v15 }
 0x2fb   : > { %1664 = vrsqrt.f32 %v2312_v58  ;;  %v943_v37 = vmul.f32 %v2252_v50, %v942_v8 }
 0x2fc   : > { %1666 = vrsqrt.f32 %v2316_v61 }
 0x2fd   : > { %v947_v34 = vsel %vm2357_vm10, %v2252_v50, %v943_v37  ;;  %vm1222_vm10 = vcmask 785408  }
 0x2fe   : > { %v2244_v18 = vpop.xlane.xlu2 %1160 }
 0x2ff   : > { %v1165_v28 = vmul.f32 %v2244_v18, %v2048_v59  ;;  %v1174_v18 = vsub.f32 1.5, %v1173_v11 }
 0x301   : > { %v2362_v56 = vadd.f32 1e-05, %v1165_v28  ;;  %v1175_v36 = vmul.f32 %v2271_v63, %v1174_v18  ;;  %v978_v28 = vmul.f32 %v947_v34, %v2056_v1 }
 0x306   : > { %v578_v6 = vpop.xlane.xlu2 %577 }
 0x307   : > { %v591_v13 = vmul.f32 %v2048_v59, %v578_v6  ;;  %v823_v6 = vmul.f32 %v2239_v41, %v822_v38  ;;  %v833_v38 = vmul.f32 %v2256_v53, %v832_v10 }
 0x309   : > { %v2290_v30 = vsub.f32 %v2189_v45, %v591_v13  ;;  %v1058_v13 = vsub.f32 1.5, %v1057_v12  ;;  %v827_v23 = vsel %vm2330_vm5, %v2239_v41, %v823_v6  ;;  %v1067_v12 = vmul.f32 0.5, %v1066_v25 }
 0x30a   : > { %v858_v3 = vmul.f32 %v827_v23, %v2095_v27  ;;  %v1191_v6 = vmul.f32 %v2344_v22, %v2294_v33  ;;  %v837_v27 = vsel %vm2367_vm12, %v2256_v53, %v833_v38  ;;  %v1179_v38 = vsel %vm2406_vm3, %v2271_v63, %v1175_v36 }
 0x30b   : > { %v599_v45 = vmul.f32 %v2290_v30, %v2290_v30  ;;  %v1059_v32 = vmul.f32 %v2260_v55, %v1058_v13  ;;  %v952_v13 = vsub.f32 1.5, %v951_v31  ;;  %v1068_v15 = vsub.f32 1.5, %v1067_v12 }
 0x30c   : > { %vm1071_vm5 = vweird.f32 %v2301_v19  ;;  %v1210_v34 = vmul.f32 %v1179_v38, %v2076_v9  ;;  %v1214_v36 = vsel %vm569_vm0, %v858_v3, %v978_v28  ;;  %vm1197_vm12 = vweird.f32 %v2344_v22 }
 0x30d   : > { %v607_v60 = vsel %vm569_vm0, %v599_v45, 0.0  ;;  %v2349_v45 = vpop.eup %1660  ;;  %v1063_v11 = vsel %vm2385_vm14, %v2260_v55, %v1059_v32  ;;  %v1192_v55 = vmul.f32 %v2344_v22, %v1191_v6  ;;  %v953_v18 = vmul.f32 %v2292_v14, %v952_v13  ;;  %vm2445_vm9 = vmor %vm1070_vm8, %vm1071_vm5 }
 0x30e   : > { %608 = vadd.xlane.f32.xlu0 %v607_v60  ;;  %v2355_v43 = vpop.eup %1662  ;;  %v839_v50 = vmul.f32 %v2349_v45, %v2303_v42  ;;  %v1094_v37 = vmul.f32 %v1063_v11, %v2059_v2  ;;  %v1069_v12 = vmul.f32 %v2301_v19, %v1068_v15  ;;  %vm844_vm14 = vweird.f32 %v2303_v42 }
 0x30f   : > { %v2364_v60 = vpop.eup %1664  ;;  %v959_v53 = vmul.f32 %v2355_v43, %v2308_v48  ;;  %v2426_v63 = vmul.f32 0.5, %v1192_v55  ;;  %v957_v51 = vsel %vm2436_vm7, %v2292_v14, %v953_v18  ;;  %v2462_v55 = vld [vmem:[%s2626_s8] ss:$0 sm:$0xff]  ;;  %vm845_vm3 = vweird.f32 %v2349_v45 }
 0x310   : > { %v2375_v8 = vpop.eup %1666  ;;  %v1075_v21 = vmul.f32 %v2364_v60, %v2312_v58  ;;  %v840_v32 = vmul.f32 %v2349_v45, %v839_v50  ;;  %v1073_v50 = vsel %vm2445_vm9, %v2301_v19, %v1069_v12  ;;  %v1218_v3 = vsel %vm541_vm2, %v1214_v36, %v1094_v37  ;;  %vm2497_vm6 = vmor %vm844_vm14, %vm845_vm3 }
 0x311   : > { %v960_v31 = vmul.f32 %v2355_v43, %v959_v53  ;;  %v979_v19 = vmul.f32 %v957_v51, %v2092_v26  ;;  %v1223_v23 = vsel %vm1222_vm10, %v1218_v3, %v1210_v34  ;;  %v1095_v37 = vmul.f32 %v1073_v50, %v2084_v17 }
 0x312   : > { %v1155_v0 = vpop.xlane.xlu0 %1154  ;;  %v1076_v2 = vmul.f32 %v2364_v60, %v1075_v21  ;;  %v841_v9 = vmul.f32 0.5, %v840_v32  ;;  %v1194_v21 = vsub.f32 1.5, %v2426_v63  ;;  %v1230_v17 = vmul.f32 %v2462_v55, %v1223_v23 }
 0x313   : > { %v1163_v29 = vmul.f32 %v1155_v0, %v2048_v59  ;;  %v849_v0 = vmul.f32 %v2375_v8, %v2316_v61  ;;  %v961_v13 = vmul.f32 0.5, %v960_v31  ;;  %vm965_vm4 = vweird.f32 %v2355_v43 }
 0x314   : > { %v1077_v53 = vmul.f32 0.5, %v1076_v2  ;;  %v842_v38 = vsub.f32 1.5, %v841_v9  ;;  %vm1081_vm5 = vweird.f32 %v2364_v60  ;;  %vm964_vm7 = vweird.f32 %v2308_v48 }
 0x315   : > { %v2353_v41 = vadd.f32 1e-05, %v1163_v29  ;;  %v859_v29 = vmul.f32 %v837_v27, %v2139_v52  ;;  %v850_v5 = vmul.f32 %v2375_v8, %v849_v0  ;;  %v962_v18 = vsub.f32 1.5, %v961_v13  ;;  %vm2505_vm8 = vmor %vm964_vm7, %vm965_vm4 }
 0x316   : > { %v1078_v31 = vsub.f32 1.5, %v1077_v53  ;;  %v1195_v50 = vmul.f32 %v2344_v22, %v1194_v21  ;;  %vm1080_vm9 = vweird.f32 %v2312_v58  ;;  %vm855_vm14 = vweird.f32 %v2375_v8 }
 0x317   : > { %1668 = vrsqrt.f32 %v2353_v41  ;;  %vm1186_vm13 = vweird.f32 %v2353_v41  ;;  %v963_v34 = vmul.f32 %v2355_v43, %v962_v18  ;;  %vm854_vm4 = vweird.f32 %v2316_v61 }
 0x318   : > { %1670 = vrsqrt.f32 %v2362_v56  ;;  %v1079_v36 = vmul.f32 %v2364_v60, %v1078_v31  ;;  %vm1206_vm7 = vweird.f32 %v2362_v56 }
 0x319   : > { %v967_v48 = vsel %vm2505_vm8, %v2355_v43, %v963_v34 }
 0x31a   : > { %v929_v25 = vpop.xlane.xlu0 %928 }
 0x31b   : > { %v933_v39 = vmul.f32 %v929_v25, %v2048_v59  ;;  %v2454_v25 = vmul.f32 0.5, %v850_v5  ;;  %v843_v5 = vmul.f32 %v2349_v45, %v842_v38 }
 0x31d   : > { %v1669_v1 = vpop.eup %1668  ;;  %v2420_v47 = vadd.f32 1e-05, %v933_v39  ;;  %v852_v3 = vsub.f32 1.5, %v2454_v25 }
 0x31e   : > { %v1181_v52 = vmul.f32 %v1669_v1, %v2353_v41  ;;  %v2431_v6 = vpop.eup %1670  ;;  %vm1187_vm11 = vweird.f32 %v1669_v1  ;;  %v1215_v41 = vsel %vm569_vm0, %v859_v29, %v979_v19 }
 0x31f   : > { %1672 = vrsqrt.f32 %v2420_v47  ;;  %v1201_v14 = vmul.f32 %v2431_v6, %v2362_v56  ;;  %vm1188_vm15 = vmor %vm1186_vm13, %vm1187_vm11  ;;  %v1219_v29 = vsel %vm541_vm2, %v1215_v41, %v1095_v37  ;;  %v853_v18 = vmul.f32 %v2375_v8, %v852_v3 }
 0x320   : > { %v1182_v10 = vmul.f32 %v1669_v1, %v1181_v52  ;;  %vm2517_vm11 = vmor %vm1080_vm9, %vm1081_vm5  ;;  %vm974_vm3 = vweird.f32 %v2420_v47 }
 0x321   : > { %v1202_v2 = vmul.f32 %v2431_v6, %v1201_v14  ;;  %v1083_v25 = vsel %vm2517_vm11, %v2364_v60, %v1079_v36  ;;  %vm2568_vm5 = vmor %vm854_vm4, %vm855_vm14 }
 0x322   : > { %v1183_v54 = vmul.f32 0.5, %v1182_v10  ;;  %v1045_v15 = vpop.xlane.xlu0 %1044  ;;  %v2490_v10 = vld [vmem:[%s2627_s9] ss:$0 sm:$0xff]  ;;  %v1096_v31 = vmul.f32 %v1083_v25, %v2117_v40 }
 0x323   : > { %v1049_v28 = vmul.f32 %v1045_v15, %v2048_v59  ;;  %v1237_v58 = vadd.f32 %v2490_v10, %v1230_v17 }
 0x324   : > { %v1184_v0 = vsub.f32 1.5, %v1183_v54 }
 0x325   : > { %v2466_v39 = vpop.eup %1672  ;;  %v2469_v32 = vadd.f32 1e-05, %v1049_v28  ;;  %v847_v28 = vsel %vm2497_vm6, %v2349_v45, %v843_v5  ;;  %v980_v45 = vmul.f32 %v967_v48, %v2106_v16 }
 0x326   : > { %v1185_v12 = vmul.f32 %v1669_v1, %v1184_v0  ;;  %v969_v26 = vmul.f32 %v2466_v39, %v2420_v47  ;;  %vm975_vm13 = vweird.f32 %v2466_v39  ;;  %v860_v33 = vmul.f32 %v847_v28, %v2180_v35 }
 0x327   : > { %1674 = vrsqrt.f32 %v2469_v32  ;;  %vm1090_vm9 = vweird.f32 %v2469_v32 }
 0x328   : > { %v1189_v52 = vsel %vm1188_vm15, %v1669_v1, %v1185_v12  ;;  %v970_v63 = vmul.f32 %v2466_v39, %v969_v26  ;;  %vm2543_vm15 = vmor %vm1196_vm1, %vm1197_vm12  ;;  %vm1207_vm1 = vweird.f32 %v2431_v6 }
 0x329   : > { %v1211_v27 = vmul.f32 %v1189_v52, %v2148_v62  ;;  %v1203_v62 = vmul.f32 0.5, %v1202_v2  ;;  %v1199_v16 = vsel %vm2543_vm15, %v2344_v22, %v1195_v50  ;;  %vm2556_vm12 = vmor %vm974_vm3, %vm975_vm13  ;;  %v1216_v52 = vsel %vm569_vm0, %v860_v33, %v980_v45 }
 0x32a   : > { %v971_v1 = vmul.f32 0.5, %v970_v63  ;;  %v572_v51 = vpop.xlane.xlu0 %571  ;;  %v857_v63 = vsel %vm2568_vm5, %v2375_v8, %v853_v18  ;;  %v1220_v41 = vsel %vm541_vm2, %v1216_v52, %v1096_v31  ;;  %v1212_v5 = vmul.f32 %v1199_v16, %v2124_v44  ;;  %vm1208_vm8 = vmor %vm1206_vm7, %vm1207_vm1 }
 0x32b   : > { %v589_v9 = vmul.f32 %v2048_v59, %v572_v51  ;;  %v1224_v13 = vsel %vm1222_vm10, %v1219_v29, %v1211_v27  ;;  %v1204_v0 = vsub.f32 1.5, %v1203_v62  ;;  %v861_v56 = vmul.f32 %v857_v63, %v2170_v24 }
 0x32c   : > { %v972_v42 = vsub.f32 1.5, %v971_v1  ;;  %v1231_v54 = vmul.f32 %v2462_v55, %v1224_v13  ;;  %v1225_v1 = vsel %vm1222_vm10, %v1220_v41, %v1212_v5  ;;  %v1640_v41 = vld [vmem:[#allocation6] ss:$0 sm:$0xff] }
 0x32d   : > { %v1675_v15 = vpop.eup %1674  ;;  %v2522_v14 = vsub.f32 %v2196_v57, %v589_v9  ;;  %v1205_v47 = vmul.f32 %v2431_v6, %v1204_v0  ;;  %v1232_v29 = vmul.f32 %v2462_v55, %v1225_v1 }
 0x32e   : > { %v1085_v43 = vmul.f32 %v1675_v15, %v2469_v32  ;;  %v1238_v19 = vadd.f32 %v2490_v10, %v1231_v54  ;;  %v973_v23 = vmul.f32 %v2466_v39, %v972_v42  ;;  %vm1091_vm6 = vweird.f32 %v1675_v15 }
 0x32f   : > { %v597_v57 = vmul.f32 %v2522_v14, %v2522_v14  ;;  %v1209_v36 = vsel %vm1208_vm8, %v2431_v6, %v1205_v47  ;;  %vm1092_vm11 = vmor %vm1090_vm9, %vm1091_vm6  ;;  %v1239_v62 = vadd.f32 %v2490_v10, %v1232_v29  ;;  %v1641_v47 = vld [vmem:[#allocation7] ss:$0 sm:$0xff] }
 0x330   : > { %v1086_v37 = vmul.f32 %v1675_v15, %v1085_v43  ;;  %v1241_v38 = vpack.c.bf16 %v1238_v19, %v1237_v58  ;;  %v977_v22 = vsel %vm2556_vm12, %v2466_v39, %v973_v23 }
 0x331   : > { %v601_v12 = vsel %vm569_vm0, %v597_v57, 0.0  ;;  %v981_v34 = vmul.f32 %v977_v22, %v2155_v4  ;;  %v1213_v4 = vmul.f32 %v1209_v36, %v2131_v49 }
 0x332   : > { %v1087_v2 = vmul.f32 0.5, %v1086_v37  ;;  %1319 = vmatmul.bf16.vlgmr.msra.gmra.mxu2 %v1241_v38  ;;  %602 = vadd.xlane.f32.xlu1 %v601_v12  ;;  %v581_v40 = vpop.xlane.xlu0 %580 }
 0x333   : > { %v592_v61 = vmul.f32 %v2048_v59, %v581_v40  ;;  %v1217_v32 = vsel %vm569_vm0, %v861_v56, %v981_v34  ;;  %v1639_v40 = vld [vmem:[#allocation4] ss:$0 sm:$0xff] }
 0x334   : > { %v1088_v17 = vsub.f32 1.5, %v1087_v2 }
 0x335   : > { %v2578_v39 = vsub.f32 %v2200_v46, %v592_v61 }
 0x336   : > { %v1089_v27 = vmul.f32 %v1675_v15, %v1088_v17 }
 0x337   : > { %v600_v8 = vmul.f32 %v2578_v39, %v2578_v39 }
 0x338   : > { %v1093_v46 = vsel %vm1092_vm11, %v1675_v15, %v1089_v27 }
 0x339   : > { %v1097_v51 = vmul.f32 %v1093_v46, %v2162_v7  ;;  %v610_v44 = vsel %vm569_vm0, %v600_v8, 0.0 }
 0x33a   : > { %611 = vadd.xlane.f32.xlu1 %v610_v44 }
 0x33b   : > { %v1221_v6 = vsel %vm541_vm2, %v1217_v32, %v1097_v51 }
 0x33c   : > { %v1226_v11 = vsel %vm1222_vm10, %v1221_v6, %v1213_v4 }
 0x33d   : > { %v1233_v24 = vmul.f32 %v2462_v55, %v1226_v11 }
 0x33f   : > { %v1240_v9 = vadd.f32 %v2490_v10, %v1233_v24 }
 0x341   : > { %v1242_v7 = vpack.c.bf16 %v1240_v9, %v1239_v62 }
 0x343   : > { %1324 = vmatmul.bf16.gmra.mxu2 %v1242_v7 }
 0x34b   : > { %v606_v13 = vpop.xlane.xlu2 %605 }
 0x34c   : > { %v614_v49 = vmul.f32 %v606_v13, %v2048_v59 }
 0x34e   : > { %v618_v50 = vadd.f32 1e-05, %v614_v49 }
 0x350   : > { %1676 = vrsqrt.f32 %v618_v50  ;;  %vm637_vm10 = vweird.f32 %v618_v50 }
 0x356   : > { %v1677_v15 = vpop.eup %1676 }
 0x357   : > { %v632_v3 = vmul.f32 %v1677_v15, %v618_v50  ;;  %vm638_vm2 = vweird.f32 %v1677_v15 }
 0x358   : > { %vm639_vm13 = vmor %vm637_vm10, %vm638_vm2 }
 0x359   : > { %v633_v48 = vmul.f32 %v1677_v15, %v632_v3 }
 0x35b   : > { %v634_v28 = vmul.f32 0.5, %v633_v48 }
 0x35d   : > { %v635_v43 = vsub.f32 1.5, %v634_v28 }
 0x35f   : > { %v636_v37 = vmul.f32 %v1677_v15, %v635_v43 }
 0x361   : > { %v640_v31 = vsel %vm639_vm13, %v1677_v15, %v636_v37 }
 0x381   : > { %v609_v53 = vpop.xlane.xlu0 %608 }
 0x382   : > { %v615_v42 = vmul.f32 %v609_v53, %v2048_v59 }
 0x384   : > { %v619_v54 = vadd.f32 1e-05, %v615_v42 }
 0x386   : > { %1678 = vrsqrt.f32 %v619_v54  ;;  %vm647_vm12 = vweird.f32 %v619_v54 }
 0x38c   : > { %v1679_v58 = vpop.eup %1678 }
 0x38d   : > { %v642_v25 = vmul.f32 %v1679_v58, %v619_v54  ;;  %vm648_vm3 = vweird.f32 %v1679_v58 }
 0x38e   : > { %vm649_vm1 = vmor %vm647_vm12, %vm648_vm3 }
 0x38f   : > { %v643_v0 = vmul.f32 %v1679_v58, %v642_v25 }
 0x391   : > { %v644_v60 = vmul.f32 0.5, %v643_v0 }
 0x393   : > { %v645_v33 = vsub.f32 1.5, %v644_v60 }
 0x395   : > { %v646_v35 = vmul.f32 %v1679_v58, %v645_v33 }
 0x397   : > { %v650_v8 = vsel %vm649_vm1, %v1679_v58, %v646_v35 }
 0x3a5   : > { %v603_v55 = vpop.xlane.xlu1 %602 }
 0x3a6   : > { %v613_v21 = vmul.f32 %v603_v55, %v2048_v59 }
 0x3a8   : > { %v617_v10 = vadd.f32 1e-05, %v613_v21 }
 0x3aa   : > { %1680 = vrsqrt.f32 %v617_v10  ;;  %vm627_vm15 = vweird.f32 %v617_v10 }
 0x3ad   : > { %v612_v19 = vpop.xlane.xlu1 %611 }
 0x3ae   : > { %v616_v23 = vmul.f32 %v612_v19, %v2048_v59  ;;  %v662_v59 = vmul.f32 %v640_v31, %v2205_v20 }
 0x3b0   : > { %v1681_v57 = vpop.eup %1680  ;;  %v620_v45 = vadd.f32 1e-05, %v616_v23  ;;  %v669_v34 = vmul.f32 %v1639_v40, %v662_v59 }
 0x3b1   : > { %v622_v38 = vmul.f32 %v1681_v57, %v617_v10  ;;  %vm628_vm14 = vweird.f32 %v1681_v57 }
 0x3b2   : > { %1682 = vrsqrt.f32 %v620_v45  ;;  %vm629_vm4 = vmor %vm627_vm15, %vm628_vm14  ;;  %v676_v44 = vadd.f32 %v1640_v41, %v669_v34  ;;  %vm657_vm6 = vweird.f32 %v620_v45 }
 0x3b3   : > { %v623_v18 = vmul.f32 %v1681_v57, %v622_v38 }
 0x3b5   : > { %v624_v12 = vmul.f32 0.5, %v623_v18  ;;  %v1320_v16 = vpop.f32.mrf.mxu2 }
 0x3b6   : > { %v1321_v5 = vadd.f32 %v1641_v47, %v1320_v16 }
 0x3b7   : > { %v625_v26 = vsub.f32 1.5, %v624_v12 }
 0x3b8   : > { %v1683_v2 = vpop.eup %1682  ;;  %v1330_v51 = vmax.f32 %v1321_v5, 0.0 }
 0x3b9   : > { %v626_v22 = vmul.f32 %v1681_v57, %v625_v26  ;;  %v652_v61 = vmul.f32 %v1683_v2, %v620_v45  ;;  %vm658_vm5 = vweird.f32 %v1683_v2 }
 0x3ba   : > { %vm659_vm7 = vmor %vm657_vm6, %vm658_vm5 }
 0x3bb   : > { %v630_v17 = vsel %vm629_vm4, %v1681_v57, %v626_v22  ;;  %v653_v52 = vmul.f32 %v1683_v2, %v652_v61 }
 0x3bc   : > { %v661_v63 = vmul.f32 %v630_v17, %v2522_v14  ;;  %v663_v14 = vmul.f32 %v650_v8, %v2290_v30 }
 0x3bd   : > { %v654_v27 = vmul.f32 0.5, %v653_v52  ;;  %v1322_v36 = vpop.f32.mrf.mxu2 }
 0x3be   : > { %v668_v20 = vmul.f32 %v1639_v40, %v661_v63  ;;  %v1323_v56 = vadd.f32 %v1641_v47, %v1322_v36  ;;  %v670_v11 = vmul.f32 %v1639_v40, %v663_v14 }
 0x3bf   : > { %v655_v46 = vsub.f32 1.5, %v654_v27 }
 0x3c0   : > { %v675_v1 = vadd.f32 %v1640_v41, %v668_v20  ;;  %v1331_v4 = vmax.f32 %v1323_v56, 0.0  ;;  %v677_v7 = vadd.f32 %v1640_v41, %v670_v11 }
 0x3c1   : > { %v656_v32 = vmul.f32 %v1683_v2, %v655_v46 }
 0x3c2   : > { %v1334_v6 = vadd.f32 %v1330_v51, %v675_v1  ;;  %v1335_v29 = vadd.f32 %v1331_v4, %v676_v44 }
 0x3c3   : > { %v660_v24 = vsel %vm659_vm7, %v1683_v2, %v656_v32 }
 0x3c4   : > { %1338 = vst.msk [vmem:[%s496_s23] sm:$0xff] %vm569_vm0, %v1334_v6  ;;  %v664_v49 = vmul.f32 %v660_v24, %v2578_v39 }
 0x3c5   : > { %1339 = vst.msk [vmem:[%s496_s23 + $0x8] sm:$0xff] %vm569_vm0, %v1335_v29 }
 0x3c6   : > { %v1325_v62 = vpop.f32.mrf.mxu2  ;;  %v671_v30 = vmul.f32 %v1639_v40, %v664_v49 }
 0x3c7   : > { %v1326_v9 = vadd.f32 %v1641_v47, %v1325_v62 }
 0x3c8   : > { %v678_v54 = vadd.f32 %v1640_v41, %v671_v30 }
 0x3c9   : > { %v1332_v13 = vmax.f32 %v1326_v9, 0.0 }
 0x3cb   : > { %v1336_v50 = vadd.f32 %v1332_v13, %v677_v7 }
 0x3cd   : > { %1340 = vst.msk [vmem:[%s496_s23 + $0x10] sm:$0xff] %vm569_vm0, %v1336_v50 }
 0x3ce   : > { %v1327_v53 = vpop.f32.mrf.mxu2 }
 0x3cf   : > { %v1328_v42 = vadd.f32 %v1641_v47, %v1327_v53 }
 0x3d1   : > { %v1333_v15 = vmax.f32 %v1328_v42, 0.0 }
 0x3d3   : > { %v1337_v3 = vadd.f32 %v1333_v15, %v678_v54 }
 0x3d5   : > { %1341 = vst.msk [vmem:[%s496_s23 + $0x18] sm:$0xff] %vm569_vm0, %v1337_v3 }
 0x3d6 PF: > { %s25_s21 = sadd.s32 1, %s1822_s21  }
 0x3d7   : > { %p22_p7 = scmp.ge.s32.totalorder %s25_s21, 6  }
 0x3d9   :  { %24 = sbr.rel (!%p22_p7) target bundleno = 3 (0x3), region = 118 }
 0x3de   :  { %1364 = vsyncpa [#allocation3], 1 }
 0x3df   :  { %1366 = vsyncpa [#allocation3 + $0x1], 1 }
 0x3e0   :  { %1367 = vsyncpa [#allocation5], 1 }
 0x3e1   :  { %1368 = vsyncpa [#allocation8], 1 }

// kernel: convnext_feature_extractor_forward.9
= control target key start
LH: loop header
LB: loop body
LE: loop exit
PB: predicated region body
PF: predicated region fallthrough
CT: control target
= control target key end

     0   :  { %10 = vsyncpa [#allocation3], 0  ;;  %s681_s18 = smov 0   ;;  %s791_s0 = inlined_call_operand.vmem [shape: f32[32,128], index: 0, kind: input, shape index: {}]   ;;  %s792_s1 = inlined_call_operand.vmem [shape: f32[1,128], index: 1, kind: input, shape index: {}]   ;;  %s793_s2 = inlined_call_operand.vmem [shape: f32[1,128], index: 2, kind: input, shape index: {}]   ;;  %s794_s3 = inlined_call_operand.vmem [shape: bf16[128,64], index: 3, kind: input, shape index: {}]   ;;  %s795_s4 = inlined_call_operand.hbm [shape: f32[1,64], index: 4, kind: input, shape index: {}]   ;;  %s796_s5 = inlined_call_operand.vmem [shape: f32[32,64], index: 5, kind: output, shape index: {}]  }
   0x1 LB: > { %s517_s19 = sadd.s32 4294967295, %s644_s18   ;;  %p519_p0 = scmp.ge.s32.totalorder %s644_s18, 1  ;;  %s644_s18 = sphi %s681_s18, %s16_s18  }
   0x2   : > { %p157_p1 = scmp.lt.s32.totalorder %s644_s18, 5  ;;  %s178_s22 = sshll.u32 %s795_s4, 4  ;;  %s179_s22 = int_to_ptr.hbm [resolvable:$true] %s178_s22 }
   0x3   : > { %p576_p3 = scmp.eq.s32.totalorder %s517_s19, 0  ;;  %s646_s23 = smov [#allocation2]  }
   0x4   : > { %p158_p2 = pnand %p519_p0, %p157_p1  ;;  %s180_s24 = sshll.u32 %s646_s23, 4  ;;  %s181_s24 = int_to_ptr.vmem [resolvable:$true] %s180_s24 }
   0x6   : > { %p572_p4 = pneg %p158_p2  ;;  %200 = sbr.rel (%p158_p2) target bundleno = 645 (0x285), region = 40 }
   0x8   : > { %p573_p5 = pnand %p576_p3, %p572_p4 }
   0xa   : > { %575 = dma.hbm_to_vmem [thread:$0]  (!%p573_p5), %s179_s22, 16, %s181_s24, [#allocation3]  }
   0xb   : > { %639 = dma.done.wait (%p576_p3), [#allocation3], 16  }
   0xc   : > { %641 = vsyncadd (%p576_p3), [#allocation3], 4294967280  ;;  %p227_p6 = scmp.lt.s32.totalorder %s517_s19, 3  ;;  %s647_s29 = smov 96   ;;  %vm238_vm0 = vcmask 261120   ;;  %v650_v8 = vmov 32.0  }
   0xd   : > { %s648_s30 = smov 32   ;;  %s649_s6 = smov 64   ;;  %594 = vrcp.f32 %v650_v8  ;;  %v567_v38 = vld [vmem:[%s794_s3 + $0x38] sm:$0xff]  ;;  %v566_v39 = vld [vmem:[%s794_s3 + $0x30] sm:$0xff]  ;;  %v565_v40 = vld [vmem:[%s794_s3 + $0x28] sm:$0xff]  ;;  %vm357_vm14 = vcmask 523264  }
   0xe   : > { %s800_s19 = smov (!%p227_p6, %s517_s19), 3  ;;  %438 = vmatpush.bf16.msra.mxu0 %v567_v38  ;;  %v564_v42 = vld [vmem:[%s794_s3 + $0x20] sm:$0xff]  ;;  %v563_v44 = vld [vmem:[%s794_s3 + $0x18] sm:$0xff]  ;;  %v562_v49 = vld [vmem:[%s794_s3 + $0x10] sm:$0xff]  ;;  %vm359_vm15 = vcmask 785408  }
   0xf   : > { %s524_s25 = sshll.u32 %s800_s19, 3  ;;  %v561_v50 = vld [vmem:[%s794_s3 + $0x8] sm:$0xff]  ;;  %v560_v53 = vld [vmem:[%s794_s3] sm:$0xff] }
  0x10   : > { %s230_s28 = scalar_lea.vmem %s791_s0, %s524_s25  ;;  %s234_s7 = scalar_lea.vmem %s796_s5, %s524_s25 }
  0x11   : > { %v235_v0 = vld [vmem:[%s230_s28] sm:$0xff] }
  0x12   : > { %269 = vrot.lane.b32.xlu0 %v235_v0, %s647_s29  ;;  %327 = vrot.lane.b32.xlu1 %v235_v0, %s648_s30  ;;  %v239_v1 = vsel %vm238_vm0, %v235_v0, 0.0 }
  0x13   : > { %v595_v9 = vpop.eup %594  ;;  %439 = vmatpush.bf16.msra.mxu0 %v566_v39 }
  0x14   : > { %v243_v10 = vmul.f32 32.0, %v595_v9  ;;  %vm247_vm1 = vweird.f32 %v595_v9 }
  0x16   : > { %v244_v11 = vsub.f32 1.0, %v243_v10 }
  0x17   : > { %440 = vmatpush.bf16.msra.mxu0 %v565_v40 }
  0x18   : > { %v245_v12 = vmul.f32 %v595_v9, %v244_v11 }
  0x1a   : > { %298 = vrot.lane.b32.xlu0 %v235_v0, %s649_s6  ;;  %v246_v13 = vadd.f32 %v595_v9, %v245_v12 }
  0x1b   : > { %441 = vmatpush.bf16.msra.mxu0 %v564_v42 }
  0x1c   : > { %v707_v14 = vsel %vm247_vm1, %v595_v9, %v246_v13 }
  0x1f   : > { %442 = vmatpush.bf16.msra.mxu0 %v563_v44 }
  0x23   : > { %443 = vmatpush.bf16.msra.mxu0 %v562_v49 }
  0x27   : > { %444 = vmatpush.bf16.msra.mxu0 %v561_v50 }
  0x2b   : > { %445 = vmatpush.bf16.msra.mxu0 %v560_v53 }
  0x44   : > { %240 = vadd.xlane.f32.xlu0 %v239_v1 }
  0x84   : > { %v270_v2 = vpop.permute.xlu0 %269  ;;  %v328_v6 = vpop.permute.xlu1 %327 }
  0x85   : > { %v272_v3 = vsel %vm238_vm0, %v270_v2, 0.0  ;;  %v330_v7 = vsel %vm238_vm0, %v328_v6, 0.0 }
  0x86   : > { %273 = vadd.xlane.f32.xlu1 %v272_v3 }
  0x8c   : > { %v299_v4 = vpop.permute.xlu0 %298 }
  0x8d   : > { %v301_v5 = vsel %vm238_vm0, %v299_v4, 0.0 }
  0x8e   : > { %302 = vadd.xlane.f32.xlu2 %v301_v5 }
  0x96   : > { %331 = vadd.xlane.f32.xlu2 %v330_v7 }
  0xb7   : > { %v241_v15 = vpop.xlane.xlu0 %240 }
  0xb8   : > { %v249_v16 = vmul.f32 %v707_v14, %v241_v15 }
  0xba   : > { %v710_v17 = vsub.f32 %v235_v0, %v249_v16 }
  0xbc   : > { %v251_v18 = vmul.f32 %v710_v17, %v710_v17 }
  0xbe   : > { %v252_v19 = vsel %vm238_vm0, %v251_v18, 0.0 }
  0xbf   : > { %253 = vadd.xlane.f32.xlu1 %v252_v19 }
  0xf9   : > { %v274_v20 = vpop.xlane.xlu1 %273 }
  0xfa   : > { %v275_v21 = vmul.f32 %v274_v20, %v707_v14 }
  0xfc   : > { %v716_v22 = vsub.f32 %v235_v0, %v275_v21 }
  0xfe   : > { %v277_v23 = vmul.f32 %v716_v22, %v716_v22 }
 0x100   : > { %279 = vrot.lane.b32.xlu2 %v277_v23, %s647_s29 }
 0x101   : > { %v303_v24 = vpop.xlane.xlu2 %302 }
 0x102   : > { %v304_v25 = vmul.f32 %v303_v24, %v707_v14 }
 0x104   : > { %v722_v26 = vsub.f32 %v235_v0, %v304_v25 }
 0x106   : > { %v306_v27 = vmul.f32 %v722_v26, %v722_v26 }
 0x108   : > { %308 = vrot.lane.b32.xlu2 %v306_v27, %s649_s6 }
 0x109   : > { %v332_v28 = vpop.xlane.xlu2 %331 }
 0x10a   : > { %v333_v29 = vmul.f32 %v332_v28, %v707_v14 }
 0x10c   : > { %v728_v30 = vsub.f32 %v235_v0, %v333_v29  ;;  %v591_v29 = vld [vmem:[%s792_s1] ss:$0 sm:$0xff] }
 0x10e   : > { %v335_v31 = vmul.f32 %v728_v30, %v728_v30 }
 0x110   : > { %337 = vrot.lane.b32.xlu2 %v335_v31, %s648_s30 }
 0x132   : > { %v254_v41 = vpop.xlane.xlu1 %253 }
 0x133   : > { %v255_v43 = vmul.f32 %v254_v41, %v707_v14 }
 0x135   : > { %v256_v45 = vadd.f32 1e-06, %v255_v43 }
 0x137   : > { %596 = vrsqrt.f32 %v256_v45  ;;  %vm263_vm2 = vweird.f32 %v256_v45 }
 0x13d   : > { %v597_v54 = vpop.eup %596 }
 0x13e   : > { %v258_v58 = vmul.f32 %v597_v54, %v256_v45  ;;  %vm264_vm3 = vweird.f32 %v597_v54 }
 0x13f   : > { %vm764_vm6 = vmor %vm263_vm2, %vm264_vm3 }
 0x140   : > { %v259_v62 = vmul.f32 %v597_v54, %v258_v58 }
 0x142   : > { %v260_v3 = vmul.f32 0.5, %v259_v62 }
 0x144   : > { %v261_v7 = vsub.f32 1.5, %v260_v3 }
 0x146   : > { %v262_v13 = vmul.f32 %v597_v54, %v261_v7 }
 0x148   : > { %v266_v20 = vsel %vm764_vm6, %v597_v54, %v262_v13 }
 0x149   : > { %v267_v27 = vmul.f32 %v266_v20, %v710_v17 }
 0x15a   : > { %v280_v32 = vpop.permute.xlu2 %279 }
 0x15b   : > { %v282_v33 = vsel %vm238_vm0, %v280_v32, 0.0 }
 0x15c   : > { %283 = vadd.xlane.f32.xlu2 %v282_v33 }
 0x162   : > { %v309_v34 = vpop.permute.xlu2 %308 }
 0x163   : > { %v311_v35 = vsel %vm238_vm0, %v309_v34, 0.0 }
 0x164   : > { %312 = vadd.xlane.f32.xlu0 %v311_v35 }
 0x16a   : > { %v338_v36 = vpop.permute.xlu2 %337 }
 0x16b   : > { %v340_v37 = vsel %vm238_vm0, %v338_v36, 0.0  ;;  %v593_v36 = vld [vmem:[#allocation2] ss:$0 sm:$0xff] }
 0x16c   : > { %341 = vadd.xlane.f32.xlu1 %v340_v37 }
 0x1cf   : > { %v284_v46 = vpop.xlane.xlu2 %283 }
 0x1d0   : > { %v285_v47 = vmul.f32 %v284_v46, %v707_v14 }
 0x1d2   : > { %v286_v48 = vadd.f32 1e-06, %v285_v47 }
 0x1d4   : > { %598 = vrsqrt.f32 %v286_v48  ;;  %vm293_vm7 = vweird.f32 %v286_v48 }
 0x1d7   : > { %v313_v51 = vpop.xlane.xlu0 %312 }
 0x1d8   : > { %v314_v52 = vmul.f32 %v313_v51, %v707_v14 }
 0x1da   : > { %v599_v55 = vpop.eup %598  ;;  %v315_v56 = vadd.f32 1e-06, %v314_v52 }
 0x1db   : > { %v288_v57 = vmul.f32 %v599_v55, %v286_v48  ;;  %vm294_vm4 = vweird.f32 %v599_v55 }
 0x1dc   : > { %600 = vrsqrt.f32 %v315_v56  ;;  %vm295_vm8 = vmor %vm293_vm7, %vm294_vm4  ;;  %vm322_vm9 = vweird.f32 %v315_v56 }
 0x1dd   : > { %v289_v59 = vmul.f32 %v599_v55, %v288_v57 }
 0x1df   : > { %v342_v60 = vpop.xlane.xlu1 %341  ;;  %v290_v1 = vmul.f32 0.5, %v289_v59 }
 0x1e0   : > { %v343_v61 = vmul.f32 %v342_v60, %v707_v14 }
 0x1e1   : > { %v291_v5 = vsub.f32 1.5, %v290_v1 }
 0x1e2   : > { %v601_v63 = vpop.eup %600  ;;  %v344_v0 = vadd.f32 1e-06, %v343_v61 }
 0x1e3   : > { %v317_v2 = vmul.f32 %v601_v63, %v315_v56  ;;  %v292_v10 = vmul.f32 %v599_v55, %v291_v5  ;;  %vm323_vm5 = vweird.f32 %v601_v63 }
 0x1e4   : > { %602 = vrsqrt.f32 %v344_v0  ;;  %vm324_vm10 = vmor %vm322_vm9, %vm323_vm5  ;;  %vm351_vm12 = vweird.f32 %v344_v0 }
 0x1e5   : > { %v318_v4 = vmul.f32 %v601_v63, %v317_v2  ;;  %v296_v16 = vsel %vm295_vm8, %v599_v55, %v292_v10 }
 0x1e6   : > { %v297_v23 = vmul.f32 %v296_v16, %v716_v22 }
 0x1e7   : > { %v319_v6 = vmul.f32 0.5, %v318_v4 }
 0x1e8   : > { %v356_v32 = vsel %vm238_vm0, %v267_v27, %v297_v23 }
 0x1e9   : > { %v320_v8 = vsub.f32 1.5, %v319_v6 }
 0x1ea   : > { %v603_v9 = vpop.eup %602 }
 0x1eb   : > { %v346_v11 = vmul.f32 %v603_v9, %v344_v0  ;;  %v321_v12 = vmul.f32 %v601_v63, %v320_v8  ;;  %vm352_vm11 = vweird.f32 %v603_v9 }
 0x1ec   : > { %vm353_vm13 = vmor %vm351_vm12, %vm352_vm11 }
 0x1ed   : > { %v347_v15 = vmul.f32 %v603_v9, %v346_v11  ;;  %v325_v19 = vsel %vm324_vm10, %v601_v63, %v321_v12 }
 0x1ee   : > { %v326_v24 = vmul.f32 %v325_v19, %v722_v26  ;;  %v592_v26 = vld [vmem:[%s793_s2] ss:$0 sm:$0xff] }
 0x1ef   : > { %v348_v18 = vmul.f32 0.5, %v347_v15 }
 0x1f0   : > { %v358_v22 = vsel %vm357_vm14, %v356_v32, %v326_v24 }
 0x1f1   : > { %v349_v21 = vsub.f32 1.5, %v348_v18 }
 0x1f3   : > { %v350_v25 = vmul.f32 %v603_v9, %v349_v21 }
 0x1f5   : > { %v354_v28 = vsel %vm353_vm13, %v603_v9, %v350_v25 }
 0x1f6   : > { %v355_v31 = vmul.f32 %v354_v28, %v728_v30 }
 0x1f8   : > { %v360_v17 = vsel %vm359_vm15, %v358_v22, %v355_v31 }
 0x1f9   : > { %v364_v33 = vmul.f32 %v591_v29, %v360_v17 }
 0x1fb   : > { %v368_v34 = vadd.f32 %v592_v26, %v364_v33 }
 0x1fd   : > { %v369_v35 = vpack.c.bf16 %v368_v34, %v368_v34 }
 0x1ff   : > { %446 = vmatmul.bf16.vlgmr.msra.gmra.mxu0 %v369_v35 }
 0x27c   : > { %v447_v30 = vpop.f32.mrf.mxu0 }
 0x27d   : > { %v448_v37 = vadd.f32 %v593_v36, %v447_v30 }
 0x27f   : > { %451 = vst.msk [vmem:[%s234_s7] sm:$0xff] %vm357_vm14, %v448_v37 }
 0x284   : > { %v449_v38 = vpop.f32.mrf.mxu0 }
 0x285 PF: > { %s16_s18 = sadd.s32 1, %s644_s18  }
 0x286   : > { %p13_p7 = scmp.ge.s32.totalorder %s16_s18, 6  }
 0x288   :  { %15 = sbr.rel (!%p13_p7) target bundleno = 1 (0x1), region = 75 }
 0x28d   :  { %471 = vsyncpa [#allocation3], 1 }
 0x28e   :  { %473 = vsyncpa [#allocation3 + $0x1], 1 }

// kernel: convnext_feature_extractor_forward.7
= control target key start
LH: loop header
LB: loop body
LE: loop exit
PB: predicated region body
PF: predicated region fallthrough
CT: control target
= control target key end

     0   :  { %s2869_s17 = smov 0   ;;  %s5104_s0 = inlined_call_operand.vmem [shape: f32[2,118,32], index: 0, kind: input, shape index: {}]   ;;  %s5105_s1 = inlined_call_operand.vmem [shape: f32[64,7], index: 1, kind: input, shape index: {}]   ;;  %s5106_s2 = inlined_call_operand.vmem [shape: f32[49,32], index: 2, kind: input, shape index: {}]   ;;  %s5107_s3 = inlined_call_operand.vmem [shape: f32[1,32], index: 3, kind: input, shape index: {}]   ;;  %s5108_s4 = inlined_call_operand.vmem [shape: f32[1,32], index: 4, kind: input, shape index: {}]   ;;  %s5109_s5 = inlined_call_operand.vmem [shape: f32[1,32], index: 5, kind: input, shape index: {}]   ;;  %s5110_s6 = inlined_call_operand.vmem [shape: bf16[32,128], index: 6, kind: input, shape index: {}]   ;;  %s5111_s7 = inlined_call_operand.vmem [shape: f32[1,128], index: 7, kind: input, shape index: {}]   ;;  %s5112_s8 = inlined_call_operand.vmem [shape: bf16[128,32], index: 8, kind: input, shape index: {}]   ;;  %s5113_s9 = inlined_call_operand.vmem [shape: f32[1,32], index: 9, kind: input, shape index: {}]   ;;  %s5114_s10 = inlined_call_operand.vmem [shape: f32[1,32], index: 10, kind: input, shape index: {}]   ;;  %s5115_s11 = inlined_call_operand.vmem [shape: f32[2,118,32], index: 11, kind: output, shape index: {}]  }
   0x1 LB: > { %s2576_s18 = sadd.s32 4294967295, %s2798_s17   ;;  %p2580_p0 = scmp.ge.s32.totalorder %s2798_s17, 1  ;;  %s2798_s17 = sphi %s2869_s17, %s21_s17  }
   0x2   : > { %p337_p1 = scmp.lt.s32.totalorder %s2798_s17, 3 }
   0x4   : > { %p338_p2 = pnand %p2580_p0, %p337_p1 }
   0x6   : > { %341 = sbr.rel (%p338_p2) target bundleno = 993 (0x3e1), region = 64 }
   0xb   : > { %v2880_v0 = vld [vmem:[%s5105_s1 + $0x18] sm:$0xff]  ;;  %v411_v1 = vld [vmem:[%s5105_s1 + $0x8] sm:$0xff]  ;;  %v5129_v2 = vmov 4   ;;  %v5116_v3 = vmov 2   ;;  %v5119_v4 = vmov 1   ;;  %v2893_v5 = vld [vmem:[%s5105_s1 + $0x20] sm:$0xff] }
   0xc   : > { %2684 = vset.pattern.permute.xlu0 %v5129_v2  ;;  %2676 = vset.pattern.permute.xlu2 %v5116_v3  ;;  %v412_v6 = vld [vmem:[%s5105_s1 + $0x10] sm:$0xff]  ;;  %v5117_v7 = vmov 3   ;;  %v2906_v8 = vld [vmem:[%s5105_s1 + $0x28] sm:$0xff]  ;;  %v5125_v9 = vmov 0   ;;  %v5121_v11 = vmov 5   ;;  %v2931_v12 = vld [vmem:[%s5105_s1 + $0x38] sm:$0xff] }
   0xd   : > { %2675 = vset.pattern.permute.xlu1 %v5119_v4  ;;  %1438 = vperm.xlu0 %2684, %v2880_v0   ;;  %v2919_v10 = vld [vmem:[%s5105_s1 + $0x30] sm:$0xff]  ;;  %5376 = vst [vmem:[#allocation2_spill] sm:$0xff] %v2931_v12  ;;  %p377_p3 = scmp.lt.s32.totalorder %s2576_s18, 1  ;;  %v5127_v13 = vmov 6   ;;  %v2963_v16 = vld [vmem:[%s5106_s2] sm:$0xff]  ;;  %v2968_v17 = vld [vmem:[%s5106_s2 + $0x8] sm:$0xff] }
   0xe   : > { %736 = vperm.xlu1 %2675, %v2880_v0   ;;  %964 = vperm.xlu2 %2676, %v411_v1   ;;  %5378 = vst [vmem:[#allocation4_spill] sm:$0xff] %v2963_v16  ;;  %v2973_v18 = vld [vmem:[%s5106_s2 + $0x10] sm:$0xff]  ;;  %v2976_v19 = vperm.slane %v2963_v16, 2  ;;  %v2979_v20 = vperm.slane %v2968_v17, 1  ;;  %v2998_v26 = vperm.slane %v2963_v16, 1  ;;  %v3001_v27 = vperm.slane %v2968_v17, 0 }
   0xf   : > { %s5792_s18 = smov (!%p377_p3, %s2576_s18), 1  ;;  %5379 = vst [vmem:[#allocation5_spill] sm:$0xff] %v2968_v17  ;;  %v2983_v21 = vperm.slane %v2973_v18, 0  ;;  %v3006_v30 = vperm.slane %v2973_v18, 7  ;;  %v3011_v31 = vld [vmem:[%s5106_s2 + $0x18] sm:$0xff]  ;;  %v3018_v34 = vperm.slane %v2968_v17, 7 }
  0x10   : > { %s2657_s14 = smul.u32 120, %s5792_s18  ;;  %5380 = vst [vmem:[#allocation6_spill] sm:$0xff] %v2973_v18  ;;  %v3026_v36 = vld [vmem:[%s5106_s2 + $0x20] sm:$0xff]  ;;  %v3031_v39 = vperm.slane %v3011_v31, 6  ;;  %v3038_v42 = vperm.slane %v2973_v18, 6  ;;  %v3049_v44 = vld [vmem:[%s5106_s2 + $0x28] sm:$0xff] }
  0x11   : > { %5381 = vst [vmem:[#allocation7_spill] sm:$0xff] %v2976_v19  ;;  %v3052_v45 = vperm.slane %v3026_v36, 5  ;;  %v3061_v51 = vperm.slane %v3011_v31, 5  ;;  %v3067_v53 = vperm.slane %v3049_v44, 4  ;;  %v3070_v54 = vperm.slane %v2963_v16, 0 }
  0x12   : > { %s2952_s19 = scalar_lea.vmem %s5104_s0, %s2657_s14  ;;  %5382 = vst [vmem:[#allocation8_spill] sm:$0xff] %v2979_v20  ;;  %v3073_v55 = vperm.slane %v2963_v16, 7  ;;  %vm984_vm0 = vcmask 1041408   ;;  %vm750_vm1 = vcmask 1040384   ;;  %vm793_vm2 = vcmask 1046528   ;;  %s5046_s27 = scalar_lea.vmem %s5115_s11, %s2657_s14 }
  0x13   : > { %v2955_v14 = vld [vmem:[%s2952_s19 + $0x10] sm:$0xff]  ;;  %v2958_v15 = vld [vmem:[%s2952_s19 + $0x18] sm:$0xff]  ;;  %5383 = vst [vmem:[#allocation9_spill] sm:$0xff] %v2983_v21  ;;  %v2987_v22 = vld [vmem:[%s2952_s19 + $0x20] sm:$0xff]  ;;  %vm1452_vm3 = vcmask 1043456   ;;  %vm1218_vm4 = vcmask 1042432  }
  0x14   : > { %5377 = vst [vmem:[#allocation3_spill] sm:$0xff] %v2958_v15  ;;  %v830_v23 = vmul.f32 %v2976_v19, %v2955_v14  ;;  %v849_v24 = vmul.f32 %v2979_v20, %v2958_v15  ;;  %v2995_v25 = vld [vmem:[%s2952_s19 + $0x28] sm:$0xff]  ;;  %v868_v29 = vmul.f32 %v2983_v21, %v2987_v22  ;;  %v598_v32 = vmul.f32 %v2998_v26, %v2987_v22  ;;  %v3021_v35 = vld [vmem:[%s2952_s19 + $0x30] sm:$0xff]  ;;  %v3043_v43 = vld [vmem:[%s2952_s19 + $0x38] sm:$0xff] }
  0x15   : > { %2685 = vset.pattern.permute.xlu0 %v5119_v4  ;;  %5384 = vst [vmem:[#allocation10_spill] sm:$0xff] %v2998_v26  ;;  %v617_v33 = vmul.f32 %v3001_v27, %v2995_v25  ;;  %v887_v38 = vmul.f32 %v3006_v30, %v2995_v25  ;;  %v636_v41 = vmul.f32 %v3018_v34, %v3021_v35  ;;  %v3064_v52 = vld [vmem:[%s2952_s19 + $0x40] sm:$0xff]  ;;  %vm1261_vm5 = vcmask 1044480  }
  0x16   : > { %739 = vperm.xlu1 %2675, %v2893_v5   ;;  %967 = vperm.xlu2 %2676, %v412_v6   ;;  %5385 = vst [vmem:[#allocation11_spill] sm:$0xff] %v3001_v27  ;;  %v858_v28 = vadd.f32 %v849_v24, %v830_v23  ;;  %v906_v47 = vmul.f32 %v3031_v39, %v3021_v35  ;;  %v3096_v23 = vperm.slane %v3026_v36, 4  ;;  %vm1027_vm6 = vcmask 1045504  }
  0x17   : > { %730 = vperm.xlu0 %2685, %v411_v1   ;;  %5386 = vst [vmem:[#allocation12_spill] sm:$0xff] %v3006_v30  ;;  %v626_v40 = vadd.f32 %v617_v33, %v598_v32  ;;  %v655_v50 = vmul.f32 %v3038_v42, %v3043_v43  ;;  %v596_v56 = vmul.f32 %v2998_v26, %v2955_v14  ;;  %v3107_v33 = vperm.slane %v2973_v18, 5 }
  0x18   : > { %5387 = vst [vmem:[#allocation13_spill] sm:$0xff] %v3011_v31  ;;  %v877_v37 = vadd.f32 %v868_v29, %v858_v28  ;;  %v925_v57 = vmul.f32 %v3052_v45, %v3043_v43  ;;  %v597_v58 = vmul.f32 %v2998_v26, %v2958_v15  ;;  %v615_v59 = vmul.f32 %v3001_v27, %v2958_v15  ;;  %v3102_v28 = vld [vmem:[%s2952_s19 + $0x48] sm:$0xff] }
  0x19   : > { %5388 = vst [vmem:[#allocation14_spill] sm:$0xff] %v3018_v34  ;;  %v645_v49 = vadd.f32 %v636_v41, %v626_v40  ;;  %v616_v60 = vmul.f32 %v3001_v27, %v2987_v22  ;;  %v422_v62 = vmul.f32 %v3070_v54, %v2958_v15  ;;  %v439_v63 = vmul.f32 %v3073_v55, %v2987_v22 }
  0x1a   : > { %5389 = vst [vmem:[#allocation15_spill] sm:$0xff] %v3026_v36  ;;  %v896_v46 = vadd.f32 %v887_v38, %v877_v37  ;;  %v634_v24 = vmul.f32 %v3018_v34, %v2987_v22  ;;  %v624_v37 = vadd.f32 %v615_v59, %v596_v56  ;;  %v635_v40 = vmul.f32 %v3018_v34, %v2995_v25 }
  0x1b   : > { %5390 = vst [vmem:[#allocation16_spill] sm:$0xff] %v3031_v39  ;;  %v447_v29 = vadd.f32 %v439_v63, %v422_v62  ;;  %v625_v38 = vadd.f32 %v616_v60, %v597_v58  ;;  %v473_v56 = vmul.f32 %v3107_v33, %v3021_v35  ;;  %v3123_v58 = vperm.slane %v3011_v31, 4 }
  0x1c   : > { %5391 = vst [vmem:[#allocation17_spill] sm:$0xff] %v3038_v42  ;;  %v915_v61 = vadd.f32 %v906_v47, %v896_v46  ;;  %v944_v46 = vmul.f32 %v3067_v53, %v3064_v52  ;;  %v3126_v60 = vperm.slane %v3049_v44, 3  ;;  %vm2006_vm7 = vcmask 261120  }
  0x1d   : > { %5392 = vst [vmem:[#allocation18_spill] sm:$0xff] %v3049_v44 }
  0x1e   : > { %2677 = vset.pattern.permute.xlu1 %v5116_v3  ;;  %2678 = vset.pattern.permute.xlu2 %v5117_v7  ;;  %5393 = vst [vmem:[#allocation19_spill] sm:$0xff] %v3052_v45  ;;  %v934_v41 = vadd.f32 %v925_v57, %v915_v61  ;;  %v643_v57 = vadd.f32 %v634_v24, %v624_v37  ;;  %v3143_v37 = vperm.slane %v3049_v44, 2 }
  0x1f   : > { %973 = vperm.xlu1 %2677, %v2893_v5   ;;  %733 = vperm.xlu0 %2685, %v412_v6   ;;  %5395 = vst [vmem:[#allocation21_spill] sm:$0xff] %v3061_v51  ;;  %v653_v61 = vmul.f32 %v3038_v42, %v2995_v25  ;;  %v490_v24 = vmul.f32 %v3123_v58, %v3043_v43 }
  0x20   : > { %1198 = vperm.xlu2 %2678, %v411_v1   ;;  %5396 = vst [vmem:[#allocation22_spill] sm:$0xff] %v3067_v53  ;;  %v3224_v53 = vperm.slane %v3026_v36, 0 }
  0x21   : > { %5397 = vst [vmem:[#allocation23_spill] sm:$0xff] %v3070_v54 }
  0x22   : > { %5398 = vst [vmem:[#allocation24_spill] sm:$0xff] %v3073_v55 }
  0x23   : > { %5400 = vst [vmem:[#allocation26_spill] sm:$0xff] %v3096_v23 }
  0x24   : > { %5401 = vst [vmem:[#allocation27_spill] sm:$0xff] %v3107_v33 }
  0x25   : > { %5403 = vst [vmem:[#allocation29_spill] sm:$0xff] %v3123_v58 }
  0x26   : > { %5404 = vst [vmem:[#allocation30_spill] sm:$0xff] %v3126_v60 }
  0x27   : > { %2679 = vset.pattern.permute.xlu1 %v5117_v7  ;;  %742 = vperm.xlu0 %2685, %v2906_v8   ;;  %5406 = vst [vmem:[#allocation32_spill] sm:$0xff] %v3143_v37 }
  0x28   : > { %1204 = vperm.xlu2 %2678, %v2880_v0   ;;  %1201 = vperm.xlu1 %2679, %v412_v6   ;;  %5417 = vst [vmem:[#allocation43_spill] sm:$0xff] %v3224_v53 }
  0x2f   : > { %2690 = vset.pattern.permute.xlu0 %v5117_v7 }
  0x30   : > { %2681 = vset.pattern.permute.xlu2 %v5125_v9  ;;  %2680 = vset.pattern.permute.xlu1 %v5125_v9 }
  0x31   : > { %1207 = vperm.xlu0 %2690, %v2893_v5   ;;  %554 = vperm.xlu2 %2681, %v2880_v0  }
  0x32   : > { %549 = vperm.xlu1 %2680, %v412_v6  }
  0x39   : > { %1213 = vperm.xlu0 %2690, %v2919_v10   ;;  %2683 = vset.pattern.permute.xlu2 %v5129_v2 }
  0x3a   : > { %2682 = vset.pattern.permute.xlu1 %v5129_v2  ;;  %1435 = vperm.xlu2 %2683, %v412_v6   ;;  %v3187_v2 = vperm.slane %v2968_v17, 3 }
  0x3b   : > { %1432 = vperm.xlu1 %2682, %v411_v1  }
  0x3c   : > { %5411 = vst [vmem:[#allocation37_spill] sm:$0xff] %v3187_v2 }
  0x41   : > { %2695 = vset.pattern.permute.xlu0 %v5116_v3 }
  0x42   : > { %970 = vperm.xlu0 %2695, %v2880_v0   ;;  %2686 = vset.pattern.permute.xlu2 %v5121_v11 }
  0x43   : > { %1441 = vperm.xlu1 %2682, %v2893_v5   ;;  %1665 = vperm.xlu2 %2686, %v411_v1  }
  0x4a   : > { %982 = vperm.xlu0 %2695, %v2931_v12  }
  0x4b   : > { %2687 = vset.pattern.permute.xlu1 %v5121_v11  ;;  %1671 = vperm.xlu2 %2686, %v2880_v0  }
  0x4c   : > { %1668 = vperm.xlu1 %2687, %v412_v6  }
  0x52   : > { %2704 = vset.pattern.permute.xlu0 %v5121_v11 }
  0x53   : > { %1674 = vperm.xlu0 %2704, %v2893_v5   ;;  %2689 = vset.pattern.permute.xlu2 %v5127_v13 }
  0x54   : > { %2688 = vset.pattern.permute.xlu1 %v5127_v13  ;;  %1900 = vperm.xlu2 %2689, %v412_v6   ;;  %v674_v6 = vmul.f32 %v3061_v51, %v3064_v52  ;;  %v3179_v13 = vperm.slane %v2963_v16, 3 }
  0x55   : > { %1897 = vperm.xlu1 %2688, %v411_v1   ;;  %v664_v1 = vadd.f32 %v655_v50, %v645_v49  ;;  %v693_v49 = vmul.f32 %v3096_v23, %v3102_v28 }
  0x56   : > { %5408 = vst [vmem:[#allocation34_spill] sm:$0xff] %v3179_v13 }
  0x57   : > { %v683_v59 = vadd.f32 %v674_v6, %v664_v1  ;;  %v3138_v1 = vperm.slane %v3026_v36, 3 }
  0x59   : > { %5405 = vst [vmem:[#allocation31_spill] sm:$0xff] %v3138_v1 }
  0x5b   : > { %1677 = vperm.xlu0 %2704, %v2906_v8  }
  0x5c   : > { %1906 = vperm.xlu2 %2689, %v2893_v5  }
  0x5d   : > { %1903 = vperm.xlu1 %2688, %v2880_v0   ;;  %v3090_v0 = vperm.slane %v2968_v17, 6 }
  0x5f   : > { %5399 = vst [vmem:[#allocation25_spill] sm:$0xff] %v3090_v0  ;;  %v456_v32 = vmul.f32 %v3090_v0, %v2995_v25 }
  0x61   : > { %v464_v50 = vadd.f32 %v456_v32, %v447_v29  ;;  %v644_v29 = vadd.f32 %v635_v40, %v625_v38  ;;  %v654_v32 = vmul.f32 %v3038_v42, %v3021_v35  ;;  %v662_v38 = vadd.f32 %v653_v61, %v643_v57 }
  0x62   : > { %v672_v40 = vmul.f32 %v3061_v51, %v3021_v35  ;;  %v599_v57 = vmul.f32 %v2998_v26, %v2995_v25  ;;  %v618_v61 = vmul.f32 %v3001_v27, %v3021_v35  ;;  %v1318_v27 = vmul.f32 %v3187_v2, %v2987_v22 }
  0x63   : > { %1683 = vperm.xlu0 %2704, %v2931_v12   ;;  %v481_v6 = vadd.f32 %v473_v56, %v464_v50  ;;  %v702_v56 = vadd.f32 %v693_v49, %v683_v59  ;;  %v663_v11 = vadd.f32 %v654_v32, %v644_v29  ;;  %v524_v59 = vmul.f32 %v3143_v37, %v3102_v28 }
  0x64   : > { %2692 = vset.pattern.permute.xlu2 %v5116_v3  ;;  %v691_v29 = vmul.f32 %v3096_v23, %v3043_v43  ;;  %v692_v32 = vmul.f32 %v3096_v23, %v3064_v52 }
  0x65   : > { %2691 = vset.pattern.permute.xlu1 %v5119_v4  ;;  %976 = vperm.xlu2 %2692, %v2906_v8   ;;  %v498_v49 = vadd.f32 %v490_v24, %v481_v6  ;;  %v3184_v24 = vperm.slane %v2963_v16, 4 }
  0x66   : > { %745 = vperm.xlu1 %2691, %v2919_v10  }
  0x67   : > { %5410 = vst [vmem:[#allocation36_spill] sm:$0xff] %v3184_v24 }
  0x68   : > { %v3056_v48 = vpop.permute.xlu2 %964 }
  0x69   : > { %5394 = vst [vmem:[#allocation20_spill] sm:$0xff] %v3056_v48  ;;  %v5123_v62 = vrot.slane %v3056_v48, 6  ;;  %v3190_v48 = vperm.slane %v2973_v18, 2 }
  0x6b   : > { %2713 = vset.pattern.permute.xlu0 %v5125_v9  ;;  %5412 = vst [vmem:[#allocation38_spill] sm:$0xff] %v3190_v48  ;;  %v1337_v26 = vmul.f32 %v3190_v48, %v2995_v25 }
  0x6d   : > { %2694 = vset.pattern.permute.xlu2 %v5117_v7  ;;  %v953_v7 = vadd.f32 %v944_v46, %v934_v41  ;;  %v673_v41 = vmul.f32 %v3061_v51, %v3043_v43  ;;  %v507_v46 = vmul.f32 %v3138_v1, %v3064_v52 }
  0x6e   : > { %2693 = vset.pattern.permute.xlu1 %v5116_v3  ;;  %1210 = vperm.xlu2 %2694, %v2906_v8   ;;  %v3133_v3 = vld [vmem:[%s2952_s19 + $0x50] sm:$0xff] }
  0x6f   : > { %979 = vperm.xlu1 %2693, %v2919_v10   ;;  %v3147_v4 = vmul.f32 %v3126_v60, %v3133_v3  ;;  %v682_v6 = vadd.f32 %v673_v41, %v663_v11  ;;  %v637_v11 = vmul.f32 %v3018_v34, %v3043_v43  ;;  %v1299_v41 = vmul.f32 %v3184_v24, %v2958_v15 }
  0x70   : > { %v3116_v47 = vpop.permute.xlu2 %967  ;;  %v1064_v34 = vmul.f32 %v3179_v13, %v2955_v14 }
  0x71   : > { %5402 = vst [vmem:[#allocation28_spill] sm:$0xff] %v3116_v47  ;;  %v5124_v63 = vrot.slane %v3116_v47, 6  ;;  %v3213_v47 = vperm.slane %v2973_v18, 1  ;;  %v656_v18 = vmul.f32 %v3038_v42, %v3064_v52  ;;  %v701_v1 = vadd.f32 %v692_v32, %v682_v6 }
  0x72   : > { %v3275_v32 = vperm.slane %v3049_v44, 6 }
  0x73   : > { %v989_v50 = vsel %vm984_vm0, %v5123_v62, %v5124_v63  ;;  %v681_v63 = vadd.f32 %v672_v40, %v662_v38  ;;  %v3198_v38 = vperm.slane %v3011_v31, 1  ;;  %v627_v40 = vadd.f32 %v618_v61, %v599_v57  ;;  %5416 = vst [vmem:[#allocation42_spill] sm:$0xff] %v3213_v47 }
  0x74   : > { %v3174_v62 = vmul.f32 %v989_v50, %v953_v7  ;;  %v3195_v7 = vld [vmem:[%s5105_s1] sm:$0xff]  ;;  %v3203_v50 = vperm.slane %v2968_v17, 2  ;;  %v515_v57 = vadd.f32 %v507_v46, %v498_v49  ;;  %v711_v61 = vmul.f32 %v3126_v60, %v3102_v28  ;;  %5424 = vst [vmem:[#allocation48_spill] sm:$0xff] %v3275_v32 }
  0x75   : > { %5413 = vst [vmem:[#allocation39_spill] sm:$0xff] %v3195_v7  ;;  %539 = vperm.xlu0 %2713, %v3195_v7   ;;  %v1065_v7 = vmul.f32 %v3179_v13, %v2958_v15  ;;  %v1327_v17 = vadd.f32 %v1318_v27, %v1299_v41  ;;  %v1356_v16 = vmul.f32 %v3198_v38, %v3021_v35  ;;  %v5418_v46 = vmov 4  }
  0x76   : > { %2697 = vset.pattern.permute.xlu2 %v5125_v9  ;;  %5407 = vst [vmem:[#allocation33_spill] sm:$0xff] %v3174_v62  ;;  %v646_v45 = vadd.f32 %v637_v11, %v627_v40  ;;  %v1083_v39 = vmul.f32 %v3203_v50, %v2958_v15  ;;  %v1084_v27 = vmul.f32 %v3203_v50, %v2987_v22  ;;  %v3236_v41 = vperm.slane %v3011_v31, 0  ;;  %v5436_v62 = vld [vmem:[#allocation29_spill] sm:$0xff] }
  0x77   : > { %2696 = vset.pattern.permute.xlu1 %v5125_v9  ;;  %564 = vperm.xlu2 %2697, %v2906_v8   ;;  %v710_v9 = vmul.f32 %v3126_v60, %v3064_v52  ;;  %5414 = vst [vmem:[#allocation40_spill] sm:$0xff] %v3198_v38  ;;  %v1346_v42 = vadd.f32 %v1337_v26, %v1327_v17  ;;  %v3255_v26 = vperm.slane %v3026_v36, 7 }
  0x78   : > { %559 = vperm.xlu1 %2696, %v2893_v5   ;;  %5415 = vst [vmem:[#allocation41_spill] sm:$0xff] %v3203_v50  ;;  %v1102_v37 = vmul.f32 %v3213_v47, %v2987_v22  ;;  %v1103_v40 = vmul.f32 %v3213_v47, %v2995_v25  ;;  %v700_v11 = vadd.f32 %v691_v29, %v681_v63  ;;  %v5422_v63 = vmov 6  }
  0x79   : > { %5420 = vst [vmem:[#allocation45_spill] sm:$0xff] %v3236_v41  ;;  %v1092_v21 = vadd.f32 %v1083_v39, %v1064_v34  ;;  %v1093_v58 = vadd.f32 %v1084_v27, %v1065_v7  ;;  %v1365_v38 = vadd.f32 %v1356_v16, %v1346_v42  ;;  %v1375_v17 = vmul.f32 %v3224_v53, %v3043_v43 }
  0x7a   : > { %v3181_v5 = vpop.permute.xlu2 %1198  ;;  %5421 = vst [vmem:[#allocation46_spill] sm:$0xff] %v3255_v26  ;;  %v665_v12 = vadd.f32 %v656_v18, %v646_v45  ;;  %v675_v34 = vmul.f32 %v3061_v51, %v3102_v28  ;;  %v1121_v39 = vmul.f32 %v3236_v41, %v2995_v25  ;;  %v1122_v42 = vmul.f32 %v3236_v41, %v3021_v35 }
  0x7b   : > { %5409 = vst [vmem:[#allocation35_spill] sm:$0xff] %v3181_v5  ;;  %v1112_v16 = vadd.f32 %v1103_v40, %v1093_v58  ;;  %v3268_v29 = vadd.f32 %v524_v59, %v515_v57  ;;  %v3270_v18 = vadd.f32 %v710_v9, %v700_v11  ;;  %v3272_v45 = vadd.f32 %v711_v61, %v701_v1  ;;  %v3280_v58 = vld [vmem:[%s2952_s19 + $0x58] sm:$0xff] }
  0x7c   : > { %v1384_v6 = vadd.f32 %v1375_v17, %v1365_v38  ;;  %5425 = vst [vmem:[#allocation49_spill] sm:$0xff] %v3280_v58  ;;  %v1085_v59 = vmul.f32 %v3203_v50, %v2995_v25  ;;  %v684_v7 = vadd.f32 %v675_v34, %v665_v12  ;;  %v694_v1 = vmul.f32 %v3096_v23, %v3133_v3 }
  0x7d   : > { %2718 = vset.pattern.permute.xlu0 %v5422_v63  ;;  %v3290_v57 = vperm.slane %v3026_v36, 6  ;;  %v1131_v27 = vadd.f32 %v1122_v42, %v1112_v16  ;;  %v5427_v17 = vmov 5   ;;  %v1413_v19 = vmul.f32 %v3275_v32, %v3102_v28 }
  0x7e   : > { %v3318_v51 = vadd.f32 %v694_v1, %v684_v7  ;;  %v455_v1 = vmul.f32 %v3090_v0, %v2987_v22  ;;  %v1336_v0 = vmul.f32 %v3190_v48, %v2987_v22 }
  0x7f   : > { %2699 = vset.pattern.permute.xlu2 %v5418_v46  ;;  %v3229_v49 = vpop.permute.xlu0 %1438  ;;  %5426 = vst [vmem:[#allocation50_spill] sm:$0xff] %v3290_v57 }
  0x80   : > { %5419 = vst [vmem:[#allocation44_spill] sm:$0xff] %v3229_v49  ;;  %2698 = vset.pattern.permute.xlu1 %v5418_v46  ;;  %1447 = vperm.xlu2 %2699, %v2919_v10   ;;  %v3240_v30 = vpop.permute.xlu1 %736  ;;  %v3250_v46 = vadd.f32 %v3147_v4, %v702_v56  ;;  %v1111_v4 = vadd.f32 %v1102_v37, %v1092_v21  ;;  %v3266_v56 = vperm.slane %v3011_v31, 7 }
  0x81   : > { %1444 = vperm.xlu1 %2698, %v2906_v8   ;;  %v1394_v21 = vmul.f32 %v3255_v26, %v3064_v52  ;;  %v1066_v37 = vmul.f32 %v3179_v13, %v2987_v22  ;;  %v756_v16 = vrot.slane %v3240_v30, 7 }
  0x82   : > { %v3247_v20 = vpop.permute.xlu2 %1204  ;;  %5423 = vst [vmem:[#allocation47_spill] sm:$0xff] %v3266_v56  ;;  %v1130_v61 = vadd.f32 %v1121_v39, %v1111_v4  ;;  %v1140_v40 = vmul.f32 %v3266_v56, %v3021_v35  ;;  %v1141_v11 = vmul.f32 %v3266_v56, %v3043_v43  ;;  %v3308_v39 = vmul.f32 %v3126_v60, %v3280_v58 }
  0x83   : > { %v3311_v4 = vperm.slane %v3049_v44, 5  ;;  %v1403_v42 = vadd.f32 %v1394_v21, %v1384_v6  ;;  %v1094_v9 = vadd.f32 %v1085_v59, %v1066_v37  ;;  %v1159_v60 = vmul.f32 %v3290_v57, %v3043_v43 }
  0x84   : > { %v1149_v50 = vadd.f32 %v1140_v40, %v1130_v61  ;;  %v1150_v30 = vadd.f32 %v1141_v11, %v1131_v27  ;;  %v1160_v6 = vmul.f32 %v3290_v57, %v3064_v52  ;;  %v438_v21 = vmul.f32 %v3073_v55, %v2958_v15 }
  0x85   : > { %5429 = vst [vmem:[#allocation52_spill] sm:$0xff] %v3311_v4  ;;  %v3331_v59 = vmul.f32 %v3311_v4, %v3064_v52  ;;  %v3335_v7 = vmul.f32 %v3311_v4, %v3102_v28  ;;  %v3339_v61 = vadd.f32 %v1413_v19, %v1403_v42  ;;  %v1123_v40 = vmul.f32 %v3236_v41, %v3043_v43 }
  0x86   : > { %v1298_v55 = vmul.f32 %v3184_v24, %v2955_v14  ;;  %v3352_v19 = vadd.f32 %v1159_v60, %v1149_v50  ;;  %v1161_v60 = vmul.f32 %v3290_v57, %v3102_v28  ;;  %v489_v44 = vmul.f32 %v5436_v62, %v3021_v35  ;;  %v5438_v62 = vld [vmem:[#allocation9_spill] sm:$0xff] }
  0x87   : > { %v869_v31 = vmul.f32 %v5438_v62, %v2995_v25 }
  0x88   : > { %2701 = vset.pattern.permute.xlu2 %v5422_v63  ;;  %v3293_v38 = vpop.permute.xlu1 %739 }
  0x89   : > { %2700 = vset.pattern.permute.xlu1 %v5427_v17  ;;  %1909 = vperm.xlu2 %2701, %v2906_v8   ;;  %v3302_v34 = vpop.permute.xlu0 %730  ;;  %v1104_v8 = vmul.f32 %v3213_v47, %v3021_v35  ;;  %v5188_v12 = vrot.slane %v3293_v38, 7  ;;  %v421_v17 = vmul.f32 %v3070_v54, %v2955_v14  ;;  %v1317_v54 = vmul.f32 %v3187_v2, %v2958_v15 }
  0x8a   : > { %5428 = vst [vmem:[#allocation51_spill] sm:$0xff] %v3302_v34  ;;  %1680 = vperm.xlu1 %2700, %v2919_v10   ;;  %v1142_v47 = vmul.f32 %v3266_v56, %v3064_v52 }
  0x8b   : > { %v555_v23 = vpop.permute.xlu2 %554  ;;  %v1113_v27 = vadd.f32 %v1104_v8, %v1094_v9  ;;  %v446_v11 = vadd.f32 %v438_v21, %v421_v17  ;;  %v759_v37 = vsel %vm750_vm1, %v756_v16, %v5188_v12  ;;  %v3354_v9 = vadd.f32 %v1160_v6, %v1150_v30  ;;  %v5433_v8 = vld [vmem:[#allocation7_spill] sm:$0xff] }
  0x8c   : > { %v472_v17 = vmul.f32 %v3107_v33, %v2995_v25  ;;  %v5430_v21 = vmov 1   ;;  %v1326_v50 = vadd.f32 %v1317_v54, %v1298_v55  ;;  %v3367_v30 = vmul.f32 %v759_v37, %v3250_v46  ;;  %v5434_v54 = vld [vmem:[#allocation40_spill] sm:$0xff] }
  0x8d   : > { %v463_v42 = vadd.f32 %v455_v1, %v446_v11  ;;  %v5432_v1 = vld [vmem:[#allocation2_spill] sm:$0xff]  ;;  %v3373_v11 = vmul.f32 %v3311_v4, %v3133_v3  ;;  %v831_v33 = vmul.f32 %v5433_v8, %v2958_v15  ;;  %v1132_v56 = vadd.f32 %v1123_v40, %v1113_v27  ;;  %v5435_v46 = vld [vmem:[#allocation8_spill] sm:$0xff] }
  0x8e   : > { %5431 = vst [vmem:[#allocation53_spill] sm:$0xff] %v3367_v30  ;;  %v1345_v57 = vadd.f32 %v1336_v0, %v1326_v50  ;;  %v1355_v55 = vmul.f32 %v5434_v54, %v2995_v25  ;;  %v832_v36 = vmul.f32 %v5433_v8, %v2987_v22  ;;  %v5437_v0 = vrot.slane %v3302_v34, 7 }
  0x8f   : > { %v480_v4 = vadd.f32 %v472_v17, %v463_v42  ;;  %v580_v42 = vmul.f32 %v555_v23, %v3268_v29  ;;  %v1151_v15 = vadd.f32 %v1142_v47, %v1132_v56  ;;  %v5443_v47 = vrot.slane %v3229_v49, 4 }
  0x90   : > { %v1364_v34 = vadd.f32 %v1355_v55, %v1345_v57  ;;  %v5448_v49 = vmov 3  }
  0x91   : > { %2703 = vset.pattern.permute.xlu2 %v5430_v21  ;;  %v3360_v12 = vpop.permute.xlu1 %973  ;;  %v734_v41 = vpop.permute.xlu0 %733 }
  0x92   : > { %v754_v6 = vrot.slane %v734_v41, 7  ;;  %2702 = vset.pattern.permute.xlu1 %v5422_v63  ;;  %748 = vperm.xlu2 %2703, %v5432_v1   ;;  %v850_v41 = vmul.f32 %v5435_v46, %v2987_v22  ;;  %v5441_v63 = vld [vmem:[#allocation32_spill] sm:$0xff] }
  0x93   : > { %1912 = vperm.xlu1 %2702, %v2919_v10   ;;  %v523_v23 = vmul.f32 %v5441_v63, %v3064_v52 }
  0x94   : > { %v757_v37 = vsel %vm750_vm1, %v754_v6, %v756_v16  ;;  %v3383_v13 = vpop.permute.xlu2 %1435  ;;  %v755_v27 = vsel %vm750_vm1, %v5437_v0, %v754_v6  ;;  %v851_v16 = vmul.f32 %v5435_v46, %v2995_v25  ;;  %v859_v17 = vadd.f32 %v850_v41, %v831_v33  ;;  %v5440_v0 = vld [vmem:[#allocation31_spill] sm:$0xff] }
  0x95   : > { %v778_v40 = vmul.f32 %v757_v37, %v3272_v45  ;;  %v1374_v6 = vmul.f32 %v3224_v53, %v3021_v35  ;;  %v3403_v45 = vmul.f32 %v755_v27, %v3270_v18  ;;  %v497_v37 = vadd.f32 %v489_v44, %v480_v4 }
  0x96   : > { %v506_v50 = vmul.f32 %v5440_v0, %v3043_v43  ;;  %v5442_v33 = vrot.slane %v3367_v30, 1  ;;  %v5444_v56 = vrot.slane %v3383_v13, 4  ;;  %v860_v18 = vadd.f32 %v851_v16, %v832_v36  ;;  %v5447_v30 = vld [vmem:[#allocation12_spill] sm:$0xff] }
  0x97   : > { %v799_v21 = vrot.slane %v778_v40, 1  ;;  %5439 = vst [vmem:[#allocation2_spill] sm:$0xff] %v3403_v45  ;;  %v870_v44 = vmul.f32 %v5438_v62, %v3021_v35  ;;  %v5446_v27 = vmov 0   ;;  %v888_v63 = vmul.f32 %v5447_v30, %v3021_v35 }
  0x98   : > { %v1459_v57 = vsel %vm1452_vm3, %v5444_v56, %v5443_v47  ;;  %v1170_v36 = vadd.f32 %v1161_v60, %v1151_v15  ;;  %v1383_v16 = vadd.f32 %v1374_v6, %v1364_v34  ;;  %v514_v56 = vadd.f32 %v506_v50, %v497_v37  ;;  %v5452_v50 = vld [vmem:[#allocation16_spill] sm:$0xff] }
  0x99   : > { %v802_v29 = vsel %vm793_vm2, %v799_v21, %v5442_v33  ;;  %v3417_v55 = vpop.permute.xlu0 %742  ;;  %v878_v33 = vadd.f32 %v869_v31, %v859_v17  ;;  %v3433_v47 = vmul.f32 %v1459_v57, %v3339_v61  ;;  %v5450_v31 = vrot.slane %v3293_v38, 7 }
  0x9a   : > { %5445 = vst [vmem:[#allocation54_spill] sm:$0xff] %v3417_v55  ;;  %v3421_v4 = vadd.f32 %v802_v29, %v580_v42  ;;  %v5218_v41 = vrot.slane %v3417_v55, 7  ;;  %2706 = vset.pattern.permute.xlu2 %v5446_v27  ;;  %v1202_v40 = vpop.permute.xlu1 %1201  ;;  %v1393_v42 = vmul.f32 %v3255_v26, %v3043_v43  ;;  %v5217_v29 = vrot.slane %v3403_v45, 1 }
  0x9b   : > { %v1222_v0 = vrot.slane %v1202_v40, 5  ;;  %2705 = vset.pattern.permute.xlu1 %v5448_v49  ;;  %569 = vperm.xlu2 %2706, %v2919_v10   ;;  %5449 = vst [vmem:[#allocation55_spill] sm:$0xff] %v3433_v47  ;;  %v722_v10 = vadd.f32 %v3308_v39, %v3318_v51  ;;  %v1187_v15 = vadd.f32 %v3331_v59, %v3352_v19  ;;  %v5453_v39 = vrot.slane %v3181_v5, 5  ;;  %v5460_v51 = vld [vmem:[#allocation22_spill] sm:$0xff] }
  0x9c   : > { %v761_v17 = vsel %vm750_vm1, %v5450_v31, %v5218_v41  ;;  %1216 = vperm.xlu1 %2705, %v5432_v1   ;;  %v879_v60 = vadd.f32 %v870_v44, %v860_v18  ;;  %v889_v61 = vmul.f32 %v5447_v30, %v3043_v43  ;;  %v1188_v38 = vadd.f32 %v3335_v7, %v3354_v9  ;;  %v5456_v31 = vld [vmem:[#allocation19_spill] sm:$0xff] }
  0x9d   : > { %v3445_v34 = vpop.permute.xlu2 %1665  ;;  %v1412_v6 = vmul.f32 %v3275_v32, %v3064_v52  ;;  %v897_v57 = vadd.f32 %v888_v63, %v878_v33  ;;  %v907_v37 = vmul.f32 %v5452_v50, %v3043_v43  ;;  %v1223_v59 = vsel %vm1218_vm4, %v5453_v39, %v1222_v0 }
  0x9e   : > { %5451 = vst [vmem:[#allocation56_spill] sm:$0xff] %v3445_v34  ;;  %v1189_v19 = vadd.f32 %v3373_v11, %v1170_v36  ;;  %v1402_v18 = vadd.f32 %v1393_v42, %v1383_v16  ;;  %v3461_v40 = vadd.f32 %v523_v23, %v514_v56  ;;  %v3466_v63 = vsel %vm793_vm2, %v5217_v29, %v799_v21 }
  0x9f   : > { %v1300_v7 = vmul.f32 %v3184_v24, %v2987_v22  ;;  %v898_v9 = vadd.f32 %v889_v61, %v879_v60  ;;  %v908_v33 = vmul.f32 %v5452_v50, %v3064_v52  ;;  %v1319_v11 = vmul.f32 %v3187_v2, %v2995_v25  ;;  %v5475_v2 = vld [vmem:[#allocation13_spill] sm:$0xff] }
  0xa0   : > { %v1338_v36 = vmul.f32 %v3190_v48, %v3021_v35  ;;  %v5454_v23 = vrot.slane %v3247_v20, 5  ;;  %v3479_v42 = vmul.f32 %v1223_v59, %v1187_v15  ;;  %v916_v21 = vadd.f32 %v907_v37, %v897_v57 }
  0xa1   : > { %v926_v56 = vmul.f32 %v5456_v31, %v3064_v52  ;;  %v5458_v61 = vmov 4   ;;  %v3486_v39 = vadd.f32 %v1412_v6, %v1402_v18  ;;  %v1328_v29 = vadd.f32 %v1319_v11, %v1300_v7 }
  0xa2   : > { %v1225_v16 = vsel %vm1218_vm4, %v1222_v0, %v5454_v23  ;;  %5455 = vst [vmem:[#allocation57_spill] sm:$0xff] %v3479_v42  ;;  %v1357_v41 = vmul.f32 %v5434_v54, %v3043_v43  ;;  %v836_v0 = vmul.f32 %v5433_v8, %v3064_v52  ;;  %v3492_v15 = vmul.f32 %v761_v17, %v722_v10 }
  0xa3   : > { %v3483_v60 = vpop.permute.xlu0 %1207  ;;  %2708 = vset.pattern.permute.xlu2 %v5458_v61  ;;  %v855_v6 = vmul.f32 %v5435_v46, %v3102_v28  ;;  %v874_v59 = vmul.f32 %v5438_v62, %v3133_v3  ;;  %v3501_v18 = vmul.f32 %v1225_v16, %v1188_v38  ;;  %v917_v17 = vadd.f32 %v908_v33, %v898_v9  ;;  %v5463_v33 = vld [vmem:[#allocation4_spill] sm:$0xff] }
  0xa4   : > { %5457 = vst [vmem:[#allocation58_spill] sm:$0xff] %v3483_v60  ;;  %v550_v37 = vpop.permute.xlu1 %549  ;;  %2707 = vset.pattern.permute.xlu1 %v5446_v27  ;;  %1450 = vperm.xlu2 %2708, %v5432_v1   ;;  %v927_v10 = vmul.f32 %v5456_v31, %v3102_v28  ;;  %v1347_v11 = vadd.f32 %v1338_v36, %v1328_v29  ;;  %v5461_v38 = vrot.slane %v3483_v60, 5  ;;  %v5462_v16 = vmov %v5454_v23 }
  0xa5   : > { %5459 = vst [vmem:[#allocation59_spill] sm:$0xff] %v3492_v15  ;;  %574 = vperm.xlu1 %2707, %v5432_v1   ;;  %v3504_v7 = vpop.permute.xlu2 %1671  ;;  %v935_v44 = vadd.f32 %v926_v56, %v916_v21  ;;  %v945_v57 = vmul.f32 %v5460_v51, %v3102_v28  ;;  %v864_v45 = vadd.f32 %v855_v6, %v836_v0  ;;  %v3519_v29 = vperm.slane %v5463_v33, 5  ;;  %v5465_v56 = vld [vmem:[#allocation5_spill] sm:$0xff]  ;;  %v5467_v0 = vld [vmem:[#allocation6_spill] sm:$0xff] }
  0xa6   : > { %v1227_v5 = vsel %vm1218_vm4, %v5462_v16, %v5461_v38  ;;  %v1366_v54 = vadd.f32 %v1357_v41, %v1347_v11  ;;  %v1376_v9 = vmul.f32 %v3224_v53, %v3064_v52  ;;  %v893_v21 = vmul.f32 %v5447_v30, %v3280_v58  ;;  %v5469_v38 = vld [vmem:[#allocation3_spill] sm:$0xff]  ;;  %v3539_v53 = vld [vmem:[%s2952_s19 + $0x60] sm:$0xff] }
  0xa7   : > { %5464 = vst [vmem:[#allocation4_spill] sm:$0xff] %v3519_v29  ;;  %v883_v36 = vadd.f32 %v874_v59, %v864_v45  ;;  %v3524_v23 = vperm.slane %v5465_v56, 4  ;;  %v3527_v6 = vperm.slane %v5467_v0, 3  ;;  %v1267_v20 = vrot.slane %v3501_v18, 3 }
  0xa8   : > { %v946_v41 = vmul.f32 %v5460_v51, %v3133_v3  ;;  %v1531_v11 = vmul.f32 %v3519_v29, %v2955_v14  ;;  %v1532_v45 = vmul.f32 %v3519_v29, %v5469_v38  ;;  %v3536_v59 = vmul.f32 %v1227_v5, %v1189_v19  ;;  %5471 = vst [vmem:[#allocation61_spill] sm:$0xff] %v3539_v53 }
  0xa9   : > { %5466 = vst [vmem:[#allocation5_spill] sm:$0xff] %v3524_v23  ;;  %v936_v16 = vadd.f32 %v927_v10, %v917_v17  ;;  %v1550_v48 = vmul.f32 %v3524_v23, %v5469_v38  ;;  %v1551_v18 = vmul.f32 %v3524_v23, %v2987_v22  ;;  %v1385_v55 = vadd.f32 %v1376_v9, %v1366_v54  ;;  %v3554_v17 = vld [vmem:[%s2952_s19 + $0x68] sm:$0xff] }
  0xaa   : > { %5468 = vst [vmem:[#allocation6_spill] sm:$0xff] %v3527_v6  ;;  %v1395_v47 = vmul.f32 %v3255_v26, %v3102_v28  ;;  %v912_v5 = vmul.f32 %v5452_v50, %v3539_v53  ;;  %v5473_v19 = vmov 1   ;;  %v902_v10 = vadd.f32 %v893_v21, %v883_v36  ;;  %v5479_v53 = vld [vmem:[#allocation39_spill] sm:$0xff] }
  0xab   : > { %5470 = vst [vmem:[#allocation60_spill] sm:$0xff] %v3536_v59  ;;  %v3546_v24 = vpop.permute.xlu0 %1213  ;;  %v1559_v60 = vadd.f32 %v1550_v48, %v1531_v11  ;;  %v1569_v38 = vmul.f32 %v3527_v6, %v2987_v22  ;;  %v3559_v34 = vperm.slane %v5475_v2, 2  ;;  %v5477_v9 = vmov 6   ;;  %v3579_v2 = vld [vmem:[%s2952_s19 + $0x70] sm:$0x3f] }
  0xac   : > { %5472 = vst [vmem:[#allocation62_spill] sm:$0xff] %v3546_v24  ;;  %2710 = vset.pattern.permute.xlu2 %v5473_v19  ;;  %v954_v19 = vadd.f32 %v945_v57, %v935_v44  ;;  %v1560_v58 = vadd.f32 %v1551_v18, %v1532_v45  ;;  %v1570_v48 = vmul.f32 %v3527_v6, %v2995_v25  ;;  %v5480_v36 = vrot.slane %v3479_v42, 3  ;;  %v5486_v42 = vld [vmem:[#allocation18_spill] sm:$0xff] }
  0xad   : > { %5474 = vst [vmem:[#allocation63_spill] sm:$0xff] %v3554_v17  ;;  %2709 = vset.pattern.permute.xlu1 %v5477_v9  ;;  %v3563_v26 = vpop.permute.xlu1 %1432  ;;  %727 = vperm.xlu2 %2710, %v5479_v53   ;;  %v579_v54 = vmul.f32 %v550_v37, %v3461_v40  ;;  %v955_v9 = vadd.f32 %v946_v41, %v936_v16 }
  0xae   : > { %5476 = vst [vmem:[#allocation64_spill] sm:$0xff] %v3559_v34  ;;  %v3571_v21 = vsel %vm1261_vm5, %v5480_v36, %v1267_v20  ;;  %1915 = vperm.xlu1 %2709, %v5432_v1   ;;  %v3576_v15 = vpop.permute.xlu2 %1900  ;;  %v1404_v57 = vadd.f32 %v1395_v47, %v1385_v55  ;;  %v1414_v45 = vmul.f32 %v3275_v32, %v3133_v3  ;;  %v5482_v1 = vld [vmem:[#allocation15_spill] sm:$0xff]  ;;  %v3612_v32 = vperm.slane %v5486_v42, 0 }
  0xaf   : > { %5478 = vst [vmem:[#allocation65_spill] sm:$0xff] %v3563_v26  ;;  %v931_v18 = vmul.f32 %v5456_v31, %v3554_v17  ;;  %v921_v36 = vadd.f32 %v912_v5, %v902_v10  ;;  %v1578_v11 = vadd.f32 %v1569_v38, %v1559_v60  ;;  %v1588_v40 = vmul.f32 %v3559_v34, %v2995_v25 }
  0xb0   : > { %5481 = vst [vmem:[#allocation39_spill] sm:$0xff] %v3579_v2  ;;  %v3589_v37 = vperm.slane %v5482_v1, 1  ;;  %v950_v41 = vmul.f32 %v5460_v51, %v3579_v2  ;;  %v1579_v16 = vadd.f32 %v1570_v48, %v1560_v58  ;;  %v1589_v55 = vmul.f32 %v3559_v34, %v3021_v35 }
  0xb1   : > { %v833_v47 = vmul.f32 %v5433_v8, %v2995_v25  ;;  %v5484_v5 = vrot.slane %v3536_v59, 3  ;;  %v3603_v38 = vadd.f32 %v3466_v63, %v579_v54  ;;  %v852_v44 = vmul.f32 %v5435_v46, %v3021_v35  ;;  %5487 = vst [vmem:[#allocation18_spill] sm:$0xff] %v3612_v32 }
  0xb2   : > { %5483 = vst [vmem:[#allocation15_spill] sm:$0xff] %v3589_v37  ;;  %v3609_v48 = vadd.f32 %v1414_v45, %v1404_v57  ;;  %v871_v2 = vmul.f32 %v5438_v62, %v3043_v43  ;;  %v1607_v63 = vmul.f32 %v3589_v37, %v3021_v35  ;;  %v1598_v59 = vadd.f32 %v1589_v55, %v1579_v16 }
  0xb3   : > { %v3600_v60 = vsel %vm1261_vm5, %v1267_v20, %v5484_v5  ;;  %v940_v5 = vadd.f32 %v931_v18, %v921_v36  ;;  %v861_v54 = vadd.f32 %v852_v44, %v833_v47  ;;  %v1608_v57 = vmul.f32 %v3589_v37, %v3043_v43 }
  0xb4   : > { %5485 = vst [vmem:[#allocation66_spill] sm:$0xff] %v3600_v60  ;;  %v971_v20 = vpop.permute.xlu0 %970  ;;  %v1597_v60 = vadd.f32 %v1588_v40, %v1578_v11  ;;  %v1533_v45 = vmul.f32 %v3519_v29, %v2987_v22  ;;  %v5488_v58 = vrot.slane %v3383_v13, 4  ;;  %v5489_v17 = vrot.slane %v3563_v26, 4  ;;  %v5492_v40 = vld [vmem:[#allocation28_spill] sm:$0xff] }
  0xb5   : > { %v990_v10 = vrot.slane %v971_v20, 6  ;;  %2712 = vset.pattern.permute.xlu2 %v5448_v49  ;;  %v5490_v36 = vmov 2   ;;  %v3632_v49 = vperm.slane %v5486_v42, 7  ;;  %v890_v44 = vmul.f32 %v5447_v30, %v3064_v52  ;;  %v3642_v47 = vpop.permute.xlu1 %1441 }
  0xb6   : > { %v1457_v11 = vsel %vm1452_vm3, %v5489_v17, %v5488_v58  ;;  %2711 = vset.pattern.permute.xlu1 %v5490_v36  ;;  %1195 = vperm.xlu2 %2712, %v5479_v53   ;;  %v5493_v16 = vrot.slane %v5492_v40, 6  ;;  %v5494_v55 = vrot.slane %v3360_v12, 6  ;;  %5495 = vst [vmem:[#allocation28_spill] sm:$0xff] %v3642_v47  ;;  %v880_v58 = vadd.f32 %v871_v2, %v861_v54  ;;  %v3649_v26 = vpop.permute.xlu2 %1906 }
  0xb7   : > { %5491 = vst [vmem:[#allocation67_spill] sm:$0xff] %v3632_v49  ;;  %961 = vperm.xlu1 %2711, %v5479_v53   ;;  %v1552_v20 = vmul.f32 %v3524_v23, %v2995_v25  ;;  %v1616_v40 = vadd.f32 %v1607_v63, %v1597_v60  ;;  %v1617_v30 = vadd.f32 %v1608_v57, %v1598_v59  ;;  %v5255_v60 = vrot.slane %v3642_v47, 4 }
  0xb8   : > { %v991_v13 = vsel %vm984_vm0, %v5493_v16, %v990_v10  ;;  %v993_v17 = vsel %vm984_vm0, %v990_v10, %v5494_v55  ;;  %5497 = vst [vmem:[#allocation69_spill] sm:$0xff] %v3649_v26  ;;  %v1626_v16 = vmul.f32 %v3612_v32, %v3043_v43  ;;  %v1627_v10 = vmul.f32 %v3612_v32, %v3064_v52 }
  0xb9   : > { %v1012_v36 = vmul.f32 %v991_v13, %v954_v19  ;;  %v3647_v18 = vmul.f32 %v993_v17, %v955_v9  ;;  %v1561_v55 = vadd.f32 %v1552_v20, %v1533_v45  ;;  %v1571_v2 = vmul.f32 %v3527_v6, %v3021_v35 }
  0xba   : > { %v3658_v54 = vmul.f32 %v1457_v11, %v3486_v39  ;;  %v3661_v13 = vadd.f32 %v950_v41, %v940_v5  ;;  %v1645_v59 = vmul.f32 %v3632_v49, %v3064_v52  ;;  %v899_v63 = vadd.f32 %v890_v44, %v880_v58 }
  0xbb   : > { %5496 = vst [vmem:[#allocation68_spill] sm:$0xff] %v3647_v18  ;;  %v1033_v19 = vrot.slane %v1012_v36, 2  ;;  %v5256_v9 = vrot.slane %v3647_v18, 2  ;;  %v909_v57 = vmul.f32 %v5452_v50, %v3102_v28  ;;  %v1635_v39 = vadd.f32 %v1626_v16, %v1616_v40 }
  0xbc   : > { %5498 = vst [vmem:[#allocation70_spill] sm:$0xff] %v3658_v54  ;;  %v1646_v11 = vmul.f32 %v3632_v49, %v3102_v28  ;;  %v3674_v41 = vperm.slane %v5463_v33, 6  ;;  %v3679_v17 = vpop.permute.xlu0 %982  ;;  %v1636_v44 = vadd.f32 %v1627_v10, %v1617_v30  ;;  %v1580_v58 = vadd.f32 %v1571_v2, %v1561_v55  ;;  %v5504_v30 = vld [vmem:[#allocation44_spill] sm:$0xff] }
  0xbd   : > { %v1036_v45 = vsel %vm1027_vm6, %v1033_v19, %v5256_v9  ;;  %5501 = vst [vmem:[#allocation73_spill] sm:$0xff] %v3679_v17  ;;  %v1590_v20 = vmul.f32 %v3559_v34, %v3043_v43  ;;  %v3688_v33 = vperm.slane %v5465_v56, 5  ;;  %v5505_v16 = vrot.slane %v5504_v30, 4  ;;  %v2760_v30 = vld [vmem:[%s5105_s1 + $0x8] sm:$0xff] }
  0xbe   : > { %5499 = vst [vmem:[#allocation71_spill] sm:$0xff] %v3674_v41  ;;  %v3677_v5 = vadd.f32 %v1036_v45, %v3421_v4  ;;  %2715 = vset.pattern.permute.xlu2 %v5458_v61  ;;  %v1763_v40 = vmul.f32 %v3674_v41, %v2955_v14  ;;  %v3691_v4 = vperm.slane %v5467_v0, 4  ;;  %v918_v55 = vadd.f32 %v909_v57, %v899_v63  ;;  %v5506_v14 = vld [vmem:[#allocation13_spill] sm:$0xff]  ;;  %v5509_v63 = vld [vmem:[#allocation3_spill] sm:$0xff]  ;;  %v1669_v9 = vpop.permute.xlu1 %1668 }
  0xbf   : > { %5502 = vst [vmem:[#allocation74_spill] sm:$0xff] %v3688_v33  ;;  %v1461_v10 = vsel %vm1452_vm3, %v5505_v16, %v5255_v60  ;;  %v928_v2 = vmul.f32 %v5456_v31, %v3133_v3  ;;  %2714 = vset.pattern.permute.xlu1 %v5446_v27  ;;  %1429 = vperm.xlu2 %2715, %v5479_v53   ;;  %v3703_v61 = vperm.slane %v5506_v14, 3  ;;  %v5508_v0 = vld [vmem:[#allocation49_spill] sm:$0xff] }
  0xc0   : > { %5500 = vst [vmem:[#allocation72_spill] sm:$0xff] %v3677_v5  ;;  %v1654_v56 = vadd.f32 %v1645_v59, %v1635_v39  ;;  %v947_v45 = vmul.f32 %v5460_v51, %v5508_v0  ;;  %544 = vperm.xlu1 %2714, %v2760_v30   ;;  %v1782_v57 = vmul.f32 %v3688_v33, %v5509_v63  ;;  %v5510_v16 = vld [vmem:[#allocation33_spill] sm:$0xff]  ;;  %v3723_v5 = vpop.permute.xlu2 %976 }
  0xc1   : > { %5503 = vst [vmem:[#allocation75_spill] sm:$0xff] %v3691_v4  ;;  %v1801_v27 = vmul.f32 %v3691_v4, %v2987_v22  ;;  %v5511_v60 = vrot.slane %v5510_v16, 2  ;;  %v1655_v59 = vadd.f32 %v1646_v11, %v1636_v44  ;;  %v1599_v39 = vadd.f32 %v1590_v20, %v1580_v58  ;;  %v5519_v44 = vld [vmem:[#allocation56_spill] sm:$0xff] }
  0xc2   : > { %5507 = vst [vmem:[#allocation44_spill] sm:$0xff] %v3703_v61  ;;  %v1609_v36 = vmul.f32 %v3589_v37, %v3064_v52  ;;  %v3720_v47 = vmul.f32 %v1461_v10, %v3609_v48  ;;  %v1791_v63 = vadd.f32 %v1782_v57, %v1763_v40  ;;  %v3726_v22 = vperm.slane %v5482_v1, 2  ;;  %v5514_v10 = vld [vmem:[#allocation34_spill] sm:$0xff] }
  0xc3   : > { %v1034_v14 = vsel %vm1027_vm6, %v5511_v60, %v1033_v19  ;;  %v937_v16 = vadd.f32 %v928_v2, %v918_v55  ;;  %v1628_v19 = vmul.f32 %v3612_v32, %v3102_v28  ;;  %v1647_v60 = vmul.f32 %v3632_v49, %v3133_v3 }
  0xc4   : > { %5512 = vst [vmem:[#allocation13_spill] sm:$0xff] %v3720_v47  ;;  %v1820_v11 = vmul.f32 %v3703_v61, %v2995_v25  ;;  %v3735_v48 = vadd.f32 %v1034_v14, %v3603_v38  ;;  %v1688_v58 = vrot.slane %v1669_v9, 3  ;;  %v1810_v20 = vadd.f32 %v1801_v27, %v1791_v63  ;;  %v5516_v14 = vld [vmem:[#allocation41_spill] sm:$0xff] }
  0xc5   : > { %5513 = vst [vmem:[#allocation49_spill] sm:$0xff] %v3726_v22  ;;  %v1618_v40 = vadd.f32 %v1609_v36, %v1599_v39  ;;  %v1067_v55 = vmul.f32 %v5514_v10, %v2995_v25  ;;  %v1068_v2 = vmul.f32 %v5514_v10, %v3021_v35  ;;  %v1839_v30 = vmul.f32 %v3726_v22, %v3021_v35  ;;  %v3750_v63 = vpop.permute.xlu0 %1674  ;;  %v5518_v39 = vld [vmem:[#allocation42_spill] sm:$0xff] }
  0xc6   : > { %v1829_v57 = vadd.f32 %v1820_v11, %v1810_v20  ;;  %v3746_v38 = vperm.slane %v5486_v42, 1  ;;  %v1086_v9 = vmul.f32 %v5516_v14, %v3021_v35  ;;  %v956_v27 = vadd.f32 %v947_v45, %v937_v16  ;;  %v5521_v16 = vld [vmem:[#allocation45_spill] sm:$0xff] }
  0xc7   : > { %v5517_v36 = vmov 6   ;;  %v1087_v25 = vmul.f32 %v5516_v14, %v3043_v43  ;;  %v1105_v11 = vmul.f32 %v5518_v39, %v3043_v43  ;;  %v1106_v20 = vmul.f32 %v5518_v39, %v3064_v52 }
  0xc8   : > { %5515 = vst [vmem:[#allocation3_spill] sm:$0xff] %v3746_v38  ;;  %2717 = vset.pattern.permute.xlu2 %v5517_v36  ;;  %v5520_v1 = vrot.slane %v5519_v44, 3  ;;  %v1095_v45 = vadd.f32 %v1086_v9, %v1067_v55  ;;  %v1124_v18 = vmul.f32 %v5521_v16, %v3064_v52  ;;  %v5522_v36 = vmov 5  }
  0xc9   : > { %2716 = vset.pattern.permute.xlu1 %v5522_v36  ;;  %1894 = vperm.xlu2 %2717, %v5479_v53   ;;  %v5523_v14 = vrot.slane %v3504_v7, 3  ;;  %v5524_v39 = vrot.slane %v3723_v5, 6  ;;  %v5525_v42 = vrot.slane %v3360_v12, 6  ;;  %v1637_v47 = vadd.f32 %v1628_v19, %v1618_v40 }
  0xca   : > { %v1689_v10 = vsel %vm1261_vm5, %v5520_v1, %v1688_v58  ;;  %v3778_v1 = vld [vmem:[%s5106_s2 + $0x30] ss:$0 sm:$0xff]  ;;  %v1096_v55 = vadd.f32 %v1087_v25, %v1068_v2  ;;  %1662 = vperm.xlu1 %2716, %v5479_v53   ;;  %v5266_v9 = vrot.slane %v3750_v63, 3  ;;  %v1848_v36 = vadd.f32 %v1839_v30, %v1829_v57 }
  0xcb   : > { %v1691_v26 = vsel %vm1261_vm5, %v1688_v58, %v5523_v14  ;;  %v995_v44 = vsel %vm984_vm0, %v5525_v42, %v5524_v39  ;;  %5526 = vst [vmem:[#allocation76_spill] sm:$0xff] %v3778_v1  ;;  %v1858_v58 = vmul.f32 %v3746_v38, %v3043_v43  ;;  %v1114_v14 = vadd.f32 %v1105_v11, %v1095_v45  ;;  %v3791_v39 = vpop.permute.xlu1 %1897  ;;  %v5533_v11 = vld [vmem:[#allocation47_spill] sm:$0xff] }
  0xcc   : > { %v5527_v12 = vrot.slane %v3679_v17, 6  ;;  %v3789_v40 = vmul.f32 %v1689_v10, %v1654_v56  ;;  %5530 = vst [vmem:[#allocation79_spill] sm:$0xff] %v3791_v39  ;;  %v1115_v2 = vadd.f32 %v1106_v20, %v1096_v55  ;;  %v1125_v53 = vmul.f32 %v5521_v16, %v3102_v28  ;;  %v3804_v56 = vld [vmem:[%s2952_s19 + $0x28] sm:$0xff] }
  0xcd   : > { %v3795_v25 = vmul.f32 %v1691_v26, %v1655_v59  ;;  %v3797_v30 = vmul.f32 %v995_v44, %v956_v27  ;;  %v1133_v57 = vadd.f32 %v1124_v18, %v1114_v14  ;;  %v1143_v42 = vmul.f32 %v5533_v11, %v3102_v28  ;;  %5534 = vst [vmem:[#allocation82_spill] sm:$0xff] %v3804_v56  ;;  %v3836_v14 = vld [vmem:[%s2952_s19 + $0x18] sm:$0xff] }
  0xce   : > { %v3787_v19 = vmul.f32 %v5527_v12, %v3661_v13  ;;  %5529 = vst [vmem:[#allocation78_spill] sm:$0xff] %v3789_v40  ;;  %v1656_v45 = vadd.f32 %v1647_v60, %v1637_v47  ;;  %v1877_v13 = vmul.f32 %v3778_v1, %v3064_v52  ;;  %v1534_v10 = vmul.f32 %v3804_v56, %v3519_v29  ;;  %v1211_v12 = vpop.permute.xlu2 %1210 }
  0xcf   : > { %5531 = vst [vmem:[#allocation80_spill] sm:$0xff] %v3795_v25  ;;  %v1553_v20 = vmul.f32 %v3524_v23, %v3021_v35  ;;  %v5535_v26 = vrot.slane %v3504_v7, 3  ;;  %v1867_v59 = vadd.f32 %v1858_v58, %v1848_v36  ;;  %v5267_v47 = vrot.slane %v3791_v39, 2  ;;  %v5536_v58 = vld [vmem:[#allocation50_spill] sm:$0xff]  ;;  %v3853_v7 = vpop.permute.xlu0 %1677  ;;  %v5554_v23 = vld [vmem:[#allocation27_spill] sm:$0xff] }
  0xd0   : > { %5528 = vst [vmem:[#allocation77_spill] sm:$0xff] %v3787_v19  ;;  %v1572_v60 = vmul.f32 %v3527_v6, %v3043_v43  ;;  %v1134_v27 = vadd.f32 %v1125_v53, %v1115_v2  ;;  %v1144_v35 = vmul.f32 %v5533_v11, %v3133_v3  ;;  %v1152_v36 = vadd.f32 %v1143_v42, %v1133_v57  ;;  %v3841_v42 = vld [vmem:[%s2952_s19 + $0x20] sm:$0xff] }
  0xd1   : > { %5532 = vst [vmem:[#allocation81_spill] sm:$0xff] %v3797_v30  ;;  %v1693_v18 = vsel %vm1261_vm5, %v5535_v26, %v5266_v9  ;;  %v1562_v55 = vadd.f32 %v1553_v20, %v1534_v10  ;;  %v1162_v26 = vmul.f32 %v5536_v58, %v3133_v3  ;;  %v1591_v2 = vmul.f32 %v3559_v34, %v3064_v52  ;;  %v5545_v11 = vld [vmem:[#allocation58_spill] sm:$0xff] }
  0xd2   : > { %v3826_v9 = vmul.f32 %v1693_v18, %v1656_v45  ;;  %v1886_v53 = vadd.f32 %v1877_v13, %v1867_v59  ;;  %v5538_v10 = vrot.slane %v3576_v15, 2  ;;  %5539 = vst [vmem:[#allocation84_spill] sm:$0xff] %v3836_v14  ;;  %v1764_v57 = vmul.f32 %v3836_v14, %v3674_v41  ;;  %v5541_v13 = vld [vmem:[#allocation52_spill] sm:$0xff]  ;;  %v3885_v34 = vld [vmem:[%s2952_s19 + $0x40] sm:$0xff] }
  0xd3   : > { %v1581_v44 = vadd.f32 %v1572_v60, %v1562_v55  ;;  %5540 = vst [vmem:[#allocation85_spill] sm:$0xff] %v3841_v42  ;;  %v1783_v45 = vmul.f32 %v3841_v42, %v3688_v33  ;;  %v1153_v18 = vadd.f32 %v1144_v35, %v1134_v27  ;;  %v1163_v52 = vmul.f32 %v5536_v58, %v5508_v0  ;;  %v3855_v27 = vpop.permute.xlu1 %1903 }
  0xd4   : > { %5537 = vst [vmem:[#allocation83_spill] sm:$0xff] %v3826_v9  ;;  %v1921_v20 = vsel %vm1027_vm6, %v5267_v47, %v5538_v10  ;;  %v1181_v59 = vmul.f32 %v5541_v13, %v5508_v0  ;;  %v1228_v60 = vrot.slane %v1211_v12, 5  ;;  %v1171_v55 = vadd.f32 %v1162_v26, %v1152_v36  ;;  %v3862_v36 = vld [vmem:[%s2952_s19 + $0x30] sm:$0xff] }
  0xd5   : > { %v1610_v10 = vmul.f32 %v3589_v37, %v3102_v28  ;;  %v1792_v47 = vadd.f32 %v1783_v45, %v1764_v57  ;;  %v1802_v43 = vmul.f32 %v3804_v56, %v3691_v4  ;;  %5542 = vst [vmem:[#allocation86_spill] sm:$0xff] %v3853_v7  ;;  %v1600_v39 = vadd.f32 %v1591_v2, %v1581_v44  ;;  %v5544_v57 = vld [vmem:[#allocation61_spill] sm:$0xff] }
  0xd6   : > { %v1765_v35 = vmul.f32 %v3841_v42, %v3674_v41  ;;  %v1784_v12 = vmul.f32 %v3804_v56, %v3688_v33  ;;  %v1821_v28 = vmul.f32 %v3862_v36, %v3703_v61  ;;  %v3866_v26 = vmul.f32 %v1921_v20, %v1886_v53  ;;  %v3871_v2 = vld [vmem:[%s2952_s19 + $0x38] sm:$0xff] }
  0xd7   : > { %v1182_v45 = vmul.f32 %v5541_v13, %v5544_v57  ;;  %v1811_v44 = vadd.f32 %v1802_v43, %v1792_v47  ;;  %v1840_v19 = vmul.f32 %v3871_v2, %v3726_v22  ;;  %v1172_v58 = vadd.f32 %v1163_v52, %v1153_v18 }
  0xd8   : > { %5543 = vst [vmem:[#allocation87_spill] sm:$0xff] %v3866_v26  ;;  %v5546_v16 = vrot.slane %v5545_v11, 5  ;;  %v5547_v37 = vrot.slane %v3546_v24, 5  ;;  %v1629_v20 = vmul.f32 %v3612_v32, %v3133_v3  ;;  %v1190_v13 = vadd.f32 %v1181_v59, %v1171_v55  ;;  %v3892_v24 = vld [vmem:[%s2952_s19 + $0x48] sm:$0xff] }
  0xd9   : > { %v1830_v43 = vadd.f32 %v1821_v28, %v1811_v44  ;;  %v1859_v18 = vmul.f32 %v3885_v34, %v3746_v38  ;;  %v1619_v52 = vadd.f32 %v1610_v10, %v1600_v39  ;;  %v1793_v11 = vadd.f32 %v1784_v12, %v1765_v35  ;;  %v5549_v28 = vld [vmem:[#allocation24_spill] sm:$0xff]  ;;  %v5550_v12 = vld [vmem:[#allocation25_spill] sm:$0xff] }
  0xda   : > { %v1229_v14 = vsel %vm1218_vm4, %v5546_v16, %v1228_v60  ;;  %v1231_v53 = vsel %vm1218_vm4, %v1228_v60, %v5547_v37  ;;  %v1803_v16 = vmul.f32 %v3862_v36, %v3691_v4  ;;  %v1878_v37 = vmul.f32 %v3892_v24, %v3778_v1  ;;  %v5548_v60 = vld [vmem:[#allocation23_spill] sm:$0xff] }
  0xdb   : > { %v1849_v3 = vadd.f32 %v1840_v19, %v1830_v43  ;;  %v424_v55 = vmul.f32 %v3804_v56, %v5548_v60  ;;  %v441_v44 = vmul.f32 %v3862_v36, %v5549_v28  ;;  %v1191_v10 = vadd.f32 %v1182_v45, %v1172_v58 }
  0xdc   : > { %v1648_v35 = vmul.f32 %v3632_v49, %v5508_v0  ;;  %v458_v47 = vmul.f32 %v3871_v2, %v5550_v12  ;;  %v5551_v32 = vrot.slane %v3853_v7, 3  ;;  %v5552_v19 = vrot.slane %v3750_v63, 3 }
  0xdd   : > { %v1868_v59 = vadd.f32 %v1859_v18, %v1849_v3  ;;  %v449_v6 = vadd.f32 %v441_v44, %v424_v55  ;;  %v475_v29 = vmul.f32 %v3885_v34, %v5554_v23  ;;  %v1638_v39 = vadd.f32 %v1629_v20, %v1619_v52  ;;  %v5558_v18 = vld [vmem:[#allocation10_spill] sm:$0xff]  ;;  %v3930_v52 = vpop.permute.xlu1 %745  ;;  %v5566_v44 = vld [vmem:[#allocation17_spill] sm:$0xff] }
  0xde   : > { %v3911_v43 = vsel %vm1261_vm5, %v5552_v19, %v5551_v32  ;;  %v1812_v58 = vadd.f32 %v1803_v16, %v1793_v11  ;;  %v1822_v45 = vmul.f32 %v3871_v2, %v3703_v61  ;;  %v5555_v49 = vrot.slane %v3855_v27, 2  ;;  %5560 = vst [vmem:[#allocation88_spill] sm:$0xff] %v3930_v52  ;;  %v5561_v11 = vld [vmem:[#allocation11_spill] sm:$0xff]  ;;  %v5562_v16 = vld [vmem:[#allocation14_spill] sm:$0xff] }
  0xdf   : > { %5553 = vst [vmem:[#allocation61_spill] sm:$0xff] %v3911_v43  ;;  %v5556_v17 = vrot.slane %v3576_v15, 2  ;;  %v3922_v63 = vmul.f32 %v1229_v14, %v1190_v13  ;;  %v1887_v32 = vadd.f32 %v1878_v37, %v1868_v59  ;;  %v466_v19 = vadd.f32 %v458_v47, %v449_v6  ;;  %v5564_v13 = vld [vmem:[#allocation29_spill] sm:$0xff] }
  0xe0   : > { %v600_v3 = vmul.f32 %v3862_v36, %v5558_v18  ;;  %v3926_v55 = vmul.f32 %v1231_v53, %v1191_v10  ;;  %v1841_v20 = vmul.f32 %v3885_v34, %v3726_v22  ;;  %v619_v15 = vmul.f32 %v3871_v2, %v5561_v11 }
  0xe1   : > { %v1923_v7 = vsel %vm1027_vm6, %v5556_v17, %v5555_v49  ;;  %5557 = vst [vmem:[#allocation58_spill] sm:$0xff] %v3922_v63  ;;  %v638_v49 = vmul.f32 %v3885_v34, %v5562_v16  ;;  %v3938_v6 = vmul.f32 %v3892_v24, %v3746_v38  ;;  %v483_v14 = vadd.f32 %v475_v29, %v466_v19  ;;  %v5567_v63 = vld [vmem:[#allocation31_spill] sm:$0xff]  ;;  %v5573_v16 = vld [vmem:[#allocation26_spill] sm:$0xff] }
  0xe2   : > { %5559 = vst [vmem:[#allocation27_spill] sm:$0xff] %v3926_v55  ;;  %v3940_v17 = vmul.f32 %v1923_v7, %v1887_v32  ;;  %v492_v53 = vmul.f32 %v3892_v24, %v5564_v13  ;;  %v3944_v47 = vadd.f32 %v1648_v35, %v1638_v39  ;;  %v1831_v37 = vadd.f32 %v1822_v45, %v1812_v58  ;;  %v3950_v55 = vld [vmem:[%s2952_s19 + $0x50] sm:$0xff]  ;;  %v5569_v35 = vld [vmem:[#allocation21_spill] sm:$0xff]  ;;  %v5570_v19 = vld [vmem:[#allocation55_spill] sm:$0xff] }
  0xe3   : > { %v628_v59 = vadd.f32 %v619_v15, %v600_v3  ;;  %v657_v10 = vmul.f32 %v3892_v24, %v5566_v44  ;;  %v509_v9 = vmul.f32 %v3950_v55, %v5567_v63  ;;  %v5568_v7 = vld [vmem:[#allocation32_spill] sm:$0xff]  ;;  %v1289_v32 = vadd.f32 %v3571_v21, %v3735_v48 }
  0xe4   : > { %5563 = vst [vmem:[#allocation89_spill] sm:$0xff] %v3940_v17  ;;  %v526_v29 = vmul.f32 %v5568_v7, %v5508_v0  ;;  %v676_v58 = vmul.f32 %v3950_v55, %v5569_v35  ;;  %v5571_v3 = vrot.slane %v5570_v19, 4  ;;  %v5572_v15 = vrot.slane %v3658_v54, 4  ;;  %v5582_v19 = vld [vmem:[#allocation12_spill] sm:$0xff] }
  0xe5   : > { %5565 = vst [vmem:[#allocation90_spill] sm:$0xff] %v3944_v47  ;;  %v647_v39 = vadd.f32 %v638_v49, %v628_v59  ;;  %v3966_v47 = vpop.permute.xlu2 %564  ;;  %v500_v44 = vadd.f32 %v492_v53, %v483_v14  ;;  %v695_v11 = vmul.f32 %v5573_v16, %v5508_v0  ;;  %v5574_v21 = vrot.slane %v3795_v25, 5 }
  0xe6   : > { %v1501_v43 = vsel %vm1452_vm3, %v5572_v15, %v5571_v3  ;;  %v5575_v48 = vrot.slane %v3789_v40, 5  ;;  %v5576_v45 = vrot.slane %v3940_v17, 6  ;;  %v5577_v54 = vrot.slane %v3866_v26, 6 }
  0xe7   : > { %v1522_v30 = vadd.f32 %v1501_v43, %v1289_v32  ;;  %v666_v59 = vadd.f32 %v657_v10, %v647_v39  ;;  %v834_v14 = vmul.f32 %v3862_v36, %v5433_v8  ;;  %v835_v53 = vmul.f32 %v3871_v2, %v5433_v8  ;;  %v5578_v43 = vld [vmem:[#allocation30_spill] sm:$0xff] }
  0xe8   : > { %v1733_v49 = vsel %vm1218_vm4, %v5575_v48, %v5574_v21  ;;  %v1965_v3 = vsel %vm984_vm0, %v5577_v54, %v5576_v45  ;;  %v714_v32 = vmul.f32 %v5578_v43, %v5544_v57  ;;  %v3989_v10 = vld [vmem:[%s5107_s3] ss:$0 sm:$0xff]  ;;  %v853_v39 = vmul.f32 %v3871_v2, %v5435_v46 }
  0xe9   : > { %v1754_v15 = vadd.f32 %v1733_v49, %v1522_v30  ;;  %v854_v54 = vmul.f32 %v3885_v34, %v5435_v46  ;;  %v685_v45 = vadd.f32 %v676_v58, %v666_v59  ;;  %v5579_v21 = vrot.slane %v3930_v52, 7  ;;  %v5580_v48 = vld [vmem:[#allocation54_spill] sm:$0xff]  ;;  %v4006_v59 = vpop.permute.xlu1 %979 }
  0xea   : > { %v5581_v26 = vrot.slane %v5580_v48, 7  ;;  %v872_v30 = vmul.f32 %v3885_v34, %v5438_v62  ;;  %v873_v49 = vmul.f32 %v3892_v24, %v5438_v62  ;;  %v862_v17 = vadd.f32 %v853_v39, %v834_v14 }
  0xeb   : > { %v1986_v8 = vadd.f32 %v1965_v3, %v1754_v15  ;;  %v863_v25 = vadd.f32 %v854_v54, %v835_v53  ;;  %v891_v43 = vmul.f32 %v3892_v24, %v5582_v19  ;;  %v517_v46 = vadd.f32 %v509_v9, %v500_v44 }
  0xec   : > { %v763_v40 = vsel %vm750_vm1, %v5581_v26, %v5579_v21  ;;  %v704_v58 = vadd.f32 %v695_v11, %v685_v45  ;;  %v892_v26 = vmul.f32 %v3950_v55, %v5582_v19  ;;  %v881_v48 = vadd.f32 %v872_v30, %v862_v17 }
  0xed   : > { %v4011_v21 = vadd.f32 %v3989_v10, %v1986_v8  ;;  %v882_v52 = vadd.f32 %v873_v49, %v863_v25  ;;  %v910_v3 = vmul.f32 %v3950_v55, %v5452_v50  ;;  %v1850_v14 = vadd.f32 %v1841_v20, %v1831_v37 }
  0xee   : > { %v723_v53 = vadd.f32 %v714_v32, %v704_v58  ;;  %v911_v9 = vmul.f32 %v5452_v50, %v5508_v0  ;;  %v929_v11 = vmul.f32 %v5456_v31, %v5508_v0  ;;  %v900_v15 = vadd.f32 %v891_v43, %v881_v48  ;;  %v4032_v43 = vpop.permute.xlu2 %1447 }
  0xef   : > { %5583 = vst [vmem:[#allocation54_spill] sm:$0xff] %v4011_v21  ;;  %v2013_v44 = vsel %vm2006_vm7, %v4011_v21, 0.0  ;;  %v901_v39 = vadd.f32 %v892_v26, %v882_v52  ;;  %v5306_v8 = vrot.slane %v4006_v59, 6  ;;  %v1766_v25 = vmul.f32 %v3804_v56, %v3674_v41 }
  0xf0   : > { %v4022_v17 = vmul.f32 %v763_v40, %v723_v53  ;;  %2014 = vadd.xlane.f32.xlu0 %v2013_v44  ;;  %v1785_v20 = vmul.f32 %v3862_v36, %v3688_v33  ;;  %v1804_v37 = vmul.f32 %v3871_v2, %v3691_v4  ;;  %v1879_v0 = vmul.f32 %v3950_v55, %v3778_v1  ;;  %v5587_v44 = vld [vmem:[#allocation69_spill] sm:$0xff] }
  0xf1   : > { %v534_v32 = vadd.f32 %v526_v29, %v517_v46  ;;  %v919_v52 = vadd.f32 %v910_v3, %v900_v15  ;;  %v948_v40 = vmul.f32 %v5460_v51, %v5544_v57  ;;  %v1869_v54 = vadd.f32 %v3938_v6, %v1850_v14  ;;  %v5585_v6 = vld [vmem:[#allocation59_spill] sm:$0xff] }
  0xf2   : > { %v5305_v45 = vrot.slane %v4022_v17, 1  ;;  %v1794_v30 = vadd.f32 %v1785_v20, %v1766_v25  ;;  %v1823_v49 = vmul.f32 %v3885_v34, %v3703_v61  ;;  %v920_v58 = vadd.f32 %v911_v9, %v901_v39 }
  0xf3   : > { %v930_v26 = vmul.f32 %v5456_v31, %v5544_v57  ;;  %v938_v48 = vadd.f32 %v929_v11, %v919_v52  ;;  %v5584_v46 = vrot.slane %v3723_v5, 6  ;;  %v5586_v3 = vrot.slane %v5585_v6, 1  ;;  %v5599_v31 = vld [vmem:[#allocation14_spill] sm:$0xff] }
  0xf4   : > { %v1813_v53 = vadd.f32 %v1804_v37, %v1794_v30  ;;  %v1842_v9 = vmul.f32 %v3892_v24, %v3726_v22  ;;  %v423_v11 = vmul.f32 %v3841_v42, %v5548_v60  ;;  %v5588_v15 = vrot.slane %v5587_v44, 2  ;;  %v5590_v30 = vld [vmem:[#allocation63_spill] sm:$0xff]  ;;  %v5600_v42 = vld [vmem:[#allocation17_spill] sm:$0xff] }
  0xf5   : > { %v997_v29 = vsel %vm984_vm0, %v5584_v46, %v5306_v8  ;;  %v806_v14 = vsel %vm793_vm2, %v5586_v3, %v5305_v45  ;;  %v5589_v5 = vrot.slane %v3855_v27, 2  ;;  %v582_v25 = vmul.f32 %v3966_v47, %v534_v32 }
  0xf6   : > { %v957_v20 = vadd.f32 %v948_v40, %v938_v48  ;;  %v440_v52 = vmul.f32 %v3804_v56, %v5549_v28  ;;  %v1888_v37 = vadd.f32 %v1879_v0, %v1869_v54  ;;  %v949_v46 = vmul.f32 %v5460_v51, %v5590_v30  ;;  %v4075_v40 = vld [vmem:[%s2952_s19 + $0x58] sm:$0xff] }
  0xf7   : > { %v1925_v39 = vsel %vm1027_vm6, %v5589_v5, %v5588_v15  ;;  %v1832_v3 = vadd.f32 %v1823_v49, %v1813_v53  ;;  %v457_v45 = vmul.f32 %v3862_v36, %v5550_v12  ;;  %v939_v8 = vadd.f32 %v930_v26, %v920_v58  ;;  %v5592_v49 = vld [vmem:[#allocation53_spill] sm:$0xff] }
  0xf8   : > { %v4068_v21 = vmul.f32 %v997_v29, %v957_v20  ;;  %v448_v27 = vadd.f32 %v440_v52, %v423_v11  ;;  %v474_v15 = vmul.f32 %v3871_v2, %v5554_v23  ;;  %v1861_v32 = vmul.f32 %v3950_v55, %v3746_v38  ;;  %v4100_v52 = vpop.permute.xlu2 %1909  ;;  %v5602_v38 = vld [vmem:[#allocation58_spill] sm:$0xff] }
  0xf9   : > { %v1851_v47 = vadd.f32 %v1842_v9, %v1832_v3  ;;  %v1880_v0 = vmul.f32 %v4075_v40, %v3778_v1  ;;  %v5591_v54 = vrot.slane %v5585_v6, 1  ;;  %v5593_v48 = vrot.slane %v5592_v49, 1  ;;  %5596 = vst [vmem:[#allocation59_spill] sm:$0xff] %v4100_v52 }
  0xfa   : > { %v824_v26 = vadd.f32 %v806_v14, %v582_v25  ;;  %v5313_v29 = vrot.slane %v4068_v21, 2  ;;  %v465_v53 = vadd.f32 %v457_v45, %v448_v27  ;;  %v491_v9 = vmul.f32 %v3885_v34, %v5564_v13  ;;  %v5594_v14 = vld [vmem:[#allocation81_spill] sm:$0xff]  ;;  %v5597_v27 = vld [vmem:[#allocation11_spill] sm:$0xff] }
  0xfb   : > { %v804_v58 = vsel %vm793_vm2, %v5593_v48, %v5591_v54  ;;  %v508_v11 = vmul.f32 %v3892_v24, %v5567_v63  ;;  %v525_v5 = vmul.f32 %v3950_v55, %v5568_v7  ;;  %v601_v6 = vmul.f32 %v3871_v2, %v5558_v18 }
  0xfc   : > { %v602_v20 = vmul.f32 %v3885_v34, %v5558_v18  ;;  %v5595_v25 = vrot.slane %v5594_v14, 2  ;;  %v482_v3 = vadd.f32 %v474_v15, %v465_v53  ;;  %v620_v54 = vmul.f32 %v3885_v34, %v5597_v27  ;;  %v5601_v53 = vld [vmem:[#allocation83_spill] sm:$0xff] }
  0xfd   : > { %v621_v49 = vmul.f32 %v3892_v24, %v5597_v27  ;;  %v1870_v51 = vadd.f32 %v1861_v32, %v1851_v47  ;;  %v639_v50 = vmul.f32 %v3892_v24, %v5599_v31  ;;  %v640_v19 = vmul.f32 %v3950_v55, %v5599_v31  ;;  %v5603_v27 = vld [vmem:[#allocation27_spill] sm:$0xff]  ;;  %v560_v47 = vpop.permute.xlu1 %559 }
  0xfe   : > { %v1040_v45 = vsel %vm1027_vm6, %v5595_v25, %v5313_v29  ;;  %v499_v62 = vadd.f32 %v491_v9, %v482_v3  ;;  %v629_v25 = vadd.f32 %v620_v54, %v601_v6  ;;  %v658_v15 = vmul.f32 %v3950_v55, %v5600_v42  ;;  %v5604_v9 = vld [vmem:[#allocation90_spill] sm:$0xff]  ;;  %v5605_v6 = vld [vmem:[#allocation61_spill] sm:$0xff] }
  0xff   : > { %v4106_v48 = vadd.f32 %v1040_v45, %v824_v26  ;;  %v630_v29 = vadd.f32 %v621_v49, %v602_v20  ;;  %v1271_v18 = vrot.slane %v5602_v38, 3  ;;  %v659_v31 = vmul.f32 %v4075_v40, %v5600_v42  ;;  %v5607_v49 = vld [vmem:[#allocation73_spill] sm:$0xff]  ;;  %v5636_v42 = vld [vmem:[#allocation80_spill] sm:$0xff] }
 0x100   : > { %v516_v32 = vadd.f32 %v508_v11, %v499_v62  ;;  %v648_v45 = vadd.f32 %v639_v50, %v629_v25  ;;  %v4122_v20 = vmul.f32 %v5605_v6, %v5604_v9  ;;  %v4124_v3 = vmul.f32 %v1925_v39, %v1888_v37  ;;  %v5610_v11 = vld [vmem:[#allocation36_spill] sm:$0xff]  ;;  %v5614_v9 = vld [vmem:[#allocation38_spill] sm:$0xff] }
 0x101   : > { %5598 = vst [vmem:[#allocation69_spill] sm:$0xff] %v4106_v48  ;;  %v649_v48 = vadd.f32 %v640_v19, %v630_v29  ;;  %v958_v54 = vadd.f32 %v949_v46, %v939_v8  ;;  %v5608_v1 = vrot.slane %v5607_v49, 6  ;;  %v5609_v38 = vrot.slane %v4006_v59, 6  ;;  %v5611_v8 = vld [vmem:[#allocation37_spill] sm:$0xff] }
 0x102   : > { %5606 = vst [vmem:[#allocation63_spill] sm:$0xff] %v4122_v20  ;;  %v1889_v62 = vadd.f32 %v1880_v0, %v1870_v51  ;;  %v533_v50 = vadd.f32 %v525_v5, %v516_v32  ;;  %v667_v19 = vadd.f32 %v658_v15, %v648_v45  ;;  %v677_v29 = vmul.f32 %v4075_v40, %v5569_v35 }
 0x103   : > { %v999_v26 = vsel %vm984_vm0, %v5609_v38, %v5608_v1  ;;  %v1301_v25 = vmul.f32 %v3804_v56, %v5610_v11  ;;  %v1302_v39 = vmul.f32 %v3862_v36, %v5610_v11  ;;  %v1320_v37 = vmul.f32 %v3862_v36, %v5611_v8 }
 0x104   : > { %v1321_v59 = vmul.f32 %v3871_v2, %v5611_v8  ;;  %v5612_v1 = vrot.slane %v4100_v52, 2  ;;  %v5613_v51 = vrot.slane %v5587_v44, 2  ;;  %v581_v0 = vmul.f32 %v560_v47, %v533_v50  ;;  %v5617_v52 = vld [vmem:[#allocation68_spill] sm:$0xff] }
 0x105   : > { %v668_v5 = vadd.f32 %v659_v31, %v649_v48  ;;  %v678_v15 = vmul.f32 %v5569_v35, %v5544_v57  ;;  %v1329_v32 = vadd.f32 %v1320_v37, %v1301_v25  ;;  %v1339_v6 = vmul.f32 %v3871_v2, %v5614_v9  ;;  %v5619_v48 = vld [vmem:[#allocation40_spill] sm:$0xff] }
 0x106   : > { %v1927_v46 = vsel %vm1027_vm6, %v5613_v51, %v5612_v1  ;;  %v1330_v45 = vadd.f32 %v1321_v59, %v1302_v39  ;;  %v1340_v49 = vmul.f32 %v3885_v34, %v5614_v9  ;;  %v4152_v38 = vmul.f32 %v999_v26, %v958_v54 }
 0x107   : > { %v823_v56 = vadd.f32 %v804_v58, %v581_v0  ;;  %v5616_v44 = vrot.slane %v5594_v14, 2  ;;  %v5618_v1 = vrot.slane %v5617_v52, 2  ;;  %v1358_v47 = vmul.f32 %v3885_v34, %v5619_v48 }
 0x108   : > { %5615 = vst [vmem:[#allocation53_spill] sm:$0xff] %v4152_v38  ;;  %v4161_v50 = vmul.f32 %v1927_v46, %v1889_v62  ;;  %v686_v25 = vadd.f32 %v677_v29, %v667_v19  ;;  %v696_v39 = vmul.f32 %v5573_v16, %v5544_v57  ;;  %v1348_v37 = vadd.f32 %v1339_v6, %v1329_v32  ;;  %v4176_v19 = vpop.permute.xlu2 %748  ;;  %v5623_v32 = vld [vmem:[#allocation43_spill] sm:$0xff] }
 0x109   : > { %v1038_v31 = vsel %vm1027_vm6, %v5618_v1, %v5616_v44  ;;  %v5621_v26 = vrot.slane %v5603_v27, 3  ;;  %v1349_v52 = vadd.f32 %v1340_v49, %v1330_v45  ;;  %v1359_v54 = vmul.f32 %v3892_v24, %v5619_v48  ;;  %v5624_v49 = vld [vmem:[#allocation60_spill] sm:$0xff]  ;;  %v5629_v27 = vld [vmem:[#allocation39_spill] sm:$0xff] }
 0x10a   : > { %5620 = vst [vmem:[#allocation81_spill] sm:$0xff] %v4161_v50  ;;  %v4170_v14 = vadd.f32 %v1038_v31, %v823_v56  ;;  %v687_v29 = vadd.f32 %v678_v15, %v668_v5  ;;  %v697_v51 = vmul.f32 %v5573_v16, %v5590_v30  ;;  %v1367_v56 = vadd.f32 %v1358_v47, %v1348_v37  ;;  %v5626_v5 = vld [vmem:[#allocation30_spill] sm:$0xff]  ;;  %v5627_v47 = vld [vmem:[#allocation72_spill] sm:$0xff]  ;;  %v5639_v50 = vld [vmem:[#allocation89_spill] sm:$0xff] }
 0x10b   : > { %v4168_v58 = vsel %vm1261_vm5, %v1271_v18, %v5621_v26  ;;  %v1377_v45 = vmul.f32 %v3892_v24, %v5623_v32  ;;  %v5625_v44 = vrot.slane %v5624_v49, 3  ;;  %v705_v31 = vadd.f32 %v696_v39, %v686_v25  ;;  %v5628_v37 = vld [vmem:[#allocation66_spill] sm:$0xff]  ;;  %v5631_v25 = vld [vmem:[#allocation13_spill] sm:$0xff] }
 0x10c   : > { %5622 = vst [vmem:[#allocation83_spill] sm:$0xff] %v4168_v58  ;;  %v715_v15 = vmul.f32 %v5626_v5, %v5590_v30  ;;  %v764_v26 = vrot.slane %v4176_v19, 7  ;;  %v1368_v59 = vadd.f32 %v1359_v54, %v1349_v52  ;;  %v1378_v0 = vmul.f32 %v3950_v55, %v5623_v32  ;;  %v5630_v49 = vld [vmem:[#allocation46_spill] sm:$0xff]  ;;  %v1445_v52 = vpop.permute.xlu1 %1444 }
 0x10d   : > { %v1272_v1 = vsel %vm1261_vm5, %v5625_v44, %v1271_v18  ;;  %v1290_v62 = vadd.f32 %v5628_v37, %v5627_v47  ;;  %v706_v46 = vadd.f32 %v697_v51, %v687_v29  ;;  %v716_v6 = vmul.f32 %v5626_v5, %v5629_v27  ;;  %v5633_v44 = vld [vmem:[#allocation55_spill] sm:$0xff] }
 0x10e   : > { %v1396_v18 = vmul.f32 %v3950_v55, %v5630_v49  ;;  %v5632_v39 = vrot.slane %v5631_v25, 4  ;;  %v5634_v58 = vrot.slane %v5633_v44, 4  ;;  %v1386_v54 = vadd.f32 %v1377_v45, %v1367_v56  ;;  %v5641_v56 = vld [vmem:[#allocation88_spill] sm:$0xff] }
 0x10f   : > { %v5635_v35 = vrot.slane %v5601_v53, 5  ;;  %v5637_v47 = vrot.slane %v5636_v42, 5  ;;  %v425_v51 = vmul.f32 %v3862_v36, %v5548_v60  ;;  %v724_v37 = vadd.f32 %v715_v15, %v705_v31  ;;  %v5644_v60 = vld [vmem:[#allocation4_spill] sm:$0xff] }
 0x110   : > { %v1503_v19 = vsel %vm1452_vm3, %v5634_v58, %v5632_v39  ;;  %v5638_v5 = vrot.slane %v4124_v3, 6  ;;  %v5640_v20 = vrot.slane %v5639_v50, 6  ;;  %v442_v58 = vmul.f32 %v3871_v2, %v5549_v28 }
 0x111   : > { %v1523_v16 = vadd.f32 %v1503_v19, %v1290_v62  ;;  %v1735_v29 = vsel %vm1218_vm4, %v5637_v47, %v5635_v35  ;;  %v459_v62 = vmul.f32 %v3885_v34, %v5550_v12  ;;  %v5642_v42 = vrot.slane %v5641_v56, 7  ;;  %v5643_v47 = vld [vmem:[#allocation48_spill] sm:$0xff] }
 0x112   : > { %v1967_v44 = vsel %vm984_vm0, %v5640_v20, %v5638_v5  ;;  %v1387_v45 = vadd.f32 %v1378_v0, %v1368_v59  ;;  %v1397_v31 = vmul.f32 %v4075_v40, %v5630_v49  ;;  %v725_v39 = vadd.f32 %v716_v6, %v706_v46  ;;  %v5646_v46 = vld [vmem:[#allocation5_spill] sm:$0xff] }
 0x113   : > { %v765_v35 = vsel %vm750_vm1, %v5642_v42, %v764_v26  ;;  %v1755_v15 = vadd.f32 %v1735_v29, %v1523_v16  ;;  %v1462_v19 = vrot.slane %v1445_v52, 4  ;;  %v450_v50 = vadd.f32 %v442_v58, %v425_v51  ;;  %v5649_v51 = vld [vmem:[#allocation28_spill] sm:$0xff] }
 0x114   : > { %v476_v20 = vmul.f32 %v3892_v24, %v5554_v23  ;;  %v1405_v5 = vadd.f32 %v1396_v18, %v1386_v54  ;;  %v1415_v28 = vmul.f32 %v4075_v40, %v5643_v47  ;;  %v1537_v56 = vmul.f32 %v3885_v34, %v5644_v60  ;;  %v5648_v54 = vld [vmem:[#allocation6_spill] sm:$0xff] }
 0x115   : > { %v1987_v12 = vadd.f32 %v1967_v44, %v1755_v15  ;;  %v4231_v42 = vmul.f32 %v765_v35, %v724_v37  ;;  %v467_v59 = vadd.f32 %v459_v62, %v450_v50  ;;  %v493_v16 = vmul.f32 %v3950_v55, %v5564_v13 }
 0x116   : > { %v1556_v0 = vmul.f32 %v3892_v24, %v5646_v46  ;;  %v1406_v6 = vadd.f32 %v1397_v31, %v1387_v45  ;;  %v1416_v18 = vmul.f32 %v5643_v47, %v5544_v57  ;;  %v1575_v29 = vmul.f32 %v3950_v55, %v5648_v54 }
 0x117   : > { %5645 = vst [vmem:[#allocation58_spill] sm:$0xff] %v4231_v42  ;;  %v4240_v52 = vadd.f32 %v3989_v10, %v1987_v12  ;;  %v5650_v37 = vrot.slane %v5649_v51, 4  ;;  %v484_v58 = vadd.f32 %v476_v20, %v467_v59  ;;  %v510_v62 = vmul.f32 %v4075_v40, %v5567_v63  ;;  %v570_v63 = vpop.permute.xlu2 %569 }
 0x118   : > { %v1565_v35 = vadd.f32 %v1556_v0, %v1537_v56  ;;  %v1424_v15 = vadd.f32 %v1415_v28, %v1405_v5  ;;  %v1535_v12 = vmul.f32 %v3862_v36, %v5644_v60  ;;  %v1536_v31 = vmul.f32 %v3871_v2, %v5644_v60  ;;  %v5651_v56 = vld [vmem:[#allocation64_spill] sm:$0xff] }
 0x119   : > { %5647 = vst [vmem:[#allocation90_spill] sm:$0xff] %v4240_v52  ;;  %v1463_v44 = vsel %vm1452_vm3, %v5650_v37, %v1462_v19  ;;  %v2016_v45 = vsel %vm2006_vm7, %v4240_v52, 0.0  ;;  %v501_v50 = vadd.f32 %v493_v16, %v484_v58  ;;  %v527_v51 = vmul.f32 %v5568_v7, %v5544_v57 }
 0x11a   : > { %2017 = vadd.xlane.f32.xlu1 %v2016_v45  ;;  %v1554_v20 = vmul.f32 %v3871_v2, %v5646_v46  ;;  %v1555_v28 = vmul.f32 %v3885_v34, %v5646_v46  ;;  %v1584_v5 = vadd.f32 %v1575_v29, %v1565_v35  ;;  %v1594_v59 = vmul.f32 %v4075_v40, %v5651_v56 }
 0x11b   : > { %v1573_v0 = vmul.f32 %v3885_v34, %v5648_v54  ;;  %v1574_v37 = vmul.f32 %v3892_v24, %v5648_v54  ;;  %v518_v16 = vadd.f32 %v510_v62, %v501_v50  ;;  %v1592_v52 = vmul.f32 %v3892_v24, %v5651_v56  ;;  %v5654_v50 = vld [vmem:[#allocation15_spill] sm:$0xff] }
 0x11c   : > { %v1563_v58 = vadd.f32 %v1554_v20, %v1535_v12  ;;  %v1564_v45 = vadd.f32 %v1555_v28, %v1536_v31  ;;  %v4270_v60 = vadd.f32 %v1272_v1, %v4170_v14  ;;  %v4272_v46 = vmul.f32 %v764_v26, %v725_v39 }
 0x11d   : > { %v5344_v29 = vrot.slane %v4231_v42, 1  ;;  %v5653_v35 = vrot.slane %v4032_v43, 4  ;;  %v1425_v13 = vadd.f32 %v1416_v18, %v1406_v6  ;;  %v4278_v54 = vmul.f32 %v1463_v44, %v1424_v15  ;;  %v5699_v42 = vld [vmem:[#allocation47_spill] sm:$0xff] }
 0x11e   : > { %5652 = vst [vmem:[#allocation61_spill] sm:$0xff] %v4272_v46  ;;  %v535_v62 = vadd.f32 %v527_v51, %v518_v16  ;;  %v1582_v12 = vadd.f32 %v1573_v0, %v1563_v58  ;;  %v1603_v31 = vadd.f32 %v1594_v59, %v1584_v5  ;;  %v1613_v20 = vmul.f32 %v5654_v50, %v5544_v57  ;;  %v5658_v5 = vld [vmem:[#allocation18_spill] sm:$0xff] }
 0x11f   : > { %v1465_v7 = vsel %vm1452_vm3, %v1462_v19, %v5653_v35  ;;  %v1593_v14 = vmul.f32 %v3950_v55, %v5651_v56  ;;  %v1303_v1 = vmul.f32 %v3871_v2, %v5610_v11  ;;  %v1583_v39 = vadd.f32 %v1574_v37, %v1564_v45  ;;  %v1681_v37 = vpop.permute.xlu1 %1680 }
 0x120   : > { %v583_v26 = vmul.f32 %v570_v63, %v535_v62  ;;  %v1601_v28 = vadd.f32 %v1592_v52, %v1582_v12  ;;  %v1611_v19 = vmul.f32 %v3950_v55, %v5654_v50  ;;  %v5655_v6 = vrot.slane %v4022_v17, 1 }
 0x121   : > { %v5656_v57 = vrot.slane %v4152_v38, 2  ;;  %v5657_v44 = vrot.slane %v4068_v21, 2  ;;  %v1304_v63 = vmul.f32 %v3885_v34, %v5610_v11  ;;  %v1322_v52 = vmul.f32 %v3885_v34, %v5611_v8 }
 0x122   : > { %v808_v18 = vsel %vm793_vm2, %v5655_v6, %v5344_v29  ;;  %v1632_v59 = vmul.f32 %v5658_v5, %v5590_v30  ;;  %v1612_v17 = vmul.f32 %v4075_v40, %v5654_v50  ;;  %v1630_v0 = vmul.f32 %v4075_v40, %v5658_v5  ;;  %v4316_v30 = vpop.permute.xlu0 %1683 }
 0x123   : > { %v1042_v15 = vsel %vm1027_vm6, %v5657_v44, %v5656_v57  ;;  %v825_v51 = vadd.f32 %v808_v18, %v583_v26  ;;  %v1323_v21 = vmul.f32 %v3892_v24, %v5611_v8  ;;  %v1331_v16 = vadd.f32 %v1322_v52, %v1303_v1 }
 0x124   : > { %v1341_v58 = vmul.f32 %v3892_v24, %v5614_v9  ;;  %v1342_v45 = vmul.f32 %v3950_v55, %v5614_v9  ;;  %v1622_v62 = vadd.f32 %v1613_v20, %v1603_v31  ;;  %v1602_v12 = vadd.f32 %v1593_v14, %v1583_v39 }
 0x125   : > { %v4314_v35 = vadd.f32 %v1042_v15, %v825_v51  ;;  %v1620_v26 = vadd.f32 %v1611_v19, %v1601_v28  ;;  %v1332_v6 = vadd.f32 %v1323_v21, %v1304_v63  ;;  %v1360_v57 = vmul.f32 %v3950_v55, %v5619_v48  ;;  %v5660_v19 = vld [vmem:[#allocation67_spill] sm:$0xff] }
 0x126   : > { %v1350_v18 = vadd.f32 %v1341_v58, %v1331_v16  ;;  %v1361_v1 = vmul.f32 %v4075_v40, %v5619_v48  ;;  %v4323_v52 = vmul.f32 %v1465_v7, %v1425_v13  ;;  %v1696_v51 = vrot.slane %v1681_v37, 3  ;;  %v4332_v16 = vld [vmem:[%s2952_s19 + $0x60] sm:$0xff] }
 0x127   : > { %5659 = vst [vmem:[#allocation73_spill] sm:$0xff] %v4314_v35  ;;  %v1698_v31 = vrot.slane %v4316_v30, 3  ;;  %v1351_v20 = vadd.f32 %v1342_v45, %v1332_v6  ;;  %v1379_v39 = vmul.f32 %v4075_v40, %v5623_v32  ;;  %v1641_v28 = vadd.f32 %v1632_v59, %v1622_v62  ;;  %v4341_v30 = vld [vmem:[%s2952_s19 + $0x68] sm:$0xff] }
 0x128   : > { %v1369_v14 = vadd.f32 %v1360_v57, %v1350_v18  ;;  %v1651_v63 = vmul.f32 %v5660_v19, %v5629_v27  ;;  %v1621_v21 = vadd.f32 %v1612_v17, %v1602_v12  ;;  %v1631_v13 = vmul.f32 %v4332_v16, %v5658_v5  ;;  %v5661_v27 = vld [vmem:[#allocation86_spill] sm:$0xff]  ;;  %v4370_v5 = vld [vmem:[%s2952_s19 + $0x70] sm:$0x3f] }
 0x129   : > { %v1639_v7 = vadd.f32 %v1630_v0, %v1620_v26  ;;  %v1649_v37 = vmul.f32 %v4332_v16, %v5660_v19  ;;  %v1370_v58 = vadd.f32 %v1361_v1, %v1351_v20  ;;  %v1380_v45 = vmul.f32 %v4332_v16, %v5623_v32  ;;  %v5677_v32 = vld [vmem:[#allocation17_spill] sm:$0xff] }
 0x12a   : > { %v1650_v59 = vmul.f32 %v4341_v30, %v5660_v19  ;;  %v5662_v17 = vrot.slane %v5661_v27, 3  ;;  %v1767_v0 = vmul.f32 %v3862_v36, %v3674_v41  ;;  %v1786_v12 = vmul.f32 %v3871_v2, %v3688_v33  ;;  %v1451_v27 = vpop.permute.xlu2 %1450  ;;  %v5703_v33 = vld [vmem:[#allocation31_spill] sm:$0xff] }
 0x12b   : > { %v1699_v26 = vsel %vm1261_vm5, %v1696_v51, %v1698_v31  ;;  %v1388_v6 = vadd.f32 %v1379_v39, %v1369_v14  ;;  %v1398_v18 = vmul.f32 %v4332_v16, %v5630_v49  ;;  %v1805_v57 = vmul.f32 %v3885_v34, %v3691_v4  ;;  %v4364_v14 = vld [vmem:[%s2952_s19] sm:$0xff]  ;;  %v4367_v39 = vld [vmem:[%s2952_s19 + $0x8] sm:$0xff] }
 0x12c   : > { %v1697_v62 = vsel %vm1261_vm5, %v5662_v17, %v1696_v51  ;;  %v1660_v1 = vadd.f32 %v1651_v63, %v1641_v28  ;;  %v1640_v20 = vadd.f32 %v1631_v13, %v1621_v21  ;;  %v1795_v17 = vadd.f32 %v1786_v12, %v1767_v0  ;;  %v5665_v12 = vld [vmem:[#allocation63_spill] sm:$0xff] }
 0x12d   : > { %v1824_v29 = vmul.f32 %v3892_v24, %v3703_v61  ;;  %v1658_v44 = vadd.f32 %v1649_v37, %v1639_v7  ;;  %v1389_v15 = vadd.f32 %v1380_v45, %v1370_v58  ;;  %v1399_v19 = vmul.f32 %v4341_v30, %v5630_v49 }
 0x12e   : > { %v1417_v51 = vmul.f32 %v4341_v30, %v5643_v47  ;;  %v1418_v28 = vmul.f32 %v4370_v5, %v5643_v47  ;;  %v1814_v63 = vadd.f32 %v1805_v57, %v1795_v17  ;;  %v1843_v21 = vmul.f32 %v3950_v55, %v3726_v22  ;;  %v5668_v17 = vld [vmem:[#allocation10_spill] sm:$0xff] }
 0x12f   : > { %v5663_v13 = vrot.slane %v4278_v54, 4  ;;  %v5664_v7 = vrot.slane %v5631_v25, 4  ;;  %v1407_v58 = vadd.f32 %v1398_v18, %v1388_v6  ;;  %v1466_v45 = vrot.slane %v1451_v27, 4  ;;  %v5669_v25 = vld [vmem:[#allocation11_spill] sm:$0xff]  ;;  %v5674_v22 = vld [vmem:[#allocation14_spill] sm:$0xff] }
 0x130   : > { %v5666_v50 = vrot.slane %v5665_v12, 5  ;;  %v5667_v56 = vrot.slane %v5601_v53, 5  ;;  %v1833_v57 = vadd.f32 %v1824_v29, %v1814_v63  ;;  %v594_v47 = vmul.f32 %v5668_v17, %v4364_v14  ;;  %v5670_v18 = vld [vmem:[#allocation3_spill] sm:$0xff]  ;;  %v5671_v29 = vld [vmem:[#allocation81_spill] sm:$0xff] }
 0x131   : > { %v1505_v37 = vsel %vm1452_vm3, %v5664_v7, %v5663_v13  ;;  %v595_v49 = vmul.f32 %v5668_v17, %v4367_v39  ;;  %v613_v13 = vmul.f32 %v5669_v25, %v4367_v39  ;;  %v1408_v6 = vadd.f32 %v1399_v19, %v1389_v15  ;;  %v4396_v7 = vld [vmem:[%s2952_s19 + $0x10] sm:$0xff]  ;;  %v4407_v19 = vpop.permute.xlu1 %1912 }
 0x132   : > { %v1524_v0 = vadd.f32 %v1505_v37, %v4270_v60  ;;  %v1737_v35 = vsel %vm1218_vm4, %v5667_v56, %v5666_v50  ;;  %v1862_v60 = vmul.f32 %v4075_v40, %v5670_v18  ;;  %v614_v53 = vmul.f32 %v4396_v7, %v5669_v25  ;;  %5675 = vst [vmem:[#allocation36_spill] sm:$0xff] %v4407_v19 }
 0x133   : > { %v1852_v56 = vadd.f32 %v1843_v21, %v1833_v57  ;;  %v5672_v50 = vrot.slane %v5671_v29, 6  ;;  %v5673_v63 = vrot.slane %v4124_v3, 6  ;;  %v622_v17 = vadd.f32 %v613_v13, %v594_v47 }
 0x134   : > { %v1756_v27 = vadd.f32 %v1737_v35, %v1524_v0  ;;  %v632_v15 = vmul.f32 %v4396_v7, %v5674_v22  ;;  %v623_v35 = vadd.f32 %v614_v53, %v595_v49  ;;  %v5676_v0 = vld [vmem:[#allocation84_spill] sm:$0xff]  ;;  %v4413_v57 = vmul.f32 %v1698_v31, %v1660_v1 }
 0x135   : > { %v1969_v37 = vsel %vm984_vm0, %v5673_v63, %v5672_v50  ;;  %v633_v61 = vmul.f32 %v5676_v0, %v5674_v22  ;;  %v651_v21 = vmul.f32 %v5676_v0, %v5677_v32  ;;  %v1659_v25 = vadd.f32 %v1650_v59, %v1640_v20  ;;  %v5679_v63 = vld [vmem:[#allocation76_spill] sm:$0xff]  ;;  %v5682_v59 = vld [vmem:[#allocation85_spill] sm:$0xff] }
 0x136   : > { %v1988_v18 = vadd.f32 %v1969_v37, %v1756_v27  ;;  %5678 = vst [vmem:[#allocation37_spill] sm:$0xff] %v4413_v57  ;;  %v4415_v3 = vmul.f32 %v1697_v62, %v1658_v44  ;;  %v641_v50 = vadd.f32 %v632_v15, %v622_v17  ;;  %v1426_v47 = vadd.f32 %v1417_v51, %v1407_v58  ;;  %v5683_v51 = vld [vmem:[#allocation21_spill] sm:$0xff] }
 0x137   : > { %v1871_v13 = vadd.f32 %v1862_v60, %v1852_v56  ;;  %v1881_v4 = vmul.f32 %v4332_v16, %v5679_v63  ;;  %v1427_v49 = vadd.f32 %v1418_v28, %v1408_v6  ;;  %v5681_v22 = vrot.slane %v4032_v43, 4  ;;  %v5685_v6 = vld [vmem:[#allocation23_spill] sm:$0xff]  ;;  %v5692_v63 = vld [vmem:[#allocation26_spill] sm:$0xff] }
 0x138   : > { %v4420_v27 = vadd.f32 %v3989_v10, %v1988_v18  ;;  %v5358_v31 = vrot.slane %v4407_v19, 2  ;;  %v652_v44 = vmul.f32 %v5682_v59, %v5677_v32  ;;  %v642_v1 = vadd.f32 %v633_v61, %v623_v35  ;;  %v5687_v61 = vld [vmem:[#allocation24_spill] sm:$0xff]  ;;  %v5689_v35 = vld [vmem:[#allocation59_spill] sm:$0xff]  ;;  %v5694_v28 = vld [vmem:[#allocation34_spill] sm:$0xff] }
 0x139   : > { %v1467_v53 = vsel %vm1452_vm3, %v5681_v22, %v1466_v45  ;;  %v660_v20 = vadd.f32 %v651_v21, %v641_v50  ;;  %v670_v58 = vmul.f32 %v5682_v59, %v5683_v51  ;;  %v4434_v43 = vmul.f32 %v1699_v26, %v1659_v25  ;;  %v5691_v25 = vld [vmem:[#allocation82_spill] sm:$0xff] }
 0x13a   : > { %5680 = vst [vmem:[#allocation38_spill] sm:$0xff] %v4420_v27  ;;  %v2019_v62 = vsel %vm2006_vm7, %v4420_v27, 0.0  ;;  %v419_v60 = vmul.f32 %v5685_v6, %v4364_v14  ;;  %v4439_v56 = vmul.f32 %v1467_v53, %v1426_v47  ;;  %v1890_v37 = vadd.f32 %v1881_v4, %v1871_v13  ;;  %v728_v47 = vpop.permute.xlu2 %727  ;;  %v5698_v27 = vld [vmem:[#allocation45_spill] sm:$0xff] }
 0x13b   : > { %5684 = vst [vmem:[#allocation68_spill] sm:$0xff] %v4434_v43  ;;  %2020 = vadd.xlane.f32.xlu2 %v2019_v62  ;;  %v436_v17 = vmul.f32 %v5687_v61, %v4367_v39  ;;  %v4443_v15 = vmul.f32 %v1466_v45, %v1427_v49  ;;  %v5690_v21 = vrot.slane %v5689_v35, 2  ;;  %v671_v50 = vmul.f32 %v5691_v25, %v5683_v51  ;;  %v5693_v45 = vld [vmem:[#allocation25_spill] sm:$0xff] }
 0x13c   : > { %5686 = vst [vmem:[#allocation60_spill] sm:$0xff] %v4439_v56  ;;  %v689_v22 = vmul.f32 %v5691_v25, %v5692_v63  ;;  %v661_v53 = vadd.f32 %v652_v44, %v642_v1  ;;  %v679_v4 = vadd.f32 %v670_v58, %v660_v20  ;;  %v690_v13 = vmul.f32 %v3862_v36, %v5692_v63  ;;  %v5695_v51 = vld [vmem:[#allocation41_spill] sm:$0xff]  ;;  %v5696_v44 = vld [vmem:[#allocation30_spill] sm:$0xff] }
 0x13d   : > { %5688 = vst [vmem:[#allocation72_spill] sm:$0xff] %v4443_v15  ;;  %v1929_v26 = vsel %vm1027_vm6, %v5690_v21, %v5358_v31  ;;  %v453_v49 = vmul.f32 %v4396_v7, %v5693_v45  ;;  %v444_v62 = vadd.f32 %v436_v17, %v419_v60  ;;  %v1069_v35 = vmul.f32 %v3871_v2, %v5694_v28  ;;  %v5697_v58 = vld [vmem:[#allocation42_spill] sm:$0xff] }
 0x13e   : > { %v1070_v21 = vmul.f32 %v3885_v34, %v5694_v28  ;;  %v1088_v31 = vmul.f32 %v3885_v34, %v5695_v51  ;;  %v4464_v32 = vmul.f32 %v1929_v26, %v1890_v37  ;;  %v708_v1 = vmul.f32 %v3862_v36, %v5696_v44 }
 0x13f   : > { %v1089_v20 = vmul.f32 %v3892_v24, %v5695_v51  ;;  %v1107_v60 = vmul.f32 %v3892_v24, %v5697_v58  ;;  %v751_v17 = vrot.slane %v728_v47, 7  ;;  %v1108_v18 = vmul.f32 %v3950_v55, %v5697_v58 }
 0x140   : > { %v1097_v63 = vadd.f32 %v1088_v31, %v1069_v35  ;;  %v1126_v57 = vmul.f32 %v3950_v55, %v5698_v27  ;;  %v680_v19 = vadd.f32 %v671_v50, %v661_v53  ;;  %v698_v37 = vadd.f32 %v689_v22, %v679_v4  ;;  %v5700_v22 = vld [vmem:[#allocation51_spill] sm:$0xff] }
 0x141   : > { %v1098_v26 = vadd.f32 %v1089_v20, %v1070_v21  ;;  %v1127_v43 = vmul.f32 %v4075_v40, %v5698_v27  ;;  %v461_v38 = vadd.f32 %v453_v49, %v444_v62  ;;  %v470_v41 = vmul.f32 %v5676_v0, %v5554_v23  ;;  %v5702_v21 = vld [vmem:[#allocation29_spill] sm:$0xff] }
 0x142   : > { %v1116_v47 = vadd.f32 %v1107_v60, %v1097_v63  ;;  %v709_v35 = vmul.f32 %v3871_v2, %v5696_v44  ;;  %v1145_v50 = vmul.f32 %v4075_v40, %v5699_v42  ;;  %v5701_v53 = vrot.slane %v5700_v22, 7 }
 0x143   : > { %v1117_v48 = vadd.f32 %v1108_v18, %v1098_v26  ;;  %v487_v49 = vmul.f32 %v5682_v59, %v5702_v21  ;;  %v1146_v20 = vmul.f32 %v4332_v16, %v5699_v42  ;;  %v699_v60 = vadd.f32 %v690_v13, %v680_v19 }
 0x144   : > { %v753_v4 = vsel %vm750_vm1, %v751_v17, %v5701_v53  ;;  %v1135_v62 = vadd.f32 %v1126_v57, %v1116_v47  ;;  %v717_v63 = vadd.f32 %v708_v1, %v698_v37  ;;  %v504_v44 = vmul.f32 %v5691_v25, %v5703_v33  ;;  %v5704_v47 = vld [vmem:[#allocation50_spill] sm:$0xff] }
 0x145   : > { %v1136_v18 = vadd.f32 %v1127_v43, %v1117_v48  ;;  %v478_v26 = vadd.f32 %v470_v41, %v461_v38  ;;  %v1062_v31 = vmul.f32 %v5694_v28, %v4364_v14  ;;  %v1063_v22 = vmul.f32 %v5694_v28, %v4367_v39  ;;  %v1217_v41 = vpop.permute.xlu1 %1216 }
 0x146   : > { %v1081_v53 = vmul.f32 %v5695_v51, %v4367_v39  ;;  %v1154_v57 = vadd.f32 %v1145_v50, %v1135_v62  ;;  %v1164_v56 = vmul.f32 %v4332_v16, %v5704_v47  ;;  %v1165_v19 = vmul.f32 %v4341_v30, %v5704_v47 }
 0x147   : > { %v1082_v48 = vmul.f32 %v4396_v7, %v5695_v51  ;;  %v1155_v38 = vadd.f32 %v1146_v20, %v1136_v18  ;;  %v1100_v13 = vmul.f32 %v4396_v7, %v5697_v58  ;;  %v1101_v28 = vmul.f32 %v5676_v0, %v5697_v58  ;;  %v5705_v18 = vld [vmem:[#allocation52_spill] sm:$0xff] }
 0x148   : > { %v1090_v43 = vadd.f32 %v1081_v53, %v1062_v31  ;;  %v718_v1 = vadd.f32 %v709_v35, %v699_v60  ;;  %v4511_v37 = vmul.f32 %v751_v17, %v717_v63  ;;  %v1119_v62 = vmul.f32 %v5676_v0, %v5698_v27 }
 0x149   : > { %v1091_v50 = vadd.f32 %v1082_v48, %v1063_v22  ;;  %v495_v46 = vadd.f32 %v487_v49, %v478_v26  ;;  %v1120_v51 = vmul.f32 %v5682_v59, %v5698_v27  ;;  %v1138_v31 = vmul.f32 %v5682_v59, %v5699_v42  ;;  %v5706_v26 = vld [vmem:[#allocation32_spill] sm:$0xff] }
 0x14a   : > { %v1109_v15 = vadd.f32 %v1100_v13, %v1090_v43  ;;  %v1173_v20 = vadd.f32 %v1164_v56, %v1154_v57  ;;  %v1183_v53 = vmul.f32 %v4341_v30, %v5705_v18  ;;  %v1232_v58 = vrot.slane %v1217_v41, 5  ;;  %v1196_v57 = vpop.permute.xlu2 %1195  ;;  %v5707_v41 = vld [vmem:[#allocation69_spill] sm:$0xff]  ;;  %v5709_v13 = vld [vmem:[#allocation62_spill] sm:$0xff] }
 0x14b   : > { %v1110_v35 = vadd.f32 %v1101_v28, %v1091_v50  ;;  %v1174_v17 = vadd.f32 %v1165_v19, %v1155_v38  ;;  %v1184_v60 = vmul.f32 %v4370_v5, %v5705_v18  ;;  %v1139_v0 = vmul.f32 %v5691_v25, %v5699_v42  ;;  %v5708_v38 = vld [vmem:[#allocation83_spill] sm:$0xff] }
 0x14c   : > { %v1128_v63 = vadd.f32 %v1119_v62, %v1109_v15  ;;  %v4525_v49 = vmul.f32 %v753_v4, %v718_v1  ;;  %v794_v27 = vrot.slane %v4511_v37, 1  ;;  %v521_v59 = vmul.f32 %v3862_v36, %v5706_v26 }
 0x14d   : > { %v1129_v56 = vadd.f32 %v1120_v51, %v1110_v35  ;;  %v512_v22 = vadd.f32 %v504_v44, %v495_v46  ;;  %v1157_v19 = vmul.f32 %v5691_v25, %v5704_v47  ;;  %v1292_v15 = vadd.f32 %v5708_v38, %v5707_v41 }
 0x14e   : > { %v1147_v48 = vadd.f32 %v1138_v31, %v1128_v63  ;;  %v1192_v43 = vadd.f32 %v1183_v53, %v1173_v20  ;;  %v5710_v42 = vrot.slane %v5709_v13, 5  ;;  %v5711_v28 = vrot.slane %v4323_v52, 4 }
 0x14f   : > { %v5712_v1 = vrot.slane %v4278_v54, 4  ;;  %v5713_v46 = vrot.slane %v4415_v3, 5  ;;  %v5714_v44 = vrot.slane %v5665_v12, 5  ;;  %v1193_v50 = vadd.f32 %v1184_v60, %v1174_v17 }
 0x150   : > { %v1233_v4 = vsel %vm1218_vm4, %v5710_v42, %v1232_v58  ;;  %v1148_v62 = vadd.f32 %v1139_v0, %v1129_v56  ;;  %v1158_v51 = vmul.f32 %v3862_v36, %v5704_v47  ;;  %v1219_v20 = vrot.slane %v1196_v57, 5 }
 0x151   : > { %v1507_v37 = vsel %vm1452_vm3, %v5712_v1, %v5711_v28  ;;  %v1739_v25 = vsel %vm1218_vm4, %v5714_v44, %v5713_v46  ;;  %v5715_v53 = vrot.slane %v4464_v32, 6  ;;  %v5716_v35 = vrot.slane %v5671_v29, 6 }
 0x152   : > { %v1525_v31 = vadd.f32 %v1507_v37, %v1292_v15  ;;  %v426_v63 = vmul.f32 %v3871_v2, %v5685_v6  ;;  %v443_v12 = vmul.f32 %v3885_v34, %v5687_v61  ;;  %v1166_v41 = vadd.f32 %v1157_v19, %v1147_v48 }
 0x153   : > { %v1971_v54 = vsel %vm984_vm0, %v5716_v35, %v5715_v53  ;;  %v1176_v17 = vmul.f32 %v3862_v36, %v5705_v18  ;;  %v460_v47 = vmul.f32 %v3892_v24, %v5693_v45  ;;  %v5374_v0 = vrot.slane %v4525_v49, 1  ;;  %v5717_v36 = vld [vmem:[#allocation35_spill] sm:$0xff] }
 0x154   : > { %v1757_v60 = vadd.f32 %v1739_v25, %v1525_v31  ;;  %v529_v56 = vadd.f32 %v521_v59, %v512_v22  ;;  %v451_v29 = vadd.f32 %v443_v12, %v426_v63  ;;  %v477_v57 = vmul.f32 %v3950_v55, %v5554_v23  ;;  %v5719_v31 = vld [vmem:[#allocation72_spill] sm:$0xff]  ;;  %v575_v12 = vpop.permute.xlu1 %574 }
 0x155   : > { %v4565_v38 = vmul.f32 %v1233_v4, %v1192_v43  ;;  %v1167_v15 = vadd.f32 %v1158_v51, %v1148_v62  ;;  %v1177_v34 = vmul.f32 %v3871_v2, %v5705_v18  ;;  %v1251_v19 = vmul.f32 %v1232_v58, %v1193_v50  ;;  %v540_v18 = vpop.permute.xlu0 %539  ;;  %v4594_v51 = vld [vmem:[%s2952_s19 + $0x18] sm:$0xff] }
 0x156   : > { %v1989_v48 = vadd.f32 %v1971_v54, %v1757_v60  ;;  %v5718_v13 = vrot.slane %v5717_v36, 5  ;;  %v468_v24 = vadd.f32 %v460_v47, %v451_v29  ;;  %v494_v59 = vmul.f32 %v4075_v40, %v5702_v21  ;;  %v5720_v47 = vld [vmem:[#allocation61_spill] sm:$0xff]  ;;  %v5722_v29 = vld [vmem:[#allocation58_spill] sm:$0xff]  ;;  %v5725_v36 = vld [vmem:[#allocation71_spill] sm:$0xff] }
 0x157   : > { %v1185_v22 = vadd.f32 %v1176_v17, %v1166_v41  ;;  %v1296_v43 = vmul.f32 %v5610_v11, %v4364_v14  ;;  %v1297_v2 = vmul.f32 %v5610_v11, %v4367_v39  ;;  %v511_v4 = vmul.f32 %v4332_v16, %v5703_v33 }
 0x158   : > { %v1221_v42 = vsel %vm1218_vm4, %v1219_v20, %v5718_v13  ;;  %v4575_v28 = vadd.f32 %v3989_v10, %v1989_v48  ;;  %v485_v58 = vadd.f32 %v477_v57, %v468_v24  ;;  %v1315_v1 = vmul.f32 %v5611_v8, %v4367_v39  ;;  %v4619_v48 = vld [vmem:[%s2952_s19 + $0x20] sm:$0xff] }
 0x159   : > { %v1316_v37 = vmul.f32 %v4396_v7, %v5611_v8  ;;  %v1186_v10 = vadd.f32 %v1177_v34, %v1167_v15  ;;  %v528_v44 = vmul.f32 %v4341_v30, %v5706_v26  ;;  %v1334_v11 = vmul.f32 %v4396_v7, %v5614_v9  ;;  %v5724_v34 = vld [vmem:[#allocation40_spill] sm:$0xff] }
 0x15a   : > { %v2022_v46 = vsel %vm2006_vm7, %v4575_v28, 0.0  ;;  %v502_v25 = vadd.f32 %v494_v59, %v485_v58  ;;  %v1324_v50 = vadd.f32 %v1315_v1, %v1296_v43  ;;  %v1335_v8 = vmul.f32 %v4594_v51, %v5614_v9  ;;  %v2777_v43 = vld [vmem:[%s2952_s19 + $0x40] sm:$0xff]  ;;  %v5728_v58 = vld [vmem:[#allocation53_spill] sm:$0xff] }
 0x15b   : > { %2023 = vadd.xlane.f32.xlu2 %v2022_v46  ;;  %v1325_v62 = vadd.f32 %v1316_v37, %v1297_v2  ;;  %v1510_v53 = vrot.slane %v5719_v31, 4  ;;  %v4599_v35 = vmul.f32 %v540_v18, %v529_v56  ;;  %v4604_v54 = vsel %vm793_vm2, %v794_v27, %v5374_v0  ;;  %v5726_v2 = vld [vmem:[#allocation77_spill] sm:$0xff]  ;;  %v5730_v37 = vld [vmem:[#allocation74_spill] sm:$0xff]  ;;  %v2778_v46 = vld [vmem:[%s2952_s19 + $0x48] sm:$0xff] }
 0x15c   : > { %v5375_v63 = vrot.slane %v4565_v38, 3  ;;  %v1277_v41 = vrot.slane %v1251_v19, 3  ;;  %v4607_v17 = vmul.f32 %v1219_v20, %v1185_v22  ;;  %v519_v60 = vadd.f32 %v511_v4, %v502_v25  ;;  %v4624_v20 = vld [vmem:[%s2952_s19 + $0x38] sm:$0xff] }
 0x15d   : > { %v5721_v9 = vrot.slane %v5720_v47, 1  ;;  %v5723_v57 = vrot.slane %v5722_v29, 1  ;;  %v4614_v15 = vmul.f32 %v1221_v42, %v1186_v10  ;;  %v1353_v27 = vmul.f32 %v4594_v51, %v5724_v34  ;;  %v5731_v47 = vld [vmem:[#allocation75_spill] sm:$0xff] }
 0x15e   : > { %v1354_v19 = vmul.f32 %v4619_v48, %v5724_v34  ;;  %v1768_v13 = vmul.f32 %v4624_v20, %v5725_v36  ;;  %v536_v24 = vadd.f32 %v528_v44, %v519_v60  ;;  %v1343_v59 = vadd.f32 %v1334_v11, %v1324_v50  ;;  %v5732_v50 = vld [vmem:[#allocation43_spill] sm:$0xff] }
 0x15f   : > { %v810_v56 = vsel %vm793_vm2, %v5723_v57, %v5721_v9  ;;  %v1344_v22 = vadd.f32 %v1335_v8, %v1325_v62  ;;  %v1769_v42 = vmul.f32 %v2777_v43, %v5725_v36  ;;  %v5727_v18 = vrot.slane %v5726_v2, 2  ;;  %v5733_v57 = vld [vmem:[#allocation44_spill] sm:$0xff] }
 0x160   : > { %v5729_v4 = vrot.slane %v5728_v58, 2  ;;  %v1787_v10 = vmul.f32 %v2777_v43, %v5730_v37  ;;  %v1788_v25 = vmul.f32 %v2778_v46, %v5730_v37  ;;  %v1806_v9 = vmul.f32 %v2778_v46, %v5731_v47  ;;  %v5734_v46 = vld [vmem:[#allocation49_spill] sm:$0xff] }
 0x161   : > { %v584_v44 = vmul.f32 %v575_v12, %v536_v24  ;;  %v1278_v11 = vsel %vm1261_vm5, %v5375_v63, %v1277_v41  ;;  %v1372_v62 = vmul.f32 %v4619_v48, %v5732_v50  ;;  %v1807_v8 = vmul.f32 %v3950_v55, %v5731_v47 }
 0x162   : > { %v1044_v1 = vsel %vm1027_vm6, %v5729_v4, %v5727_v18  ;;  %v1796_v60 = vadd.f32 %v1787_v10, %v1768_v13  ;;  %v1797_v29 = vadd.f32 %v1788_v25, %v1769_v42  ;;  %v1825_v34 = vmul.f32 %v3950_v55, %v5733_v57  ;;  %v4651_v18 = vld [vmem:[%s2952_s19 + $0x28] sm:$0xff]  ;;  %v5735_v10 = vld [vmem:[#allocation46_spill] sm:$0xff] }
 0x163   : > { %v1826_v43 = vmul.f32 %v4075_v40, %v5733_v57  ;;  %v826_v12 = vadd.f32 %v810_v56, %v584_v44  ;;  %v1362_v24 = vadd.f32 %v1353_v27, %v1343_v59  ;;  %v1363_v2 = vadd.f32 %v1354_v19, %v1344_v22  ;;  %v4662_v56 = vld [vmem:[%s2952_s19 + $0x30] sm:$0xff]  ;;  %v1916_v22 = vpop.permute.xlu1 %1915 }
 0x164   : > { %v1373_v41 = vmul.f32 %v4651_v18, %v5732_v50  ;;  %v1815_v58 = vadd.f32 %v1806_v9, %v1796_v60  ;;  %v1816_v4 = vadd.f32 %v1807_v8, %v1797_v29  ;;  %v1844_v13 = vmul.f32 %v4075_v40, %v5734_v46  ;;  %v5736_v19 = vld [vmem:[#allocation48_spill] sm:$0xff]  ;;  %v5737_v50 = vld [vmem:[#allocation3_spill] sm:$0xff] }
 0x165   : > { %v1845_v42 = vmul.f32 %v4332_v16, %v5734_v46  ;;  %v1060_v55 = vadd.f32 %v1044_v1, %v826_v12  ;;  %v1391_v25 = vmul.f32 %v4651_v18, %v5735_v10  ;;  %v1392_v27 = vmul.f32 %v4662_v56, %v5735_v10  ;;  %v4677_v12 = vld [vmem:[%s5106_s2 + $0x30] ss:$0 sm:$0xff] }
 0x166   : > { %v1410_v59 = vmul.f32 %v4662_v56, %v5736_v19  ;;  %v1834_v9 = vadd.f32 %v1825_v34, %v1815_v58  ;;  %v1835_v44 = vadd.f32 %v1826_v43, %v1816_v4  ;;  %v1863_v40 = vmul.f32 %v4332_v16, %v5737_v50  ;;  %v1430_v34 = vpop.permute.xlu2 %1429 }
 0x167   : > { %v1864_v1 = vmul.f32 %v4341_v30, %v5737_v50  ;;  %v4672_v8 = vadd.f32 %v1278_v11, %v1060_v55  ;;  %v1381_v60 = vadd.f32 %v1372_v62, %v1362_v24  ;;  %v1382_v29 = vadd.f32 %v1373_v41, %v1363_v2 }
 0x168   : > { %v1882_v10 = vmul.f32 %v4677_v12, %v4341_v30  ;;  %v1853_v43 = vadd.f32 %v1844_v13, %v1834_v9  ;;  %v1854_v58 = vadd.f32 %v1845_v42, %v1835_v44  ;;  %v1883_v16 = vmul.f32 %v4677_v12, %v4370_v5 }
 0x169   : > { %v1761_v11 = vmul.f32 %v5725_v36, %v4364_v14  ;;  %v1411_v62 = vmul.f32 %v4624_v20, %v5736_v19  ;;  %v1930_v24 = vrot.slane %v1916_v22, 2  ;;  %v1762_v2 = vmul.f32 %v5725_v36, %v4367_v39  ;;  %v5738_v19 = vld [vmem:[#allocation68_spill] sm:$0xff] }
 0x16a   : > { %v1780_v41 = vmul.f32 %v5730_v37, %v4367_v39  ;;  %v1872_v30 = vadd.f32 %v1863_v40, %v1853_v43  ;;  %v1873_v4 = vadd.f32 %v1864_v1, %v1854_v58  ;;  %v1781_v13 = vmul.f32 %v4396_v7, %v5730_v37  ;;  %v5739_v36 = vld [vmem:[#allocation60_spill] sm:$0xff] }
 0x16b   : > { %v1799_v5 = vmul.f32 %v4396_v7, %v5731_v47  ;;  %v1400_v42 = vadd.f32 %v1391_v25, %v1381_v60  ;;  %v1401_v55 = vadd.f32 %v1392_v27, %v1382_v29  ;;  %v1453_v9 = vrot.slane %v1430_v34, 4  ;;  %v5741_v43 = vld [vmem:[#allocation36_spill] sm:$0xff]  ;;  %v5744_v29 = vld [vmem:[#allocation27_spill] sm:$0xff] }
 0x16c   : > { %v1789_v44 = vadd.f32 %v1780_v41, %v1761_v11  ;;  %v1740_v22 = vrot.slane %v5738_v19, 5  ;;  %v5740_v0 = vrot.slane %v5739_v36, 4  ;;  %v1891_v40 = vadd.f32 %v1882_v10, %v1872_v30 }
 0x16d   : > { %v1892_v1 = vadd.f32 %v1883_v16, %v1873_v4  ;;  %v4703_v37 = vadd.f32 %v4604_v54, %v4599_v35  ;;  %v5742_v58 = vrot.slane %v5741_v43, 2  ;;  %v1790_v27 = vadd.f32 %v1781_v13, %v1762_v2  ;;  %v5746_v2 = vld [vmem:[#allocation65_spill] sm:$0xff]  ;;  %v5748_v13 = vld [vmem:[#allocation7_spill] sm:$0xff] }
 0x16e   : > { %v1511_v63 = vsel %vm1452_vm3, %v5740_v0, %v1510_v53  ;;  %v1800_v60 = vmul.f32 %v4594_v51, %v5731_v47  ;;  %v5743_v31 = vrot.slane %v4565_v38, 3  ;;  %v5745_v34 = vrot.slane %v5744_v29, 3 }
 0x16f   : > { %v1931_v25 = vsel %vm1027_vm6, %v5742_v58, %v1930_v24  ;;  %v1262_v53 = vrot.slane %v4607_v17, 3  ;;  %v1808_v10 = vadd.f32 %v1799_v5, %v1789_v44  ;;  %v1818_v35 = vmul.f32 %v4594_v51, %v5733_v57 }
 0x170   : > { %v1276_v0 = vsel %vm1261_vm5, %v5745_v34, %v5743_v31  ;;  %v1263_v54 = vrot.slane %v4614_v15, 3  ;;  %v1419_v16 = vadd.f32 %v1410_v59, %v1400_v42  ;;  %v4719_v11 = vadd.f32 %v1411_v62, %v1401_v55  ;;  %v5749_v62 = vld [vmem:[#allocation8_spill] sm:$0xff] }
 0x171   : > { %v5747_v41 = vrot.slane %v5746_v2, 4  ;;  %v1948_v38 = vmul.f32 %v1931_v25, %v1891_v40  ;;  %v1949_v30 = vmul.f32 %v1930_v24, %v1892_v1  ;;  %v1819_v4 = vmul.f32 %v4619_v48, %v5733_v57  ;;  %v5750_v40 = vld [vmem:[#allocation9_spill] sm:$0xff]  ;;  %v5751_v31 = vld [vmem:[#allocation12_spill] sm:$0xff] }
 0x172   : > { %v828_v5 = vmul.f32 %v5748_v13, %v4364_v14  ;;  %v1809_v44 = vadd.f32 %v1800_v60, %v1790_v27  ;;  %v1837_v43 = vmul.f32 %v4619_v48, %v5734_v46  ;;  %v829_v59 = vmul.f32 %v5748_v13, %v4367_v39  ;;  %v962_v27 = vpop.permute.xlu1 %961 }
 0x173   : > { %v4724_v47 = vsel %vm1452_vm3, %v1453_v9, %v5747_v41  ;;  %v847_v42 = vmul.f32 %v5749_v62, %v4367_v39  ;;  %v1827_v55 = vadd.f32 %v1818_v35, %v1808_v10  ;;  %v848_v24 = vmul.f32 %v4396_v7, %v5749_v62 }
 0x174   : > { %v866_v57 = vmul.f32 %v4396_v7, %v5750_v40  ;;  %v867_v1 = vmul.f32 %v4594_v51, %v5750_v40  ;;  %v4742_v58 = vmul.f32 %v1453_v9, %v1419_v16  ;;  %v1838_v25 = vmul.f32 %v4651_v18, %v5734_v46  ;;  %v5752_v16 = vld [vmem:[#allocation16_spill] sm:$0xff] }
 0x175   : > { %v856_v60 = vadd.f32 %v847_v42, %v828_v5  ;;  %v885_v29 = vmul.f32 %v4594_v51, %v5751_v31  ;;  %v1972_v34 = vrot.slane %v1948_v38, 6  ;;  %v1974_v10 = vrot.slane %v1949_v30, 6 }
 0x176   : > { %v857_v35 = vadd.f32 %v848_v24, %v829_v59  ;;  %v886_v2 = vmul.f32 %v4619_v48, %v5751_v31  ;;  %v1828_v41 = vadd.f32 %v1819_v4, %v1809_v44  ;;  %v1856_v13 = vmul.f32 %v4651_v18, %v5737_v50  ;;  %v5753_v59 = vld [vmem:[#allocation19_spill] sm:$0xff] }
 0x177   : > { %v875_v9 = vadd.f32 %v866_v57, %v856_v60  ;;  %v904_v62 = vmul.f32 %v4619_v48, %v5752_v16  ;;  %v1846_v46 = vadd.f32 %v1837_v43, %v1827_v55  ;;  %v1857_v5 = vmul.f32 %v4662_v56, %v5737_v50  ;;  %v5754_v60 = vld [vmem:[#allocation37_spill] sm:$0xff] }
 0x178   : > { %v876_v42 = vadd.f32 %v867_v1, %v857_v35  ;;  %v905_v38 = vmul.f32 %v4651_v18, %v5752_v16  ;;  %v923_v24 = vmul.f32 %v4651_v18, %v5753_v59  ;;  %v985_v4 = vrot.slane %v962_v27, 6 }
 0x179   : > { %v894_v30 = vadd.f32 %v885_v29, %v875_v9  ;;  %v1527_v44 = vadd.f32 %v1511_v63, %v4672_v8  ;;  %v924_v57 = vmul.f32 %v4662_v56, %v5753_v59  ;;  %v5755_v43 = vrot.slane %v5754_v60, 5  ;;  %v5756_v29 = vld [vmem:[#allocation22_spill] sm:$0xff]  ;;  %v5757_v8 = vld [vmem:[#allocation20_spill] sm:$0xff] }
 0x17a   : > { %v895_v40 = vadd.f32 %v886_v2, %v876_v42  ;;  %v1975_v55 = vsel %vm984_vm0, %v1972_v34, %v1974_v10  ;;  %v1847_v1 = vadd.f32 %v1838_v25, %v1828_v41  ;;  %v942_v35 = vmul.f32 %v4662_v56, %v5756_v29  ;;  %v5759_v42 = vld [vmem:[#allocation73_spill] sm:$0xff] }
 0x17b   : > { %v1743_v50 = vsel %vm1218_vm4, %v1740_v22, %v5755_v43  ;;  %v913_v31 = vadd.f32 %v904_v62, %v894_v30  ;;  %v943_v63 = vmul.f32 %v4624_v20, %v5756_v29  ;;  %v5758_v2 = vrot.slane %v5757_v8, 6 }
 0x17c   : > { %v1759_v27 = vadd.f32 %v1743_v50, %v1527_v44  ;;  %v914_v9 = vadd.f32 %v905_v38, %v895_v40  ;;  %v1293_v59 = vadd.f32 %v1276_v0, %v5759_v42  ;;  %v5760_v10 = vrot.slane %v5739_v36, 4  ;;  %v545_v36 = vpop.permute.xlu1 %544 }
 0x17d   : > { %v987_v16 = vsel %vm984_vm0, %v985_v4, %v5758_v2  ;;  %v932_v60 = vadd.f32 %v923_v24, %v913_v31  ;;  %v5761_v25 = vrot.slane %v4323_v52, 4  ;;  %v5762_v62 = vrot.slane %v4415_v3, 5  ;;  %v4794_v52 = vld [vmem:[%s5107_s3] ss:$0 sm:$0xff] }
 0x17e   : > { %v1991_v43 = vadd.f32 %v1975_v55, %v1759_v27  ;;  %v933_v30 = vadd.f32 %v924_v57, %v914_v9  ;;  %v420_v40 = vmul.f32 %v5685_v6, %v4367_v39  ;;  %v437_v0 = vmul.f32 %v4396_v7, %v5687_v61 }
 0x17f   : > { %v1509_v41 = vsel %vm1452_vm3, %v5761_v25, %v5760_v10  ;;  %v1741_v38 = vsel %vm1218_vm4, %v5762_v62, %v1740_v22  ;;  %v951_v24 = vadd.f32 %v942_v35, %v932_v60  ;;  %v5763_v3 = vrot.slane %v4464_v32, 6  ;;  %v1895_v60 = vpop.permute.xlu2 %1894  ;;  %v5767_v62 = vld [vmem:[#allocation64_spill] sm:$0xff] }
 0x180   : > { %v1526_v44 = vadd.f32 %v1509_v41, %v1293_v59  ;;  %v4797_v19 = vadd.f32 %v4794_v52, %v1991_v43  ;;  %v454_v6 = vmul.f32 %v4594_v51, %v5693_v45  ;;  %v952_v57 = vadd.f32 %v943_v63, %v933_v30 }
 0x181   : > { %v1973_v22 = vsel %vm984_vm0, %v5763_v3, %v1972_v34  ;;  %v445_v61 = vadd.f32 %v437_v0, %v420_v40  ;;  %v471_v55 = vmul.f32 %v4619_v48, %v5554_v23  ;;  %v1875_v31 = vmul.f32 %v4677_v12, %v4662_v56  ;;  %v5764_v23 = vld [vmem:[#allocation4_spill] sm:$0xff] }
 0x182   : > { %v1758_v50 = vadd.f32 %v1741_v38, %v1526_v44  ;;  %v1876_v29 = vmul.f32 %v4677_v12, %v4624_v20  ;;  %v2028_v32 = vsel %vm2006_vm7, %v4797_v19, 0.0  ;;  %v488_v34 = vmul.f32 %v4651_v18, %v5702_v21 }
 0x183   : > { %v1009_v35 = vmul.f32 %v985_v4, %v951_v24  ;;  %v1010_v45 = vmul.f32 %v987_v16, %v952_v57  ;;  %2029 = vadd.xlane.f32.xlu1 %v2028_v32  ;;  %v462_v9 = vadd.f32 %v454_v6, %v445_v61  ;;  %v1865_v63 = vadd.f32 %v1856_v13, %v1846_v46  ;;  %v5765_v4 = vld [vmem:[#allocation5_spill] sm:$0xff]  ;;  %v5766_v46 = vld [vmem:[#allocation6_spill] sm:$0xff] }
 0x184   : > { %v1990_v27 = vadd.f32 %v1973_v22, %v1758_v50  ;;  %v1866_v8 = vadd.f32 %v1857_v5, %v1847_v1  ;;  %v1529_v2 = vmul.f32 %v5764_v23, %v4364_v14  ;;  %v1530_v42 = vmul.f32 %v5764_v23, %v4367_v39  ;;  %v1663_v0 = vpop.permute.xlu1 %1662  ;;  %v5768_v22 = vld [vmem:[#allocation15_spill] sm:$0xff] }
 0x185   : > { %v479_v59 = vadd.f32 %v471_v55, %v462_v9  ;;  %v505_v21 = vmul.f32 %v4662_v56, %v5703_v33  ;;  %v1548_v16 = vmul.f32 %v5765_v4, %v4367_v39  ;;  %v522_v13 = vmul.f32 %v4624_v20, %v5706_v26  ;;  %v5769_v55 = vld [vmem:[#allocation2_spill] sm:$0xff]  ;;  %v5773_v9 = vld [vmem:[#allocation67_spill] sm:$0xff] }
 0x186   : > { %v4819_v12 = vadd.f32 %v4794_v52, %v1990_v27  ;;  %v1549_v14 = vmul.f32 %v4396_v7, %v5765_v4  ;;  %v1567_v5 = vmul.f32 %v4396_v7, %v5766_v46  ;;  %v1568_v1 = vmul.f32 %v4594_v51, %v5766_v46 }
 0x187   : > { %v1028_v43 = vrot.slane %v1009_v35, 2  ;;  %v1029_v10 = vrot.slane %v1010_v45, 2  ;;  %v496_v25 = vadd.f32 %v488_v34, %v479_v59  ;;  %v1557_v39 = vadd.f32 %v1548_v16, %v1529_v2  ;;  %v5772_v35 = vld [vmem:[#allocation18_spill] sm:$0xff]  ;;  %v5776_v16 = vld [vmem:[#allocation33_spill] sm:$0xff] }
 0x188   : > { %v2025_v33 = vsel %vm2006_vm7, %v4819_v12, 0.0  ;;  %v1558_v41 = vadd.f32 %v1549_v14, %v1530_v42  ;;  %v1586_v26 = vmul.f32 %v4594_v51, %v5767_v62  ;;  %v1587_v38 = vmul.f32 %v4619_v48, %v5767_v62  ;;  %v5774_v42 = vld [vmem:[#allocation79_spill] sm:$0xff] }
 0x189   : > { %2026 = vadd.xlane.f32.xlu0 %v2025_v33  ;;  %v1478_v7 = vmul.f32 %v4724_v47, %v4719_v11  ;;  %v1884_v30 = vadd.f32 %v1875_v31, %v1865_v63  ;;  %v1917_v44 = vrot.slane %v1895_v60, 2  ;;  %v513_v40 = vadd.f32 %v505_v21, %v496_v25  ;;  %v5780_v25 = vld [vmem:[#allocation57_spill] sm:$0xff] }
 0x18a   : > { %v1576_v24 = vadd.f32 %v1567_v5, %v1557_v39  ;;  %v1577_v3 = vadd.f32 %v1568_v1, %v1558_v41  ;;  %v1605_v6 = vmul.f32 %v4619_v48, %v5768_v22  ;;  %v1606_v57 = vmul.f32 %v4651_v18, %v5768_v22  ;;  %v5778_v1 = vld [vmem:[#allocation56_spill] sm:$0xff]  ;;  %v5782_v22 = vld [vmem:[#allocation70_spill] sm:$0xff] }
 0x18b   : > { %v1885_v50 = vadd.f32 %v1876_v29, %v1866_v8  ;;  %v1030_v51 = vsel %vm1027_vm6, %v1028_v43, %v1029_v10  ;;  %v530_v61 = vadd.f32 %v522_v13, %v513_v40  ;;  %v5770_v32 = vrot.slane %v5769_v55, 1 }
 0x18c   : > { %v5771_v11 = vrot.slane %v4525_v49, 1  ;;  %v1595_v31 = vadd.f32 %v1586_v26, %v1576_v24  ;;  %v1596_v34 = vadd.f32 %v1587_v38, %v1577_v3  ;;  %v1624_v45 = vmul.f32 %v4651_v18, %v5772_v35 }
 0x18d   : > { %v1625_v48 = vmul.f32 %v4662_v56, %v5772_v35  ;;  %v578_v27 = vmul.f32 %v545_v36, %v530_v61  ;;  %v1643_v29 = vmul.f32 %v4662_v56, %v5773_v9  ;;  %v1685_v63 = vrot.slane %v1663_v0, 3 }
 0x18e   : > { %v798_v47 = vsel %vm793_vm2, %v5771_v11, %v5770_v32  ;;  %v1614_v8 = vadd.f32 %v1605_v6, %v1595_v31  ;;  %v1615_v23 = vadd.f32 %v1606_v57, %v1596_v34  ;;  %v1644_v49 = vmul.f32 %v4624_v20, %v5773_v9  ;;  %v5786_v34 = vld [vmem:[#allocation87_spill] sm:$0xff] }
 0x18f   : > { %v2807_v2 = vmov 32.0   ;;  %v1264_v18 = vsel %vm1261_vm5, %v1262_v53, %v1263_v54  ;;  %v5775_v59 = vrot.slane %v5774_v42, 2  ;;  %v1053_v56 = vadd.f32 %v1030_v51, %v4703_v37  ;;  %v5784_v51 = vld [vmem:[#allocation78_spill] sm:$0xff] }
 0x190   : > { %2726 = vrcp.f32 %v2807_v2  ;;  %v820_v21 = vadd.f32 %v798_v47, %v578_v27  ;;  %v1495_v4 = vrot.slane %v4742_v58, 4  ;;  %v5777_v60 = vrot.slane %v5776_v16, 2 }
 0x191   : > { %v1919_v36 = vsel %vm1027_vm6, %v1917_v44, %v5775_v59  ;;  %v1633_v13 = vadd.f32 %v1624_v45, %v1614_v8  ;;  %v1634_v14 = vadd.f32 %v1625_v48, %v1615_v23  ;;  %v1496_v46 = vrot.slane %v1478_v7, 4  ;;  %v2018_v8 = vpop.xlane.xlu1 %2017 }
 0x192   : > { %v1032_v20 = vsel %vm1027_vm6, %v1029_v10, %v5777_v60  ;;  %v1941_v5 = vmul.f32 %v1917_v44, %v1884_v30  ;;  %v5779_v53 = vrot.slane %v5778_v1, 3  ;;  %v1942_v33 = vmul.f32 %v1919_v36, %v1885_v50 }
 0x193   : > { %v1054_v17 = vadd.f32 %v1032_v20, %v820_v21  ;;  %v5781_v39 = vrot.slane %v5780_v25, 3  ;;  %v1652_v58 = vadd.f32 %v1643_v29, %v1633_v13  ;;  %v1653_v41 = vadd.f32 %v1644_v49, %v1634_v14 }
 0x194   : > { %v1687_v43 = vsel %vm1261_vm5, %v1685_v63, %v5779_v53  ;;  %v1287_v10 = vadd.f32 %v1264_v18, %v1053_v56  ;;  %v1497_v30 = vsel %vm1452_vm3, %v1495_v4, %v1496_v46  ;;  %v1959_v44 = vrot.slane %v1941_v5, 6  ;;  %v5788_v56 = vld [vmem:[#allocation54_spill] sm:$0xff] }
 0x195   : > { %v1266_v37 = vsel %vm1261_vm5, %v1263_v54, %v5781_v39  ;;  %v1709_v38 = vmul.f32 %v1685_v63, %v1652_v58  ;;  %v1710_v7 = vmul.f32 %v1687_v43, %v1653_v41  ;;  %v1960_v0 = vrot.slane %v1942_v33, 6  ;;  %v2015_v63 = vpop.xlane.xlu0 %2014  ;;  %v5789_v4 = vld [vmem:[#allocation90_spill] sm:$0xff] }
 0x196   : > { %v1288_v62 = vadd.f32 %v1266_v37, %v1054_v17  ;;  %v2727_v26 = vpop.eup %2726  ;;  %v5783_v6 = vrot.slane %v5782_v22, 4  ;;  %v1520_v54 = vadd.f32 %v1497_v30, %v1287_v10  ;;  %v5785_v61 = vrot.slane %v5784_v51, 5  ;;  %v5790_v5 = vld [vmem:[#allocation38_spill] sm:$0xff] }
 0x197   : > { %v2032_v40 = vmul.f32 32.0, %v2727_v26  ;;  %v1727_v24 = vrot.slane %v1709_v38, 5  ;;  %v1728_v3 = vrot.slane %v1710_v7, 5  ;;  %v5787_v35 = vrot.slane %v5786_v34, 6 }
 0x198   : > { %v1499_v15 = vsel %vm1452_vm3, %v1496_v46, %v5783_v6  ;;  %v1961_v48 = vsel %vm984_vm0, %v1959_v44, %v1960_v0  ;;  %vm2036_vm8 = vweird.f32 %v2727_v26 }
 0x199   : > { %v1521_v57 = vadd.f32 %v1499_v15, %v1288_v62  ;;  %v2033_v50 = vsub.f32 1.0, %v2032_v40  ;;  %v1731_v55 = vsel %vm1218_vm4, %v1728_v3, %v5785_v61  ;;  %v1729_v32 = vsel %vm1218_vm4, %v1727_v24, %v1728_v3 }
 0x19a   : > { %v1752_v47 = vadd.f32 %v1729_v32, %v1520_v54  ;;  %v1963_v45 = vsel %vm984_vm0, %v1960_v0, %v5787_v35 }
 0x19b   : > { %v1753_v11 = vadd.f32 %v1731_v55, %v1521_v57  ;;  %v2034_v31 = vmul.f32 %v2727_v26, %v2033_v50 }
 0x19c   : > { %v1984_v9 = vadd.f32 %v1961_v48, %v1752_v47 }
 0x19d   : > { %v1985_v27 = vadd.f32 %v1963_v45, %v1753_v11  ;;  %v2035_v29 = vadd.f32 %v2727_v26, %v2034_v31  ;;  %v2630_v31 = vld [vmem:[%s5110_s6 + $0x8] sm:$0xff]  ;;  %v2629_v45 = vld [vmem:[%s5110_s6] sm:$0xff] }
 0x19e   : > { %v1996_v49 = vadd.f32 %v4794_v52, %v1984_v9  ;;  %2639 = vmatpush.bf16.msra.mxu3 %v2630_v31  ;;  %2254 = vmatpush.bf16.msra.mxu0 %v2630_v31 }
 0x19f   : > { %v1997_v23 = vadd.f32 %v4794_v52, %v1985_v27  ;;  %v4894_v2 = vsel %vm2036_vm8, %v2727_v26, %v2035_v29 }
 0x1a0   : > { %v2040_v18 = vmul.f32 %v4894_v2, %v2015_v63  ;;  %v2041_v42 = vmul.f32 %v4894_v2, %v2018_v8  ;;  %v2007_v36 = vsel %vm2006_vm7, %v1996_v49, 0.0 }
 0x1a1   : > { %v2010_v59 = vsel %vm2006_vm7, %v1997_v23, 0.0  ;;  %2008 = vadd.xlane.f32.xlu2 %v2007_v36 }
 0x1a2   : > { %2011 = vadd.xlane.f32.xlu0 %v2010_v59  ;;  %v4901_v21 = vsub.f32 %v5788_v56, %v2040_v18  ;;  %v4904_v16 = vsub.f32 %v5789_v4, %v2041_v42  ;;  %2640 = vmatpush.bf16.msra.mxu3 %v2629_v45  ;;  %v4963_v18 = vld [vmem:[%s5108_s4] ss:$0 sm:$0xff] }
 0x1a3   : > { %2255 = vmatpush.bf16.msra.mxu0 %v2629_v45 }
 0x1a4   : > { %v2056_v52 = vmul.f32 %v4901_v21, %v4901_v21  ;;  %v2057_v60 = vmul.f32 %v4904_v16, %v4904_v16 }
 0x1a6   : > { %v2068_v20 = vsel %vm2006_vm7, %v2056_v52, 0.0  ;;  %v2071_v13 = vsel %vm2006_vm7, %v2057_v60, 0.0  ;;  %v4971_v52 = vld [vmem:[%s5109_s5] ss:$0 sm:$0xff] }
 0x1a7   : > { %2069 = vadd.xlane.f32.xlu1 %v2068_v20 }
 0x1a9   : > { %2072 = vadd.xlane.f32.xlu2 %v2071_v13 }
 0x1ae   : > { %v2021_v14 = vpop.xlane.xlu2 %2020 }
 0x1af   : > { %v2042_v46 = vmul.f32 %v4894_v2, %v2021_v14 }
 0x1b1   : > { %v4914_v17 = vsub.f32 %v5790_v5, %v2042_v46 }
 0x1b3   : > { %v2058_v1 = vmul.f32 %v4914_v17, %v4914_v17 }
 0x1b5   : > { %v2074_v53 = vsel %vm2006_vm7, %v2058_v1, 0.0 }
 0x1b6   : > { %2075 = vadd.xlane.f32.xlu0 %v2074_v53 }
 0x1ce   : > { %v2024_v43 = vpop.xlane.xlu2 %2023 }
 0x1cf   : > { %v2043_v33 = vmul.f32 %v4894_v2, %v2024_v43 }
 0x1d1   : > { %v4921_v25 = vsub.f32 %v4575_v28, %v2043_v33 }
 0x1d3   : > { %v2059_v39 = vmul.f32 %v4921_v25, %v4921_v25 }
 0x1d5   : > { %v2077_v37 = vsel %vm2006_vm7, %v2059_v39, 0.0 }
 0x1d6   : > { %2078 = vadd.xlane.f32.xlu1 %v2077_v37 }
 0x1f6   : > { %v2030_v58 = vpop.xlane.xlu1 %2029 }
 0x1f7   : > { %v2045_v41 = vmul.f32 %v4894_v2, %v2030_v58 }
 0x1f9   : > { %v4928_v62 = vsub.f32 %v4797_v19, %v2045_v41 }
 0x1fb   : > { %v2061_v26 = vmul.f32 %v4928_v62, %v4928_v62 }
 0x1fc   : > { %v2027_v10 = vpop.xlane.xlu0 %2026 }
 0x1fd   : > { %v2044_v38 = vmul.f32 %v4894_v2, %v2027_v10  ;;  %v2083_v28 = vsel %vm2006_vm7, %v2061_v26, 0.0 }
 0x1fe   : > { %2084 = vadd.xlane.f32.xlu0 %v2083_v28 }
 0x1ff   : > { %v4935_v7 = vsub.f32 %v4819_v12, %v2044_v38 }
 0x201   : > { %v2060_v30 = vmul.f32 %v4935_v7, %v4935_v7 }
 0x203   : > { %v2080_v44 = vsel %vm2006_vm7, %v2060_v30, 0.0 }
 0x204   : > { %2081 = vadd.xlane.f32.xlu2 %v2080_v44 }
 0x214   : > { %v2009_v40 = vpop.xlane.xlu2 %2008 }
 0x215   : > { %v2012_v19 = vpop.xlane.xlu0 %2011  ;;  %v2038_v24 = vmul.f32 %v4894_v2, %v2009_v40 }
 0x216   : > { %v2039_v0 = vmul.f32 %v4894_v2, %v2012_v19 }
 0x217   : > { %v4944_v22 = vsub.f32 %v1996_v49, %v2038_v24 }
 0x218   : > { %v4942_v3 = vsub.f32 %v1997_v23, %v2039_v0 }
 0x219   : > { %v2054_v6 = vmul.f32 %v4944_v22, %v4944_v22 }
 0x21a   : > { %v2055_v12 = vmul.f32 %v4942_v3, %v4942_v3  ;;  %v2070_v15 = vpop.xlane.xlu1 %2069 }
 0x21b   : > { %v2088_v57 = vmul.f32 %v2070_v15, %v4894_v2  ;;  %v2062_v50 = vsel %vm2006_vm7, %v2054_v6, 0.0 }
 0x21c   : > { %v2065_v54 = vsel %vm2006_vm7, %v2055_v12, 0.0  ;;  %2063 = vadd.xlane.f32.xlu1 %v2062_v50  ;;  %v2073_v61 = vpop.xlane.xlu2 %2072 }
 0x21d   : > { %2066 = vadd.xlane.f32.xlu2 %v2065_v54  ;;  %v2096_v51 = vadd.f32 1e-06, %v2088_v57  ;;  %v2089_v55 = vmul.f32 %v2073_v61, %v4894_v2 }
 0x21f   : > { %2728 = vrsqrt.f32 %v2096_v51  ;;  %v2097_v32 = vadd.f32 1e-06, %v2089_v55  ;;  %vm2128_vm10 = vweird.f32 %v2096_v51 }
 0x221   : > { %2730 = vrsqrt.f32 %v2097_v32  ;;  %vm2138_vm13 = vweird.f32 %v2097_v32 }
 0x225   : > { %v2729_v11 = vpop.eup %2728 }
 0x226   : > { %v2123_v47 = vmul.f32 %v2729_v11, %v2096_v51  ;;  %vm2129_vm9 = vweird.f32 %v2729_v11 }
 0x227   : > { %v2731_v34 = vpop.eup %2730  ;;  %vm2130_vm11 = vmor %vm2128_vm10, %vm2129_vm9 }
 0x228   : > { %v2124_v35 = vmul.f32 %v2729_v11, %v2123_v47  ;;  %v2133_v48 = vmul.f32 %v2731_v34, %v2097_v32  ;;  %vm2139_vm12 = vweird.f32 %v2731_v34 }
 0x229   : > { %vm2140_vm14 = vmor %vm2138_vm13, %vm2139_vm12  ;;  %v2076_v14 = vpop.xlane.xlu0 %2075 }
 0x22a   : > { %v2125_v27 = vmul.f32 0.5, %v2124_v35  ;;  %v2134_v9 = vmul.f32 %v2731_v34, %v2133_v48  ;;  %v2090_v46 = vmul.f32 %v2076_v14, %v4894_v2 }
 0x22c   : > { %v2126_v29 = vsub.f32 1.5, %v2125_v27  ;;  %v2135_v63 = vmul.f32 0.5, %v2134_v9 }
 0x22e   : > { %v2127_v8 = vmul.f32 %v2729_v11, %v2126_v29  ;;  %v2136_v23 = vsub.f32 1.5, %v2135_v63 }
 0x230   : > { %v2131_v49 = vsel %vm2130_vm11, %v2729_v11, %v2127_v8  ;;  %v2137_v59 = vmul.f32 %v2731_v34, %v2136_v23 }
 0x231   : > { %v2184_v42 = vmul.f32 %v2131_v49, %v4901_v21 }
 0x232   : > { %v2141_v36 = vsel %vm2140_vm14, %v2731_v34, %v2137_v59 }
 0x233   : > { %v2185_v56 = vmul.f32 %v2141_v36, %v4904_v16  ;;  %v2195_v4 = vmul.f32 %v4963_v18, %v2184_v42  ;;  %v2098_v16 = vadd.f32 1e-06, %v2090_v46 }
 0x235   : > { %v2196_v60 = vmul.f32 %v4963_v18, %v2185_v56  ;;  %v2206_v20 = vadd.f32 %v4971_v52, %v2195_v4  ;;  %2732 = vrsqrt.f32 %v2098_v16  ;;  %vm2148_vm0 = vweird.f32 %v2098_v16 }
 0x237   : > { %v2207_v13 = vadd.f32 %v4971_v52, %v2196_v60 }
 0x239   : > { %v2213_v21 = vpack.c.bf16 %v2207_v13, %v2206_v20 }
 0x23b   : > { %2592 = vmatmul.msk.bf16.vlgmr.msra.gmra.mxu3 %vm2006_vm7, %v2213_v21  ;;  %v2733_v1 = vpop.eup %2732 }
 0x23c   : > { %v2143_v33 = vmul.f32 %v2733_v1, %v2098_v16  ;;  %vm2149_vm15 = vweird.f32 %v2733_v1 }
 0x23d   : > { %vm2150_vm2 = vmor %vm2148_vm0, %vm2149_vm15 }
 0x23e   : > { %v2144_v39 = vmul.f32 %v2733_v1, %v2143_v33 }
 0x240   : > { %v2145_v58 = vmul.f32 0.5, %v2144_v39 }
 0x242   : > { %v2146_v26 = vsub.f32 1.5, %v2145_v58 }
 0x244   : > { %v2147_v30 = vmul.f32 %v2733_v1, %v2146_v26 }
 0x246   : > { %v2151_v19 = vsel %vm2150_vm2, %v2733_v1, %v2147_v30  ;;  %v2638_v30 = vld [vmem:[%s5112_s8 + $0x38] sm:$0xff] }
 0x247   : > { %v2186_v0 = vmul.f32 %v2151_v19, %v4914_v17  ;;  %2641 = vmatpush.bf16.msra.mxu1 %v2638_v30  ;;  %2642 = vmatpush.bf16.msra.mxu2 %v2638_v30 }
 0x248   : > { %2421 = vmatpush.bf16.msrb.mxu0 %v2638_v30 }
 0x249   : > { %v2079_v5 = vpop.xlane.xlu1 %2078  ;;  %v2197_v12 = vmul.f32 %v4963_v18, %v2186_v0 }
 0x24a   : > { %v2091_v53 = vmul.f32 %v2079_v5, %v4894_v2 }
 0x24b   : > { %v2208_v15 = vadd.f32 %v4971_v52, %v2197_v12  ;;  %v2633_v12 = vld [vmem:[%s5112_s8 + $0x10] sm:$0xff] }
 0x24c   : > { %v2099_v43 = vadd.f32 1e-06, %v2091_v53 }
 0x24e   : > { %2734 = vrsqrt.f32 %v2099_v43  ;;  %vm2158_vm3 = vweird.f32 %v2099_v43 }
 0x254   : > { %v2735_v37 = vpop.eup %2734 }
 0x255   : > { %v2153_v41 = vmul.f32 %v2735_v37, %v2099_v43  ;;  %vm2159_vm1 = vweird.f32 %v2735_v37 }
 0x256   : > { %vm2160_vm5 = vmor %vm2158_vm3, %vm2159_vm1  ;;  %vm2519_vm3 = vcmask 259072  }
 0x257   : > { %v2154_v10 = vmul.f32 %v2735_v37, %v2153_v41 }
 0x259   : > { %v2155_v38 = vmul.f32 0.5, %v2154_v10 }
 0x25b   : > { %v2156_v28 = vsub.f32 1.5, %v2155_v38 }
 0x25d   : > { %v2157_v44 = vmul.f32 %v2735_v37, %v2156_v28 }
 0x25f   : > { %v2161_v40 = vsel %vm2160_vm5, %v2735_v37, %v2157_v44 }
 0x260   : > { %v2187_v24 = vmul.f32 %v2161_v40, %v4921_v25 }
 0x262   : > { %v2198_v6 = vmul.f32 %v4963_v18, %v2187_v24 }
 0x264   : > { %v2209_v57 = vadd.f32 %v4971_v52, %v2198_v6 }
 0x266   : > { %v2214_v50 = vpack.c.bf16 %v2209_v57, %v2208_v15  ;;  %v2632_v15 = vld [vmem:[%s5112_s8 + $0x8] sm:$0xff]  ;;  %v5028_v57 = vld [vmem:[%s5111_s7] ss:$0 sm:$0xff] }
 0x268   : > { %2593 = vmatmul.msk.bf16.gmra.mxu3 %vm2006_vm7, %v2214_v50 }
 0x271   : > { %v2085_v54 = vpop.xlane.xlu0 %2084 }
 0x272   : > { %v2093_v51 = vmul.f32 %v2085_v54, %v4894_v2 }
 0x274   : > { %v2101_v61 = vadd.f32 1e-06, %v2093_v51 }
 0x276   : > { %2736 = vrsqrt.f32 %v2101_v61  ;;  %vm2178_vm8 = vweird.f32 %v2101_v61 }
 0x277   : > { %v2082_v55 = vpop.xlane.xlu2 %2081 }
 0x278   : > { %v2092_v17 = vmul.f32 %v2082_v55, %v4894_v2 }
 0x27a   : > { %v2100_v25 = vadd.f32 1e-06, %v2092_v17 }
 0x27c   : > { %2738 = vrsqrt.f32 %v2100_v25  ;;  %v2737_v32 = vpop.eup %2736  ;;  %vm2168_vm11 = vweird.f32 %v2100_v25 }
 0x27d   : > { %v2173_v11 = vmul.f32 %v2737_v32, %v2101_v61  ;;  %vm2179_vm6 = vweird.f32 %v2737_v32 }
 0x27e   : > { %vm2180_vm9 = vmor %vm2178_vm8, %vm2179_vm6 }
 0x27f   : > { %v2174_v47 = vmul.f32 %v2737_v32, %v2173_v11 }
 0x281   : > { %v2175_v34 = vmul.f32 0.5, %v2174_v47 }
 0x282   : > { %v2739_v31 = vpop.eup %2738 }
 0x283   : > { %v2163_v35 = vmul.f32 %v2739_v31, %v2100_v25  ;;  %v2176_v45 = vsub.f32 1.5, %v2175_v34  ;;  %vm2169_vm10 = vweird.f32 %v2739_v31  ;;  %v2631_v34 = vld [vmem:[%s5112_s8] sm:$0xff] }
 0x284   : > { %vm2170_vm12 = vmor %vm2168_vm11, %vm2169_vm10 }
 0x285   : > { %v2164_v48 = vmul.f32 %v2739_v31, %v2163_v35  ;;  %v2177_v27 = vmul.f32 %v2737_v32, %v2176_v45 }
 0x287   : > { %v2165_v9 = vmul.f32 0.5, %v2164_v48  ;;  %v2181_v29 = vsel %vm2180_vm9, %v2737_v32, %v2177_v27 }
 0x288   : > { %v2189_v63 = vmul.f32 %v2181_v29, %v4928_v62 }
 0x289   : > { %v2166_v8 = vsub.f32 1.5, %v2165_v9 }
 0x28a   : > { %v2200_v49 = vmul.f32 %v4963_v18, %v2189_v63 }
 0x28b   : > { %v2167_v23 = vmul.f32 %v2739_v31, %v2166_v8 }
 0x28c   : > { %v2211_v62 = vadd.f32 %v4971_v52, %v2200_v49 }
 0x28d   : > { %v2171_v42 = vsel %vm2170_vm12, %v2739_v31, %v2167_v23 }
 0x28e   : > { %v2188_v59 = vmul.f32 %v2171_v42, %v4935_v7 }
 0x28f   : > { %v2064_v36 = vpop.xlane.xlu1 %2063 }
 0x290   : > { %v2067_v56 = vpop.xlane.xlu2 %2066  ;;  %v2086_v4 = vmul.f32 %v2064_v36, %v4894_v2  ;;  %v2199_v20 = vmul.f32 %v4963_v18, %v2188_v59 }
 0x291   : > { %v2087_v60 = vmul.f32 %v2067_v56, %v4894_v2 }
 0x292   : > { %v2094_v13 = vadd.f32 1e-06, %v2086_v4  ;;  %v2210_v14 = vadd.f32 %v4971_v52, %v2199_v20 }
 0x293   : > { %v2095_v21 = vadd.f32 1e-06, %v2087_v60 }
 0x294   : > { %2740 = vrsqrt.f32 %v2094_v13  ;;  %v2215_v46 = vpack.c.bf16 %v2211_v62, %v2210_v14  ;;  %vm2108_vm15 = vweird.f32 %v2094_v13 }
 0x295   : > { %2742 = vrsqrt.f32 %v2095_v21  ;;  %vm2118_vm1 = vweird.f32 %v2095_v21 }
 0x296   : > { %2594 = vmatmul.msk.bf16.gmra.mxu3 %vm2006_vm7, %v2215_v46 }
 0x29a   : > { %v2741_v7 = vpop.eup %2740 }
 0x29b   : > { %v2743_v16 = vpop.eup %2742  ;;  %v2103_v5 = vmul.f32 %v2741_v7, %v2094_v13  ;;  %vm2109_vm13 = vweird.f32 %v2741_v7 }
 0x29c   : > { %v2113_v1 = vmul.f32 %v2743_v16, %v2095_v21  ;;  %vm2119_vm14 = vweird.f32 %v2743_v16  ;;  %vm2110_vm0 = vmor %vm2108_vm15, %vm2109_vm13 }
 0x29d   : > { %v2104_v53 = vmul.f32 %v2741_v7, %v2103_v5  ;;  %vm2120_vm2 = vmor %vm2118_vm1, %vm2119_vm14 }
 0x29e   : > { %v2114_v43 = vmul.f32 %v2743_v16, %v2113_v1 }
 0x29f   : > { %v2105_v2 = vmul.f32 0.5, %v2104_v53 }
 0x2a0   : > { %v2115_v33 = vmul.f32 0.5, %v2114_v43 }
 0x2a1   : > { %v2106_v39 = vsub.f32 1.5, %v2105_v2 }
 0x2a2   : > { %v2116_v37 = vsub.f32 1.5, %v2115_v33 }
 0x2a3   : > { %v2107_v58 = vmul.f32 %v2741_v7, %v2106_v39 }
 0x2a4   : > { %v2117_v41 = vmul.f32 %v2743_v16, %v2116_v37 }
 0x2a5   : > { %v2111_v10 = vsel %vm2110_vm0, %v2741_v7, %v2107_v58 }
 0x2a6   : > { %v2182_v26 = vmul.f32 %v2111_v10, %v4944_v22  ;;  %v2121_v38 = vsel %vm2120_vm2, %v2743_v16, %v2117_v41  ;;  %v2636_v22 = vld [vmem:[%s5112_s8 + $0x28] sm:$0xff] }
 0x2a7   : > { %v2183_v28 = vmul.f32 %v2121_v38, %v4942_v3  ;;  %v2637_v3 = vld [vmem:[%s5112_s8 + $0x30] sm:$0xff] }
 0x2a8   : > { %v2193_v44 = vmul.f32 %v4963_v18, %v2182_v26  ;;  %2643 = vmatpush.bf16.msra.mxu1 %v2637_v3  ;;  %2644 = vmatpush.bf16.msra.mxu2 %v2637_v3 }
 0x2a9   : > { %v2194_v19 = vmul.f32 %v4963_v18, %v2183_v28  ;;  %2422 = vmatpush.bf16.msrb.mxu0 %v2637_v3  ;;  %v2635_v18 = vld [vmem:[%s5112_s8 + $0x20] sm:$0xff] }
 0x2aa   : > { %v2204_v40 = vadd.f32 %v4971_v52, %v2193_v44 }
 0x2ab   : > { %v2205_v0 = vadd.f32 %v4971_v52, %v2194_v19  ;;  %v2634_v52 = vld [vmem:[%s5112_s8 + $0x18] sm:$0xff] }
 0x2ac   : > { %2645 = vmatpush.bf16.msra.mxu1 %v2636_v22  ;;  %2646 = vmatpush.bf16.msra.mxu2 %v2636_v22 }
 0x2ad   : > { %v2212_v24 = vpack.c.bf16 %v2205_v0, %v2204_v40  ;;  %2423 = vmatpush.bf16.msrb.mxu0 %v2636_v22 }
 0x2af   : > { %2591 = vmatmul.msk.bf16.vlgmr.msra.gmra.mxu0 %vm2006_vm7, %v2212_v24 }
 0x2b0   : > { %2647 = vmatpush.bf16.msra.mxu1 %v2635_v18  ;;  %2648 = vmatpush.bf16.msra.mxu2 %v2635_v18 }
 0x2b1   : > { %2424 = vmatpush.bf16.msrb.mxu0 %v2635_v18 }
 0x2b4   : > { %2649 = vmatpush.bf16.msra.mxu1 %v2634_v52  ;;  %2650 = vmatpush.bf16.msra.mxu2 %v2634_v52 }
 0x2b5   : > { %2425 = vmatpush.bf16.msrb.mxu0 %v2634_v52 }
 0x2b8   : > { %2651 = vmatpush.bf16.msra.mxu1 %v2633_v12  ;;  %2652 = vmatpush.bf16.msra.mxu2 %v2633_v12 }
 0x2b9   : > { %2426 = vmatpush.bf16.msrb.mxu0 %v2633_v12 }
 0x2bc   : > { %2653 = vmatpush.bf16.msra.mxu1 %v2632_v15  ;;  %2654 = vmatpush.bf16.msra.mxu2 %v2632_v15 }
 0x2bd   : > { %2427 = vmatpush.bf16.msrb.mxu0 %v2632_v15 }
 0x2be   : > { %v2262_v6 = vpop.f32.mrf.mxu3 }
 0x2bf   : > { %v2263_v50 = vadd.f32 %v5028_v57, %v2262_v6 }
 0x2c0   : > { %2655 = vmatpush.bf16.msra.mxu1 %v2631_v34  ;;  %2656 = vmatpush.bf16.msra.mxu2 %v2631_v34 }
 0x2c1   : > { %v2279_v61 = vmul.f32 %v2263_v50, %v2263_v50  ;;  %2428 = vmatpush.bf16.msrb.mxu0 %v2631_v34 }
 0x2c3   : > { %v2287_v17 = vmul.f32 %v2279_v61, %v2263_v50 }
 0x2c5   : > { %v2295_v32 = vmul.f32 0.044715, %v2287_v17 }
 0x2c6   : > { %v2264_v54 = vpop.f32.mrf.mxu3 }
 0x2c7   : > { %v2265_v51 = vadd.f32 %v5028_v57, %v2264_v54  ;;  %v2303_v47 = vadd.f32 %v2295_v32, %v2263_v50 }
 0x2c9   : > { %v2280_v55 = vmul.f32 %v2265_v51, %v2265_v51  ;;  %v2311_v35 = vmul.f32 0.7978846, %v2303_v47 }
 0x2cb   : > { %v2288_v25 = vmul.f32 %v2280_v55, %v2265_v51  ;;  %2744 = vtanh.f32 %v2311_v35 }
 0x2cd   : > { %v2296_v11 = vmul.f32 0.044715, %v2288_v25 }
 0x2cf   : > { %v2304_v31 = vadd.f32 %v2296_v11, %v2265_v51 }
 0x2d1   : > { %v2312_v45 = vmul.f32 0.7978846, %v2304_v31  ;;  %v2745_v48 = vpop.eup %2744 }
 0x2d2   : > { %v2327_v9 = vadd.f32 1.0, %v2745_v48 }
 0x2d3   : > { %2746 = vtanh.f32 %v2312_v45 }
 0x2d4   : > { %v2335_v63 = vmul.f32 0.5, %v2327_v9 }
 0x2d6   : > { %v2343_v23 = vmul.f32 %v2335_v63, %v2263_v50 }
 0x2d9   : > { %v2747_v27 = vpop.eup %2746 }
 0x2da   : > { %v2328_v29 = vadd.f32 1.0, %v2747_v27 }
 0x2dc   : > { %v2336_v8 = vmul.f32 0.5, %v2328_v29 }
 0x2de   : > { %v2344_v49 = vmul.f32 %v2336_v8, %v2265_v51 }
 0x2e0   : > { %v2350_v42 = vpack.c.bf16 %v2344_v49, %v2343_v23 }
 0x2e2   : > { %2434 = vmatmul.bf16.vlgmr.msra.gmra.mxu1 %v2350_v42 }
 0x2eb   : > { %v2267_v59 = vpop.f32.mrf.mxu3 }
 0x2ec   : > { %v2268_v36 = vadd.f32 %v5028_v57, %v2267_v59 }
 0x2ee   : > { %v2281_v56 = vmul.f32 %v2268_v36, %v2268_v36 }
 0x2f0   : > { %v2289_v4 = vmul.f32 %v2281_v56, %v2268_v36 }
 0x2f2   : > { %v2297_v62 = vmul.f32 0.044715, %v2289_v4 }
 0x2f3   : > { %v2269_v60 = vpop.f32.mrf.mxu3 }
 0x2f4   : > { %v2270_v20 = vadd.f32 %v5028_v57, %v2269_v60  ;;  %v2305_v14 = vadd.f32 %v2297_v62, %v2268_v36 }
 0x2f6   : > { %v2282_v13 = vmul.f32 %v2270_v20, %v2270_v20  ;;  %v2313_v16 = vmul.f32 0.7978846, %v2305_v14  ;;  %v2725_v14 = vld [vmem:[%s5114_s10] ss:$0 sm:$0xff] }
 0x2f8   : > { %v2290_v21 = vmul.f32 %v2282_v13, %v2270_v20  ;;  %2748 = vtanh.f32 %v2313_v16  ;;  %v2724_v13 = vld [vmem:[%s5113_s9] ss:$0 sm:$0xff] }
 0x2fa   : > { %v2298_v46 = vmul.f32 0.044715, %v2290_v21 }
 0x2fc   : > { %v2306_v7 = vadd.f32 %v2298_v46, %v2270_v20 }
 0x2fe   : > { %v2314_v5 = vmul.f32 0.7978846, %v2306_v7  ;;  %v2749_v1 = vpop.eup %2748 }
 0x2ff   : > { %v2329_v43 = vadd.f32 1.0, %v2749_v1 }
 0x300   : > { %2750 = vtanh.f32 %v2314_v5 }
 0x301   : > { %v2337_v33 = vmul.f32 0.5, %v2329_v43 }
 0x303   : > { %v2345_v37 = vmul.f32 %v2337_v33, %v2268_v36 }
 0x306   : > { %v2751_v53 = vpop.eup %2750 }
 0x307   : > { %v2330_v2 = vadd.f32 1.0, %v2751_v53 }
 0x309   : > { %v2338_v39 = vmul.f32 0.5, %v2330_v2  ;;  %v2783_v2 = vld [vmem:[%s2952_s19 + $0x30] sm:$0xff] }
 0x30b   : > { %v2346_v58 = vmul.f32 %v2338_v39, %v2270_v20  ;;  %v2808_v20 = vmov 0.0  }
 0x30c   : > { %2505 = vst.msk [vmem:[%s5046_s27] sm:$0xff] %vm2006_vm7, %v2808_v20 }
 0x30d   : > { %v2351_v10 = vpack.c.bf16 %v2346_v58, %v2345_v37  ;;  %2506 = vst.msk [vmem:[%s5046_s27 + $0x8] sm:$0xff] %vm2006_vm7, %v2808_v20 }
 0x30e   : > { %2507 = vst.msk [vmem:[%s5046_s27 + $0x10] sm:$0xff] %vm2006_vm7, %v2808_v20 }
 0x30f   : > { %2439 = vmatmul.bf16.vlgmr.msra.gmra.mxu2 %v2351_v10  ;;  %2517 = vst.msk [vmem:[%s5046_s27 + $0x60] sm:$0xff] %vm2006_vm7, %v2808_v20 }
 0x310   : > { %2518 = vst.msk [vmem:[%s5046_s27 + $0x68] sm:$0xff] %vm2006_vm7, %v2808_v20 }
 0x311   : > { %2520 = vst.msk [vmem:[%s5046_s27 + $0x70] sm:$0x3f] %vm2519_vm3, %v2808_v20 }
 0x319   : > { %v2272_v41 = vpop.f32.mrf.mxu3 }
 0x31a   : > { %v2273_v26 = vadd.f32 %v5028_v57, %v2272_v41 }
 0x31c   : > { %v2283_v38 = vmul.f32 %v2273_v26, %v2273_v26 }
 0x31e   : > { %v2291_v28 = vmul.f32 %v2283_v38, %v2273_v26 }
 0x320   : > { %v2299_v30 = vmul.f32 0.044715, %v2291_v28 }
 0x321   : > { %v2274_v44 = vpop.f32.mrf.mxu3 }
 0x322   : > { %v2307_v19 = vadd.f32 %v2299_v30, %v2273_v26  ;;  %v2275_v40 = vadd.f32 %v5028_v57, %v2274_v44 }
 0x324   : > { %v2284_v0 = vmul.f32 %v2275_v40, %v2275_v40  ;;  %v2315_v24 = vmul.f32 0.7978846, %v2307_v19 }
 0x326   : > { %v2292_v3 = vmul.f32 %v2284_v0, %v2275_v40  ;;  %2752 = vtanh.f32 %v2315_v24  ;;  %v2785_v0 = vld [vmem:[%s2952_s19 + $0x40] sm:$0xff] }
 0x328   : > { %v2300_v22 = vmul.f32 0.044715, %v2292_v3 }
 0x32a   : > { %v2308_v18 = vadd.f32 %v2300_v22, %v2275_v40 }
 0x32c   : > { %v2257_v52 = vpop.f32.mrf.mxu0  ;;  %v2316_v12 = vmul.f32 0.7978846, %v2308_v18  ;;  %v2753_v15 = vpop.eup %2752 }
 0x32d   : > { %v2258_v6 = vadd.f32 %v5028_v57, %v2257_v52  ;;  %v2331_v51 = vadd.f32 1.0, %v2753_v15 }
 0x32e   : > { %2754 = vtanh.f32 %v2316_v12 }
 0x32f   : > { %v2277_v54 = vmul.f32 %v2258_v6, %v2258_v6  ;;  %v2339_v47 = vmul.f32 0.5, %v2331_v51 }
 0x331   : > { %v2285_v50 = vmul.f32 %v2277_v54, %v2258_v6  ;;  %v2347_v48 = vmul.f32 %v2339_v47, %v2273_v26  ;;  %v2784_v26 = vld [vmem:[%s2952_s19 + $0x38] sm:$0xff]  ;;  %v2788_v47 = vld [vmem:[%s2952_s19 + $0x50] sm:$0xff] }
 0x333   : > { %v2293_v61 = vmul.f32 0.044715, %v2285_v50 }
 0x334   : > { %v2755_v55 = vpop.eup %2754  ;;  %v2259_v17 = vpop.f32.mrf.mxu0 }
 0x335   : > { %v2301_v25 = vadd.f32 %v2293_v61, %v2258_v6  ;;  %v2260_v32 = vadd.f32 %v5028_v57, %v2259_v17  ;;  %v2332_v11 = vadd.f32 1.0, %v2755_v55 }
 0x337   : > { %v2309_v31 = vmul.f32 0.7978846, %v2301_v25  ;;  %v2278_v34 = vmul.f32 %v2260_v32, %v2260_v32  ;;  %v2340_v35 = vmul.f32 0.5, %v2332_v11 }
 0x339   : > { %v2286_v45 = vmul.f32 %v2278_v34, %v2260_v32  ;;  %v2348_v27 = vmul.f32 %v2340_v35, %v2275_v40  ;;  %2756 = vtanh.f32 %v2309_v31 }
 0x33b   : > { %v2294_v9 = vmul.f32 0.044715, %v2286_v45  ;;  %v2352_v29 = vpack.c.bf16 %v2348_v27, %v2347_v48  ;;  %v2789_v48 = vld [vmem:[%s2952_s19 + $0x18] sm:$0xff] }
 0x33d   : > { %v2302_v63 = vadd.f32 %v2294_v9, %v2260_v32  ;;  %2444 = vmatmul.bf16.gmra.mxu2 %v2352_v29 }
 0x33f   : > { %v2310_v8 = vmul.f32 0.7978846, %v2302_v63  ;;  %v2757_v23 = vpop.eup %2756 }
 0x340   : > { %v2325_v49 = vadd.f32 1.0, %v2757_v23 }
 0x341   : > { %2758 = vtanh.f32 %v2310_v8 }
 0x342   : > { %v2333_v59 = vmul.f32 0.5, %v2325_v49 }
 0x344   : > { %v2341_v56 = vmul.f32 %v2333_v59, %v2258_v6  ;;  %v2786_v6 = vld [vmem:[%s2952_s19 + $0x48] sm:$0xff] }
 0x347   : > { %v2759_v42 = vpop.eup %2758 }
 0x348   : > { %v2326_v57 = vadd.f32 1.0, %v2759_v42 }
 0x34a   : > { %v2334_v36 = vmul.f32 0.5, %v2326_v57  ;;  %v2790_v57 = vld [vmem:[%s2952_s19 + $0x20] sm:$0xff] }
 0x34c   : > { %v2342_v4 = vmul.f32 %v2334_v36, %v2260_v32  ;;  %v2787_v32 = vld [vmem:[%s2952_s19 + $0x58] sm:$0xff]  ;;  %v2791_v36 = vld [vmem:[%s2952_s19 + $0x28] sm:$0xff] }
 0x34e   : > { %v2349_v60 = vpack.c.bf16 %v2342_v4, %v2341_v56 }
 0x350   : > { %2429 = vmatmul.bf16.vlgmr.msrb.gmra.mxu0 %v2349_v60 }
 0x35f   : > { %v2435_v62 = vpop.f32.mrf.mxu1 }
 0x360   : > { %v2436_v21 = vadd.f32 %v2724_v13, %v2435_v62 }
 0x362   : > { %v2456_v7 = vmul.f32 %v2725_v14, %v2436_v21 }
 0x364   : > { %v2473_v1 = vrot.slane %v2456_v7, 5 }
 0x367   : > { %v2437_v46 = vpop.f32.mrf.mxu1 }
 0x368   : > { %v2438_v16 = vadd.f32 %v2724_v13, %v2437_v46 }
 0x36a   : > { %v2457_v5 = vmul.f32 %v2725_v14, %v2438_v16 }
 0x36c   : > { %v2475_v53 = vrot.slane %v2457_v5, 5 }
 0x36e   : > { %v2476_v43 = vsel %vm1218_vm4, %v2473_v1, %v2475_v53 }
 0x36f   : > { %v2497_v33 = vadd.f32 %v2783_v2, %v2476_v43 }
 0x371   : > { %2511 = vst.msk [vmem:[%s5046_s27 + $0x30] sm:$0xff] %vm2006_vm7, %v2497_v33 }
 0x392   : > { %v2440_v39 = vpop.f32.mrf.mxu2 }
 0x393   : > { %v2441_v37 = vadd.f32 %v2724_v13, %v2440_v39 }
 0x395   : > { %v2458_v58 = vmul.f32 %v2725_v14, %v2441_v37 }
 0x397   : > { %v2477_v41 = vrot.slane %v2458_v58, 5 }
 0x399   : > { %v2478_v10 = vsel %vm1218_vm4, %v2475_v53, %v2477_v41 }
 0x39a   : > { %v2498_v38 = vadd.f32 %v2784_v26, %v2478_v10  ;;  %v2442_v28 = vpop.f32.mrf.mxu2 }
 0x39b   : > { %v2443_v30 = vadd.f32 %v2724_v13, %v2442_v28 }
 0x39c   : > { %2512 = vst.msk [vmem:[%s5046_s27 + $0x38] sm:$0xff] %vm2006_vm7, %v2498_v38 }
 0x39d   : > { %v2459_v44 = vmul.f32 %v2725_v14, %v2443_v30 }
 0x39f   : > { %v2479_v19 = vrot.slane %v2459_v44, 5 }
 0x3a1   : > { %v2480_v40 = vsel %vm1218_vm4, %v2477_v41, %v2479_v19 }
 0x3a2   : > { %v2499_v24 = vadd.f32 %v2785_v0, %v2480_v40 }
 0x3a4   : > { %2513 = vst.msk [vmem:[%s5046_s27 + $0x40] sm:$0xff] %vm2006_vm7, %v2499_v24 }
 0x3c0   : > { %v2445_v3 = vpop.f32.mrf.mxu2 }
 0x3c1   : > { %v2446_v22 = vadd.f32 %v2724_v13, %v2445_v3 }
 0x3c3   : > { %v2460_v18 = vmul.f32 %v2725_v14, %v2446_v22 }
 0x3c5   : > { %v2481_v52 = vrot.slane %v2460_v18, 5 }
 0x3c7   : > { %v2482_v12 = vsel %vm1218_vm4, %v2479_v19, %v2481_v52 }
 0x3c8   : > { %v2500_v15 = vadd.f32 %v2786_v6, %v2482_v12  ;;  %v2447_v54 = vpop.f32.mrf.mxu2 }
 0x3c9   : > { %v2448_v50 = vadd.f32 %v2724_v13, %v2447_v54 }
 0x3ca   : > { %2514 = vst.msk [vmem:[%s5046_s27 + $0x48] sm:$0xff] %vm2006_vm7, %v2500_v15 }
 0x3cb   : > { %v2461_v51 = vmul.f32 %v2725_v14, %v2448_v50 }
 0x3cd   : > { %v2483_v61 = vrot.slane %v2461_v51, 5  ;;  %v2430_v55 = vpop.f32.mrf.mxu0 }
 0x3ce   : > { %v2431_v17 = vadd.f32 %v2724_v13, %v2430_v55 }
 0x3cf   : > { %v2484_v25 = vsel %vm1218_vm4, %v2481_v52, %v2483_v61  ;;  %v2502_v11 = vadd.f32 %v2787_v32, %v2483_v61 }
 0x3d0   : > { %v2501_v31 = vadd.f32 %v2788_v47, %v2484_v25  ;;  %v2454_v34 = vmul.f32 %v2725_v14, %v2431_v17 }
 0x3d1   : > { %v2504_v35 = vsel %vm1218_vm4, %v2502_v11, 0.0 }
 0x3d2   : > { %2515 = vst.msk [vmem:[%s5046_s27 + $0x50] sm:$0xff] %vm2006_vm7, %v2501_v31  ;;  %v2470_v45 = vrot.slane %v2454_v34, 5 }
 0x3d3   : > { %2516 = vst.msk [vmem:[%s5046_s27 + $0x58] sm:$0xff] %vm2006_vm7, %v2504_v35 }
 0x3d4   : > { %v2494_v27 = vadd.f32 %v2789_v48, %v2470_v45 }
 0x3d5   : > { %v2432_v9 = vpop.f32.mrf.mxu0 }
 0x3d6   : > { %v2503_v29 = vsel %vm1218_vm4, 0.0, %v2494_v27  ;;  %v2433_v63 = vadd.f32 %v2724_v13, %v2432_v9 }
 0x3d7   : > { %2508 = vst.msk [vmem:[%s5046_s27 + $0x18] sm:$0xff] %vm2006_vm7, %v2503_v29 }
 0x3d8   : > { %v2455_v8 = vmul.f32 %v2725_v14, %v2433_v63 }
 0x3da   : > { %v2471_v23 = vrot.slane %v2455_v8, 5 }
 0x3dc   : > { %v2472_v49 = vsel %vm1218_vm4, %v2470_v45, %v2471_v23  ;;  %v2474_v42 = vsel %vm1218_vm4, %v2471_v23, %v2473_v1 }
 0x3dd   : > { %v2495_v59 = vadd.f32 %v2790_v57, %v2472_v49  ;;  %v2496_v56 = vadd.f32 %v2791_v36, %v2474_v42 }
 0x3df   : > { %2509 = vst.msk [vmem:[%s5046_s27 + $0x20] sm:$0xff] %vm2006_vm7, %v2495_v59 }
 0x3e0   : > { %2510 = vst.msk [vmem:[%s5046_s27 + $0x28] sm:$0xff] %vm2006_vm7, %v2496_v56 }
 0x3e1 PF: > { %s21_s17 = sadd.s32 1, %s2798_s17  }
 0x3e2   : > { %p18_p4 = scmp.ge.s32.totalorder %s21_s17, 4  }
 0x3e4   :  { %20 = sbr.rel (!%p18_p4) target bundleno = 1 (0x1), region = 94 }

// kernel: convnext_feature_extractor_forward.10
= control target key start
LH: loop header
LB: loop body
LE: loop exit
PB: predicated region body
PF: predicated region fallthrough
CT: control target
= control target key end

     0   :  { %s1830_s17 = smov 0   ;;  %s2619_s0 = inlined_call_operand.vmem [shape: f32[2,46,64], index: 0, kind: input, shape index: {}]   ;;  %s2620_s1 = inlined_call_operand.vmem [shape: f32[16,7], index: 1, kind: input, shape index: {}]   ;;  %s2621_s2 = inlined_call_operand.vmem [shape: f32[49,64], index: 2, kind: input, shape index: {}]   ;;  %s2622_s3 = inlined_call_operand.vmem [shape: f32[1,64], index: 3, kind: input, shape index: {}]   ;;  %s2623_s4 = inlined_call_operand.vmem [shape: f32[1,64], index: 4, kind: input, shape index: {}]   ;;  %s2624_s5 = inlined_call_operand.vmem [shape: f32[1,64], index: 5, kind: input, shape index: {}]   ;;  %s2625_s6 = inlined_call_operand.vmem [shape: bf16[64,256], index: 6, kind: input, shape index: {}]   ;;  %s2626_s7 = inlined_call_operand.vmem [shape: f32[1,256], index: 7, kind: input, shape index: {}]   ;;  %s2627_s8 = inlined_call_operand.vmem [shape: bf16[256,64], index: 8, kind: input, shape index: {}]   ;;  %s2628_s9 = inlined_call_operand.vmem [shape: f32[1,64], index: 9, kind: input, shape index: {}]   ;;  %s2629_s10 = inlined_call_operand.vmem [shape: f32[1,64], index: 10, kind: input, shape index: {}]   ;;  %s2630_s11 = inlined_call_operand.vmem [shape: f32[2,46,64], index: 11, kind: output, shape index: {}]  }
   0x1 LB: > { %s1569_s18 = sadd.s32 4294967295, %s1759_s17   ;;  %p1573_p0 = scmp.ge.s32.totalorder %s1759_s17, 1  ;;  %s1759_s17 = sphi %s1830_s17, %s21_s17  }
   0x2   : > { %p337_p1 = scmp.lt.s32.totalorder %s1759_s17, 3 }
   0x4   : > { %p338_p2 = pnand %p1573_p0, %p337_p1 }
   0x5   : > { %p377_p3 = scmp.lt.s32.totalorder (!%p338_p2), %s1569_s18, 1 }
   0x6   : > { %341 = sbr.rel (%p338_p2) target bundleno = 788 (0x314), region = 64 }
   0xb   : > { %v401_v0 = vld [vmem:[%s2620_s1] sm:$0xff]  ;;  %v1761_v1 = vmov 2   ;;  %v1762_v2 = vmov 1   ;;  %v1763_v3 = vmov 3   ;;  %v402_v4 = vld [vmem:[%s2620_s1 + $0x8] sm:$0xff]  ;;  %v1764_v5 = vmov 0  }
   0xc   : > { %1719 = vset.pattern.permute.xlu1 %v1761_v1  ;;  %1718 = vset.pattern.permute.xlu0 %v1762_v2  ;;  %v1765_v6 = vmov 4   ;;  %v1766_v7 = vmov 5   ;;  %v1767_v8 = vmov 6   ;;  %s2647_s18 = smov (!%p377_p3, %s1569_s18), 1  ;;  %v1867_v11 = vld [vmem:[%s2621_s2 + $0x8] sm:$0xff]  ;;  %v1873_v13 = vld [vmem:[%s2621_s2] sm:$0xff] }
   0xd   : > { %680 = vperm.xlu1 %1719, %v401_v0   ;;  %569 = vperm.xlu0 %1718, %v401_v0   ;;  %s1700_s23 = smul.u32 48, %s2647_s18  ;;  %v715_v12 = vperm.slane %v1867_v11, 2  ;;  %v1878_v14 = vld [vmem:[%s2621_s2 + $0x18] sm:$0xff]  ;;  %v1888_v18 = vld [vmem:[%s2621_s2 + $0x10] sm:$0xff]  ;;  %v1893_v19 = vld [vmem:[%s2621_s2 + $0x20] sm:$0xff]  ;;  %v708_v20 = vperm.slane %v1873_v13, 3 }
   0xe   : > { %1720 = vset.pattern.permute.xlu2 %v1763_v3  ;;  %v740_v21 = vperm.slane %v1878_v14, 0  ;;  %vm415_vm0 = vcmask 1043456   ;;  %v733_v25 = vperm.slane %v1888_v18, 1  ;;  %v765_v27 = vperm.slane %v1893_v19, 6 }
   0xf   : > { %791 = vperm.xlu2 %1720, %v401_v0   ;;  %s1856_s26 = scalar_lea.vmem %s2619_s0, %s1700_s23  ;;  %v758_v35 = vperm.slane %v1878_v14, 7  ;;  %v1915_v40 = vperm.slane %v1873_v13, 2  ;;  %v1918_v41 = vperm.slane %v1867_v11, 1  ;;  %v1933_v54 = vperm.slane %v1888_v18, 7  ;;  %s2591_s24 = scalar_lea.vmem %s2630_s11, %s1700_s23 }
  0x10   : > { %v1859_v9 = vld [vmem:[%s1856_s26] sm:$0xff]  ;;  %v1862_v10 = vld [vmem:[%s1856_s26 + $0x8] sm:$0xff]  ;;  %v1883_v17 = vld [vmem:[%s1856_s26 + $0x10] sm:$0xff]  ;;  %v1939_v58 = vperm.slane %v1888_v18, 0  ;;  %vm796_vm1 = vcmask 1042432   ;;  %vm685_vm2 = vcmask 1041408  }
  0x11   : > { %v716_v15 = vmul.f32 %v715_v12, %v1859_v9  ;;  %v717_v16 = vmul.f32 %v715_v12, %v1862_v10  ;;  %v718_v24 = vmul.f32 %v715_v12, %v1883_v17  ;;  %v1900_v26 = vld [vmem:[%s1856_s26 + $0x18] sm:$0xff]  ;;  %v709_v29 = vmul.f32 %v708_v20, %v1859_v9  ;;  %v1929_v50 = vld [vmem:[%s1856_s26 + $0x20] sm:$0xff] }
  0x12   : > { %v741_v30 = vmul.f32 %v740_v21, %v1862_v10  ;;  %v742_v31 = vmul.f32 %v740_v21, %v1883_v17  ;;  %v711_v33 = vmul.f32 %v708_v20, %v1883_v17  ;;  %v734_v34 = vmul.f32 %v733_v25, %v1862_v10 }
  0x13   : > { %v722_v22 = vrot.slane %v716_v15, 4  ;;  %v723_v23 = vrot.slane %v717_v16, 4  ;;  %v725_v28 = vrot.slane %v718_v24, 4  ;;  %v710_v36 = vmul.f32 %v708_v20, %v1862_v10 }
  0x14   : > { %v743_v37 = vmul.f32 %v740_v21, %v1900_v26  ;;  %v766_v38 = vmul.f32 %v765_v27, %v1883_v17  ;;  %v747_v43 = vrot.slane %v741_v30, 4  ;;  %v748_v44 = vrot.slane %v742_v31, 4 }
  0x15   : > { %683 = vperm.xlu1 %1719, %v402_v4   ;;  %572 = vperm.xlu0 %1718, %v402_v4   ;;  %v724_v32 = vsel %vm415_vm0, %v722_v22, %v723_v23  ;;  %v726_v39 = vsel %vm415_vm0, %v723_v23, %v725_v28  ;;  %v767_v45 = vmul.f32 %v765_v27, %v1900_v26  ;;  %v1965_v22 = vld [vmem:[%s2621_s2 + $0x28] sm:$0xff]  ;;  %vm574_vm3 = vcmask 1040384  }
  0x16   : > { %v730_v42 = vadd.f32 %v724_v32, %v709_v29  ;;  %v732_v46 = vadd.f32 %v725_v28, %v711_v33  ;;  %v736_v47 = vmul.f32 %v733_v25, %v1900_v26  ;;  %v605_v48 = vmul.f32 %v1918_v41, %v1859_v9 }
  0x17   : > { %794 = vperm.xlu2 %1720, %v402_v4   ;;  %v1926_v49 = vmul.f32 %v1918_v41, %v1862_v10  ;;  %v731_v51 = vadd.f32 %v726_v39, %v710_v36  ;;  %v735_v52 = vmul.f32 %v733_v25, %v1883_v17  ;;  %v750_v53 = vrot.slane %v743_v37, 4 }
  0x18   : > { %v598_v55 = vmul.f32 %v1915_v40, %v1859_v9  ;;  %v611_v56 = vrot.slane %v605_v48, 4  ;;  %v759_v59 = vmul.f32 %v758_v35, %v1883_v17  ;;  %v630_v60 = vmul.f32 %v1933_v54, %v1862_v10 }
  0x19   : > { %v612_v57 = vrot.slane %v1926_v49, 4  ;;  %v1946_v61 = vmul.f32 %v1933_v54, %v1883_v17  ;;  %v737_v62 = vadd.f32 %v734_v34, %v730_v42  ;;  %v739_v63 = vadd.f32 %v736_v47, %v732_v46 }
  0x1a   : > { %v749_v2 = vsel %vm415_vm0, %v747_v43, %v748_v44  ;;  %v772_v3 = vrot.slane %v766_v38, 4  ;;  %v623_v12 = vmul.f32 %v1939_v58, %v1862_v10  ;;  %v760_v15 = vmul.f32 %v758_v35, %v1900_v26 }
  0x1b   : > { %v613_v1 = vsel %vm415_vm0, %v611_v56, %v612_v57  ;;  %v761_v16 = vmul.f32 %v758_v35, %v1929_v50  ;;  %v636_v20 = vrot.slane %v630_v60, 4  ;;  %v637_v21 = vrot.slane %v1946_v61, 4 }
  0x1c   : > { %v755_v23 = vadd.f32 %v749_v2, %v737_v62  ;;  %v757_v24 = vadd.f32 %v750_v53, %v739_v63  ;;  %v1971_v29 = vperm.slane %v1878_v14, 6  ;;  %v1980_v33 = vperm.slane %v1873_v13, 1 }
  0x1d   : > { %1722 = vset.pattern.permute.xlu1 %v1764_v5  ;;  %1721 = vset.pattern.permute.xlu0 %v1764_v5  ;;  %v1954_v5 = vperm.slane %v1893_v19, 5  ;;  %v783_v37 = vperm.slane %v1965_v22, 5  ;;  %v638_v38 = vsel %vm415_vm0, %v636_v20, %v637_v21  ;;  %v1994_v39 = vperm.slane %v1888_v18, 6 }
  0x1e   : > { %479 = vperm.xlu1 %1722, %v402_v4   ;;  %474 = vperm.xlu0 %1721, %v401_v0   ;;  %v762_v42 = vadd.f32 %v759_v59, %v755_v23  ;;  %v764_v47 = vadd.f32 %v761_v16, %v757_v24  ;;  %v648_v48 = vmul.f32 %v1971_v29, %v1883_v17  ;;  %v2007_v59 = vperm.slane %v1867_v11, 7 }
  0x1f   : > { %1723 = vset.pattern.permute.xlu2 %v1765_v6  ;;  %v655_v30 = vmul.f32 %v1954_v5, %v1883_v17  ;;  %v1977_v31 = vmul.f32 %v1954_v5, %v1900_v26  ;;  %v487_v56 = vmul.f32 %v1980_v33, %v1859_v9  ;;  %v519_v62 = vmul.f32 %v1994_v39, %v1862_v10 }
  0x20   : > { %890 = vperm.xlu2 %1723, %v401_v0   ;;  %v2016_v63 = vmul.f32 %v1994_v39, %v1883_v17  ;;  %v784_v2 = vmul.f32 %v783_v37, %v1900_v26  ;;  %v672_v16 = vperm.slane %v1965_v22, 4  ;;  %v512_v23 = vmul.f32 %v2007_v59, %v1862_v10 }
  0x21   : > { %v2112_v61 = vperm.slane %v1888_v18, 2  ;;  %vm587_vm4 = vcmask 1046528   ;;  %vm698_vm5 = vcmask 1045504   ;;  %vm809_vm6 = vcmask 1044480  }
  0x22   : > { %vm1142_vm7 = vcmask 523264   ;;  %vm1512_vm15 = vcmask 521216  }
  0x26   : > { %1724 = vset.pattern.permute.xlu1 %v1765_v6  ;;  %1726 = vset.pattern.permute.xlu0 %v1766_v7  ;;  %v773_v6 = vrot.slane %v767_v45, 4 }
  0x27   : > { %893 = vperm.xlu1 %1724, %v402_v4   ;;  %1002 = vperm.xlu0 %1726, %v402_v4  }
  0x28   : > { %1725 = vset.pattern.permute.xlu2 %v1766_v7  ;;  %v751_v7 = vsel %vm415_vm0, %v748_v44, %v750_v53  ;;  %v774_v36 = vsel %vm415_vm0, %v772_v3, %v773_v6  ;;  %v785_v3 = vmul.f32 %v783_v37, %v1929_v50 }
  0x29   : > { %999 = vperm.xlu2 %1725, %v401_v0  }
  0x2f   : > { %1727 = vset.pattern.permute.xlu1 %v1767_v8  ;;  %1729 = vset.pattern.permute.xlu0 %v1767_v8 }
  0x30   : > { %1108 = vperm.xlu1 %1727, %v401_v0   ;;  %v768_v0 = vmul.f32 %v765_v27, %v1929_v50  ;;  %v1968_v27 = vperm.slane %v1867_v11, 0 }
  0x31   : > { %1728 = vset.pattern.permute.xlu2 %v1767_v8  ;;  %v619_v8 = vadd.f32 %v613_v1, %v598_v55  ;;  %v662_v55 = vrot.slane %v1977_v31, 4  ;;  %v780_v1 = vadd.f32 %v774_v36, %v762_v42  ;;  %v600_v42 = vmul.f32 %v1915_v40, %v1883_v17 }
  0x32   : > { %1111 = vperm.xlu2 %1728, %v402_v4   ;;  %v738_v4 = vadd.f32 %v735_v52, %v731_v51  ;;  %v775_v25 = vrot.slane %v768_v0, 4  ;;  %v494_v34 = vmul.f32 %v1968_v27, %v1859_v9  ;;  %v1986_v35 = vmul.f32 %v1968_v27, %v1862_v10  ;;  %v2001_v52 = vld [vmem:[%s1856_s26 + $0x28] sm:$0x3f] }
  0x33   : > { %v626_v32 = vadd.f32 %v623_v12, %v619_v8  ;;  %v661_v51 = vrot.slane %v655_v30, 4  ;;  %v2019_v0 = vperm.slane %v1893_v19, 4  ;;  %v786_v8 = vmul.f32 %v783_v37, %v2001_v52 }
  0x34   : > { %v756_v28 = vadd.f32 %v751_v7, %v738_v4  ;;  %v776_v43 = vsel %vm415_vm0, %v773_v6, %v775_v25  ;;  %v500_v44 = vrot.slane %v494_v34, 4  ;;  %v501_v45 = vrot.slane %v1986_v35, 4 }
  0x35   : > { %v644_v53 = vadd.f32 %v638_v38, %v626_v32  ;;  %v782_v7 = vadd.f32 %v775_v25, %v764_v47  ;;  %v607_v12 = vmul.f32 %v1918_v41, %v1883_v17  ;;  %v663_v24 = vsel %vm415_vm0, %v661_v51, %v662_v55 }
  0x36   : > { %v763_v46 = vadd.f32 %v760_v15, %v756_v28  ;;  %v502_v60 = vsel %vm415_vm0, %v500_v44, %v501_v45  ;;  %v525_v28 = vrot.slane %v519_v62, 4  ;;  %v526_v30 = vrot.slane %v2016_v63, 4 }
  0x37   : > { %v651_v15 = vadd.f32 %v648_v48, %v644_v53  ;;  %v508_v20 = vadd.f32 %v502_v60, %v487_v56  ;;  %v544_v25 = vmul.f32 %v2019_v0, %v1883_v17  ;;  %v787_v32 = vadd.f32 %v784_v2, %v780_v1 }
  0x38   : > { %v781_v6 = vadd.f32 %v776_v43, %v763_v46  ;;  %v2039_v41 = vmul.f32 %v2019_v0, %v1900_v26  ;;  %v614_v34 = vrot.slane %v607_v12, 4  ;;  %v789_v36 = vadd.f32 %v786_v8, %v782_v7 }
  0x39   : > { %v2042_v37 = vperm.slane %v1878_v14, 5  ;;  %v2045_v38 = vperm.slane %v1965_v22, 3  ;;  %v669_v44 = vadd.f32 %v663_v24, %v651_v15  ;;  %v673_v46 = vmul.f32 %v672_v16, %v1900_v26 }
  0x3a   : > { %v515_v47 = vadd.f32 %v512_v23, %v508_v20  ;;  %v788_v48 = vadd.f32 %v785_v3, %v781_v6  ;;  %v527_v51 = vsel %vm415_vm0, %v525_v28, %v526_v30  ;;  %v550_v53 = vrot.slane %v544_v25, 4 }
  0x3b   : > { %v599_v56 = vmul.f32 %v1915_v40, %v1862_v10  ;;  %v551_v60 = vrot.slane %v2039_v41, 4  ;;  %v615_v62 = vsel %vm415_vm0, %v612_v57, %v614_v34  ;;  %v632_v1 = vmul.f32 %v1933_v54, %v1900_v26 }
  0x3c   : > { %v496_v2 = vmul.f32 %v1968_v27, %v1883_v17  ;;  %v537_v3 = vmul.f32 %v2042_v37, %v1883_v17  ;;  %v621_v6 = vadd.f32 %v614_v34, %v600_v42  ;;  %v625_v40 = vmul.f32 %v1939_v58, %v1900_v26 }
  0x3d   : > { %v2072_v49 = vadd.f32 %v673_v46, %v669_v44  ;;  %v533_v57 = vadd.f32 %v527_v51, %v515_v47  ;;  %v620_v12 = vadd.f32 %v615_v62, %v599_v56  ;;  %v624_v27 = vmul.f32 %v1939_v58, %v1883_v17 }
  0x3e   : > { %v503_v8 = vrot.slane %v496_v2, 4  ;;  %v657_v15 = vmul.f32 %v1954_v5, %v1929_v50  ;;  %v489_v20 = vmul.f32 %v1980_v33, %v1883_v17  ;;  %v552_v23 = vsel %vm415_vm0, %v550_v53, %v551_v60 }
  0x3f   : > { %v639_v24 = vrot.slane %v632_v1, 4  ;;  %v649_v28 = vmul.f32 %v1971_v29, %v1900_v26  ;;  %v488_v25 = vmul.f32 %v1980_v33, %v1862_v10  ;;  %v650_v58 = vmul.f32 %v1971_v29, %v1929_v50 }
  0x40   : > { %v504_v5 = vsel %vm415_vm0, %v501_v45, %v503_v8  ;;  %v521_v34 = vmul.f32 %v1994_v39, %v1900_v26  ;;  %v540_v46 = vadd.f32 %v537_v3, %v533_v57  ;;  %v2096_v47 = vmul.f32 %v672_v16, %v1929_v50 }
  0x41   : > { %v627_v51 = vadd.f32 %v624_v27, %v620_v12  ;;  %v664_v33 = vrot.slane %v657_v15, 4  ;;  %v510_v53 = vadd.f32 %v503_v8, %v489_v20  ;;  %v514_v29 = vmul.f32 %v2007_v59, %v1900_v26 }
  0x42   : > { %v640_v35 = vsel %vm415_vm0, %v637_v21, %v639_v24  ;;  %v509_v45 = vadd.f32 %v504_v5, %v488_v25  ;;  %v513_v39 = vmul.f32 %v2007_v59, %v1883_v17  ;;  %v2106_v56 = vperm.slane %v1873_v13, 4 }
  0x43   : > { %v675_v1 = vmul.f32 %v672_v16, %v2001_v52  ;;  %v528_v2 = vrot.slane %v521_v34, 4  ;;  %v826_v3 = vperm.slane %v1867_v11, 3  ;;  %v847_v21 = vperm.slane %v1878_v14, 1 }
  0x44   : > { %v645_v57 = vadd.f32 %v640_v35, %v627_v51  ;;  %v517_v8 = vadd.f32 %v514_v29, %v510_v53  ;;  %v820_v59 = vmul.f32 %v2106_v56, %v1859_v9  ;;  %v516_v12 = vadd.f32 %v513_v39, %v509_v45 }
  0x45   : > { %v2120_v16 = vmul.f32 %v826_v3, %v1862_v10  ;;  %v546_v27 = vmul.f32 %v2019_v0, %v1929_v50  ;;  %v538_v31 = vmul.f32 %v2042_v37, %v1900_v26  ;;  %v2146_v0 = vmul.f32 %v847_v21, %v1883_v17 }
  0x46   : > { %v403_v53 = vperm.slane %v1873_v13, 0  ;;  %v2631_v35 = vperm.slane %v1893_v19, 7  ;;  %v430_v45 = vperm.slane %v1888_v18, 5 }
  0x47   : > { %v553_v34 = vrot.slane %v546_v27, 4  ;;  %v425_v27 = vperm.slane %v1867_v11, 6 }
  0x48   : > { %v2182_v41 = vmul.f32 %v2631_v35, %v1900_v26  ;;  %v446_v35 = vperm.slane %v1878_v14, 4 }
  0x69   : > { %v2023_v4 = vpop.permute.xlu2 %791 }
  0x6a   : > { %v797_v43 = vrot.slane %v2023_v4, 5  ;;  %v562_v4 = vmul.f32 %v2045_v38, %v1900_v26 }
  0x6c   : > { %v2070_v7 = vmul.f32 %v797_v43, %v787_v32  ;;  %v628_v32 = vadd.f32 %v625_v40, %v621_v6  ;;  %v558_v40 = vadd.f32 %v552_v23, %v540_v46  ;;  %v529_v23 = vsel %vm415_vm0, %v526_v30, %v528_v2 }
  0x6d   : > { %v652_v30 = vadd.f32 %v649_v28, %v645_v57  ;;  %v534_v5 = vadd.f32 %v529_v23, %v516_v12  ;;  %v408_v28 = vperm.slane %v1873_v13, 7  ;;  %v554_v57 = vsel %vm415_vm0, %v551_v60, %v553_v34 }
  0x6e   : > { %v646_v62 = vadd.f32 %v639_v24, %v628_v32  ;;  %v2633_v24 = vrot.slane %v2120_v16, 4  ;;  %v539_v32 = vmul.f32 %v2042_v37, %v1929_v50  ;;  %v2632_v37 = vrot.slane %v2146_v0, 4 }
  0x6f   : > { %v432_v60 = vmul.f32 %v430_v45, %v1883_v17  ;;  %v433_v23 = vmul.f32 %v430_v45, %v1900_v26 }
  0x70   : > { %v653_v20 = vadd.f32 %v650_v58, %v646_v62 }
  0x71   : > { %v795_v54 = vpop.permute.xlu2 %794 }
  0x72   : > { %v798_v44 = vrot.slane %v795_v54, 5  ;;  %v671_v51 = vadd.f32 %v664_v33, %v653_v20 }
  0x74   : > { %v799_v6 = vsel %vm796_vm1, %v797_v43, %v798_v44  ;;  %v2122_v54 = vmul.f32 %v798_v44, %v789_v36  ;;  %v665_v43 = vsel %vm415_vm0, %v662_v55, %v664_v33  ;;  %v2137_v36 = vadd.f32 %v562_v4, %v558_v40 }
  0x75   : > { %v2129_v15 = vmul.f32 %v799_v6, %v788_v48  ;;  %v841_v55 = vmul.f32 %v2112_v61, %v1862_v10  ;;  %v535_v48 = vadd.f32 %v528_v2, %v517_v8  ;;  %v837_v4 = vadd.f32 %v2633_v24, %v820_v59 }
  0x76   : > { %v2156_v44 = vperm.slane %v1893_v19, 0  ;;  %v670_v39 = vadd.f32 %v665_v43, %v652_v30  ;;  %v2165_v2 = vmul.f32 %v408_v28, %v1862_v10  ;;  %v411_v6 = vmul.f32 %v408_v28, %v1883_v17 }
  0x77   : > { %v844_v29 = vadd.f32 %v841_v55, %v837_v4  ;;  %v542_v62 = vadd.f32 %v539_v32, %v535_v48  ;;  %v541_v40 = vadd.f32 %v538_v31, %v534_v5  ;;  %v405_v59 = vmul.f32 %v403_v53, %v1862_v10 }
  0x78   : > { %v862_v8 = vmul.f32 %v2156_v44, %v1883_v17  ;;  %v417_v43 = vrot.slane %v2165_v2, 4  ;;  %v419_v12 = vrot.slane %v411_v6, 4  ;;  %v563_v31 = vmul.f32 %v2045_v38, %v1929_v50 }
  0x79   : > { %v858_v20 = vadd.f32 %v2632_v37, %v844_v29  ;;  %v564_v55 = vmul.f32 %v2045_v38, %v2001_v52  ;;  %v559_v32 = vadd.f32 %v554_v57, %v541_v40  ;;  %v560_v4 = vadd.f32 %v553_v34, %v542_v62 }
  0x7a   : > { %v420_v30 = vsel %vm415_vm0, %v417_v43, %v419_v12  ;;  %v2191_v5 = vpop.permute.xlu2 %890  ;;  %v2194_v29 = vperm.slane %v1965_v22, 6  ;;  %v451_v2 = vperm.slane %v1893_v19, 3  ;;  %v427_v38 = vmul.f32 %v425_v27, %v1883_v17 }
  0x7b   : > { %v424_v42 = vadd.f32 %v420_v30, %v405_v59  ;;  %v865_v12 = vadd.f32 %v862_v8, %v858_v20  ;;  %v2634_v40 = vrot.slane %v2182_v41, 4  ;;  %v438_v34 = vrot.slane %v432_v60, 4 }
  0x7c   : > { %v440_v62 = vrot.slane %v433_v23, 4  ;;  %v677_v57 = vadd.f32 %v2096_v47, %v670_v39  ;;  %v895_v58 = vrot.slane %v2191_v5, 4  ;;  %v567_v37 = vadd.f32 %v564_v55, %v560_v4 }
  0x7d   : > { %v883_v20 = vmul.f32 %v2194_v29, %v1900_v26  ;;  %v429_v60 = vadd.f32 %v427_v38, %v424_v42  ;;  %v879_v47 = vadd.f32 %v2634_v40, %v865_v12  ;;  %v454_v23 = vmul.f32 %v451_v2, %v1929_v50 }
  0x7e   : > { %v441_v39 = vsel %vm415_vm0, %v438_v34, %v440_v62  ;;  %v448_v30 = vmul.f32 %v446_v35, %v1900_v26  ;;  %v426_v12 = vmul.f32 %v425_v27, %v1862_v10  ;;  %v2229_v40 = vperm.slane %v1873_v13, 5 }
  0x7f   : > { %v2135_v25 = vpop.permute.xlu1 %680  ;;  %v2148_v63 = vpop.permute.xlu0 %569  ;;  %v445_v38 = vadd.f32 %v441_v39, %v429_v60  ;;  %v461_v59 = vrot.slane %v454_v23, 4  ;;  %v447_v60 = vmul.f32 %v446_v35, %v1883_v17 }
  0x80   : > { %v686_v33 = vrot.slane %v2135_v25, 6  ;;  %v678_v25 = vadd.f32 %v675_v1, %v671_v51  ;;  %v575_v51 = vrot.slane %v2148_v63, 7  ;;  %v453_v63 = vmul.f32 %v451_v2, %v1900_v26 }
  0x82   : > { %v2198_v1 = vmul.f32 %v686_v33, %v2072_v49  ;;  %v566_v49 = vadd.f32 %v563_v31, %v559_v32  ;;  %v2209_v8 = vmul.f32 %v575_v51, %v2137_v36  ;;  %v409_v31 = vmul.f32 %v408_v28, %v1859_v9 }
  0x83   : > { %v404_v36 = vmul.f32 %v403_v53, %v1859_v9  ;;  %v459_v4 = vrot.slane %v453_v63, 4  ;;  %v452_v28 = vmul.f32 %v451_v2, %v1883_v17  ;;  %v2232_v53 = vperm.slane %v1867_v11, 4 }
  0x84   : > { %v917_v2 = vmul.f32 %v2229_v40, %v1859_v9  ;;  %v2246_v63 = vperm.slane %v1878_v14, 2  ;;  %v588_v23 = vrot.slane %v2209_v8, 1 }
  0x85   : > { %v458_v39 = vrot.slane %v452_v28, 4  ;;  %v2269_v28 = vperm.slane %v1965_v22, 0 }
  0x87   : > { %v684_v48 = vpop.permute.xlu1 %683  ;;  %v573_v6 = vpop.permute.xlu0 %572 }
  0x88   : > { %v687_v46 = vrot.slane %v684_v48, 6  ;;  %v576_v24 = vrot.slane %v573_v6, 7  ;;  %v431_v48 = vmul.f32 %v430_v45, %v1862_v10  ;;  %v416_v6 = vrot.slane %v409_v31, 4 }
  0x89   : > { %v467_v45 = vperm.slane %v1965_v22, 2 }
  0x8a   : > { %v688_v55 = vsel %vm685_vm2, %v686_v33, %v687_v46  ;;  %v2222_v32 = vmul.f32 %v687_v46, %v678_v25  ;;  %v577_v42 = vsel %vm574_vm3, %v575_v51, %v576_v24  ;;  %v437_v62 = vrot.slane %v431_v48, 4 }
  0x8b   : > { %v418_v33 = vsel %vm415_vm0, %v416_v6, %v417_v43  ;;  %v583_v46 = vmul.f32 %v576_v24, %v567_v37  ;;  %v2236_v51 = vperm.slane %v1888_v18, 3  ;;  %v2243_v43 = vmul.f32 %v2232_v53, %v1862_v10 }
  0x8c   : > { %v423_v25 = vadd.f32 %v418_v33, %v404_v36  ;;  %v439_v27 = vsel %vm415_vm0, %v437_v62, %v438_v34  ;;  %v450_v24 = vadd.f32 %v448_v30, %v445_v38  ;;  %v2250_v31 = vmul.f32 %v688_v55, %v677_v57 }
  0x8d   : > { %v462_v34 = vsel %vm415_vm0, %v459_v4, %v461_v59  ;;  %v930_v36 = vrot.slane %v2243_v43, 4  ;;  %v582_v48 = vmul.f32 %v577_v42, %v566_v49  ;;  %v942_v62 = vmul.f32 %v2236_v51, %v1862_v10 }
  0x8e   : > { %v428_v37 = vadd.f32 %v426_v12, %v423_v25  ;;  %v2258_v30 = vmul.f32 %v2246_v63, %v1883_v17  ;;  %v702_v35 = vrot.slane %v2222_v32, 2  ;;  %v591_v38 = vrot.slane %v583_v46, 1 }
  0x8f   : > { %v886_v12 = vadd.f32 %v883_v20, %v879_v47  ;;  %v938_v57 = vadd.f32 %v930_v36, %v917_v2  ;;  %v466_v8 = vadd.f32 %v462_v34, %v450_v24  ;;  %v469_v59 = vmul.f32 %v467_v45, %v1929_v50 }
  0x90   : > { %v444_v6 = vadd.f32 %v439_v27, %v428_v37  ;;  %v460_v49 = vsel %vm415_vm0, %v458_v39, %v459_v4  ;;  %v2266_v42 = vperm.slane %v1893_v19, 1  ;;  %v822_v33 = vmul.f32 %v2106_v56, %v1883_v17  ;;  %v480_v47 = vpop.permute.xlu1 %479 }
  0x91   : > { %v828_v20 = vmul.f32 %v826_v3, %v1883_v17  ;;  %v945_v46 = vadd.f32 %v942_v62, %v938_v57  ;;  %v2635_v25 = vrot.slane %v2258_v30, 4  ;;  %v821_v4 = vmul.f32 %v2106_v56, %v1862_v10 }
  0x92   : > { %v449_v55 = vadd.f32 %v447_v60, %v444_v6  ;;  %v849_v27 = vmul.f32 %v847_v21, %v1900_v26  ;;  %v589_v2 = vrot.slane %v582_v48, 1  ;;  %v468_v24 = vmul.f32 %v467_v45, %v1900_v26 }
  0x93   : > { %v832_v37 = vrot.slane %v828_v20, 4  ;;  %v843_v60 = vmul.f32 %v2112_v61, %v1900_v26  ;;  %v471_v39 = vadd.f32 %v469_v59, %v466_v8  ;;  %v842_v34 = vmul.f32 %v2112_v61, %v1883_v17 }
  0x94   : > { %v465_v3 = vadd.f32 %v460_v49, %v449_v55  ;;  %v853_v6 = vrot.slane %v849_v27, 4  ;;  %v700_v62 = vrot.slane %v2250_v31, 2  ;;  %v2290_v56 = vmul.f32 %v2269_v28, %v1900_v26 }
  0x95   : > { %v2636_v21 = vrot.slane %v2120_v16, 4  ;;  %v839_v48 = vadd.f32 %v832_v37, %v822_v33  ;;  %v2297_v57 = vmul.f32 %v895_v58, %v886_v12  ;;  %v963_v61 = vadd.f32 %v2635_v25, %v945_v46 }
  0x96   : > { %v967_v31 = vmul.f32 %v2266_v42, %v1883_v17  ;;  %v592_v59 = vsel %vm587_vm4, %v589_v2, %v591_v38  ;;  %v2637_v16 = vrot.slane %v2146_v0, 4  ;;  %v2638_v33 = vperm.slane %v1893_v19, 7 }
  0x97   : > { %v833_v45 = vsel %vm415_vm0, %v2636_v21, %v832_v37  ;;  %v846_v55 = vadd.f32 %v843_v60, %v839_v48  ;;  %v483_v20 = vmul.f32 %v480_v47, %v471_v39  ;;  %v470_v27 = vadd.f32 %v468_v24, %v465_v3  ;;  %v475_v21 = vpop.permute.xlu0 %474 }
  0x98   : > { %v838_v8 = vadd.f32 %v833_v45, %v821_v4  ;;  %v854_v49 = vsel %vm415_vm0, %v2637_v16, %v853_v6  ;;  %v870_v12 = vmul.f32 %v2638_v33, %v1929_v50  ;;  %v2311_v37 = vperm.slane %v1965_v22, 7 }
  0x99   : > { %v980_v4 = vrot.slane %v2290_v56, 4  ;;  %v863_v38 = vmul.f32 %v2156_v44, %v1900_v26  ;;  %v864_v0 = vmul.f32 %v2156_v44, %v1929_v50  ;;  %v925_v60 = vmul.f32 %v2232_v53, %v1883_v17  ;;  %v2325_v33 = vpop.permute.xlu1 %893 }
  0x9a   : > { %v845_v46 = vadd.f32 %v842_v34, %v838_v8  ;;  %v970_v45 = vadd.f32 %v967_v31, %v963_v61  ;;  %v860_v47 = vadd.f32 %v853_v6, %v846_v55  ;;  %v926_v24 = vmul.f32 %v2232_v53, %v1900_v26 }
  0x9b   : > { %v590_v39 = vsel %vm587_vm4, %v588_v23, %v589_v2  ;;  %v874_v3 = vrot.slane %v870_v12, 4  ;;  %v918_v34 = vmul.f32 %v2229_v40, %v1862_v10  ;;  %v931_v8 = vrot.slane %v925_v60, 4 }
  0x9c   : > { %v859_v48 = vadd.f32 %v854_v49, %v845_v46  ;;  %v482_v16 = vmul.f32 %v475_v21, %v470_v27  ;;  %v919_v44 = vmul.f32 %v2229_v40, %v1883_v17  ;;  %v933_v25 = vrot.slane %v926_v24, 4  ;;  %v2347_v46 = vpop.permute.xlu2 %999 }
  0x9d   : > { %v950_v6 = vmul.f32 %v2246_v63, %v1900_v26  ;;  %v596_v61 = vadd.f32 %v592_v59, %v483_v20  ;;  %v992_v53 = vmul.f32 %v2311_v37, %v1900_v26  ;;  %v932_v23 = vsel %vm415_vm0, %v930_v36, %v931_v8 }
  0x9e   : > { %v951_v2 = vmul.f32 %v2246_v63, %v1929_v50  ;;  %v988_v31 = vadd.f32 %v980_v4, %v970_v45  ;;  %v866_v55 = vadd.f32 %v863_v38, %v859_v48  ;;  %v867_v40 = vadd.f32 %v864_v0, %v860_v47 }
  0x9f   : > { %v934_v49 = vsel %vm415_vm0, %v931_v8, %v933_v25  ;;  %v2639_v12 = vrot.slane %v2182_v41, 4  ;;  %v896_v20 = vrot.slane %v2325_v33, 4  ;;  %v939_v27 = vadd.f32 %v932_v23, %v918_v34 }
  0xa0   : > { %v943_v43 = vmul.f32 %v2236_v51, %v1883_v17  ;;  %v595_v36 = vadd.f32 %v590_v39, %v482_v16  ;;  %v940_v63 = vadd.f32 %v934_v49, %v919_v44  ;;  %v944_v21 = vmul.f32 %v2236_v51, %v1900_v26 }
  0xa1   : > { %v875_v59 = vsel %vm415_vm0, %v2639_v12, %v874_v3  ;;  %v956_v38 = vrot.slane %v950_v6, 4  ;;  %v907_v25 = vrot.slane %v2297_v57, 4  ;;  %v703_v41 = vsel %vm698_vm5, %v700_v62, %v702_v35 }
  0xa2   : > { %v2640_v0 = vrot.slane %v2198_v1, 2  ;;  %v958_v45 = vrot.slane %v951_v2, 4  ;;  %v880_v48 = vadd.f32 %v875_v59, %v866_v55  ;;  %v881_v47 = vadd.f32 %v874_v3, %v867_v40 }
  0xa3   : > { %v884_v24 = vmul.f32 %v2194_v29, %v1929_v50  ;;  %v885_v51 = vmul.f32 %v2194_v29, %v2001_v52  ;;  %v2362_v39 = vadd.f32 %v703_v41, %v596_v61  ;;  %v2364_v34 = vadd.f32 %v992_v53, %v988_v31 }
  0xa4   : > { %v701_v60 = vsel %vm698_vm5, %v2640_v0, %v700_v62  ;;  %v1004_v32 = vrot.slane %v2347_v46, 3  ;;  %v946_v35 = vadd.f32 %v943_v43, %v939_v27  ;;  %v2374_v1 = vsel %vm415_vm0, %v895_v58, %v896_v20 }
  0xa5   : > { %v2367_v8 = vadd.f32 %v701_v60, %v595_v36  ;;  %v947_v62 = vadd.f32 %v944_v21, %v940_v63  ;;  %v2641_v3 = vrot.slane %v2258_v30, 4  ;;  %v959_v16 = vsel %vm415_vm0, %v956_v38, %v958_v45 }
  0xa6   : > { %v975_v44 = vmul.f32 %v2269_v28, %v1929_v50  ;;  %v1025_v6 = vperm.slane %v1873_v13, 6  ;;  %v1032_v61 = vperm.slane %v1867_v11, 5  ;;  %v887_v53 = vadd.f32 %v884_v24, %v880_v48 }
  0xa7   : > { %v957_v29 = vsel %vm415_vm0, %v2641_v3, %v956_v38  ;;  %v888_v23 = vadd.f32 %v885_v51, %v881_v47  ;;  %v968_v58 = vmul.f32 %v2266_v42, %v1900_v26  ;;  %v969_v5 = vmul.f32 %v2266_v42, %v1929_v50 }
  0xa8   : > { %v964_v30 = vadd.f32 %v957_v29, %v946_v35  ;;  %v976_v2 = vmul.f32 %v2269_v28, %v2001_v52  ;;  %v1034_v31 = vmul.f32 %v1032_v61, %v1883_v17  ;;  %v1035_v55 = vmul.f32 %v1032_v61, %v1900_v26 }
  0xa9   : > { %v965_v40 = vadd.f32 %v959_v16, %v947_v62  ;;  %v1028_v13 = vmul.f32 %v1025_v6, %v1883_v17  ;;  %v1050_v11 = vperm.slane %v1888_v18, 4  ;;  %v1057_v49 = vperm.slane %v1878_v14, 3  ;;  %v1003_v16 = vpop.permute.xlu0 %1002 }
  0xaa   : > { %v981_v12 = vrot.slane %v975_v44, 4  ;;  %v1040_v59 = vrot.slane %v1034_v31, 4  ;;  %v1042_v27 = vrot.slane %v1035_v55, 4  ;;  %v1082_v42 = vperm.slane %v1965_v22, 1 }
  0xab   : > { %v1053_v43 = vmul.f32 %v1050_v11, %v1900_v26  ;;  %v1059_v28 = vmul.f32 %v1057_v49, %v1900_v26  ;;  %v1060_v36 = vmul.f32 %v1057_v49, %v1929_v50  ;;  %v1075_v63 = vperm.slane %v1893_v19, 2 }
  0xac   : > { %v983_v21 = vrot.slane %v976_v2, 4  ;;  %v993_v38 = vmul.f32 %v2311_v37, %v1929_v50  ;;  %v1043_v18 = vsel %vm415_vm0, %v1040_v59, %v1042_v27  ;;  %v1084_v14 = vmul.f32 %v1082_v42, %v1929_v50 }
  0xad   : > { %v971_v41 = vadd.f32 %v968_v58, %v964_v30  ;;  %v1049_v0 = vadd.f32 %v1043_v18, %v1028_v13  ;;  %v1065_v60 = vrot.slane %v1059_v28, 4  ;;  %v1067_v22 = vrot.slane %v1060_v36, 4  ;;  %v1730_v58 = vld [vmem:[%s2621_s2 + $0x30] ss:$0 sm:$0xff]  ;;  %v1112_v18 = vpop.permute.xlu2 %1111 }
  0xae   : > { %v982_v45 = vsel %vm415_vm0, %v980_v4, %v981_v12  ;;  %v994_v48 = vmul.f32 %v2311_v37, %v2001_v52  ;;  %v1085_v19 = vmul.f32 %v1082_v42, %v2001_v52  ;;  %v1090_v47 = vrot.slane %v1084_v14, 4 }
  0xaf   : > { %v972_v24 = vadd.f32 %v969_v5, %v965_v40  ;;  %v1056_v51 = vadd.f32 %v1053_v43, %v1049_v0  ;;  %v1068_v35 = vsel %vm415_vm0, %v1065_v60, %v1067_v22  ;;  %v1078_v62 = vmul.f32 %v1075_v63, %v1929_v50 }
  0xb0   : > { %v984_v3 = vsel %vm415_vm0, %v981_v12, %v983_v21  ;;  %v1092_v29 = vrot.slane %v1085_v19, 4  ;;  %v1026_v56 = vmul.f32 %v1025_v6, %v1859_v9  ;;  %v1033_v4 = vmul.f32 %v1032_v61, %v1862_v10 }
  0xb1   : > { %v989_v44 = vadd.f32 %v982_v45, %v971_v41  ;;  %v1074_v37 = vadd.f32 %v1068_v35, %v1056_v51  ;;  %v1027_v5 = vmul.f32 %v1025_v6, %v1862_v10  ;;  %v1058_v30 = vmul.f32 %v1057_v49, %v1883_v17 }
  0xb2   : > { %v1093_v2 = vsel %vm415_vm0, %v1090_v47, %v1092_v29  ;;  %v1039_v31 = vrot.slane %v1033_v4, 4  ;;  %v1051_v55 = vmul.f32 %v1050_v11, %v1862_v10  ;;  %v1083_v9 = vmul.f32 %v1082_v42, %v1900_v26 }
  0xb3   : > { %v990_v40 = vadd.f32 %v984_v3, %v972_v24  ;;  %v1081_v61 = vadd.f32 %v1078_v62, %v1074_v37  ;;  %v1052_v13 = vmul.f32 %v1050_v11, %v1883_v17  ;;  %v1064_v12 = vrot.slane %v1058_v30, 4 }
  0xb4   : > { %v903_v27 = vmul.f32 %v896_v20, %v888_v23  ;;  %v1005_v43 = vrot.slane %v1003_v16, 3  ;;  %v1041_v6 = vsel %vm415_vm0, %v1039_v31, %v1040_v59  ;;  %v1047_v28 = vadd.f32 %v1039_v31, %v1026_v56  ;;  %v1109_v20 = vpop.permute.xlu1 %1108 }
  0xb5   : > { %v902_v49 = vmul.f32 %v2374_v1, %v887_v53  ;;  %v1099_v36 = vadd.f32 %v1093_v2, %v1081_v61  ;;  %v1103_v21 = vmul.f32 %v1730_v58, %v2001_v52  ;;  %v1048_v10 = vadd.f32 %v1041_v6, %v1027_v5 }
  0xb6   : > { %v1054_v42 = vadd.f32 %v1051_v55, %v1047_v28  ;;  %v1066_v14 = vsel %vm415_vm0, %v1064_v12, %v1065_v60  ;;  %v1076_v11 = vmul.f32 %v1075_v63, %v1883_v17  ;;  %v1089_v41 = vrot.slane %v1083_v9, 4 }
  0xb7   : > { %v996_v0 = vadd.f32 %v993_v38, %v989_v44  ;;  %v997_v33 = vadd.f32 %v994_v48, %v990_v40  ;;  %v1055_v23 = vadd.f32 %v1052_v13, %v1048_v10  ;;  %v1077_v59 = vmul.f32 %v1075_v63, %v1900_v26 }
  0xb8   : > { %v1010_v1 = vmul.f32 %v1004_v32, %v2364_v34  ;;  %v910_v53 = vrot.slane %v903_v27, 4  ;;  %v1006_v52 = vsel %vm809_vm6, %v1004_v32, %v1005_v43  ;;  %v1072_v22 = vadd.f32 %v1064_v12, %v1054_v42 }
  0xb9   : > { %v908_v60 = vrot.slane %v902_v49, 4  ;;  %v1106_v45 = vadd.f32 %v1103_v21, %v1099_v36  ;;  %v1114_v17 = vrot.slane %v1112_v18, 2  ;;  %v1073_v19 = vadd.f32 %v1066_v14, %v1055_v23 }
  0xba   : > { %v1079_v38 = vadd.f32 %v1076_v11, %v1072_v22  ;;  %v1091_v48 = vsel %vm415_vm0, %v1089_v41, %v1090_v47  ;;  %v1101_v24 = vmul.f32 %v1730_v58, %v1900_v26  ;;  %v1113_v63 = vrot.slane %v1109_v20, 2 }
  0xbb   : > { %v1011_v51 = vmul.f32 %v1006_v52, %v996_v0  ;;  %v1012_v35 = vmul.f32 %v1005_v43, %v997_v33  ;;  %v1080_v62 = vadd.f32 %v1077_v59, %v1073_v19  ;;  %v1102_v34 = vmul.f32 %v1730_v58, %v1929_v50 }
  0xbc   : > { %v2642_v46 = vrot.slane %v2122_v54, 3  ;;  %v2643_v32 = vrot.slane %v2129_v15, 3  ;;  %v2645_v56 = vrot.slane %v2070_v7, 3  ;;  %v1097_v4 = vadd.f32 %v1089_v41, %v1079_v38  ;;  %v1602_v38 = vld [vmem:[%s2625_s6 + $0x30] sm:$0xf] }
  0xbd   : > { %v911_v26 = vsel %vm415_vm0, %v908_v60, %v910_v53  ;;  %v1121_v16 = vmul.f32 %v1114_v17, %v1106_v45  ;;  %v1098_v44 = vadd.f32 %v1091_v48, %v1080_v62  ;;  %v909_v50 = vsel %vm415_vm0, %v907_v25, %v908_v60  ;;  %v1683_v48 = vld [vmem:[%s2625_s6 + $0x34] sm:$0xf0]  ;;  %v1594_v62 = vld [vmem:[%s2625_s6 + $0x20] sm:$0xf] }
  0xbe   : > { %v814_v3 = vsel %vm809_vm6, %v2643_v32, %v2642_v46  ;;  %v2644_v29 = vmov %v2643_v32  ;;  %v1104_v58 = vadd.f32 %v1101_v24, %v1097_v4  ;;  %v1115_v15 = vsel %vm698_vm5, %v1113_v63, %v1114_v17  ;;  %v1682_v24 = vld [vmem:[%s2625_s6 + $0x34] sm:$0xf]  ;;  %v1680_v46 = vld [vmem:[%s2625_s6 + $0x24] sm:$0xf] }
  0xbf   : > { %v812_v47 = vsel %vm809_vm6, %v2645_v56, %v2644_v29  ;;  %v818_v54 = vadd.f32 %v814_v3, %v2362_v39  ;;  %v1016_v5 = vrot.slane %v1010_v1, 5  ;;  %v1017_v7 = vrot.slane %v1011_v51, 5  ;;  %v1604_v51 = vld [vmem:[%s2625_s6 + $0x38] sm:$0xf0]  ;;  %v1596_v3 = vld [vmem:[%s2625_s6 + $0x28] sm:$0xf0] }
  0xc0   : > { %v817_v37 = vadd.f32 %v812_v47, %v2367_v8  ;;  %v1019_v30 = vrot.slane %v1012_v35, 5  ;;  %v1105_v2 = vadd.f32 %v1102_v34, %v1098_v44  ;;  %v1119_v31 = vmul.f32 %v1113_v63, %v1104_v58  ;;  %v1731_v8 = vld [vmem:[%s2622_s3] ss:$0 sm:$0xff]  ;;  %v1681_v34 = vld [vmem:[%s2625_s6 + $0x24] sm:$0xf0] }
  0xc1   : > { %v915_v55 = vadd.f32 %v911_v26, %v818_v54  ;;  %v1128_v40 = vrot.slane %v1121_v16, 6  ;;  %v1018_v39 = vsel %vm796_vm1, %v1016_v5, %v1017_v7  ;;  %v1768_v42 = vmov 64.0   ;;  %v1586_v56 = vld [vmem:[%s2625_s6 + $0x10] sm:$0xf]  ;;  %v1679_v47 = vld [vmem:[%s2625_s6 + $0x14] sm:$0xf0] }
  0xc2   : > { %v914_v9 = vadd.f32 %v909_v50, %v817_v37  ;;  %v1120_v61 = vmul.f32 %v1115_v15, %v1105_v2  ;;  %v1125_v13 = vrot.slane %v1119_v31, 6  ;;  %v1020_v25 = vsel %vm796_vm1, %v1017_v7, %v1019_v30  ;;  %v1678_v4 = vld [vmem:[%s2625_s6 + $0x14] sm:$0xf]  ;;  %v1588_v16 = vld [vmem:[%s2625_s6 + $0x18] sm:$0xf0] }
  0xc3   : > { %v1024_v12 = vadd.f32 %v1020_v25, %v915_v55  ;;  %1736 = vrcp.f32 %v1768_v42  ;;  %v1603_v63 = vor.u32 %v1683_v48, %v1602_v38  ;;  %v1607_v35 = vor.u32 %v1682_v24, %v1604_v51  ;;  %v1578_v50 = vld [vmem:[%s2625_s6] sm:$0xf]  ;;  %v1677_v54 = vld [vmem:[%s2625_s6 + $0x4] sm:$0xf0]  ;;  %v1676_v37 = vld [vmem:[%s2625_s6 + $0x4] sm:$0xf] }
  0xc4   : > { %v1126_v57 = vrot.slane %v1120_v61, 6  ;;  %v1023_v27 = vadd.f32 %v1018_v39, %v914_v9  ;;  %v1595_v32 = vor.u32 %v1681_v34, %v1594_v62  ;;  %v1599_v29 = vor.u32 %v1680_v46, %v1596_v3  ;;  %v1580_v15 = vld [vmem:[%s2625_s6 + $0x8] sm:$0xf0]  ;;  %v1694_v38 = vld [vmem:[%s2627_s8 + $0x50] sm:$0xff]  ;;  %v1684_v62 = vld [vmem:[%s2627_s8] sm:$0xff] }
  0xc5   : > { %1266 = vmatpush.bf16.msra.mxu0 %v1603_v63  ;;  %1280 = vmatpush.bf16.msra.mxu1 %v1607_v35  ;;  %v1587_v26 = vor.u32 %v1679_v47, %v1586_v56  ;;  %v1591_v44 = vor.u32 %v1678_v4, %v1588_v16  ;;  %v1579_v58 = vor.u32 %v1677_v54, %v1578_v50  ;;  %v1685_v48 = vld [vmem:[%s2627_s8 + $0x8] sm:$0xff]  ;;  %v1213_v63 = vld [vmem:[%s2626_s7] sm:$0x3] }
  0xc6   : > { %v1129_v43 = vsel %vm685_vm2, %v1126_v57, %v1128_v40  ;;  %v1127_v6 = vsel %vm685_vm2, %v1125_v13, %v1126_v57  ;;  %v1583_v5 = vor.u32 %v1676_v37, %v1580_v15  ;;  %v1693_v24 = vld [vmem:[%s2627_s8 + $0x48] sm:$0xff]  ;;  %v1215_v51 = vperm.slane %v1213_v63, 0  ;;  %v1692_v34 = vld [vmem:[%s2627_s8 + $0x40] sm:$0xff] }
  0xc7   : > { %v1133_v28 = vadd.f32 %v1129_v43, %v1024_v12  ;;  %v1132_v49 = vadd.f32 %v1127_v6, %v1023_v27  ;;  %v1216_v35 = vperm.slane %v1213_v63, 1 }
  0xc9   : > { %v1139_v36 = vadd.f32 %v1731_v8, %v1133_v28  ;;  %v1138_v21 = vadd.f32 %v1731_v8, %v1132_v49  ;;  %v1737_v14 = vpop.eup %1736  ;;  %1267 = vmatpush.bf16.msra.mxu0 %v1595_v32  ;;  %1281 = vmatpush.bf16.msra.mxu1 %v1599_v29  ;;  %v1732_v49 = vld [vmem:[%s2623_s4] ss:$0 sm:$0xff] }
  0xca   : > { %v1150_v11 = vmul.f32 64.0, %v1737_v14  ;;  %vm1154_vm8 = vweird.f32 %v1737_v14 }
  0xcb   : > { %v1146_v10 = vsel %vm1142_vm7, %v1139_v36, 0.0  ;;  %v1143_v18 = vsel %vm1142_vm7, %v1138_v21, 0.0 }
  0xcc   : > { %1147 = vadd.xlane.f32.xlu2 %v1146_v10  ;;  %1144 = vadd.xlane.f32.xlu1 %v1143_v18  ;;  %v1151_v41 = vsub.f32 1.0, %v1150_v11  ;;  %v1733_v18 = vld [vmem:[%s2624_s5] ss:$0 sm:$0xff] }
  0xcd   : > { %1268 = vmatpush.bf16.msra.mxu0 %v1587_v26  ;;  %1282 = vmatpush.bf16.msra.mxu1 %v1591_v44 }
  0xce   : > { %v1152_v0 = vmul.f32 %v1737_v14, %v1151_v41 }
  0xd0   : > { %v1153_v33 = vadd.f32 %v1737_v14, %v1152_v0 }
  0xd1   : > { %1269 = vmatpush.bf16.msra.mxu0 %v1579_v58  ;;  %1283 = vmatpush.bf16.msra.mxu1 %v1583_v5 }
  0xd2   : > { %v1155_v20 = vsel %vm1154_vm8, %v1737_v14, %v1153_v33 }
 0x13f   : > { %v1148_v23 = vpop.xlane.xlu2 %1147  ;;  %v1145_v59 = vpop.xlane.xlu1 %1144 }
 0x140   : > { %v1157_v1 = vmul.f32 %v1155_v20, %v1148_v23  ;;  %v1156_v53 = vmul.f32 %v1155_v20, %v1145_v59  ;;  %v1699_v23 = vld [vmem:[%s2627_s8 + $0x78] sm:$0xff]  ;;  %v1690_v59 = vld [vmem:[%s2627_s8 + $0x30] sm:$0xff] }
 0x141   : > { %1474 = vmatpush.bf16.msra.mxu3 %v1699_v23  ;;  %v1769_v23 = vmov 0.0  }
 0x142   : > { %v2467_v52 = vsub.f32 %v1139_v36, %v1157_v1  ;;  %v2469_v22 = vsub.f32 %v1138_v21, %v1156_v53  ;;  %v1698_v1 = vld [vmem:[%s2627_s8 + $0x70] sm:$0xff]  ;;  %v1689_v53 = vld [vmem:[%s2627_s8 + $0x28] sm:$0xff]  ;;  %1507 = vst.msk [vmem:[%s2591_s24] sm:$0xff] %vm1142_vm7, %v1769_v23 }
 0x143   : > { %1511 = vst.msk [vmem:[%s2591_s24 + $0x20] sm:$0xff] %vm1142_vm7, %v1769_v23 }
 0x144   : > { %v1161_v60 = vmul.f32 %v2467_v52, %v2467_v52  ;;  %v1160_v45 = vmul.f32 %v2469_v22, %v2469_v22  ;;  %1513 = vst.msk [vmem:[%s2591_s24 + $0x28] sm:$0x3f] %vm1512_vm15, %v1769_v23 }
 0x145   : > { %1475 = vmatpush.bf16.msra.mxu3 %v1698_v1 }
 0x146   : > { %v1165_v17 = vsel %vm1142_vm7, %v1161_v60, 0.0  ;;  %v1162_v19 = vsel %vm1142_vm7, %v1160_v45, 0.0  ;;  %v1696_v60 = vld [vmem:[%s2627_s8 + $0x60] sm:$0xff]  ;;  %v1687_v45 = vld [vmem:[%s2627_s8 + $0x18] sm:$0xff] }
 0x147   : > { %1166 = vadd.xlane.f32.xlu2 %v1165_v17  ;;  %1163 = vadd.xlane.f32.xlu0 %v1162_v19  ;;  %v1695_v17 = vld [vmem:[%s2627_s8 + $0x58] sm:$0xff]  ;;  %v1686_v19 = vld [vmem:[%s2627_s8 + $0x10] sm:$0xff] }
 0x1ba   : > { %v1167_v7 = vpop.xlane.xlu2 %1166  ;;  %v1164_v30 = vpop.xlane.xlu0 %1163 }
 0x1bb   : > { %v1169_v2 = vmul.f32 %v1167_v7, %v1155_v20  ;;  %v1168_v31 = vmul.f32 %v1164_v30, %v1155_v20  ;;  %v1691_v20 = vld [vmem:[%s2627_s8 + $0x38] sm:$0xff] }
 0x1bc   : > { %1460 = vmatpush.bf16.msra.mxu2 %v1691_v20 }
 0x1bd   : > { %v1171_v55 = vadd.f32 1e-06, %v1169_v2  ;;  %v1170_v9 = vadd.f32 1e-06, %v1168_v31 }
 0x1bf   : > { %1738 = vrsqrt.f32 %v1171_v55  ;;  %vm1188_vm11 = vweird.f32 %v1171_v55  ;;  %vm1178_vm13 = vweird.f32 %v1170_v9 }
 0x1c0   : > { %1740 = vrsqrt.f32 %v1170_v9  ;;  %1461 = vmatpush.bf16.msra.mxu2 %v1690_v59  ;;  %v1734_v59 = vld [vmem:[%s2628_s9] ss:$0 sm:$0xff] }
 0x1c4   : > { %1462 = vmatpush.bf16.msra.mxu2 %v1689_v53 }
 0x1c5   : > { %v1739_v40 = vpop.eup %1738 }
 0x1c6   : > { %v1741_v61 = vpop.eup %1740  ;;  %v1183_v13 = vmul.f32 %v1739_v40, %v1171_v55  ;;  %vm1189_vm9 = vweird.f32 %v1739_v40 }
 0x1c7   : > { %v1173_v57 = vmul.f32 %v1741_v61, %v1170_v9  ;;  %vm1179_vm10 = vweird.f32 %v1741_v61  ;;  %vm1190_vm12 = vmor %vm1188_vm11, %vm1189_vm9 }
 0x1c8   : > { %v1184_v25 = vmul.f32 %v1739_v40, %v1183_v13  ;;  %vm1180_vm14 = vmor %vm1178_vm13, %vm1179_vm10 }
 0x1c9   : > { %v1174_v39 = vmul.f32 %v1741_v61, %v1173_v57 }
 0x1ca   : > { %v1185_v12 = vmul.f32 0.5, %v1184_v25 }
 0x1cb   : > { %v1175_v8 = vmul.f32 0.5, %v1174_v39 }
 0x1cc   : > { %v1186_v27 = vsub.f32 1.5, %v1185_v12 }
 0x1cd   : > { %v1176_v43 = vsub.f32 1.5, %v1175_v8 }
 0x1ce   : > { %v1187_v6 = vmul.f32 %v1739_v40, %v1186_v27 }
 0x1cf   : > { %v1177_v28 = vmul.f32 %v1741_v61, %v1176_v43 }
 0x1d0   : > { %v1191_v36 = vsel %vm1190_vm12, %v1739_v40, %v1187_v6 }
 0x1d1   : > { %v1193_v21 = vmul.f32 %v1191_v36, %v2467_v52  ;;  %v1181_v10 = vsel %vm1180_vm14, %v1741_v61, %v1177_v28  ;;  %v1697_v52 = vld [vmem:[%s2627_s8 + $0x68] sm:$0xff] }
 0x1d2   : > { %v1192_v42 = vmul.f32 %v1181_v10, %v2469_v22  ;;  %1476 = vmatpush.bf16.msra.mxu3 %v1697_v52  ;;  %v1688_v22 = vld [vmem:[%s2627_s8 + $0x20] sm:$0xff] }
 0x1d3   : > { %v1198_v14 = vmul.f32 %v1732_v49, %v1193_v21  ;;  %1463 = vmatpush.bf16.msra.mxu2 %v1688_v22  ;;  %v1735_v22 = vld [vmem:[%s2629_s10] ss:$0 sm:$0xff] }
 0x1d4   : > { %v1197_v11 = vmul.f32 %v1732_v49, %v1192_v42 }
 0x1d5   : > { %v1203_v41 = vadd.f32 %v1733_v18, %v1198_v14 }
 0x1d6   : > { %v1202_v0 = vadd.f32 %v1733_v18, %v1197_v11  ;;  %1477 = vmatpush.bf16.msra.mxu3 %v1696_v60 }
 0x1d7   : > { %1464 = vmatpush.bf16.msra.mxu2 %v1687_v45 }
 0x1d8   : > { %v1204_v33 = vpack.c.bf16 %v1203_v41, %v1202_v0 }
 0x1da   : > { %1608 = vmatmul.msk.bf16.vlgmr.msra.gmra.mxu0 %vm1142_vm7, %v1204_v33  ;;  %1609 = vmatmul.msk.bf16.vlgmr.msra.gmra.mxu1 %vm1142_vm7, %v1204_v33 }
 0x1db   : > { %1478 = vmatpush.bf16.msra.mxu3 %v1695_v17  ;;  %1465 = vmatpush.bf16.msra.mxu2 %v1686_v19 }
 0x1df   : > { %1479 = vmatpush.bf16.msra.mxu3 %v1694_v38  ;;  %1466 = vmatpush.bf16.msra.mxu2 %v1685_v48  ;;  %v1750_v38 = vld [vmem:[%s1856_s26 + $0x8] sm:$0xff] }
 0x1e3   : > { %1480 = vmatpush.bf16.msra.mxu3 %v1693_v24  ;;  %1467 = vmatpush.bf16.msra.mxu2 %v1684_v62 }
 0x1e7   : > { %1481 = vmatpush.bf16.msra.mxu3 %v1692_v34 }
 0x257   : > { %v1271_v46 = vpop.f32.mrf.mxu0  ;;  %v1285_v32 = vpop.f32.mrf.mxu1 }
 0x258   : > { %v1272_v3 = vadd.f32 %v1271_v46, %v1215_v51  ;;  %v1286_v29 = vadd.f32 %v1285_v32, %v1216_v35  ;;  %v1751_v32 = vld [vmem:[%s1856_s26 + $0x18] sm:$0xff] }
 0x25a   : > { %v1290_v56 = vmul.f32 %v1272_v3, %v1272_v3  ;;  %v1291_v47 = vmul.f32 %v1286_v29, %v1286_v29 }
 0x25c   : > { %v1294_v4 = vmul.f32 %v1290_v56, %v1272_v3  ;;  %v1295_v26 = vmul.f32 %v1291_v47, %v1286_v29 }
 0x25e   : > { %v1298_v16 = vmul.f32 0.044715, %v1294_v4  ;;  %v1299_v44 = vmul.f32 0.044715, %v1295_v26 }
 0x25f   : > { %v1273_v50 = vpop.f32.mrf.mxu0  ;;  %v1287_v54 = vpop.f32.mrf.mxu1 }
 0x260   : > { %v1302_v37 = vadd.f32 %v1298_v16, %v1272_v3  ;;  %v1303_v58 = vadd.f32 %v1299_v44, %v1286_v29  ;;  %v1274_v15 = vadd.f32 %v1273_v50, %v1215_v51  ;;  %v1288_v5 = vadd.f32 %v1287_v54, %v1216_v35 }
 0x262   : > { %v1292_v7 = vmul.f32 %v1274_v15, %v1274_v15  ;;  %v1293_v30 = vmul.f32 %v1288_v5, %v1288_v5  ;;  %v1306_v2 = vmul.f32 0.7978846, %v1302_v37  ;;  %v1307_v31 = vmul.f32 0.7978846, %v1303_v58 }
 0x264   : > { %v1296_v55 = vmul.f32 %v1292_v7, %v1274_v15  ;;  %v1297_v9 = vmul.f32 %v1293_v30, %v1288_v5  ;;  %1742 = vtanh.f32 %v1306_v2 }
 0x265   : > { %1744 = vtanh.f32 %v1307_v31 }
 0x266   : > { %v1300_v40 = vmul.f32 0.044715, %v1296_v55  ;;  %v1301_v61 = vmul.f32 0.044715, %v1297_v9 }
 0x268   : > { %v1304_v13 = vadd.f32 %v1300_v40, %v1274_v15  ;;  %v1305_v57 = vadd.f32 %v1301_v61, %v1288_v5 }
 0x26a   : > { %v1308_v25 = vmul.f32 0.7978846, %v1304_v13  ;;  %v1309_v39 = vmul.f32 0.7978846, %v1305_v57  ;;  %v1743_v12 = vpop.eup %1742 }
 0x26b   : > { %v1745_v8 = vpop.eup %1744  ;;  %v1314_v27 = vadd.f32 1.0, %v1743_v12 }
 0x26c   : > { %1746 = vtanh.f32 %v1308_v25  ;;  %v1315_v43 = vadd.f32 1.0, %v1745_v8 }
 0x26d   : > { %1748 = vtanh.f32 %v1309_v39  ;;  %v1318_v36 = vmul.f32 0.5, %v1314_v27 }
 0x26e   : > { %v1319_v10 = vmul.f32 0.5, %v1315_v43 }
 0x26f   : > { %v1322_v14 = vmul.f32 %v1318_v36, %v1272_v3 }
 0x270   : > { %v1323_v41 = vmul.f32 %v1319_v10, %v1286_v29  ;;  %v1752_v29 = vld [vmem:[%s1856_s26 + $0x10] sm:$0xff] }
 0x272   : > { %v1747_v6 = vpop.eup %1746 }
 0x273   : > { %v1749_v28 = vpop.eup %1748  ;;  %v1316_v49 = vadd.f32 1.0, %v1747_v6 }
 0x274   : > { %v1317_v21 = vadd.f32 1.0, %v1749_v28 }
 0x275   : > { %v1320_v18 = vmul.f32 0.5, %v1316_v49 }
 0x276   : > { %v1321_v42 = vmul.f32 0.5, %v1317_v21 }
 0x277   : > { %v1324_v11 = vmul.f32 %v1320_v18, %v1274_v15 }
 0x278   : > { %v1325_v0 = vmul.f32 %v1321_v42, %v1288_v5 }
 0x279   : > { %v1326_v33 = vpack.c.bf16 %v1324_v11, %v1322_v14 }
 0x27a   : > { %v1327_v20 = vpack.c.bf16 %v1325_v0, %v1323_v41 }
 0x27b   : > { %1468 = vmatmul.bf16.vlgmr.msra.gmra.mxu2 %v1326_v33 }
 0x27c   : > { %1482 = vmatmul.bf16.vlgmr.msra.gmra.mxu3 %v1327_v20 }
 0x2fe   : > { %v1469_v1 = vpop.f32.mrf.mxu2 }
 0x2ff   : > { %v1470_v53 = vadd.f32 %v1734_v59, %v1469_v1  ;;  %v1483_v52 = vpop.f32.mrf.mxu3 }
 0x301   : > { %v1484_v60 = vadd.f32 %v1483_v52, %v1470_v53 }
 0x303   : > { %v1492_v45 = vmul.f32 %v1735_v22, %v1484_v60 }
 0x305   : > { %v1496_v17 = vrot.slane %v1492_v45, 1 }
 0x306   : > { %v1471_v19 = vpop.f32.mrf.mxu2 }
 0x307   : > { %v1502_v48 = vadd.f32 %v1750_v38, %v1496_v17  ;;  %v1472_v24 = vadd.f32 %v1734_v59, %v1471_v19  ;;  %v1485_v63 = vpop.f32.mrf.mxu3 }
 0x309   : > { %v1505_v51 = vsel %vm587_vm4, 0.0, %v1502_v48  ;;  %v1486_v35 = vadd.f32 %v1485_v63, %v1472_v24 }
 0x30a   : > { %1508 = vst.msk [vmem:[%s2591_s24 + $0x8] sm:$0xff] %vm1142_vm7, %v1505_v51 }
 0x30b   : > { %v1493_v62 = vmul.f32 %v1735_v22, %v1486_v35 }
 0x30d   : > { %v1497_v34 = vrot.slane %v1493_v62, 1 }
 0x30f   : > { %v1498_v46 = vsel %vm587_vm4, %v1496_v17, %v1497_v34  ;;  %v1504_v3 = vadd.f32 %v1751_v32, %v1497_v34 }
 0x310   : > { %v1503_v56 = vadd.f32 %v1752_v29, %v1498_v46 }
 0x311   : > { %v1506_v47 = vsel %vm587_vm4, %v1504_v3, 0.0 }
 0x312   : > { %1509 = vst.msk [vmem:[%s2591_s24 + $0x10] sm:$0xff] %vm1142_vm7, %v1503_v56 }
 0x313   : > { %1510 = vst.msk [vmem:[%s2591_s24 + $0x18] sm:$0xff] %vm1142_vm7, %v1506_v47 }
 0x314 PF: > { %s21_s17 = sadd.s32 1, %s1759_s17  }
 0x315   : > { %p18_p4 = scmp.ge.s32.totalorder %s21_s17, 4  }
 0x317   :  { %20 = sbr.rel (!%p18_p4) target bundleno = 1 (0x1), region = 94 }

</bundles_post_ra>
